<compile_context>
chip_gen: v7x
topology: tpu7x:2x2x1
jax: 0.10.0
libtpu: 0.0.40
codegen_flags: <defaults>
</compile_context>

<pallas_src>
import functools

import jax
import jax.numpy as jnp
from jax.experimental import pallas as pl
from jax.experimental.pallas import tpu as pltpu

K = 4                        # every conv / conv-transpose uses kernel_size=4
BN_EPS = 1e-5                # PyTorch BatchNorm2d default eps


def _vmem_limit_bytes():
    """Per-generation scoped-VMEM limit: ~70% of physical, capped (v7x = 64 MiB/TC)."""
    cap = 128 * 1024 * 1024
    try:
        cap = int(getattr(pltpu.get_tpu_info(), "vmem_capacity_bytes", cap))
    except Exception:
        pass
    return max(32 * 1024 * 1024, min(int(0.7 * cap), 100 * 1024 * 1024))


_VMEM_LIMIT = _vmem_limit_bytes()


# ----------------------------------------------------------------------------
# tiling helpers
# ----------------------------------------------------------------------------
def _pick_tile(dim, cap, align):
    """Largest legal block size for `dim`: the full dim if small, else an aligned
    divisor <= cap (fallback: full dim, which is always legal)."""
    if dim <= cap:
        return dim
    for t in range(cap, align - 1, -align):
        if dim % t == 0:
            return t
    return dim


def _choose_m_tile(m, cap=1024, align=16):
    """Return (tile, padded_m) for the row dim: aligned divisor <= cap if one exists,
    otherwise pad m up to a multiple of the cap (keeps blocks double-bufferable)."""
    if m <= cap:
        return m, m
    for t in range(cap, align - 1, -align):
        if m % t == 0:
            return t, m
    return cap, ((m + cap - 1) // cap) * cap


def _row_group(m, c):
    """Pack g rows into one (g*c)-lane row so kernel-B loads/stores are lane-dense."""
    g = 1
    while (c * g) % 128 != 0 and m % (g * 2) == 0 and c * g * 2 <= 1024:
        g *= 2
    return g


# ----------------------------------------------------------------------------
# Pallas kernel A: pre-act -> bf16 matmul -> f32 acc -> BN partial stats / epilogue
# ----------------------------------------------------------------------------
def _matmul_stats_kernel(p_ref, w_ref, b_ref, y_ref, s_ref, ss_ref, acc_ref,
                         *, pre_act, sigmoid):
    k = pl.program_id(2)

    @pl.when(k == 0)
    def _init():
        acc_ref[...] = jnp.zeros_like(acc_ref)

    p = p_ref[...].astype(jnp.float32)            # elementwise pre-act in f32 (v5e-safe)
    if pre_act == "lrelu":
        p = jnp.where(p >= 0.0, p, 0.2 * p)       # nn.LeakyReLU(0.2)
    elif pre_act == "relu":
        p = jnp.maximum(p, 0.0)                   # nn.ReLU

    acc_ref[...] += jnp.dot(p.astype(jnp.bfloat16), w_ref[...],
                            preferred_element_type=jnp.float32)    # bf16 MXU, f32 acc

    @pl.when(k == pl.num_programs(2) - 1)
    def _finalize():
        acc = acc_ref[...] + b_ref[...]           # bias is zeros for BN layers
        # partial training-mode BatchNorm statistics for this (M-tile, Cout-tile)
        s_ref[0] = jnp.sum(acc, axis=0, keepdims=True)
        ss_ref[0] = jnp.sum(acc * acc, axis=0, keepdims=True)
        if sigmoid:
            acc = 1.0 / (1.0 + jnp.exp(-acc))     # exp -> EUP; outermost layer only
        y_ref[...] = acc.astype(y_ref.dtype)


def _fused_matmul(patches, w, bias, *, pre_act, sigmoid, out_dtype):
    m, kd = patches.shape
    cout = w.shape[-1]
    tm, mp = _choose_m_tile(m, cap=1024, align=16)
    if mp != m:
        patches = jnp.pad(patches, ((0, mp - m), (0, 0)))
    tk = _pick_tile(kd, 512, 128)
    tn = _pick_tile(cout, 256, 128)
    mt, nt, kt = mp // tm, cout // tn, kd // tk
    # v7x has two TensorCores: keep >=2 parallel programs on the non-tiny layers
    if mt == 1 and nt == 1 and mp >= 32 and mp % 32 == 0:
        tm, mt = mp // 2, 2

    cost = pl.CostEstimate(
        flops=int(2 * mp * kd * cout),
        transcendentals=int(mp * cout) if sigmoid else 0,
        bytes_accessed=int(mp * kd * 2 + kd * cout * 2
                           + mp * cout * jnp.dtype(out_dtype).itemsize
                           + (1 + 2 * mt) * cout * 4))

    y, s, ss = pl.pallas_call(
        functools.partial(_matmul_stats_kernel, pre_act=pre_act, sigmoid=sigmoid),
        grid=(mt, nt, kt),
        in_specs=[
            pl.BlockSpec((tm, tk), lambda i, j, k: (i, k)),
            pl.BlockSpec((tk, tn), lambda i, j, k: (k, j)),
            pl.BlockSpec((1, tn), lambda i, j, k: (0, j)),
        ],
        out_specs=[
            pl.BlockSpec((tm, tn), lambda i, j, k: (i, j)),
            pl.BlockSpec((1, 1, tn), lambda i, j, k: (i, 0, j)),
            pl.BlockSpec((1, 1, tn), lambda i, j, k: (i, 0, j)),
        ],
        out_shape=[
            jax.ShapeDtypeStruct((mp, cout), out_dtype),
            jax.ShapeDtypeStruct((mt, 1, cout), jnp.float32),
            jax.ShapeDtypeStruct((mt, 1, cout), jnp.float32),
        ],
        scratch_shapes=[pltpu.VMEM((tm, tn), jnp.float32)],
        compiler_params=pltpu.CompilerParams(
            dimension_semantics=("parallel", "parallel", "arbitrary"),
            vmem_limit_bytes=_VMEM_LIMIT),
        cost_estimate=cost,
    )(patches, w, bias)

    if mp != m:
        y = y[:m]
    return y, s, ss


# ----------------------------------------------------------------------------
# Pallas kernel B: lane-dense BatchNorm affine apply (rows packed g-at-a-time)
# ----------------------------------------------------------------------------
def _scale_shift_kernel(y_ref, sc_ref, sh_ref, o_ref):
    o = y_ref[...].astype(jnp.float32) * sc_ref[...] + sh_ref[...]
    o_ref[...] = o.astype(o_ref.dtype)


def _apply_scale_shift(y, scale, shift, *, out_dtype):
    m, c = y.shape
    g = _row_group(m, c)
    mg, cg = m // g, c * g
    yv = y.reshape(mg, cg)                                     # contiguous, lane-dense
    sc = jnp.tile(scale.astype(jnp.float32), g).reshape(1, cg)
    sh = jnp.tile(shift.astype(jnp.float32), g).reshape(1, cg)
    tm = _pick_tile(mg, 2048, 16)
    mt = mg // tm

    cost = pl.CostEstimate(
        flops=int(2 * m * c), transcendentals=0,
        bytes_accessed=int(m * c * (y.dtype.itemsize + jnp.dtype(out_dtype).itemsize)
                           + 2 * cg * 4))

    out = pl.pallas_call(
        _scale_shift_kernel,
        grid=(mt,),
        in_specs=[
            pl.BlockSpec((tm, cg), lambda i: (i, 0)),
            pl.BlockSpec((1, cg), lambda i: (0, 0)),
            pl.BlockSpec((1, cg), lambda i: (0, 0)),
        ],
        out_specs=pl.BlockSpec((tm, cg), lambda i: (i, 0)),
        out_shape=jax.ShapeDtypeStruct((mg, cg), out_dtype),
        compiler_params=pltpu.CompilerParams(
            dimension_semantics=("parallel",),
            vmem_limit_bytes=_VMEM_LIMIT),
        cost_estimate=cost,
    )(yv, sc, sh)
    return out.reshape(m, c)


# ----------------------------------------------------------------------------
# JAX glue: patch extraction + matmul-layout weights (built once at param time)
# ----------------------------------------------------------------------------
def _im2col_down(x):
    """NHWC x -> (N*Ho*Wo, 16*C) bf16 patches for a 4x4 / stride-2 / pad-1 conv.
    Column order (ky, kx, cin), cin fastest (matches _down_weight_matrix)."""
    n, h, w, c = x.shape
    ho, wo = h // 2, w // 2
    xp = jnp.pad(x.astype(jnp.bfloat16), ((0, 0), (1, 1), (1, 1), (0, 0)))
    taps = [xp[:, ky:ky + 2 * (ho - 1) + 1:2, kx:kx + 2 * (wo - 1) + 1:2, :]
            for ky in range(K) for kx in range(K)]
    pat = jnp.stack(taps, axis=3)                               # (N, Ho, Wo, 16, C)
    return pat.reshape(n * ho * wo, K * K * c)


def _im2col_up(x):
    """NHWC x -> (N*H*W, 9*C) bf16 patches: the 3x3 padded neighbourhood shared by all
    four ConvTranspose2d(4, stride=2, pad=1) output parities.  Column order (ty, tx, cin),
    cin fastest (matches _up_weight_matrix)."""
    n, h, w, c = x.shape
    xp = jnp.pad(x.astype(jnp.bfloat16), ((0, 0), (1, 1), (1, 1), (0, 0)))
    taps = [xp[:, ty:ty + h, tx:tx + w, :] for ty in range(3) for tx in range(3)]
    pat = jnp.stack(taps, axis=3)                               # (N, H, W, 9, C)
    return pat.reshape(n * h * w, 9 * c)


def _down_weight_matrix(w_oihw):
    """Conv2d weight (Cout, Cin, 4, 4) -> (16*Cin, Cout) bf16, rows = (ky, kx, cin)."""
    cout, cin = w_oihw.shape[0], w_oihw.shape[1]
    return jnp.transpose(w_oihw, (2, 3, 1, 0)).reshape(K * K * cin, cout).astype(jnp.bfloat16)


def _up_weight_matrix(w_iohw):
    """ConvTranspose2d weight (Cin, Cout, 4, 4) -> merged (9*Cin, 4*Cout) bf16 matrix.
    Rows = (ty, tx, cin); output lane groups = (py, px, cout).  Parity (py, px) only uses
    taps ty in {py, py+1}, tx in {px, px+1}; other rows stay zero."""
    cin, cout = w_iohw.shape[0], w_iohw.shape[1]
    wm = jnp.zeros((3, 3, cin, 2, 2, cout), jnp.float32)
    for py in range(2):
        for px in range(2):
            for dy in range(2):
                for dx in range(2):
                    wm = wm.at[py + dy, px + dx, :, py, px, :].set(
                        w_iohw[:, :, 3 - 2 * dy - py, 3 - 2 * dx - px])
    return wm.reshape(9 * cin, 4 * cout).astype(jnp.bfloat16)


def _bn_scale_shift(sum_c, sumsq_c, count, gamma, beta):
    # training-mode BatchNorm2d from biased batch statistics (one-pass; clamped >= 0)
    mean = sum_c / count
    var = jnp.maximum(sumsq_c / count - mean * mean, 0.0)
    scale = gamma * jax.lax.rsqrt(var + BN_EPS)
    shift = beta - mean * scale
    return scale, shift


# ----------------------------------------------------------------------------
# Layer ops (NHWC)
# ----------------------------------------------------------------------------
def conv_down(x, w_mat, *, pre_act, bn):
    """Conv2d(Cin, Cout, 4, stride=2, pad=1, bias=False) with fused pre-activation and
    optional training-mode BatchNorm."""
    n, h, w, _ = x.shape
    ho, wo = h // 2, w // 2
    cout = w_mat.shape[-1]
    patches = _im2col_down(x)
    y, s, ss = _fused_matmul(patches, w_mat, jnp.zeros((1, cout), jnp.float32),
                             pre_act=pre_act, sigmoid=False, out_dtype=jnp.bfloat16)
    if bn is not None:
        scale, shift = _bn_scale_shift(jnp.sum(s, axis=(0, 1)), jnp.sum(ss, axis=(0, 1)),
                                       n * ho * wo, bn[0], bn[1])
        y = _apply_scale_shift(y, scale, shift, out_dtype=jnp.bfloat16)
    return y.reshape(n, ho, wo, cout)


def conv_up(x, w_mat, *, bias, bn, sigmoid):
    """ConvTranspose2d(Cin, Cout, 4, stride=2, pad=1) with fused ReLU pre-activation as a
    single merged matmul producing all four output parities, followed by BatchNorm
    (kernel B) or a fused bias + Sigmoid epilogue (kernel A)."""
    n, h, w, _ = x.shape
    cout4 = w_mat.shape[-1]
    cout = cout4 // 4
    m = n * h * w
    patches = _im2col_up(x)                                     # (M, 9*Cin)
    if bias is not None:
        b4 = jnp.tile(bias.astype(jnp.float32), 4).reshape(1, cout4)
    else:
        b4 = jnp.zeros((1, cout4), jnp.float32)
    out_dtype = jnp.float32 if bn is None else jnp.bfloat16
    y, s, ss = _fused_matmul(patches, w_mat, b4, pre_act="relu",
                             sigmoid=sigmoid, out_dtype=out_dtype)
    if bn is not None:
        sum_c = jnp.sum(s, axis=(0, 1)).reshape(4, cout).sum(axis=0)
        sumsq_c = jnp.sum(ss, axis=(0, 1)).reshape(4, cout).sum(axis=0)
        scale, shift = _bn_scale_shift(sum_c, sumsq_c, 4 * m, bn[0], bn[1])
        y = _apply_scale_shift(y, jnp.tile(scale, 4), jnp.tile(shift, 4),
                               out_dtype=jnp.bfloat16)
    # interleave the four output parities; channels are ordered (py, px, cout)
    y = y.reshape(n, h, w, 2, 2, cout).transpose(0, 1, 3, 2, 4, 5)
    return y.reshape(n, 2 * h, 2 * w, cout)


# ----------------------------------------------------------------------------
# UNet parameters (deterministic, matmul-layout weights prebuilt once) and forward
# ----------------------------------------------------------------------------
def build_unet_params(key, input_nc, output_nc, num_downs, ngf):
    keys = iter(jax.random.split(key, num_downs * 8))

    def nk():
        return next(keys)

    def make_block(outer_nc, inner_nc, in_nc=None, submodule=None,
                   outermost=False, innermost=False):
        if in_nc is None:
            in_nc = outer_nc
        p = {}
        # downconv: Conv2d(in_nc, inner_nc, 4, stride=2, pad=1, bias=False)
        dw = 0.02 * jax.random.normal(nk(), (inner_nc, in_nc, K, K), jnp.float32)
        p['down_w'] = _down_weight_matrix(dw)
        if (not outermost) and (not innermost):
            p['down_gamma'] = 1.0 + 0.1 * jax.random.normal(nk(), (inner_nc,), jnp.float32)
            p['down_beta'] = 0.1 * jax.random.normal(nk(), (inner_nc,), jnp.float32)
        up_in = inner_nc if innermost else inner_nc * 2
        # upconv: ConvTranspose2d(up_in, outer_nc, 4, stride=2, pad=1)
        uw = 0.02 * jax.random.normal(nk(), (up_in, outer_nc, K, K), jnp.float32)
        p['up_w'] = _up_weight_matrix(uw)
        if outermost:
            p['up_b'] = 0.02 * jax.random.normal(nk(), (outer_nc,), jnp.float32)
        else:
            p['up_gamma'] = 1.0 + 0.1 * jax.random.normal(nk(), (outer_nc,), jnp.float32)
            p['up_beta'] = 0.1 * jax.random.normal(nk(), (outer_nc,), jnp.float32)
        return {'params': p, 'sub': submodule,
                'outermost': outermost, 'innermost': innermost}

    block = make_block(ngf * 8, ngf * 8, innermost=True)
    for _ in range(num_downs - 5):
        block = make_block(ngf * 8, ngf * 8, submodule=block)
    block = make_block(ngf * 4, ngf * 8, submodule=block)
    block = make_block(ngf * 2, ngf * 4, submodule=block)
    block = make_block(ngf, ngf * 2, submodule=block)
    block = make_block(output_nc, ngf, in_nc=input_nc, submodule=block, outermost=True)
    return block


def unet_forward(block, x):
    """x and return value are NHWC."""
    p = block['params']
    if block['outermost']:
        # down = [downconv]; up = [ReLU, upconvT(+bias), Sigmoid] (fused into kernel A)
        y = conv_down(x, p['down_w'], pre_act=None, bn=None)
        y = unet_forward(block['sub'], y)
        return conv_up(y, p['up_w'], bias=p['up_b'], bn=None, sigmoid=True)
    elif block['innermost']:
        # down = [LeakyReLU, downconv]; up = [ReLU, upconvT, BN]; skip-concat
        y = conv_down(x, p['down_w'], pre_act="lrelu", bn=None)
        y = conv_up(y, p['up_w'], bias=None,
                    bn=(p['up_gamma'], p['up_beta']), sigmoid=False)
        return jnp.concatenate([x, y], axis=-1)
    else:
        # down = [LeakyReLU, downconv, BN]; up = [ReLU, upconvT, BN]; skip-concat
        y = conv_down(x, p['down_w'], pre_act="lrelu",
                      bn=(p['down_gamma'], p['down_beta']))
        y = unet_forward(block['sub'], y)
        y = conv_up(y, p['up_w'], bias=None,
                    bn=(p['up_gamma'], p['up_beta']), sigmoid=False)
        return jnp.concatenate([x, y], axis=-1)


if __name__ == "__main__":
    key = jax.random.PRNGKey(0)
    kx, kp = jax.random.split(key)

    # num_downs=5 requires H, W divisible by 32 (innermost block reaches 1x1).
    N, input_nc, output_nc = 2, 4, 4
    H = W = 32
    num_downs, ngf = 5, 4

    x = jax.random.normal(kx, (N, input_nc, H, W), jnp.float32)
    params = build_unet_params(kp, input_nc, output_nc, num_downs, ngf)

    @jax.jit
    def fwd(inp):
        xh = jnp.transpose(inp, (0, 2, 3, 1))     # NCHW -> NHWC once at the boundary
        yh = unet_forward(params, xh)
        return jnp.transpose(yh, (0, 3, 1, 2))    # back to NCHW to match the PyTorch API

    out = jax.block_until_ready(fwd(x))
    assert out.shape == (N, output_nc, H, W), out.shape
    assert bool(jnp.all(jnp.isfinite(out)))
    assert bool(jnp.all(out >= 0.0)) and bool(jnp.all(out <= 1.0))   # final Sigmoid
    print("KERNEL_OK")
</pallas_src>

<mosaic_0001>
module attributes {stable_mosaic.version = 11 : i64} {
  func.func @_matmul_stats_kernel(%arg0: i32, %arg1: i32, %arg2: i32, %arg3: memref<256x64xbf16, #tpu.memory_space<vmem>>, %arg4: memref<64x4xbf16, #tpu.memory_space<vmem>>, %arg5: memref<1x4xf32, #tpu.memory_space<vmem>>, %arg6: memref<256x4xbf16, #tpu.memory_space<vmem>>, %arg7: memref<1x1x4xf32, #tpu.memory_space<vmem>>, %arg8: memref<1x1x4xf32, #tpu.memory_space<vmem>>, %arg9: memref<256x4xf32, #tpu.memory_space<vmem>>) attributes {dimension_semantics = [#tpu.dimension_semantics<parallel>, #tpu.dimension_semantics<parallel>, #tpu.dimension_semantics<arbitrary>], iteration_bounds = array<i64: 2, 1, 1>, scalar_prefetch = 0 : i64, scratch_operands = 1 : i64, tpu.core_type = #tpu.core_type<tc>, window_params = [{transform_indices = @transform_0, window_bounds = array<i64: 256, 64>}, {transform_indices = @transform_1, window_bounds = array<i64: 64, 4>}, {transform_indices = @transform_2, window_bounds = array<i64: 1, 4>}, {transform_indices = @transform_3, window_bounds = array<i64: 256, 4>}, {transform_indices = @transform_4, window_bounds = array<i64: 1, 1, 4>}, {transform_indices = @transform_5, window_bounds = array<i64: 1, 1, 4>}]} {
    %c0_i32 = arith.constant 0 : i32
    %0 = arith.cmpi eq, %arg2, %c0_i32 : i32
    %1 = arith.extui %0 : i1 to i32
    %c0_i32_0 = arith.constant 0 : i32
    %2 = arith.cmpi ne, %1, %c0_i32_0 : i32
    scf.if %2 {
      %cst_10 = arith.constant 0.000000e+00 : f32
      %14 = vector.broadcast %cst_10 : f32 to vector<256x4xf32>
      %c0_11 = arith.constant 0 : index
      %c0_12 = arith.constant 0 : index
      %15 = vector.load %arg9[%c0_11, %c0_12] : memref<256x4xf32, #tpu.memory_space<vmem>>, vector<256x4xf32>
      tpu.vector_store %arg9[%c0_11, %c0_12], %14 {strides = array<i32>} : memref<256x4xf32, #tpu.memory_space<vmem>>, vector<256x4xf32>,
    } else {
    }
    %c0 = arith.constant 0 : index
    %c0_1 = arith.constant 0 : index
    %3 = vector.load %arg3[%c0, %c0_1] : memref<256x64xbf16, #tpu.memory_space<vmem>>, vector<256x64xbf16>
    %4 = arith.extf %3 : vector<256x64xbf16> to vector<256x64xf32>
    %c0_2 = arith.constant 0 : index
    %c0_3 = arith.constant 0 : index
    %5 = vector.load %arg9[%c0_2, %c0_3] : memref<256x4xf32, #tpu.memory_space<vmem>>, vector<256x4xf32>
    %6 = arith.truncf %4 : vector<256x64xf32> to vector<256x64xbf16>
    %c0_4 = arith.constant 0 : index
    %c0_5 = arith.constant 0 : index
    %7 = vector.load %arg4[%c0_4, %c0_5] : memref<64x4xbf16, #tpu.memory_space<vmem>>, vector<64x4xbf16>
    %cst = arith.constant dense<0.000000e+00> : vector<256x4xf32>
    %8 = tpu.matmul %6, %7, %cst {dimension_numbers = #tpu.dot_dimension_numbers<[1], [0], [0], [1], [0, 0, 1, 1], [], []>} : vector<256x64xbf16>, vector<64x4xbf16>, vector<256x4xf32> -> vector<256x4xf32>
    %9 = arith.addf %5, %8 : vector<256x4xf32>
    %c0_6 = arith.constant 0 : index
    %c0_7 = arith.constant 0 : index
    %10 = vector.load %arg9[%c0_6, %c0_7] : memref<256x4xf32, #tpu.memory_space<vmem>>, vector<256x4xf32>
    tpu.vector_store %arg9[%c0_6, %c0_7], %9 {strides = array<i32>} : memref<256x4xf32, #tpu.memory_space<vmem>>, vector<256x4xf32>,
    %c0_i32_8 = arith.constant 0 : i32
    %11 = arith.cmpi eq, %arg2, %c0_i32_8 : i32
    %12 = arith.extui %11 : i1 to i32
    %c0_i32_9 = arith.constant 0 : i32
    %13 = arith.cmpi ne, %12, %c0_i32_9 : i32
    scf.if %13 {
      %c0_10 = arith.constant 0 : index
      %c0_11 = arith.constant 0 : index
      %14 = vector.load %arg9[%c0_10, %c0_11] : memref<256x4xf32, #tpu.memory_space<vmem>>, vector<256x4xf32>
      %c0_12 = arith.constant 0 : index
      %c0_13 = arith.constant 0 : index
      %15 = vector.load %arg5[%c0_12, %c0_13] : memref<1x4xf32, #tpu.memory_space<vmem>>, vector<1x4xf32>
      %16 = vector.broadcast %15 : vector<1x4xf32> to vector<256x4xf32>
      %17 = arith.addf %14, %16 : vector<256x4xf32>
      %cst_14 = arith.constant dense<0.000000e+00> : vector<4xf32>
      %18 = vector.multi_reduction <add>, %17, %cst_14 [0] : vector<256x4xf32> to vector<4xf32>
      %19 = vector.shape_cast %18 : vector<4xf32> to vector<1x4xf32>
      %c0_15 = arith.constant 0 : index
      %c0_16 = arith.constant 0 : index
      %c0_17 = arith.constant 0 : index
      %20 = vector.load %arg7[%c0_15, %c0_16, %c0_17] : memref<1x1x4xf32, #tpu.memory_space<vmem>>, vector<1x1x4xf32>
      %21 = vector.shape_cast %20 : vector<1x1x4xf32> to vector<1x4xf32>
      %22 = vector.shape_cast %19 : vector<1x4xf32> to vector<1x1x4xf32>
      tpu.vector_store %arg7[%c0_15, %c0_16, %c0_17], %22 {strides = array<i32>} : memref<1x1x4xf32, #tpu.memory_space<vmem>>, vector<1x1x4xf32>,
      %23 = arith.mulf %17, %17 : vector<256x4xf32>
      %cst_18 = arith.constant dense<0.000000e+00> : vector<4xf32>
      %24 = vector.multi_reduction <add>, %23, %cst_18 [0] : vector<256x4xf32> to vector<4xf32>
      %25 = vector.shape_cast %24 : vector<4xf32> to vector<1x4xf32>
      %c0_19 = arith.constant 0 : index
      %c0_20 = arith.constant 0 : index
      %c0_21 = arith.constant 0 : index
      %26 = vector.load %arg8[%c0_19, %c0_20, %c0_21] : memref<1x1x4xf32, #tpu.memory_space<vmem>>, vector<1x1x4xf32>
      %27 = vector.shape_cast %26 : vector<1x1x4xf32> to vector<1x4xf32>
      %28 = vector.shape_cast %25 : vector<1x4xf32> to vector<1x1x4xf32>
      tpu.vector_store %arg8[%c0_19, %c0_20, %c0_21], %28 {strides = array<i32>} : memref<1x1x4xf32, #tpu.memory_space<vmem>>, vector<1x1x4xf32>,
      %29 = arith.truncf %17 : vector<256x4xf32> to vector<256x4xbf16>
      %c0_22 = arith.constant 0 : index
      %c0_23 = arith.constant 0 : index
      %30 = vector.load %arg6[%c0_22, %c0_23] : memref<256x4xbf16, #tpu.memory_space<vmem>>, vector<256x4xbf16>
      tpu.vector_store %arg6[%c0_22, %c0_23], %29 {strides = array<i32>} : memref<256x4xbf16, #tpu.memory_space<vmem>>, vector<256x4xbf16>,
    } else {
    }
    return
  }
  func.func @transform_0(%arg0: i32, %arg1: i32, %arg2: i32) -> (i32, i32) {
    %c0_i32 = arith.constant 0 : i32
    return %arg0, %arg2 : i32, i32
  }
  func.func @transform_1(%arg0: i32, %arg1: i32, %arg2: i32) -> (i32, i32) {
    %c0_i32 = arith.constant 0 : i32
    return %arg2, %arg1 : i32, i32
  }
  func.func @transform_2(%arg0: i32, %arg1: i32, %arg2: i32) -> (i32, i32) {
    %c0_i32 = arith.constant 0 : i32
    %c0_i32_0 = arith.constant 0 : i32
    return %c0_i32, %arg1 : i32, i32
  }
  func.func @transform_3(%arg0: i32, %arg1: i32, %arg2: i32) -> (i32, i32) {
    %c0_i32 = arith.constant 0 : i32
    return %arg0, %arg1 : i32, i32
  }
  func.func @transform_4(%arg0: i32, %arg1: i32, %arg2: i32) -> (i32, i32, i32) {
    %c0_i32 = arith.constant 0 : i32
    %c0_i32_0 = arith.constant 0 : i32
    return %arg0, %c0_i32, %arg1 : i32, i32, i32
  }
  func.func @transform_5(%arg0: i32, %arg1: i32, %arg2: i32) -> (i32, i32, i32) {
    %c0_i32 = arith.constant 0 : i32
    %c0_i32_0 = arith.constant 0 : i32
    return %arg0, %c0_i32, %arg1 : i32, i32, i32
  }
}

module attributes {stable_mosaic.version = 11 : i64} {
  func.func @_matmul_stats_kernel(%arg0: i32, %arg1: i32, %arg2: i32, %arg3: memref<64x64xbf16, #tpu.memory_space<vmem>>, %arg4: memref<64x8xbf16, #tpu.memory_space<vmem>>, %arg5: memref<1x8xf32, #tpu.memory_space<vmem>>, %arg6: memref<64x8xbf16, #tpu.memory_space<vmem>>, %arg7: memref<1x1x8xf32, #tpu.memory_space<vmem>>, %arg8: memref<1x1x8xf32, #tpu.memory_space<vmem>>, %arg9: memref<64x8xf32, #tpu.memory_space<vmem>>) attributes {dimension_semantics = [#tpu.dimension_semantics<parallel>, #tpu.dimension_semantics<parallel>, #tpu.dimension_semantics<arbitrary>], iteration_bounds = array<i64: 2, 1, 1>, scalar_prefetch = 0 : i64, scratch_operands = 1 : i64, tpu.core_type = #tpu.core_type<tc>, window_params = [{transform_indices = @transform_0, window_bounds = array<i64: 64, 64>}, {transform_indices = @transform_1, window_bounds = array<i64: 64, 8>}, {transform_indices = @transform_2, window_bounds = array<i64: 1, 8>}, {transform_indices = @transform_3, window_bounds = array<i64: 64, 8>}, {transform_indices = @transform_4, window_bounds = array<i64: 1, 1, 8>}, {transform_indices = @transform_5, window_bounds = array<i64: 1, 1, 8>}]} {
    %c0_i32 = arith.constant 0 : i32
    %0 = arith.cmpi eq, %arg2, %c0_i32 : i32
    %1 = arith.extui %0 : i1 to i32
    %c0_i32_0 = arith.constant 0 : i32
    %2 = arith.cmpi ne, %1, %c0_i32_0 : i32
    scf.if %2 {
      %cst_12 = arith.constant 0.000000e+00 : f32
      %19 = vector.broadcast %cst_12 : f32 to vector<64x8xf32>
      %c0_13 = arith.constant 0 : index
      %c0_14 = arith.constant 0 : index
      %20 = vector.load %arg9[%c0_13, %c0_14] : memref<64x8xf32, #tpu.memory_space<vmem>>, vector<64x8xf32>
      tpu.vector_store %arg9[%c0_13, %c0_14], %19 {strides = array<i32>} : memref<64x8xf32, #tpu.memory_space<vmem>>, vector<64x8xf32>,
    } else {
    }
    %c0 = arith.constant 0 : index
    %c0_1 = arith.constant 0 : index
    %3 = vector.load %arg3[%c0, %c0_1] : memref<64x64xbf16, #tpu.memory_space<vmem>>, vector<64x64xbf16>
    %4 = arith.extf %3 : vector<64x64xbf16> to vector<64x64xf32>
    %cst = arith.constant 0.000000e+00 : f32
    %5 = vector.broadcast %cst : f32 to vector<64x64xf32>
    %6 = arith.cmpf oge, %4, %5 : vector<64x64xf32>
    %cst_2 = arith.constant 2.000000e-01 : f32
    %7 = vector.broadcast %cst_2 : f32 to vector<64x64xf32>
    %8 = arith.mulf %7, %4 : vector<64x64xf32>
    %9 = arith.select %6, %4, %8 : vector<64x64xi1>, vector<64x64xf32>
    %c0_3 = arith.constant 0 : index
    %c0_4 = arith.constant 0 : index
    %10 = vector.load %arg9[%c0_3, %c0_4] : memref<64x8xf32, #tpu.memory_space<vmem>>, vector<64x8xf32>
    %11 = arith.truncf %9 : vector<64x64xf32> to vector<64x64xbf16>
    %c0_5 = arith.constant 0 : index
    %c0_6 = arith.constant 0 : index
    %12 = vector.load %arg4[%c0_5, %c0_6] : memref<64x8xbf16, #tpu.memory_space<vmem>>, vector<64x8xbf16>
    %cst_7 = arith.constant dense<0.000000e+00> : vector<64x8xf32>
    %13 = tpu.matmul %11, %12, %cst_7 {dimension_numbers = #tpu.dot_dimension_numbers<[1], [0], [0], [1], [0, 0, 1, 1], [], []>} : vector<64x64xbf16>, vector<64x8xbf16>, vector<64x8xf32> -> vector<64x8xf32>
    %14 = arith.addf %10, %13 : vector<64x8xf32>
    %c0_8 = arith.constant 0 : index
    %c0_9 = arith.constant 0 : index
    %15 = vector.load %arg9[%c0_8, %c0_9] : memref<64x8xf32, #tpu.memory_space<vmem>>, vector<64x8xf32>
    tpu.vector_store %arg9[%c0_8, %c0_9], %14 {strides = array<i32>} : memref<64x8xf32, #tpu.memory_space<vmem>>, vector<64x8xf32>,
    %c0_i32_10 = arith.constant 0 : i32
    %16 = arith.cmpi eq, %arg2, %c0_i32_10 : i32
    %17 = arith.extui %16 : i1 to i32
    %c0_i32_11 = arith.constant 0 : i32
    %18 = arith.cmpi ne, %17, %c0_i32_11 : i32
    scf.if %18 {
      %c0_12 = arith.constant 0 : index
      %c0_13 = arith.constant 0 : index
      %19 = vector.load %arg9[%c0_12, %c0_13] : memref<64x8xf32, #tpu.memory_space<vmem>>, vector<64x8xf32>
      %c0_14 = arith.constant 0 : index
      %c0_15 = arith.constant 0 : index
      %20 = vector.load %arg5[%c0_14, %c0_15] : memref<1x8xf32, #tpu.memory_space<vmem>>, vector<1x8xf32>
      %21 = vector.broadcast %20 : vector<1x8xf32> to vector<64x8xf32>
      %22 = arith.addf %19, %21 : vector<64x8xf32>
      %cst_16 = arith.constant dense<0.000000e+00> : vector<8xf32>
      %23 = vector.multi_reduction <add>, %22, %cst_16 [0] : vector<64x8xf32> to vector<8xf32>
      %24 = vector.shape_cast %23 : vector<8xf32> to vector<1x8xf32>
      %c0_17 = arith.constant 0 : index
      %c0_18 = arith.constant 0 : index
      %c0_19 = arith.constant 0 : index
      %25 = vector.load %arg7[%c0_17, %c0_18, %c0_19] : memref<1x1x8xf32, #tpu.memory_space<vmem>>, vector<1x1x8xf32>
      %26 = vector.shape_cast %25 : vector<1x1x8xf32> to vector<1x8xf32>
      %27 = vector.shape_cast %24 : vector<1x8xf32> to vector<1x1x8xf32>
      tpu.vector_store %arg7[%c0_17, %c0_18, %c0_19], %27 {strides = array<i32>} : memref<1x1x8xf32, #tpu.memory_space<vmem>>, vector<1x1x8xf32>,
      %28 = arith.mulf %22, %22 : vector<64x8xf32>
      %cst_20 = arith.constant dense<0.000000e+00> : vector<8xf32>
      %29 = vector.multi_reduction <add>, %28, %cst_20 [0] : vector<64x8xf32> to vector<8xf32>
      %30 = vector.shape_cast %29 : vector<8xf32> to vector<1x8xf32>
      %c0_21 = arith.constant 0 : index
      %c0_22 = arith.constant 0 : index
      %c0_23 = arith.constant 0 : index
      %31 = vector.load %arg8[%c0_21, %c0_22, %c0_23] : memref<1x1x8xf32, #tpu.memory_space<vmem>>, vector<1x1x8xf32>
      %32 = vector.shape_cast %31 : vector<1x1x8xf32> to vector<1x8xf32>
      %33 = vector.shape_cast %30 : vector<1x8xf32> to vector<1x1x8xf32>
      tpu.vector_store %arg8[%c0_21, %c0_22, %c0_23], %33 {strides = array<i32>} : memref<1x1x8xf32, #tpu.memory_space<vmem>>, vector<1x1x8xf32>,
      %34 = arith.truncf %22 : vector<64x8xf32> to vector<64x8xbf16>
      %c0_24 = arith.constant 0 : index
      %c0_25 = arith.constant 0 : index
      %35 = vector.load %arg6[%c0_24, %c0_25] : memref<64x8xbf16, #tpu.memory_space<vmem>>, vector<64x8xbf16>
      tpu.vector_store %arg6[%c0_24, %c0_25], %34 {strides = array<i32>} : memref<64x8xbf16, #tpu.memory_space<vmem>>, vector<64x8xbf16>,
    } else {
    }
    return
  }
  func.func @transform_0(%arg0: i32, %arg1: i32, %arg2: i32) -> (i32, i32) {
    %c0_i32 = arith.constant 0 : i32
    return %arg0, %arg2 : i32, i32
  }
  func.func @transform_1(%arg0: i32, %arg1: i32, %arg2: i32) -> (i32, i32) {
    %c0_i32 = arith.constant 0 : i32
    return %arg2, %arg1 : i32, i32
  }
  func.func @transform_2(%arg0: i32, %arg1: i32, %arg2: i32) -> (i32, i32) {
    %c0_i32 = arith.constant 0 : i32
    %c0_i32_0 = arith.constant 0 : i32
    return %c0_i32, %arg1 : i32, i32
  }
  func.func @transform_3(%arg0: i32, %arg1: i32, %arg2: i32) -> (i32, i32) {
    %c0_i32 = arith.constant 0 : i32
    return %arg0, %arg1 : i32, i32
  }
  func.func @transform_4(%arg0: i32, %arg1: i32, %arg2: i32) -> (i32, i32, i32) {
    %c0_i32 = arith.constant 0 : i32
    %c0_i32_0 = arith.constant 0 : i32
    return %arg0, %c0_i32, %arg1 : i32, i32, i32
  }
  func.func @transform_5(%arg0: i32, %arg1: i32, %arg2: i32) -> (i32, i32, i32) {
    %c0_i32 = arith.constant 0 : i32
    %c0_i32_0 = arith.constant 0 : i32
    return %arg0, %c0_i32, %arg1 : i32, i32, i32
  }
}

module attributes {stable_mosaic.version = 11 : i64} {
  func.func @_scale_shift_kernel(%arg0: i32, %arg1: memref<8x128xbf16, #tpu.memory_space<vmem>>, %arg2: memref<1x128xf32, #tpu.memory_space<vmem>>, %arg3: memref<1x128xf32, #tpu.memory_space<vmem>>, %arg4: memref<8x128xbf16, #tpu.memory_space<vmem>>) attributes {dimension_semantics = [#tpu.dimension_semantics<parallel>], iteration_bounds = array<i64: 1>, scalar_prefetch = 0 : i64, scratch_operands = 0 : i64, tpu.core_type = #tpu.core_type<tc>, window_params = [{transform_indices = @transform_0, window_bounds = array<i64: 8, 128>}, {pipeline_mode = #tpu.pipeline_mode<synchronous>, transform_indices = @transform_1, window_bounds = array<i64: 1, 128>}, {pipeline_mode = #tpu.pipeline_mode<synchronous>, transform_indices = @transform_2, window_bounds = array<i64: 1, 128>}, {transform_indices = @transform_3, window_bounds = array<i64: 8, 128>}]} {
    %c0 = arith.constant 0 : index
    %c0_0 = arith.constant 0 : index
    %0 = vector.load %arg1[%c0, %c0_0] : memref<8x128xbf16, #tpu.memory_space<vmem>>, vector<8x128xbf16>
    %1 = arith.extf %0 : vector<8x128xbf16> to vector<8x128xf32>
    %c0_1 = arith.constant 0 : index
    %c0_2 = arith.constant 0 : index
    %2 = vector.load %arg2[%c0_1, %c0_2] : memref<1x128xf32, #tpu.memory_space<vmem>>, vector<1x128xf32>
    %3 = vector.broadcast %2 : vector<1x128xf32> to vector<8x128xf32>
    %4 = arith.mulf %1, %3 : vector<8x128xf32>
    %c0_3 = arith.constant 0 : index
    %c0_4 = arith.constant 0 : index
    %5 = vector.load %arg3[%c0_3, %c0_4] : memref<1x128xf32, #tpu.memory_space<vmem>>, vector<1x128xf32>
    %6 = vector.broadcast %5 : vector<1x128xf32> to vector<8x128xf32>
    %7 = arith.addf %4, %6 : vector<8x128xf32>
    %8 = arith.truncf %7 : vector<8x128xf32> to vector<8x128xbf16>
    %c0_5 = arith.constant 0 : index
    %c0_6 = arith.constant 0 : index
    %9 = vector.load %arg4[%c0_5, %c0_6] : memref<8x128xbf16, #tpu.memory_space<vmem>>, vector<8x128xbf16>
    tpu.vector_store %arg4[%c0_5, %c0_6], %8 {strides = array<i32>} : memref<8x128xbf16, #tpu.memory_space<vmem>>, vector<8x128xbf16>,
    return
  }
  func.func @transform_0(%arg0: i32) -> (i32, i32) {
    %c0_i32 = arith.constant 0 : i32
    %c0_i32_0 = arith.constant 0 : i32
    return %arg0, %c0_i32 : i32, i32
  }
  func.func @transform_1(%arg0: i32) -> (i32, i32) {
    %c0_i32 = arith.constant 0 : i32
    %c0_i32_0 = arith.constant 0 : i32
    %c0_i32_1 = arith.constant 0 : i32
    return %c0_i32, %c0_i32_0 : i32, i32
  }
  func.func @transform_2(%arg0: i32) -> (i32, i32) {
    %c0_i32 = arith.constant 0 : i32
    %c0_i32_0 = arith.constant 0 : i32
    %c0_i32_1 = arith.constant 0 : i32
    return %c0_i32, %c0_i32_0 : i32, i32
  }
  func.func @transform_3(%arg0: i32) -> (i32, i32) {
    %c0_i32 = arith.constant 0 : i32
    %c0_i32_0 = arith.constant 0 : i32
    return %arg0, %c0_i32 : i32, i32
  }
}

module attributes {stable_mosaic.version = 11 : i64} {
  func.func @_matmul_stats_kernel(%arg0: i32, %arg1: i32, %arg2: i32, %arg3: memref<16x128xbf16, #tpu.memory_space<vmem>>, %arg4: memref<128x16xbf16, #tpu.memory_space<vmem>>, %arg5: memref<1x16xf32, #tpu.memory_space<vmem>>, %arg6: memref<16x16xbf16, #tpu.memory_space<vmem>>, %arg7: memref<1x1x16xf32, #tpu.memory_space<vmem>>, %arg8: memref<1x1x16xf32, #tpu.memory_space<vmem>>, %arg9: memref<16x16xf32, #tpu.memory_space<vmem>>) attributes {dimension_semantics = [#tpu.dimension_semantics<parallel>, #tpu.dimension_semantics<parallel>, #tpu.dimension_semantics<arbitrary>], iteration_bounds = array<i64: 2, 1, 1>, scalar_prefetch = 0 : i64, scratch_operands = 1 : i64, tpu.core_type = #tpu.core_type<tc>, window_params = [{transform_indices = @transform_0, window_bounds = array<i64: 16, 128>}, {transform_indices = @transform_1, window_bounds = array<i64: 128, 16>}, {transform_indices = @transform_2, window_bounds = array<i64: 1, 16>}, {transform_indices = @transform_3, window_bounds = array<i64: 16, 16>}, {transform_indices = @transform_4, window_bounds = array<i64: 1, 1, 16>}, {transform_indices = @transform_5, window_bounds = array<i64: 1, 1, 16>}]} {
    %c0_i32 = arith.constant 0 : i32
    %0 = arith.cmpi eq, %arg2, %c0_i32 : i32
    %1 = arith.extui %0 : i1 to i32
    %c0_i32_0 = arith.constant 0 : i32
    %2 = arith.cmpi ne, %1, %c0_i32_0 : i32
    scf.if %2 {
      %cst_12 = arith.constant 0.000000e+00 : f32
      %19 = vector.broadcast %cst_12 : f32 to vector<16x16xf32>
      %c0_13 = arith.constant 0 : index
      %c0_14 = arith.constant 0 : index
      %20 = vector.load %arg9[%c0_13, %c0_14] : memref<16x16xf32, #tpu.memory_space<vmem>>, vector<16x16xf32>
      tpu.vector_store %arg9[%c0_13, %c0_14], %19 {strides = array<i32>} : memref<16x16xf32, #tpu.memory_space<vmem>>, vector<16x16xf32>,
    } else {
    }
    %c0 = arith.constant 0 : index
    %c0_1 = arith.constant 0 : index
    %3 = vector.load %arg3[%c0, %c0_1] : memref<16x128xbf16, #tpu.memory_space<vmem>>, vector<16x128xbf16>
    %4 = arith.extf %3 : vector<16x128xbf16> to vector<16x128xf32>
    %cst = arith.constant 0.000000e+00 : f32
    %5 = vector.broadcast %cst : f32 to vector<16x128xf32>
    %6 = arith.cmpf oge, %4, %5 : vector<16x128xf32>
    %cst_2 = arith.constant 2.000000e-01 : f32
    %7 = vector.broadcast %cst_2 : f32 to vector<16x128xf32>
    %8 = arith.mulf %7, %4 : vector<16x128xf32>
    %9 = arith.select %6, %4, %8 : vector<16x128xi1>, vector<16x128xf32>
    %c0_3 = arith.constant 0 : index
    %c0_4 = arith.constant 0 : index
    %10 = vector.load %arg9[%c0_3, %c0_4] : memref<16x16xf32, #tpu.memory_space<vmem>>, vector<16x16xf32>
    %11 = arith.truncf %9 : vector<16x128xf32> to vector<16x128xbf16>
    %c0_5 = arith.constant 0 : index
    %c0_6 = arith.constant 0 : index
    %12 = vector.load %arg4[%c0_5, %c0_6] : memref<128x16xbf16, #tpu.memory_space<vmem>>, vector<128x16xbf16>
    %cst_7 = arith.constant dense<0.000000e+00> : vector<16x16xf32>
    %13 = tpu.matmul %11, %12, %cst_7 {dimension_numbers = #tpu.dot_dimension_numbers<[1], [0], [0], [1], [0, 0, 1, 1], [], []>} : vector<16x128xbf16>, vector<128x16xbf16>, vector<16x16xf32> -> vector<16x16xf32>
    %14 = arith.addf %10, %13 : vector<16x16xf32>
    %c0_8 = arith.constant 0 : index
    %c0_9 = arith.constant 0 : index
    %15 = vector.load %arg9[%c0_8, %c0_9] : memref<16x16xf32, #tpu.memory_space<vmem>>, vector<16x16xf32>
    tpu.vector_store %arg9[%c0_8, %c0_9], %14 {strides = array<i32>} : memref<16x16xf32, #tpu.memory_space<vmem>>, vector<16x16xf32>,
    %c0_i32_10 = arith.constant 0 : i32
    %16 = arith.cmpi eq, %arg2, %c0_i32_10 : i32
    %17 = arith.extui %16 : i1 to i32
    %c0_i32_11 = arith.constant 0 : i32
    %18 = arith.cmpi ne, %17, %c0_i32_11 : i32
    scf.if %18 {
      %c0_12 = arith.constant 0 : index
      %c0_13 = arith.constant 0 : index
      %19 = vector.load %arg9[%c0_12, %c0_13] : memref<16x16xf32, #tpu.memory_space<vmem>>, vector<16x16xf32>
      %c0_14 = arith.constant 0 : index
      %c0_15 = arith.constant 0 : index
      %20 = vector.load %arg5[%c0_14, %c0_15] : memref<1x16xf32, #tpu.memory_space<vmem>>, vector<1x16xf32>
      %21 = vector.broadcast %20 : vector<1x16xf32> to vector<16x16xf32>
      %22 = arith.addf %19, %21 : vector<16x16xf32>
      %cst_16 = arith.constant dense<0.000000e+00> : vector<16xf32>
      %23 = vector.multi_reduction <add>, %22, %cst_16 [0] : vector<16x16xf32> to vector<16xf32>
      %24 = vector.shape_cast %23 : vector<16xf32> to vector<1x16xf32>
      %c0_17 = arith.constant 0 : index
      %c0_18 = arith.constant 0 : index
      %c0_19 = arith.constant 0 : index
      %25 = vector.load %arg7[%c0_17, %c0_18, %c0_19] : memref<1x1x16xf32, #tpu.memory_space<vmem>>, vector<1x1x16xf32>
      %26 = vector.shape_cast %25 : vector<1x1x16xf32> to vector<1x16xf32>
      %27 = vector.shape_cast %24 : vector<1x16xf32> to vector<1x1x16xf32>
      tpu.vector_store %arg7[%c0_17, %c0_18, %c0_19], %27 {strides = array<i32>} : memref<1x1x16xf32, #tpu.memory_space<vmem>>, vector<1x1x16xf32>,
      %28 = arith.mulf %22, %22 : vector<16x16xf32>
      %cst_20 = arith.constant dense<0.000000e+00> : vector<16xf32>
      %29 = vector.multi_reduction <add>, %28, %cst_20 [0] : vector<16x16xf32> to vector<16xf32>
      %30 = vector.shape_cast %29 : vector<16xf32> to vector<1x16xf32>
      %c0_21 = arith.constant 0 : index
      %c0_22 = arith.constant 0 : index
      %c0_23 = arith.constant 0 : index
      %31 = vector.load %arg8[%c0_21, %c0_22, %c0_23] : memref<1x1x16xf32, #tpu.memory_space<vmem>>, vector<1x1x16xf32>
      %32 = vector.shape_cast %31 : vector<1x1x16xf32> to vector<1x16xf32>
      %33 = vector.shape_cast %30 : vector<1x16xf32> to vector<1x1x16xf32>
      tpu.vector_store %arg8[%c0_21, %c0_22, %c0_23], %33 {strides = array<i32>} : memref<1x1x16xf32, #tpu.memory_space<vmem>>, vector<1x1x16xf32>,
      %34 = arith.truncf %22 : vector<16x16xf32> to vector<16x16xbf16>
      %c0_24 = arith.constant 0 : index
      %c0_25 = arith.constant 0 : index
      %35 = vector.load %arg6[%c0_24, %c0_25] : memref<16x16xbf16, #tpu.memory_space<vmem>>, vector<16x16xbf16>
      tpu.vector_store %arg6[%c0_24, %c0_25], %34 {strides = array<i32>} : memref<16x16xbf16, #tpu.memory_space<vmem>>, vector<16x16xbf16>,
    } else {
    }
    return
  }
  func.func @transform_0(%arg0: i32, %arg1: i32, %arg2: i32) -> (i32, i32) {
    %c0_i32 = arith.constant 0 : i32
    return %arg0, %arg2 : i32, i32
  }
  func.func @transform_1(%arg0: i32, %arg1: i32, %arg2: i32) -> (i32, i32) {
    %c0_i32 = arith.constant 0 : i32
    return %arg2, %arg1 : i32, i32
  }
  func.func @transform_2(%arg0: i32, %arg1: i32, %arg2: i32) -> (i32, i32) {
    %c0_i32 = arith.constant 0 : i32
    %c0_i32_0 = arith.constant 0 : i32
    return %c0_i32, %arg1 : i32, i32
  }
  func.func @transform_3(%arg0: i32, %arg1: i32, %arg2: i32) -> (i32, i32) {
    %c0_i32 = arith.constant 0 : i32
    return %arg0, %arg1 : i32, i32
  }
  func.func @transform_4(%arg0: i32, %arg1: i32, %arg2: i32) -> (i32, i32, i32) {
    %c0_i32 = arith.constant 0 : i32
    %c0_i32_0 = arith.constant 0 : i32
    return %arg0, %c0_i32, %arg1 : i32, i32, i32
  }
  func.func @transform_5(%arg0: i32, %arg1: i32, %arg2: i32) -> (i32, i32, i32) {
    %c0_i32 = arith.constant 0 : i32
    %c0_i32_0 = arith.constant 0 : i32
    return %arg0, %c0_i32, %arg1 : i32, i32, i32
  }
}

module attributes {stable_mosaic.version = 11 : i64} {
  func.func @_scale_shift_kernel(%arg0: i32, %arg1: memref<4x128xbf16, #tpu.memory_space<vmem>>, %arg2: memref<1x128xf32, #tpu.memory_space<vmem>>, %arg3: memref<1x128xf32, #tpu.memory_space<vmem>>, %arg4: memref<4x128xbf16, #tpu.memory_space<vmem>>) attributes {dimension_semantics = [#tpu.dimension_semantics<parallel>], iteration_bounds = array<i64: 1>, scalar_prefetch = 0 : i64, scratch_operands = 0 : i64, tpu.core_type = #tpu.core_type<tc>, window_params = [{transform_indices = @transform_0, window_bounds = array<i64: 4, 128>}, {pipeline_mode = #tpu.pipeline_mode<synchronous>, transform_indices = @transform_1, window_bounds = array<i64: 1, 128>}, {pipeline_mode = #tpu.pipeline_mode<synchronous>, transform_indices = @transform_2, window_bounds = array<i64: 1, 128>}, {transform_indices = @transform_3, window_bounds = array<i64: 4, 128>}]} {
    %c0 = arith.constant 0 : index
    %c0_0 = arith.constant 0 : index
    %0 = vector.load %arg1[%c0, %c0_0] : memref<4x128xbf16, #tpu.memory_space<vmem>>, vector<4x128xbf16>
    %1 = arith.extf %0 : vector<4x128xbf16> to vector<4x128xf32>
    %c0_1 = arith.constant 0 : index
    %c0_2 = arith.constant 0 : index
    %2 = vector.load %arg2[%c0_1, %c0_2] : memref<1x128xf32, #tpu.memory_space<vmem>>, vector<1x128xf32>
    %3 = vector.broadcast %2 : vector<1x128xf32> to vector<4x128xf32>
    %4 = arith.mulf %1, %3 : vector<4x128xf32>
    %c0_3 = arith.constant 0 : index
    %c0_4 = arith.constant 0 : index
    %5 = vector.load %arg3[%c0_3, %c0_4] : memref<1x128xf32, #tpu.memory_space<vmem>>, vector<1x128xf32>
    %6 = vector.broadcast %5 : vector<1x128xf32> to vector<4x128xf32>
    %7 = arith.addf %4, %6 : vector<4x128xf32>
    %8 = arith.truncf %7 : vector<4x128xf32> to vector<4x128xbf16>
    %c0_5 = arith.constant 0 : index
    %c0_6 = arith.constant 0 : index
    %9 = vector.load %arg4[%c0_5, %c0_6] : memref<4x128xbf16, #tpu.memory_space<vmem>>, vector<4x128xbf16>
    tpu.vector_store %arg4[%c0_5, %c0_6], %8 {strides = array<i32>} : memref<4x128xbf16, #tpu.memory_space<vmem>>, vector<4x128xbf16>,
    return
  }
  func.func @transform_0(%arg0: i32) -> (i32, i32) {
    %c0_i32 = arith.constant 0 : i32
    %c0_i32_0 = arith.constant 0 : i32
    return %arg0, %c0_i32 : i32, i32
  }
  func.func @transform_1(%arg0: i32) -> (i32, i32) {
    %c0_i32 = arith.constant 0 : i32
    %c0_i32_0 = arith.constant 0 : i32
    %c0_i32_1 = arith.constant 0 : i32
    return %c0_i32, %c0_i32_0 : i32, i32
  }
  func.func @transform_2(%arg0: i32) -> (i32, i32) {
    %c0_i32 = arith.constant 0 : i32
    %c0_i32_0 = arith.constant 0 : i32
    %c0_i32_1 = arith.constant 0 : i32
    return %c0_i32, %c0_i32_0 : i32, i32
  }
  func.func @transform_3(%arg0: i32) -> (i32, i32) {
    %c0_i32 = arith.constant 0 : i32
    %c0_i32_0 = arith.constant 0 : i32
    return %arg0, %c0_i32 : i32, i32
  }
}

module attributes {stable_mosaic.version = 11 : i64} {
  func.func @_matmul_stats_kernel(%arg0: i32, %arg1: i32, %arg2: i32, %arg3: memref<8x256xbf16, #tpu.memory_space<vmem>>, %arg4: memref<256x32xbf16, #tpu.memory_space<vmem>>, %arg5: memref<1x32xf32, #tpu.memory_space<vmem>>, %arg6: memref<8x32xbf16, #tpu.memory_space<vmem>>, %arg7: memref<1x1x32xf32, #tpu.memory_space<vmem>>, %arg8: memref<1x1x32xf32, #tpu.memory_space<vmem>>, %arg9: memref<8x32xf32, #tpu.memory_space<vmem>>) attributes {dimension_semantics = [#tpu.dimension_semantics<parallel>, #tpu.dimension_semantics<parallel>, #tpu.dimension_semantics<arbitrary>], iteration_bounds = array<i64: 1, 1, 1>, scalar_prefetch = 0 : i64, scratch_operands = 1 : i64, tpu.core_type = #tpu.core_type<tc>, window_params = [{transform_indices = @transform_0, window_bounds = array<i64: 8, 256>}, {transform_indices = @transform_1, window_bounds = array<i64: 256, 32>}, {transform_indices = @transform_2, window_bounds = array<i64: 1, 32>}, {transform_indices = @transform_3, window_bounds = array<i64: 8, 32>}, {transform_indices = @transform_4, window_bounds = array<i64: 1, 1, 32>}, {transform_indices = @transform_5, window_bounds = array<i64: 1, 1, 32>}]} {
    %c0_i32 = arith.constant 0 : i32
    %0 = arith.cmpi eq, %arg2, %c0_i32 : i32
    %1 = arith.extui %0 : i1 to i32
    %c0_i32_0 = arith.constant 0 : i32
    %2 = arith.cmpi ne, %1, %c0_i32_0 : i32
    scf.if %2 {
      %cst_12 = arith.constant 0.000000e+00 : f32
      %19 = vector.broadcast %cst_12 : f32 to vector<8x32xf32>
      %c0_13 = arith.constant 0 : index
      %c0_14 = arith.constant 0 : index
      %20 = vector.load %arg9[%c0_13, %c0_14] : memref<8x32xf32, #tpu.memory_space<vmem>>, vector<8x32xf32>
      tpu.vector_store %arg9[%c0_13, %c0_14], %19 {strides = array<i32>} : memref<8x32xf32, #tpu.memory_space<vmem>>, vector<8x32xf32>,
    } else {
    }
    %c0 = arith.constant 0 : index
    %c0_1 = arith.constant 0 : index
    %3 = vector.load %arg3[%c0, %c0_1] : memref<8x256xbf16, #tpu.memory_space<vmem>>, vector<8x256xbf16>
    %4 = arith.extf %3 : vector<8x256xbf16> to vector<8x256xf32>
    %cst = arith.constant 0.000000e+00 : f32
    %5 = vector.broadcast %cst : f32 to vector<8x256xf32>
    %6 = arith.cmpf oge, %4, %5 : vector<8x256xf32>
    %cst_2 = arith.constant 2.000000e-01 : f32
    %7 = vector.broadcast %cst_2 : f32 to vector<8x256xf32>
    %8 = arith.mulf %7, %4 : vector<8x256xf32>
    %9 = arith.select %6, %4, %8 : vector<8x256xi1>, vector<8x256xf32>
    %c0_3 = arith.constant 0 : index
    %c0_4 = arith.constant 0 : index
    %10 = vector.load %arg9[%c0_3, %c0_4] : memref<8x32xf32, #tpu.memory_space<vmem>>, vector<8x32xf32>
    %11 = arith.truncf %9 : vector<8x256xf32> to vector<8x256xbf16>
    %c0_5 = arith.constant 0 : index
    %c0_6 = arith.constant 0 : index
    %12 = vector.load %arg4[%c0_5, %c0_6] : memref<256x32xbf16, #tpu.memory_space<vmem>>, vector<256x32xbf16>
    %cst_7 = arith.constant dense<0.000000e+00> : vector<8x32xf32>
    %13 = tpu.matmul %11, %12, %cst_7 {dimension_numbers = #tpu.dot_dimension_numbers<[1], [0], [0], [1], [0, 0, 1, 1], [], []>} : vector<8x256xbf16>, vector<256x32xbf16>, vector<8x32xf32> -> vector<8x32xf32>
    %14 = arith.addf %10, %13 : vector<8x32xf32>
    %c0_8 = arith.constant 0 : index
    %c0_9 = arith.constant 0 : index
    %15 = vector.load %arg9[%c0_8, %c0_9] : memref<8x32xf32, #tpu.memory_space<vmem>>, vector<8x32xf32>
    tpu.vector_store %arg9[%c0_8, %c0_9], %14 {strides = array<i32>} : memref<8x32xf32, #tpu.memory_space<vmem>>, vector<8x32xf32>,
    %c0_i32_10 = arith.constant 0 : i32
    %16 = arith.cmpi eq, %arg2, %c0_i32_10 : i32
    %17 = arith.extui %16 : i1 to i32
    %c0_i32_11 = arith.constant 0 : i32
    %18 = arith.cmpi ne, %17, %c0_i32_11 : i32
    scf.if %18 {
      %c0_12 = arith.constant 0 : index
      %c0_13 = arith.constant 0 : index
      %19 = vector.load %arg9[%c0_12, %c0_13] : memref<8x32xf32, #tpu.memory_space<vmem>>, vector<8x32xf32>
      %c0_14 = arith.constant 0 : index
      %c0_15 = arith.constant 0 : index
      %20 = vector.load %arg5[%c0_14, %c0_15] : memref<1x32xf32, #tpu.memory_space<vmem>>, vector<1x32xf32>
      %21 = vector.broadcast %20 : vector<1x32xf32> to vector<8x32xf32>
      %22 = arith.addf %19, %21 : vector<8x32xf32>
      %cst_16 = arith.constant dense<0.000000e+00> : vector<32xf32>
      %23 = vector.multi_reduction <add>, %22, %cst_16 [0] : vector<8x32xf32> to vector<32xf32>
      %24 = vector.shape_cast %23 : vector<32xf32> to vector<1x32xf32>
      %c0_17 = arith.constant 0 : index
      %c0_18 = arith.constant 0 : index
      %c0_19 = arith.constant 0 : index
      %25 = vector.load %arg7[%c0_17, %c0_18, %c0_19] : memref<1x1x32xf32, #tpu.memory_space<vmem>>, vector<1x1x32xf32>
      %26 = vector.shape_cast %25 : vector<1x1x32xf32> to vector<1x32xf32>
      %27 = vector.shape_cast %24 : vector<1x32xf32> to vector<1x1x32xf32>
      tpu.vector_store %arg7[%c0_17, %c0_18, %c0_19], %27 {strides = array<i32>} : memref<1x1x32xf32, #tpu.memory_space<vmem>>, vector<1x1x32xf32>,
      %28 = arith.mulf %22, %22 : vector<8x32xf32>
      %cst_20 = arith.constant dense<0.000000e+00> : vector<32xf32>
      %29 = vector.multi_reduction <add>, %28, %cst_20 [0] : vector<8x32xf32> to vector<32xf32>
      %30 = vector.shape_cast %29 : vector<32xf32> to vector<1x32xf32>
      %c0_21 = arith.constant 0 : index
      %c0_22 = arith.constant 0 : index
      %c0_23 = arith.constant 0 : index
      %31 = vector.load %arg8[%c0_21, %c0_22, %c0_23] : memref<1x1x32xf32, #tpu.memory_space<vmem>>, vector<1x1x32xf32>
      %32 = vector.shape_cast %31 : vector<1x1x32xf32> to vector<1x32xf32>
      %33 = vector.shape_cast %30 : vector<1x32xf32> to vector<1x1x32xf32>
      tpu.vector_store %arg8[%c0_21, %c0_22, %c0_23], %33 {strides = array<i32>} : memref<1x1x32xf32, #tpu.memory_space<vmem>>, vector<1x1x32xf32>,
      %34 = arith.truncf %22 : vector<8x32xf32> to vector<8x32xbf16>
      %c0_24 = arith.constant 0 : index
      %c0_25 = arith.constant 0 : index
      %35 = vector.load %arg6[%c0_24, %c0_25] : memref<8x32xbf16, #tpu.memory_space<vmem>>, vector<8x32xbf16>
      tpu.vector_store %arg6[%c0_24, %c0_25], %34 {strides = array<i32>} : memref<8x32xbf16, #tpu.memory_space<vmem>>, vector<8x32xbf16>,
    } else {
    }
    return
  }
  func.func @transform_0(%arg0: i32, %arg1: i32, %arg2: i32) -> (i32, i32) {
    %c0_i32 = arith.constant 0 : i32
    return %arg0, %arg2 : i32, i32
  }
  func.func @transform_1(%arg0: i32, %arg1: i32, %arg2: i32) -> (i32, i32) {
    %c0_i32 = arith.constant 0 : i32
    return %arg2, %arg1 : i32, i32
  }
  func.func @transform_2(%arg0: i32, %arg1: i32, %arg2: i32) -> (i32, i32) {
    %c0_i32 = arith.constant 0 : i32
    %c0_i32_0 = arith.constant 0 : i32
    return %c0_i32, %arg1 : i32, i32
  }
  func.func @transform_3(%arg0: i32, %arg1: i32, %arg2: i32) -> (i32, i32) {
    %c0_i32 = arith.constant 0 : i32
    return %arg0, %arg1 : i32, i32
  }
  func.func @transform_4(%arg0: i32, %arg1: i32, %arg2: i32) -> (i32, i32, i32) {
    %c0_i32 = arith.constant 0 : i32
    %c0_i32_0 = arith.constant 0 : i32
    return %arg0, %c0_i32, %arg1 : i32, i32, i32
  }
  func.func @transform_5(%arg0: i32, %arg1: i32, %arg2: i32) -> (i32, i32, i32) {
    %c0_i32 = arith.constant 0 : i32
    %c0_i32_0 = arith.constant 0 : i32
    return %arg0, %c0_i32, %arg1 : i32, i32, i32
  }
}

module attributes {stable_mosaic.version = 11 : i64} {
  func.func @_scale_shift_kernel(%arg0: i32, %arg1: memref<2x128xbf16, #tpu.memory_space<vmem>>, %arg2: memref<1x128xf32, #tpu.memory_space<vmem>>, %arg3: memref<1x128xf32, #tpu.memory_space<vmem>>, %arg4: memref<2x128xbf16, #tpu.memory_space<vmem>>) attributes {dimension_semantics = [#tpu.dimension_semantics<parallel>], iteration_bounds = array<i64: 1>, scalar_prefetch = 0 : i64, scratch_operands = 0 : i64, tpu.core_type = #tpu.core_type<tc>, window_params = [{transform_indices = @transform_0, window_bounds = array<i64: 2, 128>}, {pipeline_mode = #tpu.pipeline_mode<synchronous>, transform_indices = @transform_1, window_bounds = array<i64: 1, 128>}, {pipeline_mode = #tpu.pipeline_mode<synchronous>, transform_indices = @transform_2, window_bounds = array<i64: 1, 128>}, {transform_indices = @transform_3, window_bounds = array<i64: 2, 128>}]} {
    %c0 = arith.constant 0 : index
    %c0_0 = arith.constant 0 : index
    %0 = vector.load %arg1[%c0, %c0_0] : memref<2x128xbf16, #tpu.memory_space<vmem>>, vector<2x128xbf16>
    %1 = arith.extf %0 : vector<2x128xbf16> to vector<2x128xf32>
    %c0_1 = arith.constant 0 : index
    %c0_2 = arith.constant 0 : index
    %2 = vector.load %arg2[%c0_1, %c0_2] : memref<1x128xf32, #tpu.memory_space<vmem>>, vector<1x128xf32>
    %3 = vector.broadcast %2 : vector<1x128xf32> to vector<2x128xf32>
    %4 = arith.mulf %1, %3 : vector<2x128xf32>
    %c0_3 = arith.constant 0 : index
    %c0_4 = arith.constant 0 : index
    %5 = vector.load %arg3[%c0_3, %c0_4] : memref<1x128xf32, #tpu.memory_space<vmem>>, vector<1x128xf32>
    %6 = vector.broadcast %5 : vector<1x128xf32> to vector<2x128xf32>
    %7 = arith.addf %4, %6 : vector<2x128xf32>
    %8 = arith.truncf %7 : vector<2x128xf32> to vector<2x128xbf16>
    %c0_5 = arith.constant 0 : index
    %c0_6 = arith.constant 0 : index
    %9 = vector.load %arg4[%c0_5, %c0_6] : memref<2x128xbf16, #tpu.memory_space<vmem>>, vector<2x128xbf16>
    tpu.vector_store %arg4[%c0_5, %c0_6], %8 {strides = array<i32>} : memref<2x128xbf16, #tpu.memory_space<vmem>>, vector<2x128xbf16>,
    return
  }
  func.func @transform_0(%arg0: i32) -> (i32, i32) {
    %c0_i32 = arith.constant 0 : i32
    %c0_i32_0 = arith.constant 0 : i32
    return %arg0, %c0_i32 : i32, i32
  }
  func.func @transform_1(%arg0: i32) -> (i32, i32) {
    %c0_i32 = arith.constant 0 : i32
    %c0_i32_0 = arith.constant 0 : i32
    %c0_i32_1 = arith.constant 0 : i32
    return %c0_i32, %c0_i32_0 : i32, i32
  }
  func.func @transform_2(%arg0: i32) -> (i32, i32) {
    %c0_i32 = arith.constant 0 : i32
    %c0_i32_0 = arith.constant 0 : i32
    %c0_i32_1 = arith.constant 0 : i32
    return %c0_i32, %c0_i32_0 : i32, i32
  }
  func.func @transform_3(%arg0: i32) -> (i32, i32) {
    %c0_i32 = arith.constant 0 : i32
    %c0_i32_0 = arith.constant 0 : i32
    return %arg0, %c0_i32 : i32, i32
  }
}

module attributes {stable_mosaic.version = 11 : i64} {
  func.func @_matmul_stats_kernel(%arg0: i32, %arg1: i32, %arg2: i32, %arg3: memref<2x512xbf16, #tpu.memory_space<vmem>>, %arg4: memref<512x32xbf16, #tpu.memory_space<vmem>>, %arg5: memref<1x32xf32, #tpu.memory_space<vmem>>, %arg6: memref<2x32xbf16, #tpu.memory_space<vmem>>, %arg7: memref<1x1x32xf32, #tpu.memory_space<vmem>>, %arg8: memref<1x1x32xf32, #tpu.memory_space<vmem>>, %arg9: memref<2x32xf32, #tpu.memory_space<vmem>>) attributes {dimension_semantics = [#tpu.dimension_semantics<parallel>, #tpu.dimension_semantics<parallel>, #tpu.dimension_semantics<arbitrary>], iteration_bounds = array<i64: 1, 1, 1>, scalar_prefetch = 0 : i64, scratch_operands = 1 : i64, tpu.core_type = #tpu.core_type<tc>, window_params = [{transform_indices = @transform_0, window_bounds = array<i64: 2, 512>}, {transform_indices = @transform_1, window_bounds = array<i64: 512, 32>}, {transform_indices = @transform_2, window_bounds = array<i64: 1, 32>}, {transform_indices = @transform_3, window_bounds = array<i64: 2, 32>}, {transform_indices = @transform_4, window_bounds = array<i64: 1, 1, 32>}, {transform_indices = @transform_5, window_bounds = array<i64: 1, 1, 32>}]} {
    %c0_i32 = arith.constant 0 : i32
    %0 = arith.cmpi eq, %arg2, %c0_i32 : i32
    %1 = arith.extui %0 : i1 to i32
    %c0_i32_0 = arith.constant 0 : i32
    %2 = arith.cmpi ne, %1, %c0_i32_0 : i32
    scf.if %2 {
      %cst_12 = arith.constant 0.000000e+00 : f32
      %19 = vector.broadcast %cst_12 : f32 to vector<2x32xf32>
      %c0_13 = arith.constant 0 : index
      %c0_14 = arith.constant 0 : index
      %20 = vector.load %arg9[%c0_13, %c0_14] : memref<2x32xf32, #tpu.memory_space<vmem>>, vector<2x32xf32>
      tpu.vector_store %arg9[%c0_13, %c0_14], %19 {strides = array<i32>} : memref<2x32xf32, #tpu.memory_space<vmem>>, vector<2x32xf32>,
    } else {
    }
    %c0 = arith.constant 0 : index
    %c0_1 = arith.constant 0 : index
    %3 = vector.load %arg3[%c0, %c0_1] : memref<2x512xbf16, #tpu.memory_space<vmem>>, vector<2x512xbf16>
    %4 = arith.extf %3 : vector<2x512xbf16> to vector<2x512xf32>
    %cst = arith.constant 0.000000e+00 : f32
    %5 = vector.broadcast %cst : f32 to vector<2x512xf32>
    %6 = arith.cmpf oge, %4, %5 : vector<2x512xf32>
    %cst_2 = arith.constant 2.000000e-01 : f32
    %7 = vector.broadcast %cst_2 : f32 to vector<2x512xf32>
    %8 = arith.mulf %7, %4 : vector<2x512xf32>
    %9 = arith.select %6, %4, %8 : vector<2x512xi1>, vector<2x512xf32>
    %c0_3 = arith.constant 0 : index
    %c0_4 = arith.constant 0 : index
    %10 = vector.load %arg9[%c0_3, %c0_4] : memref<2x32xf32, #tpu.memory_space<vmem>>, vector<2x32xf32>
    %11 = arith.truncf %9 : vector<2x512xf32> to vector<2x512xbf16>
    %c0_5 = arith.constant 0 : index
    %c0_6 = arith.constant 0 : index
    %12 = vector.load %arg4[%c0_5, %c0_6] : memref<512x32xbf16, #tpu.memory_space<vmem>>, vector<512x32xbf16>
    %cst_7 = arith.constant dense<0.000000e+00> : vector<2x32xf32>
    %13 = tpu.matmul %11, %12, %cst_7 {dimension_numbers = #tpu.dot_dimension_numbers<[1], [0], [0], [1], [0, 0, 1, 1], [], []>} : vector<2x512xbf16>, vector<512x32xbf16>, vector<2x32xf32> -> vector<2x32xf32>
    %14 = arith.addf %10, %13 : vector<2x32xf32>
    %c0_8 = arith.constant 0 : index
    %c0_9 = arith.constant 0 : index
    %15 = vector.load %arg9[%c0_8, %c0_9] : memref<2x32xf32, #tpu.memory_space<vmem>>, vector<2x32xf32>
    tpu.vector_store %arg9[%c0_8, %c0_9], %14 {strides = array<i32>} : memref<2x32xf32, #tpu.memory_space<vmem>>, vector<2x32xf32>,
    %c0_i32_10 = arith.constant 0 : i32
    %16 = arith.cmpi eq, %arg2, %c0_i32_10 : i32
    %17 = arith.extui %16 : i1 to i32
    %c0_i32_11 = arith.constant 0 : i32
    %18 = arith.cmpi ne, %17, %c0_i32_11 : i32
    scf.if %18 {
      %c0_12 = arith.constant 0 : index
      %c0_13 = arith.constant 0 : index
      %19 = vector.load %arg9[%c0_12, %c0_13] : memref<2x32xf32, #tpu.memory_space<vmem>>, vector<2x32xf32>
      %c0_14 = arith.constant 0 : index
      %c0_15 = arith.constant 0 : index
      %20 = vector.load %arg5[%c0_14, %c0_15] : memref<1x32xf32, #tpu.memory_space<vmem>>, vector<1x32xf32>
      %21 = vector.broadcast %20 : vector<1x32xf32> to vector<2x32xf32>
      %22 = arith.addf %19, %21 : vector<2x32xf32>
      %cst_16 = arith.constant dense<0.000000e+00> : vector<32xf32>
      %23 = vector.multi_reduction <add>, %22, %cst_16 [0] : vector<2x32xf32> to vector<32xf32>
      %24 = vector.shape_cast %23 : vector<32xf32> to vector<1x32xf32>
      %c0_17 = arith.constant 0 : index
      %c0_18 = arith.constant 0 : index
      %c0_19 = arith.constant 0 : index
      %25 = vector.load %arg7[%c0_17, %c0_18, %c0_19] : memref<1x1x32xf32, #tpu.memory_space<vmem>>, vector<1x1x32xf32>
      %26 = vector.shape_cast %25 : vector<1x1x32xf32> to vector<1x32xf32>
      %27 = vector.shape_cast %24 : vector<1x32xf32> to vector<1x1x32xf32>
      tpu.vector_store %arg7[%c0_17, %c0_18, %c0_19], %27 {strides = array<i32>} : memref<1x1x32xf32, #tpu.memory_space<vmem>>, vector<1x1x32xf32>,
      %28 = arith.mulf %22, %22 : vector<2x32xf32>
      %cst_20 = arith.constant dense<0.000000e+00> : vector<32xf32>
      %29 = vector.multi_reduction <add>, %28, %cst_20 [0] : vector<2x32xf32> to vector<32xf32>
      %30 = vector.shape_cast %29 : vector<32xf32> to vector<1x32xf32>
      %c0_21 = arith.constant 0 : index
      %c0_22 = arith.constant 0 : index
      %c0_23 = arith.constant 0 : index
      %31 = vector.load %arg8[%c0_21, %c0_22, %c0_23] : memref<1x1x32xf32, #tpu.memory_space<vmem>>, vector<1x1x32xf32>
      %32 = vector.shape_cast %31 : vector<1x1x32xf32> to vector<1x32xf32>
      %33 = vector.shape_cast %30 : vector<1x32xf32> to vector<1x1x32xf32>
      tpu.vector_store %arg8[%c0_21, %c0_22, %c0_23], %33 {strides = array<i32>} : memref<1x1x32xf32, #tpu.memory_space<vmem>>, vector<1x1x32xf32>,
      %34 = arith.truncf %22 : vector<2x32xf32> to vector<2x32xbf16>
      %c0_24 = arith.constant 0 : index
      %c0_25 = arith.constant 0 : index
      %35 = vector.load %arg6[%c0_24, %c0_25] : memref<2x32xbf16, #tpu.memory_space<vmem>>, vector<2x32xbf16>
      tpu.vector_store %arg6[%c0_24, %c0_25], %34 {strides = array<i32>} : memref<2x32xbf16, #tpu.memory_space<vmem>>, vector<2x32xbf16>,
    } else {
    }
    return
  }
  func.func @transform_0(%arg0: i32, %arg1: i32, %arg2: i32) -> (i32, i32) {
    %c0_i32 = arith.constant 0 : i32
    return %arg0, %arg2 : i32, i32
  }
  func.func @transform_1(%arg0: i32, %arg1: i32, %arg2: i32) -> (i32, i32) {
    %c0_i32 = arith.constant 0 : i32
    return %arg2, %arg1 : i32, i32
  }
  func.func @transform_2(%arg0: i32, %arg1: i32, %arg2: i32) -> (i32, i32) {
    %c0_i32 = arith.constant 0 : i32
    %c0_i32_0 = arith.constant 0 : i32
    return %c0_i32, %arg1 : i32, i32
  }
  func.func @transform_3(%arg0: i32, %arg1: i32, %arg2: i32) -> (i32, i32) {
    %c0_i32 = arith.constant 0 : i32
    return %arg0, %arg1 : i32, i32
  }
  func.func @transform_4(%arg0: i32, %arg1: i32, %arg2: i32) -> (i32, i32, i32) {
    %c0_i32 = arith.constant 0 : i32
    %c0_i32_0 = arith.constant 0 : i32
    return %arg0, %c0_i32, %arg1 : i32, i32, i32
  }
  func.func @transform_5(%arg0: i32, %arg1: i32, %arg2: i32) -> (i32, i32, i32) {
    %c0_i32 = arith.constant 0 : i32
    %c0_i32_0 = arith.constant 0 : i32
    return %arg0, %c0_i32, %arg1 : i32, i32, i32
  }
}

module attributes {stable_mosaic.version = 11 : i64} {
  func.func @_matmul_stats_kernel(%arg0: i32, %arg1: i32, %arg2: i32, %arg3: memref<2x288xbf16, #tpu.memory_space<vmem>>, %arg4: memref<288x128xbf16, #tpu.memory_space<vmem>>, %arg5: memref<1x128xf32, #tpu.memory_space<vmem>>, %arg6: memref<2x128xbf16, #tpu.memory_space<vmem>>, %arg7: memref<1x1x128xf32, #tpu.memory_space<vmem>>, %arg8: memref<1x1x128xf32, #tpu.memory_space<vmem>>, %arg9: memref<2x128xf32, #tpu.memory_space<vmem>>) attributes {dimension_semantics = [#tpu.dimension_semantics<parallel>, #tpu.dimension_semantics<parallel>, #tpu.dimension_semantics<arbitrary>], iteration_bounds = array<i64: 1, 1, 1>, scalar_prefetch = 0 : i64, scratch_operands = 1 : i64, tpu.core_type = #tpu.core_type<tc>, window_params = [{transform_indices = @transform_0, window_bounds = array<i64: 2, 288>}, {transform_indices = @transform_1, window_bounds = array<i64: 288, 128>}, {transform_indices = @transform_2, window_bounds = array<i64: 1, 128>}, {transform_indices = @transform_3, window_bounds = array<i64: 2, 128>}, {transform_indices = @transform_4, window_bounds = array<i64: 1, 1, 128>}, {transform_indices = @transform_5, window_bounds = array<i64: 1, 1, 128>}]} {
    %c0_i32 = arith.constant 0 : i32
    %0 = arith.cmpi eq, %arg2, %c0_i32 : i32
    %1 = arith.extui %0 : i1 to i32
    %c0_i32_0 = arith.constant 0 : i32
    %2 = arith.cmpi ne, %1, %c0_i32_0 : i32
    scf.if %2 {
      %cst_11 = arith.constant 0.000000e+00 : f32
      %16 = vector.broadcast %cst_11 : f32 to vector<2x128xf32>
      %c0_12 = arith.constant 0 : index
      %c0_13 = arith.constant 0 : index
      %17 = vector.load %arg9[%c0_12, %c0_13] : memref<2x128xf32, #tpu.memory_space<vmem>>, vector<2x128xf32>
      tpu.vector_store %arg9[%c0_12, %c0_13], %16 {strides = array<i32>} : memref<2x128xf32, #tpu.memory_space<vmem>>, vector<2x128xf32>,
    } else {
    }
    %c0 = arith.constant 0 : index
    %c0_1 = arith.constant 0 : index
    %3 = vector.load %arg3[%c0, %c0_1] : memref<2x288xbf16, #tpu.memory_space<vmem>>, vector<2x288xbf16>
    %4 = arith.extf %3 : vector<2x288xbf16> to vector<2x288xf32>
    %cst = arith.constant 0.000000e+00 : f32
    %5 = vector.broadcast %cst : f32 to vector<2x288xf32>
    %6 = arith.maximumf %4, %5 : vector<2x288xf32>
    %c0_2 = arith.constant 0 : index
    %c0_3 = arith.constant 0 : index
    %7 = vector.load %arg9[%c0_2, %c0_3] : memref<2x128xf32, #tpu.memory_space<vmem>>, vector<2x128xf32>
    %8 = arith.truncf %6 : vector<2x288xf32> to vector<2x288xbf16>
    %c0_4 = arith.constant 0 : index
    %c0_5 = arith.constant 0 : index
    %9 = vector.load %arg4[%c0_4, %c0_5] : memref<288x128xbf16, #tpu.memory_space<vmem>>, vector<288x128xbf16>
    %cst_6 = arith.constant dense<0.000000e+00> : vector<2x128xf32>
    %10 = tpu.matmul %8, %9, %cst_6 {dimension_numbers = #tpu.dot_dimension_numbers<[1], [0], [0], [1], [0, 0, 1, 1], [], []>} : vector<2x288xbf16>, vector<288x128xbf16>, vector<2x128xf32> -> vector<2x128xf32>
    %11 = arith.addf %7, %10 : vector<2x128xf32>
    %c0_7 = arith.constant 0 : index
    %c0_8 = arith.constant 0 : index
    %12 = vector.load %arg9[%c0_7, %c0_8] : memref<2x128xf32, #tpu.memory_space<vmem>>, vector<2x128xf32>
    tpu.vector_store %arg9[%c0_7, %c0_8], %11 {strides = array<i32>} : memref<2x128xf32, #tpu.memory_space<vmem>>, vector<2x128xf32>,
    %c0_i32_9 = arith.constant 0 : i32
    %13 = arith.cmpi eq, %arg2, %c0_i32_9 : i32
    %14 = arith.extui %13 : i1 to i32
    %c0_i32_10 = arith.constant 0 : i32
    %15 = arith.cmpi ne, %14, %c0_i32_10 : i32
    scf.if %15 {
      %c0_11 = arith.constant 0 : index
      %c0_12 = arith.constant 0 : index
      %16 = vector.load %arg9[%c0_11, %c0_12] : memref<2x128xf32, #tpu.memory_space<vmem>>, vector<2x128xf32>
      %c0_13 = arith.constant 0 : index
      %c0_14 = arith.constant 0 : index
      %17 = vector.load %arg5[%c0_13, %c0_14] : memref<1x128xf32, #tpu.memory_space<vmem>>, vector<1x128xf32>
      %18 = vector.broadcast %17 : vector<1x128xf32> to vector<2x128xf32>
      %19 = arith.addf %16, %18 : vector<2x128xf32>
      %cst_15 = arith.constant dense<0.000000e+00> : vector<128xf32>
      %20 = vector.multi_reduction <add>, %19, %cst_15 [0] : vector<2x128xf32> to vector<128xf32>
      %21 = vector.shape_cast %20 : vector<128xf32> to vector<1x128xf32>
      %c0_16 = arith.constant 0 : index
      %c0_17 = arith.constant 0 : index
      %c0_18 = arith.constant 0 : index
      %22 = vector.load %arg7[%c0_16, %c0_17, %c0_18] : memref<1x1x128xf32, #tpu.memory_space<vmem>>, vector<1x1x128xf32>
      %23 = vector.shape_cast %22 : vector<1x1x128xf32> to vector<1x128xf32>
      %24 = vector.shape_cast %21 : vector<1x128xf32> to vector<1x1x128xf32>
      tpu.vector_store %arg7[%c0_16, %c0_17, %c0_18], %24 {strides = array<i32>} : memref<1x1x128xf32, #tpu.memory_space<vmem>>, vector<1x1x128xf32>,
      %25 = arith.mulf %19, %19 : vector<2x128xf32>
      %cst_19 = arith.constant dense<0.000000e+00> : vector<128xf32>
      %26 = vector.multi_reduction <add>, %25, %cst_19 [0] : vector<2x128xf32> to vector<128xf32>
      %27 = vector.shape_cast %26 : vector<128xf32> to vector<1x128xf32>
      %c0_20 = arith.constant 0 : index
      %c0_21 = arith.constant 0 : index
      %c0_22 = arith.constant 0 : index
      %28 = vector.load %arg8[%c0_20, %c0_21, %c0_22] : memref<1x1x128xf32, #tpu.memory_space<vmem>>, vector<1x1x128xf32>
      %29 = vector.shape_cast %28 : vector<1x1x128xf32> to vector<1x128xf32>
      %30 = vector.shape_cast %27 : vector<1x128xf32> to vector<1x1x128xf32>
      tpu.vector_store %arg8[%c0_20, %c0_21, %c0_22], %30 {strides = array<i32>} : memref<1x1x128xf32, #tpu.memory_space<vmem>>, vector<1x1x128xf32>,
      %31 = arith.truncf %19 : vector<2x128xf32> to vector<2x128xbf16>
      %c0_23 = arith.constant 0 : index
      %c0_24 = arith.constant 0 : index
      %32 = vector.load %arg6[%c0_23, %c0_24] : memref<2x128xbf16, #tpu.memory_space<vmem>>, vector<2x128xbf16>
      tpu.vector_store %arg6[%c0_23, %c0_24], %31 {strides = array<i32>} : memref<2x128xbf16, #tpu.memory_space<vmem>>, vector<2x128xbf16>,
    } else {
    }
    return
  }
  func.func @transform_0(%arg0: i32, %arg1: i32, %arg2: i32) -> (i32, i32) {
    %c0_i32 = arith.constant 0 : i32
    return %arg0, %arg2 : i32, i32
  }
  func.func @transform_1(%arg0: i32, %arg1: i32, %arg2: i32) -> (i32, i32) {
    %c0_i32 = arith.constant 0 : i32
    return %arg2, %arg1 : i32, i32
  }
  func.func @transform_2(%arg0: i32, %arg1: i32, %arg2: i32) -> (i32, i32) {
    %c0_i32 = arith.constant 0 : i32
    %c0_i32_0 = arith.constant 0 : i32
    return %c0_i32, %arg1 : i32, i32
  }
  func.func @transform_3(%arg0: i32, %arg1: i32, %arg2: i32) -> (i32, i32) {
    %c0_i32 = arith.constant 0 : i32
    return %arg0, %arg1 : i32, i32
  }
  func.func @transform_4(%arg0: i32, %arg1: i32, %arg2: i32) -> (i32, i32, i32) {
    %c0_i32 = arith.constant 0 : i32
    %c0_i32_0 = arith.constant 0 : i32
    return %arg0, %c0_i32, %arg1 : i32, i32, i32
  }
  func.func @transform_5(%arg0: i32, %arg1: i32, %arg2: i32) -> (i32, i32, i32) {
    %c0_i32 = arith.constant 0 : i32
    %c0_i32_0 = arith.constant 0 : i32
    return %arg0, %c0_i32, %arg1 : i32, i32, i32
  }
}

module attributes {stable_mosaic.version = 11 : i64} {
  func.func @_matmul_stats_kernel(%arg0: i32, %arg1: i32, %arg2: i32, %arg3: memref<8x576xbf16, #tpu.memory_space<vmem>>, %arg4: memref<576x64xbf16, #tpu.memory_space<vmem>>, %arg5: memref<1x64xf32, #tpu.memory_space<vmem>>, %arg6: memref<8x64xbf16, #tpu.memory_space<vmem>>, %arg7: memref<1x1x64xf32, #tpu.memory_space<vmem>>, %arg8: memref<1x1x64xf32, #tpu.memory_space<vmem>>, %arg9: memref<8x64xf32, #tpu.memory_space<vmem>>) attributes {dimension_semantics = [#tpu.dimension_semantics<parallel>, #tpu.dimension_semantics<parallel>, #tpu.dimension_semantics<arbitrary>], iteration_bounds = array<i64: 1, 1, 1>, scalar_prefetch = 0 : i64, scratch_operands = 1 : i64, tpu.core_type = #tpu.core_type<tc>, window_params = [{transform_indices = @transform_0, window_bounds = array<i64: 8, 576>}, {transform_indices = @transform_1, window_bounds = array<i64: 576, 64>}, {transform_indices = @transform_2, window_bounds = array<i64: 1, 64>}, {transform_indices = @transform_3, window_bounds = array<i64: 8, 64>}, {transform_indices = @transform_4, window_bounds = array<i64: 1, 1, 64>}, {transform_indices = @transform_5, window_bounds = array<i64: 1, 1, 64>}]} {
    %c0_i32 = arith.constant 0 : i32
    %0 = arith.cmpi eq, %arg2, %c0_i32 : i32
    %1 = arith.extui %0 : i1 to i32
    %c0_i32_0 = arith.constant 0 : i32
    %2 = arith.cmpi ne, %1, %c0_i32_0 : i32
    scf.if %2 {
      %cst_11 = arith.constant 0.000000e+00 : f32
      %16 = vector.broadcast %cst_11 : f32 to vector<8x64xf32>
      %c0_12 = arith.constant 0 : index
      %c0_13 = arith.constant 0 : index
      %17 = vector.load %arg9[%c0_12, %c0_13] : memref<8x64xf32, #tpu.memory_space<vmem>>, vector<8x64xf32>
      tpu.vector_store %arg9[%c0_12, %c0_13], %16 {strides = array<i32>} : memref<8x64xf32, #tpu.memory_space<vmem>>, vector<8x64xf32>,
    } else {
    }
    %c0 = arith.constant 0 : index
    %c0_1 = arith.constant 0 : index
    %3 = vector.load %arg3[%c0, %c0_1] : memref<8x576xbf16, #tpu.memory_space<vmem>>, vector<8x576xbf16>
    %4 = arith.extf %3 : vector<8x576xbf16> to vector<8x576xf32>
    %cst = arith.constant 0.000000e+00 : f32
    %5 = vector.broadcast %cst : f32 to vector<8x576xf32>
    %6 = arith.maximumf %4, %5 : vector<8x576xf32>
    %c0_2 = arith.constant 0 : index
    %c0_3 = arith.constant 0 : index
    %7 = vector.load %arg9[%c0_2, %c0_3] : memref<8x64xf32, #tpu.memory_space<vmem>>, vector<8x64xf32>
    %8 = arith.truncf %6 : vector<8x576xf32> to vector<8x576xbf16>
    %c0_4 = arith.constant 0 : index
    %c0_5 = arith.constant 0 : index
    %9 = vector.load %arg4[%c0_4, %c0_5] : memref<576x64xbf16, #tpu.memory_space<vmem>>, vector<576x64xbf16>
    %cst_6 = arith.constant dense<0.000000e+00> : vector<8x64xf32>
    %10 = tpu.matmul %8, %9, %cst_6 {dimension_numbers = #tpu.dot_dimension_numbers<[1], [0], [0], [1], [0, 0, 1, 1], [], []>} : vector<8x576xbf16>, vector<576x64xbf16>, vector<8x64xf32> -> vector<8x64xf32>
    %11 = arith.addf %7, %10 : vector<8x64xf32>
    %c0_7 = arith.constant 0 : index
    %c0_8 = arith.constant 0 : index
    %12 = vector.load %arg9[%c0_7, %c0_8] : memref<8x64xf32, #tpu.memory_space<vmem>>, vector<8x64xf32>
    tpu.vector_store %arg9[%c0_7, %c0_8], %11 {strides = array<i32>} : memref<8x64xf32, #tpu.memory_space<vmem>>, vector<8x64xf32>,
    %c0_i32_9 = arith.constant 0 : i32
    %13 = arith.cmpi eq, %arg2, %c0_i32_9 : i32
    %14 = arith.extui %13 : i1 to i32
    %c0_i32_10 = arith.constant 0 : i32
    %15 = arith.cmpi ne, %14, %c0_i32_10 : i32
    scf.if %15 {
      %c0_11 = arith.constant 0 : index
      %c0_12 = arith.constant 0 : index
      %16 = vector.load %arg9[%c0_11, %c0_12] : memref<8x64xf32, #tpu.memory_space<vmem>>, vector<8x64xf32>
      %c0_13 = arith.constant 0 : index
      %c0_14 = arith.constant 0 : index
      %17 = vector.load %arg5[%c0_13, %c0_14] : memref<1x64xf32, #tpu.memory_space<vmem>>, vector<1x64xf32>
      %18 = vector.broadcast %17 : vector<1x64xf32> to vector<8x64xf32>
      %19 = arith.addf %16, %18 : vector<8x64xf32>
      %cst_15 = arith.constant dense<0.000000e+00> : vector<64xf32>
      %20 = vector.multi_reduction <add>, %19, %cst_15 [0] : vector<8x64xf32> to vector<64xf32>
      %21 = vector.shape_cast %20 : vector<64xf32> to vector<1x64xf32>
      %c0_16 = arith.constant 0 : index
      %c0_17 = arith.constant 0 : index
      %c0_18 = arith.constant 0 : index
      %22 = vector.load %arg7[%c0_16, %c0_17, %c0_18] : memref<1x1x64xf32, #tpu.memory_space<vmem>>, vector<1x1x64xf32>
      %23 = vector.shape_cast %22 : vector<1x1x64xf32> to vector<1x64xf32>
      %24 = vector.shape_cast %21 : vector<1x64xf32> to vector<1x1x64xf32>
      tpu.vector_store %arg7[%c0_16, %c0_17, %c0_18], %24 {strides = array<i32>} : memref<1x1x64xf32, #tpu.memory_space<vmem>>, vector<1x1x64xf32>,
      %25 = arith.mulf %19, %19 : vector<8x64xf32>
      %cst_19 = arith.constant dense<0.000000e+00> : vector<64xf32>
      %26 = vector.multi_reduction <add>, %25, %cst_19 [0] : vector<8x64xf32> to vector<64xf32>
      %27 = vector.shape_cast %26 : vector<64xf32> to vector<1x64xf32>
      %c0_20 = arith.constant 0 : index
      %c0_21 = arith.constant 0 : index
      %c0_22 = arith.constant 0 : index
      %28 = vector.load %arg8[%c0_20, %c0_21, %c0_22] : memref<1x1x64xf32, #tpu.memory_space<vmem>>, vector<1x1x64xf32>
      %29 = vector.shape_cast %28 : vector<1x1x64xf32> to vector<1x64xf32>
      %30 = vector.shape_cast %27 : vector<1x64xf32> to vector<1x1x64xf32>
      tpu.vector_store %arg8[%c0_20, %c0_21, %c0_22], %30 {strides = array<i32>} : memref<1x1x64xf32, #tpu.memory_space<vmem>>, vector<1x1x64xf32>,
      %31 = arith.truncf %19 : vector<8x64xf32> to vector<8x64xbf16>
      %c0_23 = arith.constant 0 : index
      %c0_24 = arith.constant 0 : index
      %32 = vector.load %arg6[%c0_23, %c0_24] : memref<8x64xbf16, #tpu.memory_space<vmem>>, vector<8x64xbf16>
      tpu.vector_store %arg6[%c0_23, %c0_24], %31 {strides = array<i32>} : memref<8x64xbf16, #tpu.memory_space<vmem>>, vector<8x64xbf16>,
    } else {
    }
    return
  }
  func.func @transform_0(%arg0: i32, %arg1: i32, %arg2: i32) -> (i32, i32) {
    %c0_i32 = arith.constant 0 : i32
    return %arg0, %arg2 : i32, i32
  }
  func.func @transform_1(%arg0: i32, %arg1: i32, %arg2: i32) -> (i32, i32) {
    %c0_i32 = arith.constant 0 : i32
    return %arg2, %arg1 : i32, i32
  }
  func.func @transform_2(%arg0: i32, %arg1: i32, %arg2: i32) -> (i32, i32) {
    %c0_i32 = arith.constant 0 : i32
    %c0_i32_0 = arith.constant 0 : i32
    return %c0_i32, %arg1 : i32, i32
  }
  func.func @transform_3(%arg0: i32, %arg1: i32, %arg2: i32) -> (i32, i32) {
    %c0_i32 = arith.constant 0 : i32
    return %arg0, %arg1 : i32, i32
  }
  func.func @transform_4(%arg0: i32, %arg1: i32, %arg2: i32) -> (i32, i32, i32) {
    %c0_i32 = arith.constant 0 : i32
    %c0_i32_0 = arith.constant 0 : i32
    return %arg0, %c0_i32, %arg1 : i32, i32, i32
  }
  func.func @transform_5(%arg0: i32, %arg1: i32, %arg2: i32) -> (i32, i32, i32) {
    %c0_i32 = arith.constant 0 : i32
    %c0_i32_0 = arith.constant 0 : i32
    return %arg0, %c0_i32, %arg1 : i32, i32, i32
  }
}

module attributes {stable_mosaic.version = 11 : i64} {
  func.func @_matmul_stats_kernel(%arg0: i32, %arg1: i32, %arg2: i32, %arg3: memref<16x288xbf16, #tpu.memory_space<vmem>>, %arg4: memref<288x32xbf16, #tpu.memory_space<vmem>>, %arg5: memref<1x32xf32, #tpu.memory_space<vmem>>, %arg6: memref<16x32xbf16, #tpu.memory_space<vmem>>, %arg7: memref<1x1x32xf32, #tpu.memory_space<vmem>>, %arg8: memref<1x1x32xf32, #tpu.memory_space<vmem>>, %arg9: memref<16x32xf32, #tpu.memory_space<vmem>>) attributes {dimension_semantics = [#tpu.dimension_semantics<parallel>, #tpu.dimension_semantics<parallel>, #tpu.dimension_semantics<arbitrary>], iteration_bounds = array<i64: 2, 1, 1>, scalar_prefetch = 0 : i64, scratch_operands = 1 : i64, tpu.core_type = #tpu.core_type<tc>, window_params = [{transform_indices = @transform_0, window_bounds = array<i64: 16, 288>}, {transform_indices = @transform_1, window_bounds = array<i64: 288, 32>}, {transform_indices = @transform_2, window_bounds = array<i64: 1, 32>}, {transform_indices = @transform_3, window_bounds = array<i64: 16, 32>}, {transform_indices = @transform_4, window_bounds = array<i64: 1, 1, 32>}, {transform_indices = @transform_5, window_bounds = array<i64: 1, 1, 32>}]} {
    %c0_i32 = arith.constant 0 : i32
    %0 = arith.cmpi eq, %arg2, %c0_i32 : i32
    %1 = arith.extui %0 : i1 to i32
    %c0_i32_0 = arith.constant 0 : i32
    %2 = arith.cmpi ne, %1, %c0_i32_0 : i32
    scf.if %2 {
      %cst_11 = arith.constant 0.000000e+00 : f32
      %16 = vector.broadcast %cst_11 : f32 to vector<16x32xf32>
      %c0_12 = arith.constant 0 : index
      %c0_13 = arith.constant 0 : index
      %17 = vector.load %arg9[%c0_12, %c0_13] : memref<16x32xf32, #tpu.memory_space<vmem>>, vector<16x32xf32>
      tpu.vector_store %arg9[%c0_12, %c0_13], %16 {strides = array<i32>} : memref<16x32xf32, #tpu.memory_space<vmem>>, vector<16x32xf32>,
    } else {
    }
    %c0 = arith.constant 0 : index
    %c0_1 = arith.constant 0 : index
    %3 = vector.load %arg3[%c0, %c0_1] : memref<16x288xbf16, #tpu.memory_space<vmem>>, vector<16x288xbf16>
    %4 = arith.extf %3 : vector<16x288xbf16> to vector<16x288xf32>
    %cst = arith.constant 0.000000e+00 : f32
    %5 = vector.broadcast %cst : f32 to vector<16x288xf32>
    %6 = arith.maximumf %4, %5 : vector<16x288xf32>
    %c0_2 = arith.constant 0 : index
    %c0_3 = arith.constant 0 : index
    %7 = vector.load %arg9[%c0_2, %c0_3] : memref<16x32xf32, #tpu.memory_space<vmem>>, vector<16x32xf32>
    %8 = arith.truncf %6 : vector<16x288xf32> to vector<16x288xbf16>
    %c0_4 = arith.constant 0 : index
    %c0_5 = arith.constant 0 : index
    %9 = vector.load %arg4[%c0_4, %c0_5] : memref<288x32xbf16, #tpu.memory_space<vmem>>, vector<288x32xbf16>
    %cst_6 = arith.constant dense<0.000000e+00> : vector<16x32xf32>
    %10 = tpu.matmul %8, %9, %cst_6 {dimension_numbers = #tpu.dot_dimension_numbers<[1], [0], [0], [1], [0, 0, 1, 1], [], []>} : vector<16x288xbf16>, vector<288x32xbf16>, vector<16x32xf32> -> vector<16x32xf32>
    %11 = arith.addf %7, %10 : vector<16x32xf32>
    %c0_7 = arith.constant 0 : index
    %c0_8 = arith.constant 0 : index
    %12 = vector.load %arg9[%c0_7, %c0_8] : memref<16x32xf32, #tpu.memory_space<vmem>>, vector<16x32xf32>
    tpu.vector_store %arg9[%c0_7, %c0_8], %11 {strides = array<i32>} : memref<16x32xf32, #tpu.memory_space<vmem>>, vector<16x32xf32>,
    %c0_i32_9 = arith.constant 0 : i32
    %13 = arith.cmpi eq, %arg2, %c0_i32_9 : i32
    %14 = arith.extui %13 : i1 to i32
    %c0_i32_10 = arith.constant 0 : i32
    %15 = arith.cmpi ne, %14, %c0_i32_10 : i32
    scf.if %15 {
      %c0_11 = arith.constant 0 : index
      %c0_12 = arith.constant 0 : index
      %16 = vector.load %arg9[%c0_11, %c0_12] : memref<16x32xf32, #tpu.memory_space<vmem>>, vector<16x32xf32>
      %c0_13 = arith.constant 0 : index
      %c0_14 = arith.constant 0 : index
      %17 = vector.load %arg5[%c0_13, %c0_14] : memref<1x32xf32, #tpu.memory_space<vmem>>, vector<1x32xf32>
      %18 = vector.broadcast %17 : vector<1x32xf32> to vector<16x32xf32>
      %19 = arith.addf %16, %18 : vector<16x32xf32>
      %cst_15 = arith.constant dense<0.000000e+00> : vector<32xf32>
      %20 = vector.multi_reduction <add>, %19, %cst_15 [0] : vector<16x32xf32> to vector<32xf32>
      %21 = vector.shape_cast %20 : vector<32xf32> to vector<1x32xf32>
      %c0_16 = arith.constant 0 : index
      %c0_17 = arith.constant 0 : index
      %c0_18 = arith.constant 0 : index
      %22 = vector.load %arg7[%c0_16, %c0_17, %c0_18] : memref<1x1x32xf32, #tpu.memory_space<vmem>>, vector<1x1x32xf32>
      %23 = vector.shape_cast %22 : vector<1x1x32xf32> to vector<1x32xf32>
      %24 = vector.shape_cast %21 : vector<1x32xf32> to vector<1x1x32xf32>
      tpu.vector_store %arg7[%c0_16, %c0_17, %c0_18], %24 {strides = array<i32>} : memref<1x1x32xf32, #tpu.memory_space<vmem>>, vector<1x1x32xf32>,
      %25 = arith.mulf %19, %19 : vector<16x32xf32>
      %cst_19 = arith.constant dense<0.000000e+00> : vector<32xf32>
      %26 = vector.multi_reduction <add>, %25, %cst_19 [0] : vector<16x32xf32> to vector<32xf32>
      %27 = vector.shape_cast %26 : vector<32xf32> to vector<1x32xf32>
      %c0_20 = arith.constant 0 : index
      %c0_21 = arith.constant 0 : index
      %c0_22 = arith.constant 0 : index
      %28 = vector.load %arg8[%c0_20, %c0_21, %c0_22] : memref<1x1x32xf32, #tpu.memory_space<vmem>>, vector<1x1x32xf32>
      %29 = vector.shape_cast %28 : vector<1x1x32xf32> to vector<1x32xf32>
      %30 = vector.shape_cast %27 : vector<1x32xf32> to vector<1x1x32xf32>
      tpu.vector_store %arg8[%c0_20, %c0_21, %c0_22], %30 {strides = array<i32>} : memref<1x1x32xf32, #tpu.memory_space<vmem>>, vector<1x1x32xf32>,
      %31 = arith.truncf %19 : vector<16x32xf32> to vector<16x32xbf16>
      %c0_23 = arith.constant 0 : index
      %c0_24 = arith.constant 0 : index
      %32 = vector.load %arg6[%c0_23, %c0_24] : memref<16x32xbf16, #tpu.memory_space<vmem>>, vector<16x32xbf16>
      tpu.vector_store %arg6[%c0_23, %c0_24], %31 {strides = array<i32>} : memref<16x32xbf16, #tpu.memory_space<vmem>>, vector<16x32xbf16>,
    } else {
    }
    return
  }
  func.func @transform_0(%arg0: i32, %arg1: i32, %arg2: i32) -> (i32, i32) {
    %c0_i32 = arith.constant 0 : i32
    return %arg0, %arg2 : i32, i32
  }
  func.func @transform_1(%arg0: i32, %arg1: i32, %arg2: i32) -> (i32, i32) {
    %c0_i32 = arith.constant 0 : i32
    return %arg2, %arg1 : i32, i32
  }
  func.func @transform_2(%arg0: i32, %arg1: i32, %arg2: i32) -> (i32, i32) {
    %c0_i32 = arith.constant 0 : i32
    %c0_i32_0 = arith.constant 0 : i32
    return %c0_i32, %arg1 : i32, i32
  }
  func.func @transform_3(%arg0: i32, %arg1: i32, %arg2: i32) -> (i32, i32) {
    %c0_i32 = arith.constant 0 : i32
    return %arg0, %arg1 : i32, i32
  }
  func.func @transform_4(%arg0: i32, %arg1: i32, %arg2: i32) -> (i32, i32, i32) {
    %c0_i32 = arith.constant 0 : i32
    %c0_i32_0 = arith.constant 0 : i32
    return %arg0, %c0_i32, %arg1 : i32, i32, i32
  }
  func.func @transform_5(%arg0: i32, %arg1: i32, %arg2: i32) -> (i32, i32, i32) {
    %c0_i32 = arith.constant 0 : i32
    %c0_i32_0 = arith.constant 0 : i32
    return %arg0, %c0_i32, %arg1 : i32, i32, i32
  }
}

module attributes {stable_mosaic.version = 11 : i64} {
  func.func @_matmul_stats_kernel(%arg0: i32, %arg1: i32, %arg2: i32, %arg3: memref<64x144xbf16, #tpu.memory_space<vmem>>, %arg4: memref<144x16xbf16, #tpu.memory_space<vmem>>, %arg5: memref<1x16xf32, #tpu.memory_space<vmem>>, %arg6: memref<64x16xbf16, #tpu.memory_space<vmem>>, %arg7: memref<1x1x16xf32, #tpu.memory_space<vmem>>, %arg8: memref<1x1x16xf32, #tpu.memory_space<vmem>>, %arg9: memref<64x16xf32, #tpu.memory_space<vmem>>) attributes {dimension_semantics = [#tpu.dimension_semantics<parallel>, #tpu.dimension_semantics<parallel>, #tpu.dimension_semantics<arbitrary>], iteration_bounds = array<i64: 2, 1, 1>, scalar_prefetch = 0 : i64, scratch_operands = 1 : i64, tpu.core_type = #tpu.core_type<tc>, window_params = [{transform_indices = @transform_0, window_bounds = array<i64: 64, 144>}, {transform_indices = @transform_1, window_bounds = array<i64: 144, 16>}, {transform_indices = @transform_2, window_bounds = array<i64: 1, 16>}, {transform_indices = @transform_3, window_bounds = array<i64: 64, 16>}, {transform_indices = @transform_4, window_bounds = array<i64: 1, 1, 16>}, {transform_indices = @transform_5, window_bounds = array<i64: 1, 1, 16>}]} {
    %c0_i32 = arith.constant 0 : i32
    %0 = arith.cmpi eq, %arg2, %c0_i32 : i32
    %1 = arith.extui %0 : i1 to i32
    %c0_i32_0 = arith.constant 0 : i32
    %2 = arith.cmpi ne, %1, %c0_i32_0 : i32
    scf.if %2 {
      %cst_11 = arith.constant 0.000000e+00 : f32
      %16 = vector.broadcast %cst_11 : f32 to vector<64x16xf32>
      %c0_12 = arith.constant 0 : index
      %c0_13 = arith.constant 0 : index
      %17 = vector.load %arg9[%c0_12, %c0_13] : memref<64x16xf32, #tpu.memory_space<vmem>>, vector<64x16xf32>
      tpu.vector_store %arg9[%c0_12, %c0_13], %16 {strides = array<i32>} : memref<64x16xf32, #tpu.memory_space<vmem>>, vector<64x16xf32>,
    } else {
    }
    %c0 = arith.constant 0 : index
    %c0_1 = arith.constant 0 : index
    %3 = vector.load %arg3[%c0, %c0_1] : memref<64x144xbf16, #tpu.memory_space<vmem>>, vector<64x144xbf16>
    %4 = arith.extf %3 : vector<64x144xbf16> to vector<64x144xf32>
    %cst = arith.constant 0.000000e+00 : f32
    %5 = vector.broadcast %cst : f32 to vector<64x144xf32>
    %6 = arith.maximumf %4, %5 : vector<64x144xf32>
    %c0_2 = arith.constant 0 : index
    %c0_3 = arith.constant 0 : index
    %7 = vector.load %arg9[%c0_2, %c0_3] : memref<64x16xf32, #tpu.memory_space<vmem>>, vector<64x16xf32>
    %8 = arith.truncf %6 : vector<64x144xf32> to vector<64x144xbf16>
    %c0_4 = arith.constant 0 : index
    %c0_5 = arith.constant 0 : index
    %9 = vector.load %arg4[%c0_4, %c0_5] : memref<144x16xbf16, #tpu.memory_space<vmem>>, vector<144x16xbf16>
    %cst_6 = arith.constant dense<0.000000e+00> : vector<64x16xf32>
    %10 = tpu.matmul %8, %9, %cst_6 {dimension_numbers = #tpu.dot_dimension_numbers<[1], [0], [0], [1], [0, 0, 1, 1], [], []>} : vector<64x144xbf16>, vector<144x16xbf16>, vector<64x16xf32> -> vector<64x16xf32>
    %11 = arith.addf %7, %10 : vector<64x16xf32>
    %c0_7 = arith.constant 0 : index
    %c0_8 = arith.constant 0 : index
    %12 = vector.load %arg9[%c0_7, %c0_8] : memref<64x16xf32, #tpu.memory_space<vmem>>, vector<64x16xf32>
    tpu.vector_store %arg9[%c0_7, %c0_8], %11 {strides = array<i32>} : memref<64x16xf32, #tpu.memory_space<vmem>>, vector<64x16xf32>,
    %c0_i32_9 = arith.constant 0 : i32
    %13 = arith.cmpi eq, %arg2, %c0_i32_9 : i32
    %14 = arith.extui %13 : i1 to i32
    %c0_i32_10 = arith.constant 0 : i32
    %15 = arith.cmpi ne, %14, %c0_i32_10 : i32
    scf.if %15 {
      %c0_11 = arith.constant 0 : index
      %c0_12 = arith.constant 0 : index
      %16 = vector.load %arg9[%c0_11, %c0_12] : memref<64x16xf32, #tpu.memory_space<vmem>>, vector<64x16xf32>
      %c0_13 = arith.constant 0 : index
      %c0_14 = arith.constant 0 : index
      %17 = vector.load %arg5[%c0_13, %c0_14] : memref<1x16xf32, #tpu.memory_space<vmem>>, vector<1x16xf32>
      %18 = vector.broadcast %17 : vector<1x16xf32> to vector<64x16xf32>
      %19 = arith.addf %16, %18 : vector<64x16xf32>
      %cst_15 = arith.constant dense<0.000000e+00> : vector<16xf32>
      %20 = vector.multi_reduction <add>, %19, %cst_15 [0] : vector<64x16xf32> to vector<16xf32>
      %21 = vector.shape_cast %20 : vector<16xf32> to vector<1x16xf32>
      %c0_16 = arith.constant 0 : index
      %c0_17 = arith.constant 0 : index
      %c0_18 = arith.constant 0 : index
      %22 = vector.load %arg7[%c0_16, %c0_17, %c0_18] : memref<1x1x16xf32, #tpu.memory_space<vmem>>, vector<1x1x16xf32>
      %23 = vector.shape_cast %22 : vector<1x1x16xf32> to vector<1x16xf32>
      %24 = vector.shape_cast %21 : vector<1x16xf32> to vector<1x1x16xf32>
      tpu.vector_store %arg7[%c0_16, %c0_17, %c0_18], %24 {strides = array<i32>} : memref<1x1x16xf32, #tpu.memory_space<vmem>>, vector<1x1x16xf32>,
      %25 = arith.mulf %19, %19 : vector<64x16xf32>
      %cst_19 = arith.constant dense<0.000000e+00> : vector<16xf32>
      %26 = vector.multi_reduction <add>, %25, %cst_19 [0] : vector<64x16xf32> to vector<16xf32>
      %27 = vector.shape_cast %26 : vector<16xf32> to vector<1x16xf32>
      %c0_20 = arith.constant 0 : index
      %c0_21 = arith.constant 0 : index
      %c0_22 = arith.constant 0 : index
      %28 = vector.load %arg8[%c0_20, %c0_21, %c0_22] : memref<1x1x16xf32, #tpu.memory_space<vmem>>, vector<1x1x16xf32>
      %29 = vector.shape_cast %28 : vector<1x1x16xf32> to vector<1x16xf32>
      %30 = vector.shape_cast %27 : vector<1x16xf32> to vector<1x1x16xf32>
      tpu.vector_store %arg8[%c0_20, %c0_21, %c0_22], %30 {strides = array<i32>} : memref<1x1x16xf32, #tpu.memory_space<vmem>>, vector<1x1x16xf32>,
      %31 = arith.truncf %19 : vector<64x16xf32> to vector<64x16xbf16>
      %c0_23 = arith.constant 0 : index
      %c0_24 = arith.constant 0 : index
      %32 = vector.load %arg6[%c0_23, %c0_24] : memref<64x16xbf16, #tpu.memory_space<vmem>>, vector<64x16xbf16>
      tpu.vector_store %arg6[%c0_23, %c0_24], %31 {strides = array<i32>} : memref<64x16xbf16, #tpu.memory_space<vmem>>, vector<64x16xbf16>,
    } else {
    }
    return
  }
  func.func @transform_0(%arg0: i32, %arg1: i32, %arg2: i32) -> (i32, i32) {
    %c0_i32 = arith.constant 0 : i32
    return %arg0, %arg2 : i32, i32
  }
  func.func @transform_1(%arg0: i32, %arg1: i32, %arg2: i32) -> (i32, i32) {
    %c0_i32 = arith.constant 0 : i32
    return %arg2, %arg1 : i32, i32
  }
  func.func @transform_2(%arg0: i32, %arg1: i32, %arg2: i32) -> (i32, i32) {
    %c0_i32 = arith.constant 0 : i32
    %c0_i32_0 = arith.constant 0 : i32
    return %c0_i32, %arg1 : i32, i32
  }
  func.func @transform_3(%arg0: i32, %arg1: i32, %arg2: i32) -> (i32, i32) {
    %c0_i32 = arith.constant 0 : i32
    return %arg0, %arg1 : i32, i32
  }
  func.func @transform_4(%arg0: i32, %arg1: i32, %arg2: i32) -> (i32, i32, i32) {
    %c0_i32 = arith.constant 0 : i32
    %c0_i32_0 = arith.constant 0 : i32
    return %arg0, %c0_i32, %arg1 : i32, i32, i32
  }
  func.func @transform_5(%arg0: i32, %arg1: i32, %arg2: i32) -> (i32, i32, i32) {
    %c0_i32 = arith.constant 0 : i32
    %c0_i32_0 = arith.constant 0 : i32
    return %arg0, %c0_i32, %arg1 : i32, i32, i32
  }
}

module attributes {stable_mosaic.version = 11 : i64} {
  func.func @_scale_shift_kernel(%arg0: i32, %arg1: memref<16x128xbf16, #tpu.memory_space<vmem>>, %arg2: memref<1x128xf32, #tpu.memory_space<vmem>>, %arg3: memref<1x128xf32, #tpu.memory_space<vmem>>, %arg4: memref<16x128xbf16, #tpu.memory_space<vmem>>) attributes {dimension_semantics = [#tpu.dimension_semantics<parallel>], iteration_bounds = array<i64: 1>, scalar_prefetch = 0 : i64, scratch_operands = 0 : i64, tpu.core_type = #tpu.core_type<tc>, window_params = [{transform_indices = @transform_0, window_bounds = array<i64: 16, 128>}, {pipeline_mode = #tpu.pipeline_mode<synchronous>, transform_indices = @transform_1, window_bounds = array<i64: 1, 128>}, {pipeline_mode = #tpu.pipeline_mode<synchronous>, transform_indices = @transform_2, window_bounds = array<i64: 1, 128>}, {transform_indices = @transform_3, window_bounds = array<i64: 16, 128>}]} {
    %c0 = arith.constant 0 : index
    %c0_0 = arith.constant 0 : index
    %0 = vector.load %arg1[%c0, %c0_0] : memref<16x128xbf16, #tpu.memory_space<vmem>>, vector<16x128xbf16>
    %1 = arith.extf %0 : vector<16x128xbf16> to vector<16x128xf32>
    %c0_1 = arith.constant 0 : index
    %c0_2 = arith.constant 0 : index
    %2 = vector.load %arg2[%c0_1, %c0_2] : memref<1x128xf32, #tpu.memory_space<vmem>>, vector<1x128xf32>
    %3 = vector.broadcast %2 : vector<1x128xf32> to vector<16x128xf32>
    %4 = arith.mulf %1, %3 : vector<16x128xf32>
    %c0_3 = arith.constant 0 : index
    %c0_4 = arith.constant 0 : index
    %5 = vector.load %arg3[%c0_3, %c0_4] : memref<1x128xf32, #tpu.memory_space<vmem>>, vector<1x128xf32>
    %6 = vector.broadcast %5 : vector<1x128xf32> to vector<16x128xf32>
    %7 = arith.addf %4, %6 : vector<16x128xf32>
    %8 = arith.truncf %7 : vector<16x128xf32> to vector<16x128xbf16>
    %c0_5 = arith.constant 0 : index
    %c0_6 = arith.constant 0 : index
    %9 = vector.load %arg4[%c0_5, %c0_6] : memref<16x128xbf16, #tpu.memory_space<vmem>>, vector<16x128xbf16>
    tpu.vector_store %arg4[%c0_5, %c0_6], %8 {strides = array<i32>} : memref<16x128xbf16, #tpu.memory_space<vmem>>, vector<16x128xbf16>,
    return
  }
  func.func @transform_0(%arg0: i32) -> (i32, i32) {
    %c0_i32 = arith.constant 0 : i32
    %c0_i32_0 = arith.constant 0 : i32
    return %arg0, %c0_i32 : i32, i32
  }
  func.func @transform_1(%arg0: i32) -> (i32, i32) {
    %c0_i32 = arith.constant 0 : i32
    %c0_i32_0 = arith.constant 0 : i32
    %c0_i32_1 = arith.constant 0 : i32
    return %c0_i32, %c0_i32_0 : i32, i32
  }
  func.func @transform_2(%arg0: i32) -> (i32, i32) {
    %c0_i32 = arith.constant 0 : i32
    %c0_i32_0 = arith.constant 0 : i32
    %c0_i32_1 = arith.constant 0 : i32
    return %c0_i32, %c0_i32_0 : i32, i32
  }
  func.func @transform_3(%arg0: i32) -> (i32, i32) {
    %c0_i32 = arith.constant 0 : i32
    %c0_i32_0 = arith.constant 0 : i32
    return %arg0, %c0_i32 : i32, i32
  }
}

module attributes {stable_mosaic.version = 11 : i64} {
  func.func @_matmul_stats_kernel(%arg0: i32, %arg1: i32, %arg2: i32, %arg3: memref<256x72xbf16, #tpu.memory_space<vmem>>, %arg4: memref<72x16xbf16, #tpu.memory_space<vmem>>, %arg5: memref<1x16xf32, #tpu.memory_space<vmem>>, %arg6: memref<256x16xf32, #tpu.memory_space<vmem>>, %arg7: memref<1x1x16xf32, #tpu.memory_space<vmem>>, %arg8: memref<1x1x16xf32, #tpu.memory_space<vmem>>, %arg9: memref<256x16xf32, #tpu.memory_space<vmem>>) attributes {dimension_semantics = [#tpu.dimension_semantics<parallel>, #tpu.dimension_semantics<parallel>, #tpu.dimension_semantics<arbitrary>], iteration_bounds = array<i64: 2, 1, 1>, scalar_prefetch = 0 : i64, scratch_operands = 1 : i64, tpu.core_type = #tpu.core_type<tc>, window_params = [{transform_indices = @transform_0, window_bounds = array<i64: 256, 72>}, {transform_indices = @transform_1, window_bounds = array<i64: 72, 16>}, {transform_indices = @transform_2, window_bounds = array<i64: 1, 16>}, {transform_indices = @transform_3, window_bounds = array<i64: 256, 16>}, {transform_indices = @transform_4, window_bounds = array<i64: 1, 1, 16>}, {transform_indices = @transform_5, window_bounds = array<i64: 1, 1, 16>}]} {
    %c0_i32 = arith.constant 0 : i32
    %0 = arith.cmpi eq, %arg2, %c0_i32 : i32
    %1 = arith.extui %0 : i1 to i32
    %c0_i32_0 = arith.constant 0 : i32
    %2 = arith.cmpi ne, %1, %c0_i32_0 : i32
    scf.if %2 {
      %cst_11 = arith.constant 0.000000e+00 : f32
      %16 = vector.broadcast %cst_11 : f32 to vector<256x16xf32>
      %c0_12 = arith.constant 0 : index
      %c0_13 = arith.constant 0 : index
      %17 = vector.load %arg9[%c0_12, %c0_13] : memref<256x16xf32, #tpu.memory_space<vmem>>, vector<256x16xf32>
      tpu.vector_store %arg9[%c0_12, %c0_13], %16 {strides = array<i32>} : memref<256x16xf32, #tpu.memory_space<vmem>>, vector<256x16xf32>,
    } else {
    }
    %c0 = arith.constant 0 : index
    %c0_1 = arith.constant 0 : index
    %3 = vector.load %arg3[%c0, %c0_1] : memref<256x72xbf16, #tpu.memory_space<vmem>>, vector<256x72xbf16>
    %4 = arith.extf %3 : vector<256x72xbf16> to vector<256x72xf32>
    %cst = arith.constant 0.000000e+00 : f32
    %5 = vector.broadcast %cst : f32 to vector<256x72xf32>
    %6 = arith.maximumf %4, %5 : vector<256x72xf32>
    %c0_2 = arith.constant 0 : index
    %c0_3 = arith.constant 0 : index
    %7 = vector.load %arg9[%c0_2, %c0_3] : memref<256x16xf32, #tpu.memory_space<vmem>>, vector<256x16xf32>
    %8 = arith.truncf %6 : vector<256x72xf32> to vector<256x72xbf16>
    %c0_4 = arith.constant 0 : index
    %c0_5 = arith.constant 0 : index
    %9 = vector.load %arg4[%c0_4, %c0_5] : memref<72x16xbf16, #tpu.memory_space<vmem>>, vector<72x16xbf16>
    %cst_6 = arith.constant dense<0.000000e+00> : vector<256x16xf32>
    %10 = tpu.matmul %8, %9, %cst_6 {dimension_numbers = #tpu.dot_dimension_numbers<[1], [0], [0], [1], [0, 0, 1, 1], [], []>} : vector<256x72xbf16>, vector<72x16xbf16>, vector<256x16xf32> -> vector<256x16xf32>
    %11 = arith.addf %7, %10 : vector<256x16xf32>
    %c0_7 = arith.constant 0 : index
    %c0_8 = arith.constant 0 : index
    %12 = vector.load %arg9[%c0_7, %c0_8] : memref<256x16xf32, #tpu.memory_space<vmem>>, vector<256x16xf32>
    tpu.vector_store %arg9[%c0_7, %c0_8], %11 {strides = array<i32>} : memref<256x16xf32, #tpu.memory_space<vmem>>, vector<256x16xf32>,
    %c0_i32_9 = arith.constant 0 : i32
    %13 = arith.cmpi eq, %arg2, %c0_i32_9 : i32
    %14 = arith.extui %13 : i1 to i32
    %c0_i32_10 = arith.constant 0 : i32
    %15 = arith.cmpi ne, %14, %c0_i32_10 : i32
    scf.if %15 {
      %c0_11 = arith.constant 0 : index
      %c0_12 = arith.constant 0 : index
      %16 = vector.load %arg9[%c0_11, %c0_12] : memref<256x16xf32, #tpu.memory_space<vmem>>, vector<256x16xf32>
      %c0_13 = arith.constant 0 : index
      %c0_14 = arith.constant 0 : index
      %17 = vector.load %arg5[%c0_13, %c0_14] : memref<1x16xf32, #tpu.memory_space<vmem>>, vector<1x16xf32>
      %18 = vector.broadcast %17 : vector<1x16xf32> to vector<256x16xf32>
      %19 = arith.addf %16, %18 : vector<256x16xf32>
      %cst_15 = arith.constant dense<0.000000e+00> : vector<16xf32>
      %20 = vector.multi_reduction <add>, %19, %cst_15 [0] : vector<256x16xf32> to vector<16xf32>
      %21 = vector.shape_cast %20 : vector<16xf32> to vector<1x16xf32>
      %c0_16 = arith.constant 0 : index
      %c0_17 = arith.constant 0 : index
      %c0_18 = arith.constant 0 : index
      %22 = vector.load %arg7[%c0_16, %c0_17, %c0_18] : memref<1x1x16xf32, #tpu.memory_space<vmem>>, vector<1x1x16xf32>
      %23 = vector.shape_cast %22 : vector<1x1x16xf32> to vector<1x16xf32>
      %24 = vector.shape_cast %21 : vector<1x16xf32> to vector<1x1x16xf32>
      tpu.vector_store %arg7[%c0_16, %c0_17, %c0_18], %24 {strides = array<i32>} : memref<1x1x16xf32, #tpu.memory_space<vmem>>, vector<1x1x16xf32>,
      %25 = arith.mulf %19, %19 : vector<256x16xf32>
      %cst_19 = arith.constant dense<0.000000e+00> : vector<16xf32>
      %26 = vector.multi_reduction <add>, %25, %cst_19 [0] : vector<256x16xf32> to vector<16xf32>
      %27 = vector.shape_cast %26 : vector<16xf32> to vector<1x16xf32>
      %c0_20 = arith.constant 0 : index
      %c0_21 = arith.constant 0 : index
      %c0_22 = arith.constant 0 : index
      %28 = vector.load %arg8[%c0_20, %c0_21, %c0_22] : memref<1x1x16xf32, #tpu.memory_space<vmem>>, vector<1x1x16xf32>
      %29 = vector.shape_cast %28 : vector<1x1x16xf32> to vector<1x16xf32>
      %30 = vector.shape_cast %27 : vector<1x16xf32> to vector<1x1x16xf32>
      tpu.vector_store %arg8[%c0_20, %c0_21, %c0_22], %30 {strides = array<i32>} : memref<1x1x16xf32, #tpu.memory_space<vmem>>, vector<1x1x16xf32>,
      %cst_23 = arith.constant 0.000000e+00 : f32
      %31 = vector.broadcast %cst_23 : f32 to vector<256x16xf32>
      %32 = arith.subf %31, %19 : vector<256x16xf32>
      %33 = math.exp %32 : vector<256x16xf32>
      %cst_24 = arith.constant 1.000000e+00 : f32
      %34 = vector.broadcast %cst_24 : f32 to vector<256x16xf32>
      %35 = arith.addf %34, %33 : vector<256x16xf32>
      %cst_25 = arith.constant 1.000000e+00 : f32
      %36 = vector.broadcast %cst_25 : f32 to vector<256x16xf32>
      %37 = arith.divf %36, %35 : vector<256x16xf32>
      %c0_26 = arith.constant 0 : index
      %c0_27 = arith.constant 0 : index
      %38 = vector.load %arg6[%c0_26, %c0_27] : memref<256x16xf32, #tpu.memory_space<vmem>>, vector<256x16xf32>
      tpu.vector_store %arg6[%c0_26, %c0_27], %37 {strides = array<i32>} : memref<256x16xf32, #tpu.memory_space<vmem>>, vector<256x16xf32>,
    } else {
    }
    return
  }
  func.func @transform_0(%arg0: i32, %arg1: i32, %arg2: i32) -> (i32, i32) {
    %c0_i32 = arith.constant 0 : i32
    return %arg0, %arg2 : i32, i32
  }
  func.func @transform_1(%arg0: i32, %arg1: i32, %arg2: i32) -> (i32, i32) {
    %c0_i32 = arith.constant 0 : i32
    return %arg2, %arg1 : i32, i32
  }
  func.func @transform_2(%arg0: i32, %arg1: i32, %arg2: i32) -> (i32, i32) {
    %c0_i32 = arith.constant 0 : i32
    %c0_i32_0 = arith.constant 0 : i32
    return %c0_i32, %arg1 : i32, i32
  }
  func.func @transform_3(%arg0: i32, %arg1: i32, %arg2: i32) -> (i32, i32) {
    %c0_i32 = arith.constant 0 : i32
    return %arg0, %arg1 : i32, i32
  }
  func.func @transform_4(%arg0: i32, %arg1: i32, %arg2: i32) -> (i32, i32, i32) {
    %c0_i32 = arith.constant 0 : i32
    %c0_i32_0 = arith.constant 0 : i32
    return %arg0, %c0_i32, %arg1 : i32, i32, i32
  }
  func.func @transform_5(%arg0: i32, %arg1: i32, %arg2: i32) -> (i32, i32, i32) {
    %c0_i32 = arith.constant 0 : i32
    %c0_i32_0 = arith.constant 0 : i32
    return %arg0, %c0_i32, %arg1 : i32, i32, i32
  }
}

</mosaic_0001>

<bundles_post_ra>
// kernel: fwd.18
= control target key start
LH: loop header
LB: loop body
LE: loop exit
PB: predicated region body
PF: predicated region fallthrough
CT: control target
= control target key end

     0   :  { %11 = vsyncpa [#allocation4], 0  ;;  %s2765_s0 = inlined_call_operand.hbm [shape: bf16[512,64], index: 0, kind: input, shape index: {}]   ;;  %s2766_s1 = inlined_call_operand.hbm [shape: bf16[64,4], index: 1, kind: input, shape index: {}]   ;;  %s2767_s2 = inlined_call_operand.hbm [shape: f32[1,4], index: 2, kind: input, shape index: {}]   ;;  %s2768_s3 = inlined_call_operand.hbm [shape: bf16[512,4], index: 3, kind: output, shape index: {0}]   ;;  %s2769_s4 = inlined_call_operand.hbm [shape: f32[2,1,4], index: 4, kind: output, shape index: {1}]   ;;  %s2770_s5 = inlined_call_operand.hbm [shape: f32[2,1,4], index: 5, kind: output, shape index: {2}]  }
   0x1   :  { %13 = vsyncpa [#allocation4 + $0x1], 0 }
   0x2   :  { %14 = vsyncpa [#allocation7], 0 }
   0x3   :  { %15 = vsyncpa [#allocation5], 0 }
   0x4   :  { %17 = vsyncpa [#allocation5 + $0x1], 0 }
   0x5   :  { %18 = vsyncpa [#allocation11], 0 }
   0x6   :  { %20 = vsyncpa [#allocation11 + $0x1], 0  ;;  %s2036_s18 = smov 0   ;;  %s2038_s19 = smov 0  }
   0x7   :  { %s2040_s20 = smov 0   ;;  %s2042_s21 = smov 0  }
   0x8   :  { %s2044_s22 = smov 0   ;;  %s2046_s23 = smov 0  }
   0x9 LB: > { %s2067_s24 = sadd.s32 4294967295, %s1993_s23   ;;  %s2772_s25 = sadd.s32 4294967294, %s1993_s23   ;;  %s1993_s23 = sphi %s2046_s23, %s26_s23   ;;  %s1989_s22 = sphi %s2044_s22, %s2795_s22   ;;  %s1985_s21 = sphi %s2042_s21, %s2794_s21   ;;  %s1981_s20 = sphi %s2040_s20, %s2793_s20   ;;  %s1977_s19 = sphi %s2038_s19, %s2792_s19   ;;  %s1973_s18 = sphi %s2036_s18, %s2791_s18  }
   0xa   : > { %p67_p0 = scmp.ne.s32.totalorder %s1977_s19, %s1973_s18  ;;  %p2771_p1 = scmp.eq.s32.totalorder %s2067_s24, 0 }
   0xb   : > { %p153_p3 = scmp.eq.s32.totalorder %s2772_s25, 1  ;;  %p1453_p5 = scmp.ge.s32.totalorder %s1993_s23, 1 }
   0xc   : > { %p2078_p4 = por %p2771_p1, %p67_p0  ;;  %p216_p7 = scmp.lt.s32.totalorder %s1993_s23, 3 }
   0xd   : > { %p2083_p6 = por %p153_p3, %p67_p0  ;;  %s1995_s29 = smov [#allocation6]  }
   0xe   : > { %s2776_s26 = scalar_select %p2078_p4, 1, 0 }
   0xf   : > { %s2777_s27 = scalar_select %p2083_p6, 1, 0 }
  0x10   : > { %p2088_p8 = pnand %p1453_p5, %p216_p7  ;;  %s232_s30 = sshll.u32 %s1995_s29, 4  ;;  %s2092_s30 = int_to_ptr.vmem [resolvable:$true] %s232_s30 }
  0x11   : > { %s1996_s7 = smov [#allocation8]   ;;  %s1761_s11 = scalar_lea.hbm %s2766_s1, 512 }
  0x12   : > { %p1659_p9 = pneg %p2088_p8  ;;  %s248_s8 = sshll.u32 %s1996_s7, 4  ;;  %s2103_s8 = int_to_ptr.vmem [resolvable:$true] %s248_s8 }
  0x13   : > { %p1762_p12 = scmp.ne.s32.totalorder %s2766_s1, %s1761_s11  ;;  %p1768_p5 = scmp.lt.u32.totalorder %s1761_s11, %s2766_s1 }
  0x14   : > { %p2099_p11 = pnand %p1659_p9, %p2771_p1 }
  0x16   : > { %p1763_p13 = pneg %p2099_p11 }
  0x18   : > { %p1764_p0 = pnand %p1763_p13, %p1762_p12 }
  0x1a   : > { %p1765_p3 = pneg %p1764_p0 }
  0x1c   : > { %p1770_p7 = pnand %p1768_p5, %p1765_p3 }
  0x1e   : > { %1773 = shalt.err (!%p1770_p7)
}
  0x1f   : > { %s1774_s16 = scalar_lea.vmem %s2092_s30, 512  ;;  %p1782_p2 = scmp.lt.s32.totalorder %s2092_s30, %s2092_s30 }
  0x20   : > { %p1775_p9 = scmp.ne.s32.totalorder %s2092_s30, %s1774_s16  ;;  %p1783_p12 = scmp.lt.s32.totalorder %s1774_s16, %s1774_s16 }
  0x22   : > { %p1777_p10 = pnand %p1775_p9, %p1763_p13  ;;  %p1784_p0 = por %p1783_p12, %p1782_p2 }
  0x24   : > { %p1778_p1 = pneg %p1777_p10 }
  0x26   : > { %p1785_p6 = pnand %p1784_p0, %p1778_p1 }
  0x28   : > { %1788 = shalt.err (!%p1785_p6)
}
  0x29   : > { %s2773_s17 = smov 64   ;;  %s1998_s29 = smov 4  }
  0x2a   : > { %1662 = dma.hbm_to_vmem [thread:$0]  (!%p2099_p11), %s2766_s1, 512, %s2092_s30, [#allocation7], %s2773_s17, %s2773_s17, %s1998_s29  }
  0x2b   : > { %s1789_s12 = scalar_lea.hbm %s2767_s2, 16 }
  0x2c   : > { %p1790_p1 = scmp.ne.s32.totalorder %s2767_s2, %s1789_s12  ;;  %p1796_p10 = scmp.lt.u32.totalorder %s1789_s12, %s2767_s2 }
  0x2e   : > { %p1792_p2 = pnand %p1790_p1, %p1763_p13 }
  0x30   : > { %p1793_p6 = pneg %p1792_p2 }
  0x32   : > { %p1798_p3 = pnand %p1796_p10, %p1793_p6 }
  0x34   : > { %1801 = shalt.err (!%p1798_p3)
}
  0x35   : > { %s1802_s30 = scalar_lea.vmem %s2103_s8, 16  ;;  %s1809_s7 = scalar_lea.vmem %s2103_s8, 32 }
  0x36   : > { %p1803_p5 = scmp.ne.s32.totalorder %s2103_s8, %s1802_s30  ;;  %p1810_p12 = scmp.lt.s32.totalorder %s2103_s8, %s2103_s8 }
  0x37   : > { %p1811_p0 = scmp.lt.s32.totalorder %s1809_s7, %s1802_s30 }
  0x38   : > { %p1805_p7 = pnand %p1803_p5, %p1763_p13 }
  0x39   : > { %p1812_p1 = por %p1811_p0, %p1810_p12 }
  0x3a   : > { %p1806_p9 = pneg %p1805_p7 }
  0x3c   : > { %p1813_p2 = pnand %p1812_p1, %p1806_p9 }
  0x3e   : > { %1816 = shalt.err (!%p1813_p2)
}
  0x3f   : > { %1665 = dma.hbm_to_vmem [thread:$0]  (!%p2099_p11), %s2767_s2, 16, %s2103_s8, [#allocation7]  }
  0x40   : > { %s45_s11 = sadd.s32 1, %s1989_s22  ;;  %s54_s12 = sadd.s32 1, %s1981_s20 }
  0x41   : > { %p47_p13 = scmp.ge.s32.totalorder %s45_s11, 2  ;;  %p61_p6 = scmp.ne.s32.totalorder %s1981_s20, %s1977_s19 }
  0x42   : > { %p62_p10 = scmp.eq.s32.totalorder %s1993_s23, 0  ;;  %p1682_p3 = scmp.lt.s32.totalorder %s1993_s23, 2 }
  0x43   : > { %s2797_s11 = smov (%p47_p13, %s45_s11), 0  ;;  %p2780_p7 = scmp.eq.s32.totalorder %s2067_s24, 1 }
  0x44   : > { %p63_p5 = por %p62_p10, %p61_p6  ;;  %s49_s13 = ssub.s32 %s1989_s22, %s2797_s11 }
  0x45   : > { %p2171_p9 = por %p2780_p7, %p61_p6  ;;  %s259_s14 = sand.u32 1, %s1981_s20  }
  0x46   : > { %p52_p12 = scmp.eq.s32.totalorder %s49_s13, 0  ;;  %s1457_s8 = sshll.u32 %s259_s14, 7 }
  0x47   : > { %s2781_s6 = scalar_select %p2171_p9, 1, 0 }
  0x48   : > { %s1541_s15 = sshll.u32 %s1989_s22, 11  ;;  %s263_s10 = scalar_lea.vmem [#allocation3], %s1457_s8 }
  0x49   : > { %s2180_s16 = scalar_select %p52_p12, %s1981_s20, %s54_s12  }
  0x4a   : > { %s2185_s9 = scalar_lea.hbm %s2765_s0, %s1541_s15  ;;  %s271_s25 = sshll.u32 %s263_s10, 4  ;;  %s2193_s25 = int_to_ptr.vmem [resolvable:$true] %s271_s25 }
  0x4b   : > { %p2189_p11 = pnand %p1682_p3, %p63_p5  ;;  %s2195_s12 = scalar_lea.sflag [#allocation4], %s259_s14 }
  0x4c   : > { %s1817_s13 = scalar_lea.hbm %s2185_s9, 2048  ;;  %s1822_s30 = scalar_lea.hbm %s2765_s0, 4096 }
  0x4d   : > { %p1818_p0 = scmp.ne.s32.totalorder %s2185_s9, %s1817_s13  ;;  %p1819_p1 = pneg %p2189_p11 }
  0x4e   : > { %p1823_p6 = scmp.lt.u32.totalorder %s2185_s9, %s2765_s0  ;;  %p1824_p10 = scmp.lt.u32.totalorder %s1822_s30, %s1817_s13 }
  0x4f   : > { %p1820_p2 = pnand %p1819_p1, %p1818_p0  ;;  %p1826_p5 = scmp.lt.u32.totalorder %s1817_s13, %s2185_s9 }
  0x50   : > { %p1825_p3 = por %p1824_p10, %p1823_p6 }
  0x51   : > { %p1821_p13 = pneg %p1820_p2 }
  0x52   : > { %p1827_p7 = por %p1826_p5, %p1825_p3 }
  0x54   : > { %p1828_p12 = pnand %p1827_p7, %p1821_p13 }
  0x56   : > { %1831 = shalt.err (!%p1828_p12)
}
  0x57   : > { %s1832_s14 = scalar_lea.vmem %s2193_s25, 2048  ;;  %s1999_s8 = smov [#allocation3]  }
  0x58   : > { %p1833_p0 = scmp.ne.s32.totalorder %s2193_s25, %s1832_s14  ;;  %s1837_s15 = sshll.u32 %s1999_s8, 4  ;;  %s1838_s15 = int_to_ptr.vmem [resolvable:$false] %s1837_s15 }
  0x59   : > { %s1839_s7 = scalar_lea.vmem %s1838_s15, 4096  ;;  %p1840_p4 = scmp.lt.s32.totalorder %s2193_s25, %s1838_s15 }
  0x5a   : > { %p1835_p2 = pnand %p1833_p0, %p1819_p1  ;;  %p1841_p6 = scmp.lt.s32.totalorder %s1839_s7, %s1832_s14 }
  0x5c   : > { %p1836_p9 = pneg %p1835_p2  ;;  %p1842_p10 = por %p1841_p6, %p1840_p4 }
  0x5e   : > { %p1843_p3 = pnand %p1842_p10, %p1836_p9 }
  0x60   : > { %1846 = shalt.err (!%p1843_p3)
}
  0x61   : > { %s2783_s13 = smov 64   ;;  %283 = sbr.rel (%p2088_p8) target bundleno = 479 (0x1df), region = 32 }
  0x62   : > { %1669 = dma.hbm_to_vmem [thread:$0]  (!%p2189_p11), %s2185_s9, 2048, %s2193_s25, %s2195_s12, %s2783_s13, %s2783_s13, %s1998_s29  }
  0x63   : > { %s2229_s30 = sand.u32 (!%p2088_p8), 1, %s1977_s19   ;;  %p2784_p4 = scmp.ne.s32.totalorder (!%p2088_p8), %s2776_s26, 0 }
  0x64   : > { %s1461_s10 = sshll.u32 (!%p2088_p8), %s2229_s30, 7  ;;  %s286_s14 = scalar_lea.sflag (!%p2088_p8), [#allocation4], %s2229_s30 }
  0x65   : > { %s2235_s17 = scalar_lea.vmem (!%p2088_p8), [#allocation3], %s1461_s10 }
  0x68   : > { %1956 = dma.done.wait (%p2784_p4), %s286_s14, 2048  }
  0x69   : > { %1958 = vsyncadd (%p2784_p4), %s286_s14, 4294965248  ;;  %p2785_p9 = scmp.eq.s32.totalorder %s2067_s24, 0 }
  0x6b   : > { %1960 = dma.done.wait (%p2785_p9), [#allocation7], 528   ;;  %p2786_p8 = pmov %p2785_p9 }
  0x6c   : > { %vm340_vm0 = vcmask 31744   ;;  %v2000_v0 = vmov 0.0   ;;  %v1741_v1 = vld [vmem:[#allocation6] sm:$0xff]   ;;  %v1742_v2 = vld [vmem:[#allocation6 + $0x8] sm:$0xff]   ;;  %v1743_v3 = vld [vmem:[#allocation6 + $0x10] sm:$0xff]   ;;  %vm549_vm1 = vcmask 523264  }
  0x6d   : > { %1962 = vsyncadd (%p2786_p8), [#allocation7], 4294966768  ;;  %343 = vst.msk [vmem:[#allocation2 + $0x10] sm:$0xff] %vm340_vm0, %v2000_v0  ;;  %1595 = vmatprep.subr.bf16.mxu0 %v1741_v1  ;;  %1635 = vmatprep.subr.bf16.mxu1 %v1741_v1  ;;  %v1745_v4 = vld [vmem:[%s2235_s17] sm:$0xff]   ;;  %v1744_v5 = vld [vmem:[#allocation6 + $0x18] sm:$0xff]   ;;  %vm1199_vm2 = vcmask 27648  }
  0x6e   : > { %341 = vst.msk [vmem:[#allocation2] sm:$0xff] %vm340_vm0, %v2000_v0  ;;  %342 = vst.msk [vmem:[#allocation2 + $0x8] sm:$0xff] %vm340_vm0, %v2000_v0  ;;  %1596 = vmatpush3.bf16.msra.mxu0 %v1741_v1  ;;  %1639 = vmatpush3.bf16.msra.mxu1 %v1741_v1  ;;  %v1746_v6 = vld [vmem:[%s2235_s17 + $0x8] sm:$0xff]   ;;  %v1753_v7 = vld [vmem:[%s2235_s17 + $0x40] sm:$0xff]   ;;  %s2336_s25 = scalar_lea.vmem [#allocation9], %s1461_s10  ;;  %s1574_s26 = sshll.u32 %s1985_s21, 11 }
  0x6f   : > { %344 = vst.msk [vmem:[#allocation2 + $0x18] sm:$0xff] %vm340_vm0, %v2000_v0  ;;  %345 = vst.msk [vmem:[#allocation2 + $0x20] sm:$0xff] %vm340_vm0, %v2000_v0  ;;  %1597 = vmatprep.subr.bf16.mxu0 %v1742_v2  ;;  %1636 = vmatprep.subr.bf16.mxu1 %v1742_v2  ;;  %v1747_v8 = vld [vmem:[%s2235_s17 + $0x10] sm:$0xff]   ;;  %v1754_v9 = vld [vmem:[%s2235_s17 + $0x48] sm:$0xff]   ;;  %s1255_s28 = sshll.u32 %s2336_s25, 4  ;;  %s2581_s12 = scalar_lea.hbm %s2768_s3, %s1574_s26  ;;  %s2583_s28 = int_to_ptr.vmem [resolvable:$true] %s1255_s28 }
  0x70   : > { %346 = vst.msk [vmem:[#allocation2 + $0x28] sm:$0xff] %vm340_vm0, %v2000_v0  ;;  %347 = vst.msk [vmem:[#allocation2 + $0x30] sm:$0xff] %vm340_vm0, %v2000_v0  ;;  %1603 = vmatprep.mubr.msk.bf16.mxu0 %vm549_vm1, %v1745_v4  ;;  %1619 = vmatprep.mubr.msk.bf16.mxu1 %vm549_vm1, %v1753_v7  ;;  %v1755_v10 = vld [vmem:[%s2235_s17 + $0x50] sm:$0xff]   ;;  %v1748_v11 = vld [vmem:[%s2235_s17 + $0x18] sm:$0xff]   ;;  %s1233_s8 = scalar_lea.sflag [#allocation5], %s2229_s30  ;;  %s1847_s15 = scalar_lea.vmem %s2583_s28, 2048 }
  0x71   : > { %348 = vst.msk [vmem:[#allocation2 + $0x38] sm:$0xff] %vm340_vm0, %v2000_v0  ;;  %349 = vst.msk [vmem:[#allocation2 + $0x40] sm:$0xff] %vm340_vm0, %v2000_v0  ;;  %v1756_v12 = vld [vmem:[%s2235_s17 + $0x58] sm:$0xff]   ;;  %v1749_v13 = vld [vmem:[%s2235_s17 + $0x20] sm:$0xff]   ;;  %p1848_p11 = scmp.ne.s32.totalorder %s2583_s28, %s1847_s15  ;;  %p2787_p1 = scmp.ne.s32.totalorder %s2781_s6, 0 }
  0x72   : > { %350 = vst.msk [vmem:[#allocation2 + $0x48] sm:$0xff] %vm340_vm0, %v2000_v0  ;;  %351 = vst.msk [vmem:[#allocation2 + $0x50] sm:$0xff] %vm340_vm0, %v2000_v0  ;;  %1598 = vmatpush3.bf16.msra.mxu0 %v1742_v2  ;;  %1640 = vmatpush3.bf16.msra.mxu1 %v1742_v2  ;;  %v1757_v14 = vld [vmem:[%s2235_s17 + $0x60] sm:$0xff]   ;;  %v1750_v15 = vld [vmem:[%s2235_s17 + $0x28] sm:$0xff]   ;;  %s2001_s7 = smov [#allocation9]  }
  0x73   : > { %352 = vst.msk [vmem:[#allocation2 + $0x58] sm:$0xff] %vm340_vm0, %v2000_v0  ;;  %353 = vst.msk [vmem:[#allocation2 + $0x60] sm:$0xff] %vm340_vm0, %v2000_v0  ;;  %1599 = vmatprep.subr.bf16.mxu0 %v1743_v3  ;;  %1637 = vmatprep.subr.bf16.mxu1 %v1743_v3  ;;  %v1758_v16 = vld [vmem:[%s2235_s17 + $0x68] sm:$0xff]   ;;  %v1751_v17 = vld [vmem:[%s2235_s17 + $0x30] sm:$0xff]   ;;  %p1849_p13 = pnand %p1848_p11, %p2787_p1  ;;  %s1851_s13 = sshll.u32 %s2001_s7, 4  ;;  %s1852_s13 = int_to_ptr.vmem [resolvable:$false] %s1851_s13 }
  0x74   : > { %354 = vst.msk [vmem:[#allocation2 + $0x68] sm:$0xff] %vm340_vm0, %v2000_v0  ;;  %355 = vst.msk [vmem:[#allocation2 + $0x70] sm:$0xff] %vm340_vm0, %v2000_v0  ;;  %v1759_v18 = vld [vmem:[%s2235_s17 + $0x70] sm:$0xff]   ;;  %v1752_v19 = vld [vmem:[%s2235_s17 + $0x38] sm:$0xff]   ;;  %s1853_s10 = scalar_lea.vmem %s1852_s13, 4096  ;;  %p1854_p7 = scmp.lt.s32.totalorder %s2583_s28, %s1852_s13 }
  0x75   : > { %356 = vst.msk [vmem:[#allocation2 + $0x78] sm:$0xff] %vm340_vm0, %v2000_v0  ;;  %357 = vst.msk [vmem:[#allocation2 + $0x80] sm:$0xff] %vm340_vm0, %v2000_v0  ;;  %v1760_v20 = vld [vmem:[%s2235_s17 + $0x78] sm:$0xff]   ;;  %v407_v21 = vld [vmem:[#allocation2 + $0x10] sm:$0xff]  ;;  %p1850_p5 = pneg %p1849_p13  ;;  %p1855_p12 = scmp.lt.s32.totalorder %s1853_s10, %s1847_s15 }
  0x76   : > { %358 = vst.msk [vmem:[#allocation2 + $0x88] sm:$0xff] %vm340_vm0, %v2000_v0  ;;  %359 = vst.msk [vmem:[#allocation2 + $0x90] sm:$0xff] %vm340_vm0, %v2000_v0  ;;  %1600 = vmatpush3.bf16.msra.mxu0 %v1743_v3  ;;  %1641 = vmatpush3.bf16.msra.mxu1 %v1743_v3  ;;  %v405_v23 = vld [vmem:[#allocation2] sm:$0xff]  ;;  %v408_v26 = vld [vmem:[#allocation2 + $0x18] sm:$0xff] }
  0x77   : > { %360 = vst.msk [vmem:[#allocation2 + $0x98] sm:$0xff] %vm340_vm0, %v2000_v0  ;;  %361 = vst.msk [vmem:[#allocation2 + $0xa0] sm:$0xff] %vm340_vm0, %v2000_v0  ;;  %1601 = vmatprep.subr.bf16.mxu0 %v1744_v5  ;;  %1638 = vmatprep.subr.bf16.mxu1 %v1744_v5  ;;  %v406_v31 = vld [vmem:[#allocation2 + $0x8] sm:$0xff]  ;;  %v411_v45 = vld [vmem:[#allocation2 + $0x30] sm:$0xff]  ;;  %p1856_p0 = por %p1855_p12, %p1854_p7 }
  0x78   : > { %362 = vst.msk [vmem:[#allocation2 + $0xa8] sm:$0xff] %vm340_vm0, %v2000_v0  ;;  %363 = vst.msk [vmem:[#allocation2 + $0xb0] sm:$0xff] %vm340_vm0, %v2000_v0  ;;  %v409_v47 = vld [vmem:[#allocation2 + $0x20] sm:$0xff]  ;;  %v412_v51 = vld [vmem:[#allocation2 + $0x38] sm:$0xff] }
  0x79   : > { %364 = vst.msk [vmem:[#allocation2 + $0xb8] sm:$0xff] %vm340_vm0, %v2000_v0  ;;  %365 = vst.msk [vmem:[#allocation2 + $0xc0] sm:$0xff] %vm340_vm0, %v2000_v0  ;;  %v2317_v49 = vld [vmem:[#allocation8] ss:$0 sm:$0xff]  ;;  %v410_v56 = vld [vmem:[#allocation2 + $0x28] sm:$0xff]  ;;  %p1857_p2 = pnand %p1856_p0, %p1850_p5 }
  0x7a   : > { %366 = vst.msk [vmem:[#allocation2 + $0xc8] sm:$0xff] %vm340_vm0, %v2000_v0  ;;  %367 = vst.msk [vmem:[#allocation2 + $0xd0] sm:$0xff] %vm340_vm0, %v2000_v0  ;;  %1602 = vmatpush3.bf16.msra.mxu0 %v1744_v5  ;;  %1642 = vmatpush3.bf16.msra.mxu1 %v1744_v5 }
  0x7b   : > { %368 = vst.msk [vmem:[#allocation2 + $0xd8] sm:$0xff] %vm340_vm0, %v2000_v0  ;;  %369 = vst.msk [vmem:[#allocation2 + $0xe0] sm:$0xff] %vm340_vm0, %v2000_v0 }
  0x7c   : > { %370 = vst.msk [vmem:[#allocation2 + $0xe8] sm:$0xff] %vm340_vm0, %v2000_v0  ;;  %371 = vst.msk [vmem:[#allocation2 + $0xf0] sm:$0xff] %vm340_vm0, %v2000_v0  ;;  %v421_v24 = vld [vmem:[#allocation2 + $0x80] sm:$0xff] }
  0x7d   : > { %372 = vst.msk [vmem:[#allocation2 + $0xf8] sm:$0xff] %vm340_vm0, %v2000_v0  ;;  %1604 = vmatmul.mubr.msk.bf16.vlgmr.msra.gmra.mrb[0].mxu0 %vm549_vm1, %v1746_v6  ;;  %1620 = vmatmul.mubr.msk.bf16.vlgmr.msra.gmra.mrb[0].mxu1 %vm549_vm1, %v1754_v9  ;;  %v423_v22 = vld [vmem:[#allocation2 + $0x90] sm:$0xff]  ;;  %v422_v34 = vld [vmem:[#allocation2 + $0x88] sm:$0xff] }
  0x7e   : > { %1607 = vmatprep.mubr.msk.bf16.mxu0 %vm549_vm1, %v1747_v8  ;;  %1623 = vmatprep.mubr.msk.bf16.mxu1 %vm549_vm1, %v1755_v10  ;;  %v424_v28 = vld [vmem:[#allocation2 + $0x98] sm:$0xff]  ;;  %v425_v48 = vld [vmem:[#allocation2 + $0xa0] sm:$0xff] }
  0x7f   : > { %v427_v46 = vld [vmem:[#allocation2 + $0xb0] sm:$0xff]  ;;  %v426_v59 = vld [vmem:[#allocation2 + $0xa8] sm:$0xff] }
  0x80   : > { %v428_v53 = vld [vmem:[#allocation2 + $0xb8] sm:$0xff] }
  0x85   : > { %1608 = vmatmul.mubr.msk.bf16.gmra.mrb[4].mxu0 %vm549_vm1, %v1748_v11  ;;  %1624 = vmatmul.mubr.msk.bf16.gmra.mrb[4].mxu1 %vm549_vm1, %v1756_v12 }
  0x86   : > { %1611 = vmatprep.mubr.msk.bf16.mxu0 %vm549_vm1, %v1749_v13  ;;  %1627 = vmatprep.mubr.msk.bf16.mxu1 %vm549_vm1, %v1757_v14 }
  0x8d   : > { %1612 = vmatmul.mubr.msk.bf16.gmra.mrb[8].mxu0 %vm549_vm1, %v1750_v15  ;;  %1628 = vmatmul.mubr.msk.bf16.gmra.mrb[8].mxu1 %vm549_vm1, %v1758_v16 }
  0x8e   : > { %1615 = vmatprep.mubr.msk.bf16.mxu0 %vm549_vm1, %v1751_v17  ;;  %1631 = vmatprep.mubr.msk.bf16.mxu1 %vm549_vm1, %v1759_v18  ;;  %v415_v18 = vld [vmem:[#allocation2 + $0x50] sm:$0xff] }
  0x95   : > { %1616 = vmatmul.mubr.msk.bf16.gmra.mrb[12].mxu0 %vm549_vm1, %v1752_v19  ;;  %1632 = vmatmul.mubr.msk.bf16.gmra.mrb[12].mxu1 %vm549_vm1, %v1760_v20 }
 0x150   : > { %v1605_v25 = vpop.f32.mrb[0].mxu0  ;;  %v1621_v27 = vpop.f32.mrb[0].mxu1 }
 0x151   : > { %v761_v29 = vadd.f32 %v1605_v25, %v407_v21  ;;  %v632_v30 = vpop.f32.mrb[1].mxu0  ;;  %v777_v32 = vadd.f32 %v1621_v27, %v423_v22  ;;  %v696_v33 = vpop.f32.mrb[1].mxu1  ;;  %v413_v22 = vld [vmem:[#allocation2 + $0x40] sm:$0xff] }
 0x152   : > { %v759_v35 = vadd.f32 %v632_v30, %v405_v23  ;;  %v1606_v36 = vpop.f32.mrb[2].mxu0  ;;  %v775_v37 = vadd.f32 %v696_v33, %v421_v24  ;;  %v1622_v38 = vpop.f32.mrb[2].mxu1 }
 0x153   : > { %794 = vst.msk [vmem:[#allocation2 + $0x10] sm:$0xff] %vm340_vm0, %v761_v29  ;;  %v762_v39 = vadd.f32 %v1606_v36, %v408_v26  ;;  %v635_v40 = vpop.f32.mrb[3].mxu0  ;;  %810 = vst.msk [vmem:[#allocation2 + $0x90] sm:$0xff] %vm340_vm0, %v777_v32  ;;  %v778_v41 = vadd.f32 %v1622_v38, %v424_v28  ;;  %v699_v42 = vpop.f32.mrb[3].mxu1  ;;  %v416_v28 = vld [vmem:[#allocation2 + $0x58] sm:$0xff] }
 0x154   : > { %792 = vst.msk [vmem:[#allocation2] sm:$0xff] %vm340_vm0, %v759_v35  ;;  %v760_v43 = vadd.f32 %v635_v40, %v406_v31  ;;  %808 = vst.msk [vmem:[#allocation2 + $0x80] sm:$0xff] %vm340_vm0, %v775_v37  ;;  %v776_v44 = vadd.f32 %v699_v42, %v422_v34  ;;  %v414_v35 = vld [vmem:[#allocation2 + $0x48] sm:$0xff] }
 0x155   : > { %795 = vst.msk [vmem:[#allocation2 + $0x18] sm:$0xff] %vm340_vm0, %v762_v39  ;;  %811 = vst.msk [vmem:[#allocation2 + $0x98] sm:$0xff] %vm340_vm0, %v778_v41 }
 0x156   : > { %793 = vst.msk [vmem:[#allocation2 + $0x8] sm:$0xff] %vm340_vm0, %v760_v43  ;;  %809 = vst.msk [vmem:[#allocation2 + $0x88] sm:$0xff] %vm340_vm0, %v776_v44 }
 0x158   : > { %v1609_v50 = vpop.f32.mrb[4].mxu0  ;;  %v1625_v52 = vpop.f32.mrb[4].mxu1 }
 0x159   : > { %v765_v54 = vadd.f32 %v1609_v50, %v411_v45  ;;  %v648_v55 = vpop.f32.mrb[5].mxu0  ;;  %v781_v57 = vadd.f32 %v1625_v52, %v427_v46  ;;  %v712_v58 = vpop.f32.mrb[5].mxu1 }
 0x15a   : > { %v829_v60 = vld [vmem:[#allocation2 + $0x10] sm:$0xff]  ;;  %v763_v61 = vadd.f32 %v648_v55, %v409_v47  ;;  %v1610_v62 = vpop.f32.mrb[6].mxu0  ;;  %v779_v63 = vadd.f32 %v712_v58, %v425_v48  ;;  %v1626_v0 = vpop.f32.mrb[6].mxu1 }
 0x15b   : > { %v868_v1 = vadd.f32 %v2317_v49, %v829_v60  ;;  %v827_v2 = vld [vmem:[#allocation2] sm:$0xff]  ;;  %798 = vst.msk [vmem:[#allocation2 + $0x30] sm:$0xff] %vm340_vm0, %v765_v54  ;;  %v766_v3 = vadd.f32 %v1610_v62, %v412_v51  ;;  %v651_v4 = vpop.f32.mrb[7].mxu0  ;;  %v845_v5 = vld [vmem:[#allocation2 + $0x90] sm:$0xff]  ;;  %814 = vst.msk [vmem:[#allocation2 + $0xb0] sm:$0xff] %vm340_vm0, %v781_v57  ;;  %v782_v6 = vadd.f32 %v1626_v0, %v428_v53  ;;  %v715_v7 = vpop.f32.mrb[7].mxu1 }
 0x15c   : > { %v866_v8 = vadd.f32 %v2317_v49, %v827_v2  ;;  %v830_v9 = vld [vmem:[#allocation2 + $0x18] sm:$0xff]  ;;  %796 = vst.msk [vmem:[#allocation2 + $0x20] sm:$0xff] %vm340_vm0, %v763_v61  ;;  %v764_v10 = vadd.f32 %v651_v4, %v410_v56  ;;  %812 = vst.msk [vmem:[#allocation2 + $0xa0] sm:$0xff] %vm340_vm0, %v779_v63  ;;  %v780_v11 = vadd.f32 %v715_v7, %v426_v59  ;;  %v843_v36 = vld [vmem:[#allocation2 + $0x80] sm:$0xff] }
 0x15d   : > { %v1544_v12 = vpack.c.bf16 %v868_v1, %v868_v1  ;;  %v869_v13 = vadd.f32 %v2317_v49, %v830_v9  ;;  %v828_v14 = vld [vmem:[#allocation2 + $0x8] sm:$0xff]  ;;  %799 = vst.msk [vmem:[#allocation2 + $0x38] sm:$0xff] %vm340_vm0, %v766_v3  ;;  %815 = vst.msk [vmem:[#allocation2 + $0xb8] sm:$0xff] %vm340_vm0, %v782_v6  ;;  %v2331_v19 = vadd.f32 %v2317_v49, %v845_v5  ;;  %v901_v30 = vsel %vm340_vm0, %v868_v1, 0.0  ;;  %v419_v6 = vld [vmem:[#allocation2 + $0x70] sm:$0xff] }
 0x15e   : > { %v969_v15 = vmul.f32 %v866_v8, %v866_v8  ;;  %v1542_v16 = vpack.c.bf16 %v866_v8, %v866_v8  ;;  %v867_v17 = vadd.f32 %v2317_v49, %v828_v14  ;;  %797 = vst.msk [vmem:[#allocation2 + $0x28] sm:$0xff] %vm340_vm0, %v764_v10  ;;  %813 = vst.msk [vmem:[#allocation2 + $0xa8] sm:$0xff] %vm340_vm0, %v780_v11  ;;  %v898_v23 = vsel %vm340_vm0, %v866_v8, 0.0  ;;  %v417_v10 = vld [vmem:[#allocation2 + $0x60] sm:$0xff] }
 0x15f   : > { %v971_v20 = vmul.f32 %v868_v1, %v868_v1  ;;  %1202 = vst.msk [vmem:[%s2336_s25 + $0x8] sm:$0xf] %vm1199_vm2, %v1544_v12  ;;  %v1545_v21 = vpack.c.bf16 %v869_v13, %v869_v13  ;;  %v972_v31 = vmul.f32 %v869_v13, %v869_v13  ;;  %v1560_v43 = vpack.c.bf16 %v2331_v19, %v2331_v19 }
 0x160   : > { %1200 = vst.msk [vmem:[%s2336_s25] sm:$0xf] %vm1199_vm2, %v1542_v16  ;;  %v899_v24 = vsel %vm340_vm0, %v867_v17, 0.0  ;;  %v970_v25 = vmul.f32 %v867_v17, %v867_v17  ;;  %v1543_v26 = vpack.c.bf16 %v867_v17, %v867_v17  ;;  %v1613_v27 = vpop.f32.mrb[8].mxu0  ;;  %v2344_v29 = vpop.f32.mrb[8].mxu1  ;;  %v1001_v38 = vsel %vm340_vm0, %v969_v15, 0.0 }
 0x161   : > { %1203 = vst.msk [vmem:[%s2336_s25 + $0xc] sm:$0xf] %vm1199_vm2, %v1545_v21  ;;  %v900_v32 = vadd.f32 %v899_v24, %v898_v23  ;;  %v769_v33 = vadd.f32 %v1613_v27, %v415_v18  ;;  %v664_v34 = vpop.f32.mrb[9].mxu0  ;;  %v2349_v37 = vpop.f32.mrb[9].mxu1  ;;  %v1004_v53 = vsel %vm340_vm0, %v971_v20, 0.0  ;;  %v2369_v57 = vadd.f32 %v2317_v49, %v843_v36  ;;  %v420_v18 = vld [vmem:[#allocation2 + $0x78] sm:$0xff] }
 0x162   : > { %v1002_v39 = vsel %vm340_vm0, %v970_v25, 0.0  ;;  %1201 = vst.msk [vmem:[%s2336_s25 + $0x4] sm:$0xf] %vm1199_vm2, %v1543_v26  ;;  %v833_v40 = vld [vmem:[#allocation2 + $0x30] sm:$0xff]  ;;  %v767_v41 = vadd.f32 %v664_v34, %v413_v22  ;;  %v1614_v42 = vpop.f32.mrb[10].mxu0  ;;  %v2357_v44 = vpop.f32.mrb[10].mxu1 }
 0x163   : > { %v902_v45 = vadd.f32 %v901_v30, %v900_v32  ;;  %v1003_v46 = vadd.f32 %v1002_v39, %v1001_v38  ;;  %v872_v47 = vadd.f32 %v2317_v49, %v833_v40  ;;  %v831_v48 = vld [vmem:[#allocation2 + $0x20] sm:$0xff]  ;;  %802 = vst.msk [vmem:[#allocation2 + $0x50] sm:$0xff] %vm340_vm0, %v769_v33  ;;  %v770_v50 = vadd.f32 %v1614_v42, %v416_v28  ;;  %v667_v51 = vpop.f32.mrb[11].mxu0  ;;  %v2361_v52 = vpop.f32.mrb[11].mxu1  ;;  %v418_v20 = vld [vmem:[#allocation2 + $0x68] sm:$0xff] }
 0x164   : > { %v870_v54 = vadd.f32 %v2317_v49, %v831_v48  ;;  %v834_v55 = vld [vmem:[#allocation2 + $0x38] sm:$0xff]  ;;  %800 = vst.msk [vmem:[#allocation2 + $0x40] sm:$0xff] %vm340_vm0, %v767_v41  ;;  %v768_v56 = vadd.f32 %v667_v51, %v414_v35  ;;  %v903_v58 = vsel %vm340_vm0, %v869_v13, 0.0  ;;  %v1006_v59 = vsel %vm340_vm0, %v972_v31, 0.0 }
 0x165   : > { %1218 = vst.msk [vmem:[%s2336_s25 + $0x48] sm:$0xf] %vm1199_vm2, %v1560_v43  ;;  %v1005_v60 = vadd.f32 %v1004_v53, %v1003_v46  ;;  %v1548_v61 = vpack.c.bf16 %v872_v47, %v872_v47  ;;  %v832_v62 = vld [vmem:[#allocation2 + $0x28] sm:$0xff]  ;;  %v904_v63 = vadd.f32 %v903_v58, %v902_v45  ;;  %v873_v4 = vadd.f32 %v2317_v49, %v834_v55 }
 0x166   : > { %803 = vst.msk [vmem:[#allocation2 + $0x58] sm:$0xff] %vm340_vm0, %v770_v50  ;;  %v905_v0 = vsel %vm340_vm0, %v870_v54, 0.0  ;;  %v973_v1 = vmul.f32 %v870_v54, %v870_v54  ;;  %v1546_v2 = vpack.c.bf16 %v870_v54, %v870_v54  ;;  %801 = vst.msk [vmem:[#allocation2 + $0x48] sm:$0xff] %vm340_vm0, %v768_v56  ;;  %v871_v5 = vadd.f32 %v2317_v49, %v832_v62  ;;  %v846_v50 = vld [vmem:[#allocation2 + $0x98] sm:$0xff] }
 0x167   : > { %1206 = vst.msk [vmem:[%s2336_s25 + $0x18] sm:$0xf] %vm1199_vm2, %v1548_v61  ;;  %v1007_v3 = vadd.f32 %v1006_v59, %v1005_v60  ;;  %v906_v7 = vadd.f32 %v905_v0, %v904_v63  ;;  %v1558_v11 = vpack.c.bf16 %v2369_v57, %v2369_v57  ;;  %v909_v13 = vsel %vm340_vm0, %v872_v47, 0.0 }
 0x168   : > { %v1008_v8 = vsel %vm340_vm0, %v973_v1, 0.0  ;;  %1204 = vst.msk [vmem:[%s2336_s25 + $0x10] sm:$0xf] %vm1199_vm2, %v1546_v2  ;;  %v1617_v9 = vpop.f32.mrb[12].mxu0  ;;  %v2385_v12 = vpop.f32.mrb[12].mxu1  ;;  %v975_v14 = vmul.f32 %v872_v47, %v872_v47  ;;  %v1549_v16 = vpack.c.bf16 %v873_v4, %v873_v4  ;;  %v907_v22 = vsel %vm340_vm0, %v871_v5, 0.0 }
 0x169   : > { %v1009_v15 = vadd.f32 %v1008_v8, %v1007_v3  ;;  %v680_v17 = vpop.f32.mrb[13].mxu0  ;;  %v2388_v21 = vpop.f32.mrb[13].mxu1  ;;  %v974_v23 = vmul.f32 %v871_v5, %v871_v5  ;;  %v1547_v24 = vpack.c.bf16 %v871_v5, %v871_v5  ;;  %v773_v26 = vadd.f32 %v1617_v9, %v419_v6  ;;  %1216 = vst.msk [vmem:[%s2336_s25 + $0x40] sm:$0xf] %vm1199_vm2, %v1558_v11  ;;  %v844_v11 = vld [vmem:[#allocation2 + $0x88] sm:$0xff] }
 0x16a   : > { %v837_v25 = vld [vmem:[#allocation2 + $0x50] sm:$0xff]  ;;  %v1618_v27 = vpop.f32.mrb[14].mxu0  ;;  %v2393_v28 = vpop.f32.mrb[14].mxu1  ;;  %v976_v30 = vmul.f32 %v873_v4, %v873_v4  ;;  %1207 = vst.msk [vmem:[%s2336_s25 + $0x1c] sm:$0xf] %vm1199_vm2, %v1549_v16  ;;  %v908_v31 = vadd.f32 %v907_v22, %v906_v7  ;;  %v771_v34 = vadd.f32 %v680_v17, %v417_v10  ;;  %v1012_v43 = vsel %vm340_vm0, %v975_v14, 0.0 }
 0x16b   : > { %v876_v32 = vadd.f32 %v2317_v49, %v837_v25  ;;  %v835_v33 = vld [vmem:[#allocation2 + $0x40] sm:$0xff]  ;;  %v683_v35 = vpop.f32.mrb[15].mxu0  ;;  %v2398_v36 = vpop.f32.mrb[15].mxu1  ;;  %v1010_v38 = vsel %vm340_vm0, %v974_v23, 0.0  ;;  %1205 = vst.msk [vmem:[%s2336_s25 + $0x14] sm:$0xf] %vm1199_vm2, %v1547_v24  ;;  %v774_v41 = vadd.f32 %v1618_v27, %v420_v18  ;;  %v2420_v63 = vadd.f32 %v2317_v49, %v846_v50 }
 0x16c   : > { %v874_v39 = vadd.f32 %v2317_v49, %v835_v33  ;;  %806 = vst.msk [vmem:[#allocation2 + $0x70] sm:$0xff] %vm340_vm0, %v773_v26  ;;  %v772_v42 = vadd.f32 %v683_v35, %v418_v20  ;;  %v911_v45 = vsel %vm340_vm0, %v873_v4, 0.0  ;;  %v910_v46 = vadd.f32 %v909_v13, %v908_v31  ;;  %804 = vst.msk [vmem:[#allocation2 + $0x60] sm:$0xff] %vm340_vm0, %v771_v34 }
 0x16d   : > { %v838_v40 = vld [vmem:[#allocation2 + $0x58] sm:$0xff]  ;;  %v1011_v47 = vadd.f32 %v1010_v38, %v1009_v15  ;;  %v836_v48 = vld [vmem:[#allocation2 + $0x48] sm:$0xff]  ;;  %v1552_v51 = vpack.c.bf16 %v876_v32, %v876_v32  ;;  %807 = vst.msk [vmem:[#allocation2 + $0x78] sm:$0xff] %vm340_vm0, %v774_v41  ;;  %v1014_v60 = vsel %vm340_vm0, %v976_v30, 0.0  ;;  %v979_v0 = vmul.f32 %v876_v32, %v876_v32  ;;  %v849_v41 = vld [vmem:[#allocation2 + $0xb0] sm:$0xff] }
 0x16e   : > { %v913_v53 = vsel %vm340_vm0, %v874_v39, 0.0  ;;  %v977_v54 = vmul.f32 %v874_v39, %v874_v39  ;;  %v1550_v55 = vpack.c.bf16 %v874_v39, %v874_v39  ;;  %805 = vst.msk [vmem:[#allocation2 + $0x68] sm:$0xff] %vm340_vm0, %v772_v42  ;;  %v912_v58 = vadd.f32 %v911_v45, %v910_v46  ;;  %v847_v42 = vld [vmem:[#allocation2 + $0xa0] sm:$0xff] }
 0x16f   : > { %v1013_v56 = vadd.f32 %v1012_v43, %v1011_v47  ;;  %v877_v59 = vadd.f32 %v2317_v49, %v838_v40  ;;  %1210 = vst.msk [vmem:[%s2336_s25 + $0x28] sm:$0xf] %vm1199_vm2, %v1552_v51  ;;  %v875_v62 = vadd.f32 %v2317_v49, %v836_v48  ;;  %v917_v7 = vsel %vm340_vm0, %v876_v32, 0.0 }
 0x170   : > { %v1016_v61 = vsel %vm340_vm0, %v977_v54, 0.0  ;;  %1208 = vst.msk [vmem:[%s2336_s25 + $0x20] sm:$0xf] %vm1199_vm2, %v1550_v55  ;;  %v914_v1 = vadd.f32 %v913_v53, %v912_v58  ;;  %v1561_v17 = vpack.c.bf16 %v2420_v63, %v2420_v63  ;;  %v1020_v18 = vsel %vm340_vm0, %v979_v0, 0.0 }
 0x171   : > { %v1015_v2 = vadd.f32 %v1014_v60, %v1013_v56  ;;  %v1553_v3 = vpack.c.bf16 %v877_v59, %v877_v59  ;;  %v915_v4 = vsel %vm340_vm0, %v875_v62, 0.0  ;;  %v978_v5 = vmul.f32 %v875_v62, %v875_v62  ;;  %v848_v60 = vld [vmem:[#allocation2 + $0xa8] sm:$0xff] }
 0x172   : > { %v1551_v6 = vpack.c.bf16 %v875_v62, %v875_v62  ;;  %v916_v9 = vadd.f32 %v915_v4, %v914_v1  ;;  %v980_v13 = vmul.f32 %v877_v59, %v877_v59  ;;  %v919_v25 = vsel %vm340_vm0, %v877_v59, 0.0  ;;  %1219 = vst.msk [vmem:[%s2336_s25 + $0x4c] sm:$0xf] %vm1199_vm2, %v1561_v17  ;;  %v850_v59 = vld [vmem:[#allocation2 + $0xb8] sm:$0xff] }
 0x173   : > { %v1017_v8 = vadd.f32 %v1016_v61, %v1015_v2  ;;  %v841_v10 = vld [vmem:[#allocation2 + $0x70] sm:$0xff]  ;;  %1211 = vst.msk [vmem:[%s2336_s25 + $0x2c] sm:$0xf] %vm1199_vm2, %v1553_v3  ;;  %v1018_v14 = vsel %vm340_vm0, %v978_v5, 0.0  ;;  %v839_v16 = vld [vmem:[#allocation2 + $0x60] sm:$0xff]  ;;  %v2439_v30 = vadd.f32 %v2317_v49, %v844_v11  ;;  %v929_v51 = vsel %vm340_vm0, %v2369_v57, 0.0 }
 0x174   : > { %1209 = vst.msk [vmem:[%s2336_s25 + $0x24] sm:$0xf] %vm1199_vm2, %v1551_v6  ;;  %v880_v15 = vadd.f32 %v2317_v49, %v841_v10  ;;  %v918_v20 = vadd.f32 %v917_v7, %v916_v9  ;;  %v878_v23 = vadd.f32 %v2317_v49, %v839_v16  ;;  %v842_v24 = vld [vmem:[#allocation2 + $0x78] sm:$0xff]  ;;  %v1022_v38 = vsel %vm340_vm0, %v980_v13, 0.0  ;;  %v431_v61 = vld [vmem:[#allocation2 + $0xd0] sm:$0xff]  ;;  %v429_v2 = vld [vmem:[#allocation2 + $0xc0] sm:$0xff] }
 0x175   : > { %v1019_v22 = vadd.f32 %v1018_v14, %v1017_v8  ;;  %v881_v27 = vadd.f32 %v2317_v49, %v842_v24  ;;  %v840_v35 = vld [vmem:[#allocation2 + $0x68] sm:$0xff]  ;;  %v985_v53 = vmul.f32 %v2369_v57, %v2369_v57  ;;  %v1559_v55 = vpack.c.bf16 %v2439_v30, %v2439_v30  ;;  %v432_v3 = vld [vmem:[#allocation2 + $0xd8] sm:$0xff]  ;;  %v435_v14 = vld [vmem:[#allocation2 + $0xf0] sm:$0xff] }
 0x176   : > { %v1556_v26 = vpack.c.bf16 %v880_v15, %v880_v15  ;;  %v920_v32 = vadd.f32 %v919_v25, %v918_v20  ;;  %v921_v33 = vsel %vm340_vm0, %v878_v23, 0.0  ;;  %v981_v34 = vmul.f32 %v878_v23, %v878_v23  ;;  %v430_v8 = vld [vmem:[#allocation2 + $0xc8] sm:$0xff] }
 0x177   : > { %v1021_v31 = vadd.f32 %v1020_v18, %v1019_v22  ;;  %v983_v39 = vmul.f32 %v880_v15, %v880_v15  ;;  %v1554_v40 = vpack.c.bf16 %v878_v23, %v878_v23  ;;  %v1557_v47 = vpack.c.bf16 %v881_v27, %v881_v27  ;;  %1217 = vst.msk [vmem:[%s2336_s25 + $0x44] sm:$0xf] %vm1199_vm2, %v1559_v55  ;;  %v436_v22 = vld [vmem:[#allocation2 + $0xf8] sm:$0xff]  ;;  %v434_v23 = vld [vmem:[#allocation2 + $0xe8] sm:$0xff] }
 0x178   : > { %1214 = vst.msk [vmem:[%s2336_s25 + $0x38] sm:$0xf] %vm1199_vm2, %v1556_v26  ;;  %v922_v43 = vadd.f32 %v921_v33, %v920_v32  ;;  %v1024_v46 = vsel %vm340_vm0, %v981_v34, 0.0  ;;  %v925_v48 = vsel %vm340_vm0, %v880_v15, 0.0  ;;  %v879_v50 = vadd.f32 %v2317_v49, %v840_v35  ;;  %v433_v15 = vld [vmem:[#allocation2 + $0xe0] sm:$0xff] }
 0x179   : > { %v1023_v45 = vadd.f32 %v1022_v38, %v1021_v31  ;;  %1212 = vst.msk [vmem:[%s2336_s25 + $0x30] sm:$0xf] %vm1199_vm2, %v1554_v40  ;;  %1215 = vst.msk [vmem:[%s2336_s25 + $0x3c] sm:$0xf] %vm1199_vm2, %v1557_v47  ;;  %v2459_v56 = vadd.f32 %v2317_v49, %v849_v41  ;;  %v2462_v58 = vadd.f32 %v2317_v49, %v847_v42  ;;  %v1028_v62 = vsel %vm340_vm0, %v983_v39, 0.0 }
 0x17a   : > { %v923_v57 = vsel %vm340_vm0, %v879_v50, 0.0  ;;  %v982_v0 = vmul.f32 %v879_v50, %v879_v50  ;;  %v1555_v1 = vpack.c.bf16 %v879_v50, %v879_v50  ;;  %v984_v4 = vmul.f32 %v881_v27, %v881_v27 }
 0x17b   : > { %v1025_v54 = vadd.f32 %v1024_v46, %v1023_v45  ;;  %v924_v5 = vadd.f32 %v923_v57, %v922_v43  ;;  %v1564_v6 = vpack.c.bf16 %v2459_v56, %v2459_v56  ;;  %v1562_v7 = vpack.c.bf16 %v2462_v58, %v2462_v58 }
 0x17c   : > { %v1026_v9 = vsel %vm340_vm0, %v982_v0, 0.0  ;;  %1213 = vst.msk [vmem:[%s2336_s25 + $0x34] sm:$0xf] %vm1199_vm2, %v1555_v1  ;;  %v2476_v10 = vadd.f32 %v2317_v49, %v850_v59  ;;  %v2479_v11 = vadd.f32 %v2317_v49, %v848_v60  ;;  %v785_v13 = vadd.f32 %v2344_v29, %v431_v61 }
 0x17d   : > { %v926_v16 = vadd.f32 %v925_v48, %v924_v5  ;;  %v1027_v17 = vadd.f32 %v1026_v9, %v1025_v54  ;;  %1222 = vst.msk [vmem:[%s2336_s25 + $0x58] sm:$0xf] %vm1199_vm2, %v1564_v6  ;;  %1220 = vst.msk [vmem:[%s2336_s25 + $0x50] sm:$0xf] %vm1199_vm2, %v1562_v7  ;;  %v783_v18 = vadd.f32 %v2349_v37, %v429_v2  ;;  %v927_v24 = vsel %vm340_vm0, %v881_v27, 0.0 }
 0x17e   : > { %v786_v20 = vadd.f32 %v2357_v44, %v432_v3  ;;  %v1565_v29 = vpack.c.bf16 %v2476_v10, %v2476_v10  ;;  %v1563_v25 = vpack.c.bf16 %v2479_v11, %v2479_v11  ;;  %818 = vst.msk [vmem:[#allocation2 + $0xd0] sm:$0xff] %vm340_vm0, %v785_v13  ;;  %v784_v26 = vadd.f32 %v2361_v52, %v430_v8 }
 0x17f   : > { %v1029_v31 = vadd.f32 %v1028_v62, %v1027_v17  ;;  %v928_v37 = vadd.f32 %v927_v24, %v926_v16  ;;  %816 = vst.msk [vmem:[#allocation2 + $0xc0] sm:$0xff] %vm340_vm0, %v783_v18  ;;  %v789_v44 = vadd.f32 %v2385_v12, %v435_v14  ;;  %v787_v27 = vadd.f32 %v2388_v21, %v433_v15 }
 0x180   : > { %819 = vst.msk [vmem:[#allocation2 + $0xd8] sm:$0xff] %vm340_vm0, %v786_v20  ;;  %v1030_v32 = vsel %vm340_vm0, %v984_v4, 0.0  ;;  %817 = vst.msk [vmem:[#allocation2 + $0xc8] sm:$0xff] %vm340_vm0, %v784_v26  ;;  %v790_v52 = vadd.f32 %v2393_v28, %v436_v22  ;;  %v788_v33 = vadd.f32 %v2398_v36, %v434_v23  ;;  %v1032_v38 = vsel %vm340_vm0, %v985_v53, 0.0 }
 0x181   : > { %1223 = vst.msk [vmem:[%s2336_s25 + $0x5c] sm:$0xf] %vm1199_vm2, %v1565_v29  ;;  %1221 = vst.msk [vmem:[%s2336_s25 + $0x54] sm:$0xf] %vm1199_vm2, %v1563_v25  ;;  %v930_v34 = vadd.f32 %v929_v51, %v928_v37  ;;  %v1031_v35 = vadd.f32 %v1030_v32, %v1029_v31  ;;  %v931_v12 = vsel %vm340_vm0, %v2439_v30, 0.0  ;;  %v986_v28 = vmul.f32 %v2439_v30, %v2439_v30 }
 0x182   : > { %822 = vst.msk [vmem:[#allocation2 + $0xf0] sm:$0xff] %vm340_vm0, %v789_v44  ;;  %820 = vst.msk [vmem:[#allocation2 + $0xe0] sm:$0xff] %vm340_vm0, %v787_v27  ;;  %v933_v36 = vsel %vm340_vm0, %v2331_v19, 0.0  ;;  %v987_v42 = vmul.f32 %v2331_v19, %v2331_v19  ;;  %v935_v47 = vsel %vm340_vm0, %v2420_v63, 0.0  ;;  %v937_v30 = vsel %vm340_vm0, %v2462_v58, 0.0 }
 0x183   : > { %823 = vst.msk [vmem:[#allocation2 + $0xf8] sm:$0xff] %vm340_vm0, %v790_v52  ;;  %821 = vst.msk [vmem:[#allocation2 + $0xe8] sm:$0xff] %vm340_vm0, %v788_v33  ;;  %v932_v21 = vadd.f32 %v931_v12, %v930_v34  ;;  %v1033_v39 = vadd.f32 %v1032_v38, %v1031_v35  ;;  %v1034_v48 = vsel %vm340_vm0, %v986_v28, 0.0  ;;  %v939_v6 = vsel %vm340_vm0, %v2479_v11, 0.0 }
 0x184   : > { %v1036_v3 = vsel %vm340_vm0, %v987_v42, 0.0  ;;  %v988_v7 = vmul.f32 %v2420_v63, %v2420_v63  ;;  %v989_v8 = vmul.f32 %v2462_v58, %v2462_v58  ;;  %v941_v13 = vsel %vm340_vm0, %v2459_v56, 0.0 }
 0x185   : > { %v853_v40 = vld [vmem:[#allocation2 + $0xd0] sm:$0xff]  ;;  %v934_v41 = vadd.f32 %v933_v36, %v932_v21  ;;  %v1035_v19 = vadd.f32 %v1034_v48, %v1033_v39  ;;  %v943_v20 = vsel %vm340_vm0, %v2476_v10, 0.0  ;;  %v990_v29 = vmul.f32 %v2479_v11, %v2479_v11 }
 0x186   : > { %v851_v43 = vld [vmem:[#allocation2 + $0xc0] sm:$0xff]  ;;  %v2521_v46 = vadd.f32 %v2317_v49, %v853_v40  ;;  %v1038_v24 = vsel %vm340_vm0, %v988_v7, 0.0  ;;  %v1040_v26 = vsel %vm340_vm0, %v989_v8, 0.0 }
 0x187   : > { %v854_v45 = vld [vmem:[#allocation2 + $0xd8] sm:$0xff]  ;;  %v852_v50 = vld [vmem:[#allocation2 + $0xc8] sm:$0xff]  ;;  %v2529_v51 = vadd.f32 %v2317_v49, %v851_v43  ;;  %v936_v53 = vadd.f32 %v935_v47, %v934_v41  ;;  %v1037_v16 = vadd.f32 %v1036_v3, %v1035_v19 }
 0x188   : > { %v2532_v59 = vadd.f32 %v2317_v49, %v852_v50  ;;  %v2535_v60 = vadd.f32 %v2317_v49, %v854_v45  ;;  %v1568_v61 = vpack.c.bf16 %v2521_v46, %v2521_v46 }
 0x189   : > { %v855_v54 = vld [vmem:[#allocation2 + $0xe0] sm:$0xff]  ;;  %v857_v55 = vld [vmem:[#allocation2 + $0xf0] sm:$0xff]  ;;  %v938_v2 = vadd.f32 %v937_v30, %v936_v53  ;;  %v945_v22 = vsel %vm340_vm0, %v2529_v51, 0.0  ;;  %v1039_v31 = vadd.f32 %v1038_v24, %v1037_v16 }
 0x18a   : > { %v856_v62 = vld [vmem:[#allocation2 + $0xe8] sm:$0xff]  ;;  %v858_v57 = vld [vmem:[#allocation2 + $0xf8] sm:$0xff]  ;;  %v2540_v0 = vadd.f32 %v2317_v49, %v855_v54  ;;  %v2543_v1 = vadd.f32 %v2317_v49, %v857_v55  ;;  %1226 = vst.msk [vmem:[%s2336_s25 + $0x68] sm:$0xf] %vm1199_vm2, %v1568_v61  ;;  %v1567_v14 = vpack.c.bf16 %v2532_v59, %v2532_v59  ;;  %v1569_v15 = vpack.c.bf16 %v2535_v60, %v2535_v60 }
 0x18b   : > { %v2547_v4 = vadd.f32 %v2317_v49, %v856_v62  ;;  %v2550_v5 = vadd.f32 %v2317_v49, %v858_v57  ;;  %v940_v9 = vadd.f32 %v939_v6, %v938_v2  ;;  %v1566_v49 = vpack.c.bf16 %v2529_v51, %v2529_v51 }
 0x18c   : > { %v1570_v58 = vpack.c.bf16 %v2540_v0, %v2540_v0  ;;  %v1572_v18 = vpack.c.bf16 %v2543_v1, %v2543_v1  ;;  %1225 = vst.msk [vmem:[%s2336_s25 + $0x64] sm:$0xf] %vm1199_vm2, %v1567_v14  ;;  %1227 = vst.msk [vmem:[%s2336_s25 + $0x6c] sm:$0xf] %vm1199_vm2, %v1569_v15 }
 0x18d   : > { %v942_v63 = vadd.f32 %v941_v13, %v940_v9  ;;  %v1571_v17 = vpack.c.bf16 %v2547_v4, %v2547_v4  ;;  %1224 = vst.msk [vmem:[%s2336_s25 + $0x60] sm:$0xf] %vm1199_vm2, %v1566_v49  ;;  %v1573_v23 = vpack.c.bf16 %v2550_v5, %v2550_v5 }
 0x18e   : > { %1228 = vst.msk [vmem:[%s2336_s25 + $0x70] sm:$0xf] %vm1199_vm2, %v1570_v58  ;;  %1230 = vst.msk [vmem:[%s2336_s25 + $0x78] sm:$0xf] %vm1199_vm2, %v1572_v18 }
 0x18f   : > { %v944_v25 = vadd.f32 %v943_v20, %v942_v63  ;;  %1229 = vst.msk [vmem:[%s2336_s25 + $0x74] sm:$0xf] %vm1199_vm2, %v1571_v17  ;;  %1231 = vst.msk [vmem:[%s2336_s25 + $0x7c] sm:$0xf] %vm1199_vm2, %v1573_v23 }
 0x191   : > { %v946_v37 = vadd.f32 %v945_v22, %v944_v25 }
 0x192   : > { %1860 = shalt.err (!%p1857_p2)
}
 0x193   : > { %s1861_s14 = scalar_lea.hbm %s2581_s12, 2048  ;;  %s1865_s26 = scalar_lea.hbm %s2768_s3, 4096 }
 0x194   : > { %p1862_p6 = scmp.ne.s32.totalorder %s2581_s12, %s1861_s14  ;;  %p1866_p4 = scmp.lt.u32.totalorder %s2581_s12, %s2768_s3 }
 0x195   : > { %p1867_p9 = scmp.lt.u32.totalorder %s1865_s26, %s1861_s14  ;;  %p1869_p11 = scmp.lt.u32.totalorder %s1861_s14, %s2581_s12 }
 0x196   : > { %p1863_p10 = pnand %p1862_p6, %p2787_p1 }
 0x197   : > { %p1868_p8 = por %p1867_p9, %p1866_p4 }
 0x198   : > { %p1864_p3 = pneg %p1863_p10 }
 0x199   : > { %p1870_p13 = por %p1869_p11, %p1868_p8 }
 0x19b   : > { %p1871_p5 = pnand %p1870_p13, %p1864_p3 }
 0x19d   : > { %1874 = shalt.err (!%p1871_p5)
}
 0x19e   : > { %s2002_s15 = smov 64   ;;  %s2003_s7 = smov 4   ;;  %v991_v11 = vmul.f32 %v2459_v56, %v2459_v56  ;;  %v947_v44 = vsel %vm340_vm0, %v2532_v59, 0.0  ;;  %v1041_v27 = vadd.f32 %v1040_v26, %v1039_v31  ;;  %v992_v52 = vmul.f32 %v2476_v10, %v2476_v10 }
 0x19f   : > { %1653 = dma.vmem_to_hbm [thread:$0]  (%p2787_p1), %s2583_s28, 2048, %s2581_s12, %s1233_s8, %s2002_s15, %s2002_s15, %s2003_s7   ;;  %v948_v32 = vadd.f32 %v947_v44, %v946_v37  ;;  %v993_v33 = vmul.f32 %v2529_v51, %v2529_v51  ;;  %v1042_v34 = vsel %vm340_vm0, %v990_v29, 0.0  ;;  %v949_v35 = vsel %vm340_vm0, %v2521_v46, 0.0 }
 0x1a0   : > { %v1043_v38 = vadd.f32 %v1042_v34, %v1041_v27  ;;  %v1044_v56 = vsel %vm340_vm0, %v991_v11, 0.0  ;;  %v951_v21 = vsel %vm340_vm0, %v2535_v60, 0.0  ;;  %v953_v28 = vsel %vm340_vm0, %v2540_v0, 0.0  ;;  %s1237_s28 = sand.u32 1, %s2067_s24   ;;  %s1537_s12 = sshll.u32 %s1985_s21, 4 }
 0x1a1   : > { %v950_v12 = vadd.f32 %v949_v35, %v948_v32  ;;  %v994_v39 = vmul.f32 %v2532_v59, %v2532_v59  ;;  %v1046_v40 = vsel %vm340_vm0, %v992_v52, 0.0  ;;  %v1048_v41 = vsel %vm340_vm0, %v993_v33, 0.0  ;;  %s325_s8 = scalar_lea.vmem [#allocation10], %s2229_s30  ;;  %s2684_s17 = scalar_lea.hbm %s2769_s4, %s1537_s12 }
 0x1a2   : > { %v1045_v36 = vadd.f32 %v1044_v56, %v1043_v38  ;;  %v995_v45 = vmul.f32 %v2521_v46, %v2521_v46  ;;  %v955_v47 = vsel %vm340_vm0, %v2547_v4, 0.0  ;;  %v996_v50 = vmul.f32 %v2535_v60, %v2535_v60  ;;  %s1272_s13 = sshll.u32 %s325_s8, 4  ;;  %s2689_s24 = scalar_lea.sflag [#allocation11], %s1237_s28  ;;  %s2686_s13 = int_to_ptr.vmem [resolvable:$true] %s1272_s13 }
 0x1a3   : > { %v952_v10 = vadd.f32 %v951_v21, %v950_v12  ;;  %v997_v51 = vmul.f32 %v2540_v0, %v2540_v0  ;;  %v1050_v53 = vsel %vm340_vm0, %v994_v39, 0.0  ;;  %v957_v19 = vsel %vm340_vm0, %v2543_v1, 0.0  ;;  %s1875_s25 = scalar_lea.vmem %s2686_s13, 16  ;;  %s2004_s26 = smov [#allocation10]  }
 0x1a4   : > { %v1047_v42 = vadd.f32 %v1046_v40, %v1045_v36  ;;  %v1052_v46 = vsel %vm340_vm0, %v995_v45, 0.0  ;;  %v959_v59 = vsel %vm340_vm0, %v2550_v5, 0.0  ;;  %v998_v60 = vmul.f32 %v2547_v4, %v2547_v4  ;;  %p1876_p7 = scmp.ne.s32.totalorder %s2686_s13, %s1875_s25  ;;  %s1879_s29 = sshll.u32 %s2004_s26, 4  ;;  %s1880_s29 = int_to_ptr.vmem [resolvable:$false] %s1879_s29 }
 0x1a5   : > { %v954_v43 = vadd.f32 %v953_v28, %v952_v10  ;;  %v1054_v57 = vsel %vm340_vm0, %v996_v50, 0.0  ;;  %v1056_v0 = vsel %vm340_vm0, %v997_v51, 0.0  ;;  %v999_v6 = vmul.f32 %v2543_v1, %v2543_v1  ;;  %s1881_s9 = scalar_lea.vmem %s1880_s29, 32  ;;  %p1882_p2 = scmp.lt.s32.totalorder %s2686_s13, %s1880_s29 }
 0x1a6   : > { %v1049_v30 = vadd.f32 %v1048_v41, %v1047_v42  ;;  %v1000_v9 = vmul.f32 %v2550_v5, %v2550_v5  ;;  %v1058_v49 = vsel %vm340_vm0, %v998_v60, 0.0  ;;  %vm967_vm3 = vcmask 24576   ;;  %p1877_p12 = pnand %p1876_p7, %p2787_p1  ;;  %p1883_p6 = scmp.lt.s32.totalorder %s1881_s9, %s1875_s25 }
 0x1a7   : > { %v956_v48 = vadd.f32 %v955_v47, %v954_v43  ;;  %v1060_v14 = vsel %vm340_vm0, %v999_v6, 0.0 }
 0x1a8   : > { %v1051_v54 = vadd.f32 %v1050_v53, %v1049_v30  ;;  %v1062_v63 = vsel %vm340_vm0, %v1000_v9, 0.0  ;;  %p1878_p0 = pneg %p1877_p12  ;;  %p1884_p10 = por %p1883_p6, %p1882_p2 }
 0x1a9   : > { %v958_v55 = vadd.f32 %v957_v19, %v956_v48 }
 0x1aa   : > { %v1053_v61 = vadd.f32 %v1052_v46, %v1051_v54  ;;  %p1885_p3 = pnand %p1884_p10, %p1878_p0 }
 0x1ab   : > { %v960_v62 = vadd.f32 %v959_v59, %v958_v55 }
 0x1ac   : > { %v1055_v2 = vadd.f32 %v1054_v57, %v1053_v61 }
 0x1ad   : > { %v961_v3 = vrot.slane %v960_v62, 4 }
 0x1ae   : > { %v1057_v7 = vadd.f32 %v1056_v0, %v1055_v2 }
 0x1af   : > { %v962_v8 = vadd.f32 %v961_v3, %v960_v62 }
 0x1b0   : > { %v1059_v4 = vadd.f32 %v1058_v49, %v1057_v7 }
 0x1b1   : > { %v963_v13 = vrot.slane %v962_v8, 2 }
 0x1b2   : > { %v1061_v15 = vadd.f32 %v1060_v14, %v1059_v4 }
 0x1b3   : > { %v964_v16 = vadd.f32 %v963_v13, %v962_v8 }
 0x1b4   : > { %v1063_v1 = vadd.f32 %v1062_v63, %v1061_v15 }
 0x1b5   : > { %v965_v58 = vrot.slane %v964_v16, 1 }
 0x1b6   : > { %v1064_v5 = vrot.slane %v1063_v1, 4 }
 0x1b7   : > { %v966_v17 = vadd.f32 %v965_v58, %v964_v16 }
 0x1b8   : > { %v1065_v18 = vadd.f32 %v1064_v5, %v1063_v1 }
 0x1b9   : > { %968 = vst.msk [vmem:[%s325_s8] sm:$0x1] %vm967_vm3, %v966_v17 }
 0x1ba   : > { %1888 = shalt.err (!%p1885_p3)
}
 0x1bb   : > { %s1889_s15 = scalar_lea.hbm %s2684_s17, 16  ;;  %s1893_s8 = scalar_lea.hbm %s2769_s4, 32 }
 0x1bc   : > { %p1890_p4 = scmp.ne.s32.totalorder %s2684_s17, %s1889_s15  ;;  %p1894_p11 = scmp.lt.u32.totalorder %s2684_s17, %s2769_s4 }
 0x1bd   : > { %p1895_p13 = scmp.lt.u32.totalorder %s1893_s8, %s1889_s15  ;;  %p1897_p7 = scmp.lt.u32.totalorder %s1889_s15, %s2684_s17 }
 0x1be   : > { %p1891_p9 = pnand %p1890_p4, %p2787_p1 }
 0x1bf   : > { %p1896_p5 = por %p1895_p13, %p1894_p11 }
 0x1c0   : > { %p1892_p8 = pneg %p1891_p9 }
 0x1c1   : > { %p1898_p12 = por %p1897_p7, %p1896_p5 }
 0x1c3   : > { %p1899_p0 = pnand %p1898_p12, %p1892_p8 }
 0x1c5   : > { %1902 = shalt.err (!%p1899_p0)
}
 0x1c6   : > { %1654 = dma.vmem_to_hbm [thread:$0]  (%p2787_p1), %s2686_s13, 16, %s2684_s17, %s2689_s24   ;;  %v1066_v20 = vrot.slane %v1065_v18, 2 }
 0x1c7   : > { %s331_s25 = scalar_lea.vmem [#allocation12], %s2229_s30  ;;  %s2719_s15 = scalar_lea.hbm %s2770_s5, %s1537_s12 }
 0x1c8   : > { %v1067_v22 = vadd.f32 %v1066_v20, %v1065_v18  ;;  %s1286_s26 = sshll.u32 %s331_s25, 4  ;;  %s2005_s13 = smov [#allocation12]   ;;  %s1287_s26 = int_to_ptr.vmem [resolvable:$true] %s1286_s26 }
 0x1c9   : > { %s1903_s7 = scalar_lea.vmem %s1287_s26, 16  ;;  %s1907_s17 = sshll.u32 %s2005_s13, 4  ;;  %s1908_s17 = int_to_ptr.vmem [resolvable:$false] %s1907_s17 }
 0x1ca   : > { %v1068_v23 = vrot.slane %v1067_v22, 1  ;;  %p1904_p2 = scmp.ne.s32.totalorder %s1287_s26, %s1903_s7  ;;  %s1909_s30 = scalar_lea.vmem %s1908_s17, 32 }
 0x1cb   : > { %p1910_p3 = scmp.lt.s32.totalorder %s1287_s26, %s1908_s17  ;;  %p1911_p4 = scmp.lt.s32.totalorder %s1909_s30, %s1903_s7 }
 0x1cc   : > { %v1069_v24 = vadd.f32 %v1068_v23, %v1067_v22  ;;  %p1905_p6 = pnand %p1904_p2, %p2787_p1 }
 0x1cd   : > { %p1912_p9 = por %p1911_p4, %p1910_p3 }
 0x1ce   : > { %1070 = vst.msk [vmem:[%s331_s25] sm:$0x1] %vm967_vm3, %v1069_v24  ;;  %p1906_p10 = pneg %p1905_p6 }
 0x1d0   : > { %p1913_p8 = pnand %p1912_p9, %p1906_p10 }
 0x1d2   : > { %1916 = shalt.err (!%p1913_p8)
}
 0x1d3   : > { %s1917_s21 = scalar_lea.hbm %s2719_s15, 16  ;;  %s1921_s8 = scalar_lea.hbm %s2770_s5, 32 }
 0x1d4   : > { %p1918_p11 = scmp.ne.s32.totalorder %s2719_s15, %s1917_s21  ;;  %p1922_p7 = scmp.lt.u32.totalorder %s2719_s15, %s2770_s5 }
 0x1d5   : > { %p1923_p12 = scmp.lt.u32.totalorder %s1921_s8, %s1917_s21  ;;  %p1925_p2 = scmp.lt.u32.totalorder %s1917_s21, %s2719_s15 }
 0x1d6   : > { %p1919_p13 = pnand %p1918_p11, %p2787_p1 }
 0x1d7   : > { %p1924_p0 = por %p1923_p12, %p1922_p7 }
 0x1d8   : > { %p1920_p5 = pneg %p1919_p13 }
 0x1d9   : > { %p1926_p6 = por %p1925_p2, %p1924_p0 }
 0x1db   : > { %p1927_p10 = pnand %p1926_p6, %p1920_p5 }
 0x1dd   : > { %1930 = shalt.err (!%p1927_p10)
}
 0x1de   : > { %1655 = dma.vmem_to_hbm [thread:$0]  (%p2787_p1), %s1287_s26, 16, %s2719_s15, %s2689_s24  }
 0x1df PF: > { %s1298_s25 = sand.u32 1, %s1973_s18   ;;  %p2788_p3 = scmp.ne.s32.totalorder %s2777_s27, 0 }
 0x1e0   : > { %p2789_p4 = scmp.ge.s32.totalorder %s1993_s23, 2  ;;  %s1299_s29 = scalar_lea.sflag [#allocation5], %s1298_s25 }
 0x1e2   : > { %p1671_p9 = pnand %p2789_p4, %p2788_p3 }
 0x1e4   : > { %1964 = dma.done.wait (!%p1671_p9), %s1299_s29, 2048  }
 0x1e5   : > { %1966 = vsyncadd (!%p1671_p9), %s1299_s29, 4294965248  ;;  %s2790_s9 = sadd.s32 4294967294, %s1993_s23  }
 0x1e6   : > { %s1307_s7 = sand.u32 1, %s2790_s9  }
 0x1e7   : > { %s1308_s13 = scalar_lea.sflag [#allocation11], %s1307_s7 }
 0x1e8   : > { %1968 = dma.done.wait (!%p1671_p9), %s1308_s13, 32  }
 0x1e9   : > { %1970 = vsyncadd (!%p1671_p9), %s1308_s13, 4294967264  ;;  %s26_s23 = sadd.s32 1, %s1993_s23   ;;  %s2791_s18 = smov %s1977_s19 }
 0x1ea   : > { %p23_p1 = scmp.ge.s32.totalorder %s26_s23, 4   ;;  %s2792_s19 = smov %s1981_s20 }
 0x1eb   : > { %s2793_s20 = smov %s2180_s16  ;;  %s2794_s21 = smov %s1989_s22 }
 0x1ec   : > { %s2795_s22 = smov %s2797_s11  ;;  %25 = sbr.rel (!%p23_p1) target bundleno = 9 (0x9), region = 127 }
 0x1f3   :  { %1320 = vsyncpa [#allocation4], 1 }
 0x1f4   :  { %1322 = vsyncpa [#allocation4 + $0x1], 1 }
 0x1f5   :  { %1323 = vsyncpa [#allocation7], 1 }
 0x1f6   :  { %1324 = vsyncpa [#allocation5], 1 }
 0x1f7   :  { %1326 = vsyncpa [#allocation5 + $0x1], 1 }
 0x1f8   :  { %1327 = vsyncpa [#allocation11], 1 }
 0x1f9   :  { %1329 = vsyncpa [#allocation11 + $0x1], 1 }

// kernel: fwd.19
= control target key start
LH: loop header
LB: loop body
LE: loop exit
PB: predicated region body
PF: predicated region fallthrough
CT: control target
= control target key end

     0   :  { %11 = vsyncpa [#allocation4], 0  ;;  %s1751_s0 = inlined_call_operand.hbm [shape: bf16[128,64], index: 0, kind: input, shape index: {}]   ;;  %s1752_s1 = inlined_call_operand.hbm [shape: bf16[64,8], index: 1, kind: input, shape index: {}]   ;;  %s1753_s2 = inlined_call_operand.hbm [shape: f32[1,8], index: 2, kind: input, shape index: {}]   ;;  %s1754_s3 = inlined_call_operand.hbm [shape: bf16[128,8], index: 3, kind: output, shape index: {0}]   ;;  %s1755_s4 = inlined_call_operand.hbm [shape: f32[2,1,8], index: 4, kind: output, shape index: {1}]   ;;  %s1756_s5 = inlined_call_operand.hbm [shape: f32[2,1,8], index: 5, kind: output, shape index: {2}]  }
   0x1   :  { %13 = vsyncpa [#allocation4 + $0x1], 0 }
   0x2   :  { %14 = vsyncpa [#allocation7], 0 }
   0x3   :  { %15 = vsyncpa [#allocation5], 0 }
   0x4   :  { %17 = vsyncpa [#allocation5 + $0x1], 0 }
   0x5   :  { %18 = vsyncpa [#allocation11], 0 }
   0x6   :  { %20 = vsyncpa [#allocation11 + $0x1], 0  ;;  %s1343_s18 = smov 0   ;;  %s1345_s19 = smov 0  }
   0x7   :  { %s1347_s20 = smov 0   ;;  %s1349_s21 = smov 0  }
   0x8   :  { %s1351_s22 = smov 0   ;;  %s1353_s23 = smov 0  }
   0x9 LB: > { %s1374_s24 = sadd.s32 4294967295, %s1300_s23   ;;  %s1758_s25 = sadd.s32 4294967294, %s1300_s23   ;;  %s1300_s23 = sphi %s1353_s23, %s26_s23   ;;  %s1296_s22 = sphi %s1351_s22, %s1781_s22   ;;  %s1292_s21 = sphi %s1349_s21, %s1780_s21   ;;  %s1288_s20 = sphi %s1347_s20, %s1779_s20   ;;  %s1284_s19 = sphi %s1345_s19, %s1778_s19   ;;  %s1280_s18 = sphi %s1343_s18, %s1777_s18  }
   0xa   : > { %p67_p0 = scmp.ne.s32.totalorder %s1284_s19, %s1280_s18  ;;  %p1757_p1 = scmp.eq.s32.totalorder %s1374_s24, 0 }
   0xb   : > { %p153_p3 = scmp.eq.s32.totalorder %s1758_s25, 1  ;;  %p869_p5 = scmp.ge.s32.totalorder %s1300_s23, 1 }
   0xc   : > { %p1385_p4 = por %p1757_p1, %p67_p0  ;;  %p216_p7 = scmp.lt.s32.totalorder %s1300_s23, 3 }
   0xd   : > { %p1390_p6 = por %p153_p3, %p67_p0  ;;  %s1302_s29 = smov [#allocation6]  }
   0xe   : > { %s1762_s26 = scalar_select %p1385_p4, 1, 0 }
   0xf   : > { %s1763_s27 = scalar_select %p1390_p6, 1, 0 }
  0x10   : > { %p1395_p8 = pnand %p869_p5, %p216_p7  ;;  %s232_s30 = sshll.u32 %s1302_s29, 4  ;;  %s1399_s30 = int_to_ptr.vmem [resolvable:$true] %s232_s30 }
  0x11   : > { %s1303_s7 = smov [#allocation8]   ;;  %s1068_s11 = scalar_lea.hbm %s1752_s1, 512 }
  0x12   : > { %p982_p9 = pneg %p1395_p8  ;;  %s248_s8 = sshll.u32 %s1303_s7, 4  ;;  %s1410_s8 = int_to_ptr.vmem [resolvable:$true] %s248_s8 }
  0x13   : > { %p1069_p12 = scmp.ne.s32.totalorder %s1752_s1, %s1068_s11  ;;  %p1075_p5 = scmp.lt.u32.totalorder %s1068_s11, %s1752_s1 }
  0x14   : > { %p1406_p11 = pnand %p982_p9, %p1757_p1 }
  0x16   : > { %p1070_p13 = pneg %p1406_p11 }
  0x18   : > { %p1071_p0 = pnand %p1070_p13, %p1069_p12 }
  0x1a   : > { %p1072_p3 = pneg %p1071_p0 }
  0x1c   : > { %p1077_p7 = pnand %p1075_p5, %p1072_p3 }
  0x1e   : > { %1080 = shalt.err (!%p1077_p7)
}
  0x1f   : > { %s1081_s16 = scalar_lea.vmem %s1399_s30, 512  ;;  %p1089_p2 = scmp.lt.s32.totalorder %s1399_s30, %s1399_s30 }
  0x20   : > { %p1082_p9 = scmp.ne.s32.totalorder %s1399_s30, %s1081_s16  ;;  %p1090_p12 = scmp.lt.s32.totalorder %s1081_s16, %s1081_s16 }
  0x22   : > { %p1084_p10 = pnand %p1082_p9, %p1070_p13  ;;  %p1091_p0 = por %p1090_p12, %p1089_p2 }
  0x24   : > { %p1085_p1 = pneg %p1084_p10 }
  0x26   : > { %p1092_p6 = pnand %p1091_p0, %p1085_p1 }
  0x28   : > { %1095 = shalt.err (!%p1092_p6)
}
  0x29   : > { %s1759_s17 = smov 64   ;;  %s1305_s29 = smov 4  }
  0x2a   : > { %985 = dma.hbm_to_vmem [thread:$0]  (!%p1406_p11), %s1752_s1, 512, %s1399_s30, [#allocation7], %s1759_s17, %s1759_s17, %s1305_s29  }
  0x2b   : > { %s1096_s12 = scalar_lea.hbm %s1753_s2, 16 }
  0x2c   : > { %p1097_p1 = scmp.ne.s32.totalorder %s1753_s2, %s1096_s12  ;;  %p1103_p10 = scmp.lt.u32.totalorder %s1096_s12, %s1753_s2 }
  0x2e   : > { %p1099_p2 = pnand %p1097_p1, %p1070_p13 }
  0x30   : > { %p1100_p6 = pneg %p1099_p2 }
  0x32   : > { %p1105_p3 = pnand %p1103_p10, %p1100_p6 }
  0x34   : > { %1108 = shalt.err (!%p1105_p3)
}
  0x35   : > { %s1109_s30 = scalar_lea.vmem %s1410_s8, 16  ;;  %s1116_s7 = scalar_lea.vmem %s1410_s8, 32 }
  0x36   : > { %p1110_p5 = scmp.ne.s32.totalorder %s1410_s8, %s1109_s30  ;;  %p1117_p12 = scmp.lt.s32.totalorder %s1410_s8, %s1410_s8 }
  0x37   : > { %p1118_p0 = scmp.lt.s32.totalorder %s1116_s7, %s1109_s30 }
  0x38   : > { %p1112_p7 = pnand %p1110_p5, %p1070_p13 }
  0x39   : > { %p1119_p1 = por %p1118_p0, %p1117_p12 }
  0x3a   : > { %p1113_p9 = pneg %p1112_p7 }
  0x3c   : > { %p1120_p2 = pnand %p1119_p1, %p1113_p9 }
  0x3e   : > { %1123 = shalt.err (!%p1120_p2)
}
  0x3f   : > { %988 = dma.hbm_to_vmem [thread:$0]  (!%p1406_p11), %s1753_s2, 16, %s1410_s8, [#allocation7]  }
  0x40   : > { %s45_s11 = sadd.s32 1, %s1296_s22  ;;  %s54_s12 = sadd.s32 1, %s1288_s20 }
  0x41   : > { %p47_p13 = scmp.ge.s32.totalorder %s45_s11, 2  ;;  %p61_p6 = scmp.ne.s32.totalorder %s1288_s20, %s1284_s19 }
  0x42   : > { %p62_p10 = scmp.eq.s32.totalorder %s1300_s23, 0  ;;  %p1005_p3 = scmp.lt.s32.totalorder %s1300_s23, 2 }
  0x43   : > { %s1783_s11 = smov (%p47_p13, %s45_s11), 0  ;;  %p1766_p7 = scmp.eq.s32.totalorder %s1374_s24, 1 }
  0x44   : > { %p63_p5 = por %p62_p10, %p61_p6  ;;  %s49_s13 = ssub.s32 %s1296_s22, %s1783_s11 }
  0x45   : > { %p1478_p9 = por %p1766_p7, %p61_p6  ;;  %s259_s14 = sand.u32 1, %s1288_s20  }
  0x46   : > { %p52_p12 = scmp.eq.s32.totalorder %s49_s13, 0  ;;  %s873_s8 = sshll.u32 %s259_s14, 5 }
  0x47   : > { %s1767_s6 = scalar_select %p1478_p9, 1, 0 }
  0x48   : > { %s905_s15 = sshll.u32 %s1296_s22, 9  ;;  %s263_s10 = scalar_lea.vmem [#allocation3], %s873_s8 }
  0x49   : > { %s1487_s16 = scalar_select %p52_p12, %s1288_s20, %s54_s12  }
  0x4a   : > { %s1492_s9 = scalar_lea.hbm %s1751_s0, %s905_s15  ;;  %s271_s25 = sshll.u32 %s263_s10, 4  ;;  %s1500_s25 = int_to_ptr.vmem [resolvable:$true] %s271_s25 }
  0x4b   : > { %p1496_p11 = pnand %p1005_p3, %p63_p5  ;;  %s1502_s12 = scalar_lea.sflag [#allocation4], %s259_s14 }
  0x4c   : > { %s1124_s13 = scalar_lea.hbm %s1492_s9, 512  ;;  %s1129_s30 = scalar_lea.hbm %s1751_s0, 1024 }
  0x4d   : > { %p1125_p0 = scmp.ne.s32.totalorder %s1492_s9, %s1124_s13  ;;  %p1126_p1 = pneg %p1496_p11 }
  0x4e   : > { %p1130_p6 = scmp.lt.u32.totalorder %s1492_s9, %s1751_s0  ;;  %p1131_p10 = scmp.lt.u32.totalorder %s1129_s30, %s1124_s13 }
  0x4f   : > { %p1127_p2 = pnand %p1126_p1, %p1125_p0  ;;  %p1133_p5 = scmp.lt.u32.totalorder %s1124_s13, %s1492_s9 }
  0x50   : > { %p1132_p3 = por %p1131_p10, %p1130_p6 }
  0x51   : > { %p1128_p13 = pneg %p1127_p2 }
  0x52   : > { %p1134_p7 = por %p1133_p5, %p1132_p3 }
  0x54   : > { %p1135_p12 = pnand %p1134_p7, %p1128_p13 }
  0x56   : > { %1138 = shalt.err (!%p1135_p12)
}
  0x57   : > { %s1139_s14 = scalar_lea.vmem %s1500_s25, 512  ;;  %s1306_s8 = smov [#allocation3]  }
  0x58   : > { %p1140_p0 = scmp.ne.s32.totalorder %s1500_s25, %s1139_s14  ;;  %s1144_s15 = sshll.u32 %s1306_s8, 4  ;;  %s1145_s15 = int_to_ptr.vmem [resolvable:$false] %s1144_s15 }
  0x59   : > { %s1146_s7 = scalar_lea.vmem %s1145_s15, 1024  ;;  %p1147_p4 = scmp.lt.s32.totalorder %s1500_s25, %s1145_s15 }
  0x5a   : > { %p1142_p2 = pnand %p1140_p0, %p1126_p1  ;;  %p1148_p6 = scmp.lt.s32.totalorder %s1146_s7, %s1139_s14 }
  0x5c   : > { %p1143_p9 = pneg %p1142_p2  ;;  %p1149_p10 = por %p1148_p6, %p1147_p4 }
  0x5e   : > { %p1150_p3 = pnand %p1149_p10, %p1143_p9 }
  0x60   : > { %1153 = shalt.err (!%p1150_p3)
}
  0x61   : > { %s1769_s13 = smov 64   ;;  %283 = sbr.rel (%p1395_p8) target bundleno = 429 (0x1ad), region = 32 }
  0x62   : > { %992 = dma.hbm_to_vmem [thread:$0]  (!%p1496_p11), %s1492_s9, 512, %s1500_s25, %s1502_s12, %s1769_s13, %s1769_s13, %s1305_s29  }
  0x63   : > { %s1536_s30 = sand.u32 (!%p1395_p8), 1, %s1284_s19   ;;  %p1770_p4 = scmp.ne.s32.totalorder (!%p1395_p8), %s1762_s26, 0 }
  0x64   : > { %s877_s10 = sshll.u32 (!%p1395_p8), %s1536_s30, 5  ;;  %s286_s14 = scalar_lea.sflag (!%p1395_p8), [#allocation4], %s1536_s30 }
  0x65   : > { %s1542_s17 = scalar_lea.vmem (!%p1395_p8), [#allocation3], %s877_s10 }
  0x68   : > { %1263 = dma.done.wait (%p1770_p4), %s286_s14, 512  }
  0x69   : > { %1265 = vsyncadd (%p1770_p4), %s286_s14, 4294966784  ;;  %p1771_p9 = scmp.eq.s32.totalorder %s1374_s24, 0 }
  0x6b   : > { %1267 = dma.done.wait (%p1771_p9), [#allocation7], 528   ;;  %p1772_p8 = pmov %p1771_p9 }
  0x6c   : > { %vm340_vm0 = vcmask 64512   ;;  %v1307_v0 = vmov 0.0   ;;  %v1064_v1 = vld [vmem:[#allocation6] sm:$0xff]   ;;  %v1065_v2 = vld [vmem:[#allocation6 + $0x8] sm:$0xff]   ;;  %v1066_v3 = vld [vmem:[#allocation6 + $0x10] sm:$0xff]   ;;  %vm433_vm5 = vcmask 523264  }
  0x6d   : > { %1269 = vsyncadd (%p1772_p8), [#allocation7], 4294966768  ;;  %343 = vst.msk [vmem:[#allocation2 + $0x10] sm:$0xff] %vm340_vm0, %v1307_v0  ;;  %942 = vmatprep.subr.bf16.mxu0 %v1064_v1  ;;  %958 = vmatprep.subr.bf16.mxu1 %v1064_v1  ;;  %v916_v4 = vld [vmem:[%s1542_s17] sm:$0xff]   ;;  %v931_v5 = vld [vmem:[%s1542_s17 + $0x8] sm:$0xff]   ;;  %vm639_vm10 = vcmask 60416  }
  0x6e   : > { %341 = vst.msk [vmem:[#allocation2] sm:$0xff] %vm340_vm0, %v1307_v0  ;;  %342 = vst.msk [vmem:[#allocation2 + $0x8] sm:$0xff] %vm340_vm0, %v1307_v0  ;;  %943 = vmatpush3.bf16.msra.mxu0 %v1064_v1  ;;  %962 = vmatpush3.bf16.msra.mxu1 %v1064_v1  ;;  %v932_v6 = vld [vmem:[%s1542_s17 + $0x10] sm:$0xff]   ;;  %v917_v7 = vunpack.c.l.bf16 %v916_v4  ;;  %v918_v8 = vunpack.c.h.bf16 %v916_v4  ;;  %v921_v9 = vunpack.c.l.bf16 %v931_v5  ;;  %v922_v10 = vunpack.c.h.bf16 %v931_v5  ;;  %v933_v11 = vld [vmem:[%s1542_s17 + $0x18] sm:$0xff]   ;;  %s914_s25 = sshll.u32 %s1292_s21, 9  ;;  %s319_s26 = scalar_lea.vmem [#allocation9], %s877_s10 }
  0x6f   : > { %344 = vst.msk [vmem:[#allocation2 + $0x18] sm:$0xff] %vm340_vm0, %v1307_v0  ;;  %345 = vst.msk [vmem:[#allocation2 + $0x20] sm:$0xff] %vm340_vm0, %v1307_v0  ;;  %944 = vmatprep.subr.bf16.mxu0 %v1065_v2  ;;  %959 = vmatprep.subr.bf16.mxu1 %v1065_v2  ;;  %v1067_v12 = vld [vmem:[#allocation6 + $0x18] sm:$0xff]   ;;  %v925_v13 = vunpack.c.l.bf16 %v932_v6  ;;  %v926_v14 = vunpack.c.h.bf16 %v932_v6  ;;  %v929_v15 = vunpack.c.l.bf16 %v933_v11  ;;  %v930_v16 = vunpack.c.h.bf16 %v933_v11  ;;  %v889_v61 = vld [vmem:[#allocation8] ss:$0 sm:$0xff]  ;;  %s671_s28 = sshll.u32 %s319_s26, 4  ;;  %s1597_s12 = scalar_lea.hbm %s1754_s3, %s914_s25  ;;  %s1599_s28 = int_to_ptr.vmem [resolvable:$true] %s671_s28 }
  0x70   : > { %346 = vst.msk [vmem:[#allocation2 + $0x28] sm:$0xff] %vm340_vm0, %v1307_v0  ;;  %347 = vst.msk [vmem:[#allocation2 + $0x30] sm:$0xff] %vm340_vm0, %v1307_v0  ;;  %vm365_vm1 = vcmp.ge.f32.partialorder %v917_v7, 0.0  ;;  %vm366_vm2 = vcmp.ge.f32.partialorder %v918_v8, 0.0  ;;  %v373_v17 = vmul.f32 0.2, %v917_v7 }
  0x71   : > { %348 = vst.msk [vmem:[#allocation2 + $0x38] sm:$0xff] %vm340_vm0, %v1307_v0  ;;  %v374_v18 = vmul.f32 0.2, %v918_v8  ;;  %vm367_vm3 = vcmp.ge.f32.partialorder %v921_v9, 0.0  ;;  %vm368_vm4 = vcmp.ge.f32.partialorder %v922_v10, 0.0  ;;  %vm369_vm6 = vcmp.ge.f32.partialorder %v925_v13, 0.0 }
  0x72   : > { %945 = vmatpush3.bf16.msra.mxu0 %v1065_v2  ;;  %963 = vmatpush3.bf16.msra.mxu1 %v1065_v2  ;;  %v375_v19 = vmul.f32 0.2, %v921_v9  ;;  %v376_v20 = vmul.f32 0.2, %v922_v10  ;;  %v381_v21 = vsel %vm365_vm1, %v917_v7, %v373_v17  ;;  %vm370_vm7 = vcmp.ge.f32.partialorder %v926_v14, 0.0  ;;  %s649_s8 = scalar_lea.sflag [#allocation5], %s1536_s30 }
  0x73   : > { %946 = vmatprep.subr.bf16.mxu0 %v1066_v3  ;;  %960 = vmatprep.subr.bf16.mxu1 %v1066_v3  ;;  %v382_v22 = vsel %vm366_vm2, %v918_v8, %v374_v18  ;;  %v377_v25 = vmul.f32 0.2, %v925_v13  ;;  %v378_v27 = vmul.f32 0.2, %v926_v14  ;;  %vm371_vm8 = vcmp.ge.f32.partialorder %v929_v15, 0.0  ;;  %s1154_s15 = scalar_lea.vmem %s1599_s28, 512 }
  0x74   : > { %v397_v23 = vpack.c.bf16 %v382_v22, %v381_v21  ;;  %v383_v24 = vsel %vm367_vm3, %v921_v9, %v375_v19  ;;  %v384_v26 = vsel %vm368_vm4, %v922_v10, %v376_v20  ;;  %vm372_vm9 = vcmp.ge.f32.partialorder %v930_v16, 0.0  ;;  %v391_v37 = vld [vmem:[#allocation2 + $0x10] sm:$0xff]  ;;  %p1155_p11 = scmp.ne.s32.totalorder %s1599_s28, %s1154_s15  ;;  %p1773_p1 = scmp.ne.s32.totalorder %s1767_s6, 0 }
  0x75   : > { %v385_v28 = vsel %vm369_vm6, %v925_v13, %v377_v25  ;;  %v379_v29 = vmul.f32 0.2, %v929_v15  ;;  %v380_v30 = vmul.f32 0.2, %v930_v16  ;;  %v386_v31 = vsel %vm370_vm7, %v926_v14, %v378_v27  ;;  %v389_v39 = vld [vmem:[#allocation2] sm:$0xff]  ;;  %v390_v47 = vld [vmem:[#allocation2 + $0x8] sm:$0xff] }
  0x76   : > { %947 = vmatpush3.bf16.msra.mxu0 %v1066_v3  ;;  %964 = vmatpush3.bf16.msra.mxu1 %v1066_v3  ;;  %v398_v32 = vpack.c.bf16 %v384_v26, %v383_v24  ;;  %v399_v33 = vpack.c.bf16 %v386_v31, %v385_v28  ;;  %v393_v40 = vld [vmem:[#allocation2 + $0x20] sm:$0xff]  ;;  %v392_v42 = vld [vmem:[#allocation2 + $0x18] sm:$0xff]  ;;  %p1156_p13 = pnand %p1155_p11, %p1773_p1  ;;  %s1308_s7 = smov [#allocation9]  }
  0x77   : > { %948 = vmatprep.subr.bf16.mxu0 %v1067_v12  ;;  %950 = vmatprep.mubr.msk.bf16.mxu0 %vm433_vm5, %v397_v23  ;;  %v387_v34 = vsel %vm371_vm8, %v929_v15, %v379_v29  ;;  %v388_v35 = vsel %vm372_vm9, %v930_v16, %v380_v30  ;;  %v395_v38 = vld [vmem:[#allocation2 + $0x30] sm:$0xff]  ;;  %v394_v50 = vld [vmem:[#allocation2 + $0x28] sm:$0xff]  ;;  %s1158_s13 = sshll.u32 %s1308_s7, 4  ;;  %s1159_s13 = int_to_ptr.vmem [resolvable:$false] %s1158_s13 }
  0x78   : > { %961 = vmatprep.subr.bf16.mxu1 %v1067_v12  ;;  %v400_v36 = vpack.c.bf16 %v388_v35, %v387_v34  ;;  %954 = vmatprep.mubr.msk.bf16.mxu1 %vm433_vm5, %v399_v33  ;;  %v396_v44 = vld [vmem:[#allocation2 + $0x38] sm:$0xff]  ;;  %p1157_p5 = pneg %p1156_p13  ;;  %s1160_s10 = scalar_lea.vmem %s1159_s13, 1024 }
  0x79   : > { %p1161_p7 = scmp.lt.s32.totalorder %s1599_s28, %s1159_s13  ;;  %p1162_p12 = scmp.lt.s32.totalorder %s1160_s10, %s1154_s15 }
  0x7a   : > { %949 = vmatpush3.bf16.msra.mxu0 %v1067_v12  ;;  %965 = vmatpush3.bf16.msra.mxu1 %v1067_v12 }
  0x7b   : > { %p1163_p0 = por %p1162_p12, %p1161_p7 }
  0x7d   : > { %951 = vmatmul.mubr.msk.bf16.vlgmr.msra.gmra.mrb[0].mxu0 %vm433_vm5, %v398_v32  ;;  %955 = vmatmul.mubr.msk.bf16.vlgmr.msra.gmra.mrb[0].mxu1 %vm433_vm5, %v400_v36  ;;  %p1164_p2 = pnand %p1163_p0, %p1157_p5 }
 0x150   : > { %v952_v41 = vpop.f32.mrb[0].mxu0  ;;  %v956_v43 = vpop.f32.mrb[0].mxu1 }
 0x151   : > { %v513_v45 = vadd.f32 %v952_v41, %v391_v37  ;;  %v480_v46 = vpop.f32.mrb[1].mxu0  ;;  %v517_v48 = vadd.f32 %v956_v43, %v395_v38  ;;  %v496_v49 = vpop.f32.mrb[1].mxu1 }
 0x152   : > { %v511_v51 = vadd.f32 %v480_v46, %v389_v39  ;;  %v953_v52 = vpop.f32.mrb[2].mxu0  ;;  %v515_v53 = vadd.f32 %v496_v49, %v393_v40  ;;  %v957_v54 = vpop.f32.mrb[2].mxu1 }
 0x153   : > { %522 = vst.msk [vmem:[#allocation2 + $0x10] sm:$0xff] %vm340_vm0, %v513_v45  ;;  %v514_v55 = vadd.f32 %v953_v52, %v392_v42  ;;  %v483_v56 = vpop.f32.mrb[3].mxu0  ;;  %526 = vst.msk [vmem:[#allocation2 + $0x30] sm:$0xff] %vm340_vm0, %v517_v48  ;;  %v518_v57 = vadd.f32 %v957_v54, %v396_v44  ;;  %v499_v58 = vpop.f32.mrb[3].mxu1 }
 0x154   : > { %520 = vst.msk [vmem:[#allocation2] sm:$0xff] %vm340_vm0, %v511_v51  ;;  %v512_v59 = vadd.f32 %v483_v56, %v390_v47  ;;  %524 = vst.msk [vmem:[#allocation2 + $0x20] sm:$0xff] %vm340_vm0, %v515_v53  ;;  %v516_v60 = vadd.f32 %v499_v58, %v394_v50 }
 0x155   : > { %523 = vst.msk [vmem:[#allocation2 + $0x18] sm:$0xff] %vm340_vm0, %v514_v55  ;;  %527 = vst.msk [vmem:[#allocation2 + $0x38] sm:$0xff] %vm340_vm0, %v518_v57 }
 0x156   : > { %521 = vst.msk [vmem:[#allocation2 + $0x8] sm:$0xff] %vm340_vm0, %v512_v59  ;;  %525 = vst.msk [vmem:[#allocation2 + $0x28] sm:$0xff] %vm340_vm0, %v516_v60 }
 0x15a   : > { %v533_v62 = vld [vmem:[#allocation2 + $0x10] sm:$0xff] }
 0x15b   : > { %v537_v63 = vld [vmem:[#allocation2 + $0x30] sm:$0xff]  ;;  %v531_v0 = vld [vmem:[#allocation2] sm:$0xff]  ;;  %v548_v2 = vadd.f32 %v889_v61, %v533_v62 }
 0x15c   : > { %v535_v1 = vld [vmem:[#allocation2 + $0x20] sm:$0xff]  ;;  %v534_v3 = vld [vmem:[#allocation2 + $0x18] sm:$0xff]  ;;  %v546_v5 = vadd.f32 %v889_v61, %v531_v0  ;;  %v1576_v10 = vadd.f32 %v889_v61, %v537_v63 }
 0x15d   : > { %v538_v4 = vld [vmem:[#allocation2 + $0x38] sm:$0xff]  ;;  %v532_v6 = vld [vmem:[#allocation2 + $0x8] sm:$0xff]  ;;  %v549_v8 = vadd.f32 %v889_v61, %v534_v3  ;;  %v550_v9 = vadd.f32 %v889_v61, %v535_v1  ;;  %v557_v14 = vsel %vm340_vm0, %v548_v2, 0.0  ;;  %v908_v16 = vpack.c.bf16 %v548_v2, %v548_v2 }
 0x15e   : > { %v536_v7 = vld [vmem:[#allocation2 + $0x28] sm:$0xff]  ;;  %v547_v11 = vadd.f32 %v889_v61, %v532_v6  ;;  %v1580_v13 = vadd.f32 %v889_v61, %v538_v4  ;;  %v906_v15 = vpack.c.bf16 %v546_v5, %v546_v5  ;;  %v554_v17 = vsel %vm340_vm0, %v546_v5, 0.0 }
 0x15f   : > { %v1578_v12 = vadd.f32 %v889_v61, %v536_v7  ;;  %v909_v20 = vpack.c.bf16 %v549_v8, %v549_v8  ;;  %v910_v22 = vpack.c.bf16 %v550_v9, %v550_v9  ;;  %v912_v24 = vpack.c.bf16 %v1576_v10, %v1576_v10  ;;  %642 = vst.msk [vmem:[%s319_s26 + $0x8] sm:$0xf] %vm639_vm10, %v908_v16 }
 0x160   : > { %v555_v18 = vsel %vm340_vm0, %v547_v11, 0.0  ;;  %v907_v19 = vpack.c.bf16 %v547_v11, %v547_v11  ;;  %640 = vst.msk [vmem:[%s319_s26] sm:$0xf] %vm639_vm10, %v906_v15  ;;  %v913_v25 = vpack.c.bf16 %v1580_v13, %v1580_v13  ;;  %v577_v26 = vmul.f32 %v546_v5, %v546_v5 }
 0x161   : > { %v556_v21 = vadd.f32 %v555_v18, %v554_v17  ;;  %v911_v23 = vpack.c.bf16 %v1578_v12, %v1578_v12  ;;  %643 = vst.msk [vmem:[%s319_s26 + $0xc] sm:$0xf] %vm639_vm10, %v909_v20  ;;  %v578_v27 = vmul.f32 %v547_v11, %v547_v11  ;;  %v579_v28 = vmul.f32 %v548_v2, %v548_v2 }
 0x162   : > { %641 = vst.msk [vmem:[%s319_s26 + $0x4] sm:$0xf] %vm639_vm10, %v907_v19  ;;  %v559_v30 = vsel %vm340_vm0, %v549_v8, 0.0  ;;  %v561_v31 = vsel %vm340_vm0, %v550_v9, 0.0  ;;  %644 = vst.msk [vmem:[%s319_s26 + $0x10] sm:$0xf] %vm639_vm10, %v910_v22  ;;  %v580_v32 = vmul.f32 %v549_v8, %v549_v8  ;;  %v581_v33 = vmul.f32 %v550_v9, %v550_v9 }
 0x163   : > { %v558_v29 = vadd.f32 %v557_v14, %v556_v21  ;;  %645 = vst.msk [vmem:[%s319_s26 + $0x14] sm:$0xf] %vm639_vm10, %v911_v23  ;;  %646 = vst.msk [vmem:[%s319_s26 + $0x18] sm:$0xf] %vm639_vm10, %v912_v24  ;;  %v585_v34 = vsel %vm340_vm0, %v577_v26, 0.0  ;;  %v586_v35 = vsel %vm340_vm0, %v578_v27, 0.0 }
 0x164   : > { %647 = vst.msk [vmem:[%s319_s26 + $0x1c] sm:$0xf] %vm639_vm10, %v913_v25 }
 0x165   : > { %v560_v36 = vadd.f32 %v559_v30, %v558_v29 }
 0x166   : > { %1167 = shalt.err (!%p1164_p2)
}
 0x167   : > { %s1168_s14 = scalar_lea.hbm %s1597_s12, 512  ;;  %s1172_s26 = scalar_lea.hbm %s1754_s3, 1024 }
 0x168   : > { %p1169_p6 = scmp.ne.s32.totalorder %s1597_s12, %s1168_s14  ;;  %p1173_p4 = scmp.lt.u32.totalorder %s1597_s12, %s1754_s3 }
 0x169   : > { %p1174_p9 = scmp.lt.u32.totalorder %s1172_s26, %s1168_s14  ;;  %p1176_p11 = scmp.lt.u32.totalorder %s1168_s14, %s1597_s12 }
 0x16a   : > { %p1170_p10 = pnand %p1169_p6, %p1773_p1 }
 0x16b   : > { %p1175_p8 = por %p1174_p9, %p1173_p4 }
 0x16c   : > { %p1171_p3 = pneg %p1170_p10 }
 0x16d   : > { %p1177_p13 = por %p1176_p11, %p1175_p8 }
 0x16f   : > { %p1178_p5 = pnand %p1177_p13, %p1171_p3 }
 0x171   : > { %1181 = shalt.err (!%p1178_p5)
}
 0x172   : > { %s1309_s15 = smov 64   ;;  %s1310_s7 = smov 4   ;;  %v587_v37 = vadd.f32 %v586_v35, %v585_v34  ;;  %v588_v38 = vsel %vm340_vm0, %v579_v28, 0.0  ;;  %v562_v39 = vadd.f32 %v561_v31, %v560_v36  ;;  %v563_v41 = vsel %vm340_vm0, %v1578_v12, 0.0 }
 0x173   : > { %976 = dma.vmem_to_hbm [thread:$0]  (%p1773_p1), %s1599_s28, 512, %s1597_s12, %s649_s8, %s1309_s15, %s1309_s15, %s1310_s7   ;;  %v582_v42 = vmul.f32 %v1578_v12, %v1578_v12  ;;  %v590_v43 = vsel %vm340_vm0, %v580_v32, 0.0  ;;  %v592_v44 = vsel %vm340_vm0, %v581_v33, 0.0  ;;  %v565_v47 = vsel %vm340_vm0, %v1576_v10, 0.0 }
 0x174   : > { %v589_v40 = vadd.f32 %v588_v38, %v587_v37  ;;  %v564_v45 = vadd.f32 %v563_v41, %v562_v39  ;;  %v583_v48 = vmul.f32 %v1576_v10, %v1576_v10  ;;  %v567_v51 = vsel %vm340_vm0, %v1580_v13, 0.0  ;;  %s653_s28 = sand.u32 1, %s1374_s24   ;;  %s901_s12 = sshll.u32 %s1292_s21, 4 }
 0x175   : > { %v584_v52 = vmul.f32 %v1580_v13, %v1580_v13  ;;  %v594_v53 = vsel %vm340_vm0, %v582_v42, 0.0  ;;  %s325_s8 = scalar_lea.vmem [#allocation10], %s1536_s30  ;;  %vm575_vm11 = vcmask 57344   ;;  %s1663_s17 = scalar_lea.hbm %s1755_s4, %s901_s12 }
 0x176   : > { %v591_v46 = vadd.f32 %v590_v43, %v589_v40  ;;  %v566_v49 = vadd.f32 %v565_v47, %v564_v45  ;;  %v596_v56 = vsel %vm340_vm0, %v583_v48, 0.0  ;;  %s688_s13 = sshll.u32 %s325_s8, 4  ;;  %s331_s24 = scalar_lea.vmem [#allocation12], %s1536_s30  ;;  %s1665_s13 = int_to_ptr.vmem [resolvable:$true] %s688_s13 }
 0x177   : > { %v598_v59 = vsel %vm340_vm0, %v584_v52, 0.0  ;;  %s1670_s25 = sshll.u32 %s331_s24, 4  ;;  %s1673_s26 = scalar_lea.sflag [#allocation11], %s653_s28  ;;  %s703_s25 = int_to_ptr.vmem [resolvable:$true] %s1670_s25 }
 0x178   : > { %v593_v50 = vadd.f32 %v592_v44, %v591_v46  ;;  %v568_v54 = vadd.f32 %v567_v51, %v566_v49  ;;  %s1182_s29 = scalar_lea.vmem %s1665_s13, 16  ;;  %s1311_s9 = smov [#allocation10]  }
 0x179   : > { %p1183_p7 = scmp.ne.s32.totalorder %s1665_s13, %s1182_s29  ;;  %s1186_s15 = sshll.u32 %s1311_s9, 4  ;;  %s1187_s15 = int_to_ptr.vmem [resolvable:$false] %s1186_s15 }
 0x17a   : > { %v595_v55 = vadd.f32 %v594_v53, %v593_v50  ;;  %v569_v57 = vrot.slane %v568_v54, 4  ;;  %s1188_s7 = scalar_lea.vmem %s1187_s15, 32  ;;  %p1189_p2 = scmp.lt.s32.totalorder %s1665_s13, %s1187_s15 }
 0x17b   : > { %p1184_p12 = pnand %p1183_p7, %p1773_p1  ;;  %p1190_p6 = scmp.lt.s32.totalorder %s1188_s7, %s1182_s29 }
 0x17c   : > { %v597_v58 = vadd.f32 %v596_v56, %v595_v55  ;;  %v570_v60 = vadd.f32 %v569_v57, %v568_v54 }
 0x17d   : > { %p1185_p0 = pneg %p1184_p12  ;;  %p1191_p10 = por %p1190_p6, %p1189_p2 }
 0x17e   : > { %v599_v61 = vadd.f32 %v598_v59, %v597_v58  ;;  %v571_v62 = vrot.slane %v570_v60, 2 }
 0x17f   : > { %p1192_p3 = pnand %p1191_p10, %p1185_p0 }
 0x180   : > { %v600_v63 = vrot.slane %v599_v61, 4  ;;  %v572_v0 = vadd.f32 %v571_v62, %v570_v60 }
 0x182   : > { %v601_v1 = vadd.f32 %v600_v63, %v599_v61  ;;  %v573_v2 = vrot.slane %v572_v0, 1 }
 0x184   : > { %v602_v3 = vrot.slane %v601_v1, 2  ;;  %v574_v4 = vadd.f32 %v573_v2, %v572_v0 }
 0x186   : > { %v603_v5 = vadd.f32 %v602_v3, %v601_v1  ;;  %576 = vst.msk [vmem:[%s325_s8] sm:$0x1] %vm575_vm11, %v574_v4 }
 0x188   : > { %v604_v6 = vrot.slane %v603_v5, 1 }
 0x189   : > { %1195 = shalt.err (!%p1192_p3)
}
 0x18a   : > { %s1196_s28 = scalar_lea.hbm %s1663_s17, 16  ;;  %s1200_s14 = scalar_lea.hbm %s1755_s4, 32 }
 0x18b   : > { %p1197_p4 = scmp.ne.s32.totalorder %s1663_s17, %s1196_s28  ;;  %p1201_p11 = scmp.lt.u32.totalorder %s1663_s17, %s1755_s4 }
 0x18c   : > { %p1202_p13 = scmp.lt.u32.totalorder %s1200_s14, %s1196_s28  ;;  %p1204_p7 = scmp.lt.u32.totalorder %s1196_s28, %s1663_s17 }
 0x18d   : > { %p1198_p9 = pnand %p1197_p4, %p1773_p1 }
 0x18e   : > { %p1203_p5 = por %p1202_p13, %p1201_p11 }
 0x18f   : > { %p1199_p8 = pneg %p1198_p9 }
 0x190   : > { %p1205_p12 = por %p1204_p7, %p1203_p5 }
 0x192   : > { %p1206_p0 = pnand %p1205_p12, %p1199_p8 }
 0x194   : > { %1209 = shalt.err (!%p1206_p0)
}
 0x195   : > { %977 = dma.vmem_to_hbm [thread:$0]  (%p1773_p1), %s1665_s13, 16, %s1663_s17, %s1673_s26   ;;  %v605_v7 = vadd.f32 %v604_v6, %v603_v5 }
 0x196   : > { %s1702_s8 = scalar_lea.hbm %s1756_s5, %s901_s12  ;;  %s1210_s28 = scalar_lea.vmem %s703_s25, 16 }
 0x197   : > { %606 = vst.msk [vmem:[%s331_s24] sm:$0x1] %vm575_vm11, %v605_v7  ;;  %p1211_p2 = scmp.ne.s32.totalorder %s703_s25, %s1210_s28  ;;  %s1312_s10 = smov [#allocation12]  }
 0x198   : > { %s1214_s14 = sshll.u32 %s1312_s10, 4  ;;  %s1215_s14 = int_to_ptr.vmem [resolvable:$false] %s1214_s14 }
 0x199   : > { %p1212_p6 = pnand %p1211_p2, %p1773_p1  ;;  %s1216_s13 = scalar_lea.vmem %s1215_s14, 32 }
 0x19a   : > { %p1217_p3 = scmp.lt.s32.totalorder %s703_s25, %s1215_s14  ;;  %p1218_p4 = scmp.lt.s32.totalorder %s1216_s13, %s1210_s28 }
 0x19b   : > { %p1213_p10 = pneg %p1212_p6 }
 0x19c   : > { %p1219_p9 = por %p1218_p4, %p1217_p3 }
 0x19e   : > { %p1220_p8 = pnand %p1219_p9, %p1213_p10 }
 0x1a0   : > { %1223 = shalt.err (!%p1220_p8)
}
 0x1a1   : > { %s1224_s21 = scalar_lea.hbm %s1702_s8, 16  ;;  %s1228_s17 = scalar_lea.hbm %s1756_s5, 32 }
 0x1a2   : > { %p1225_p11 = scmp.ne.s32.totalorder %s1702_s8, %s1224_s21  ;;  %p1229_p7 = scmp.lt.u32.totalorder %s1702_s8, %s1756_s5 }
 0x1a3   : > { %p1230_p12 = scmp.lt.u32.totalorder %s1228_s17, %s1224_s21  ;;  %p1232_p2 = scmp.lt.u32.totalorder %s1224_s21, %s1702_s8 }
 0x1a4   : > { %p1226_p13 = pnand %p1225_p11, %p1773_p1 }
 0x1a5   : > { %p1231_p0 = por %p1230_p12, %p1229_p7 }
 0x1a6   : > { %p1227_p5 = pneg %p1226_p13 }
 0x1a7   : > { %p1233_p6 = por %p1232_p2, %p1231_p0 }
 0x1a9   : > { %p1234_p10 = pnand %p1233_p6, %p1227_p5 }
 0x1ab   : > { %1237 = shalt.err (!%p1234_p10)
}
 0x1ac   : > { %978 = dma.vmem_to_hbm [thread:$0]  (%p1773_p1), %s703_s25, 16, %s1702_s8, %s1673_s26  }
 0x1ad PF: > { %s714_s15 = sand.u32 1, %s1280_s18   ;;  %p1774_p3 = scmp.ne.s32.totalorder %s1763_s27, 0 }
 0x1ae   : > { %p1775_p4 = scmp.ge.s32.totalorder %s1300_s23, 2  ;;  %s715_s29 = scalar_lea.sflag [#allocation5], %s714_s15 }
 0x1b0   : > { %p994_p9 = pnand %p1775_p4, %p1774_p3 }
 0x1b2   : > { %1271 = dma.done.wait (!%p994_p9), %s715_s29, 512  }
 0x1b3   : > { %1273 = vsyncadd (!%p994_p9), %s715_s29, 4294966784  ;;  %s1776_s7 = sadd.s32 4294967294, %s1300_s23  }
 0x1b4   : > { %s723_s28 = sand.u32 1, %s1776_s7  }
 0x1b5   : > { %s724_s10 = scalar_lea.sflag [#allocation11], %s723_s28 }
 0x1b6   : > { %1275 = dma.done.wait (!%p994_p9), %s724_s10, 32  }
 0x1b7   : > { %1277 = vsyncadd (!%p994_p9), %s724_s10, 4294967264  ;;  %s26_s23 = sadd.s32 1, %s1300_s23   ;;  %s1777_s18 = smov %s1284_s19 }
 0x1b8   : > { %p23_p1 = scmp.ge.s32.totalorder %s26_s23, 4   ;;  %s1778_s19 = smov %s1288_s20 }
 0x1b9   : > { %s1779_s20 = smov %s1487_s16  ;;  %s1780_s21 = smov %s1296_s22 }
 0x1ba   : > { %s1781_s22 = smov %s1783_s11  ;;  %25 = sbr.rel (!%p23_p1) target bundleno = 9 (0x9), region = 127 }
 0x1c1   :  { %736 = vsyncpa [#allocation4], 1 }
 0x1c2   :  { %738 = vsyncpa [#allocation4 + $0x1], 1 }
 0x1c3   :  { %739 = vsyncpa [#allocation7], 1 }
 0x1c4   :  { %740 = vsyncpa [#allocation5], 1 }
 0x1c5   :  { %742 = vsyncpa [#allocation5 + $0x1], 1 }
 0x1c6   :  { %743 = vsyncpa [#allocation11], 1 }
 0x1c7   :  { %745 = vsyncpa [#allocation11 + $0x1], 1 }

// kernel: tile.101
= control target key start
LH: loop header
LB: loop body
LE: loop exit
PB: predicated region body
PF: predicated region fallthrough
CT: control target
= control target key end

     0   :  { %s28_s0 = inlined_call_operand.vmem [shape: f32[8], index: 0, kind: input, shape index: {}]   ;;  %s29_s1 = inlined_call_operand.vmem [shape: f32[16,8], index: 1, kind: output, shape index: {}]  }
   0x1   :  { %v4_v0 = vld [vmem:[%s28_s0] ss:$0 sm:$0xff] }
   0x2   :  { %5 = vst [vmem:[%s29_s1] sm:$0xff] %v4_v0  ;;  %8 = vst [vmem:[%s29_s1 + $0x8] sm:$0xff] %v4_v0 }

// kernel: tile.102
= control target key start
LH: loop header
LB: loop body
LE: loop exit
PB: predicated region body
PF: predicated region fallthrough
CT: control target
= control target key end

     0   :  { %s167_s10 = smov 120   ;;  %s168_s11 = smov 104   ;;  %vm4_vm0 = vcmask 64512   ;;  %s253_s0 = inlined_call_operand.vmem [shape: f32[16,8], index: 0, kind: input, shape index: {}]   ;;  %s254_s1 = inlined_call_operand.hbm [shape: f32[1,128], index: 1, kind: output, shape index: {}]  }
   0x1   :  { %v112_v0 = vld [vmem:[%s253_s0 + $0xf] sm:$0x1]   ;;  %v114_v1 = vld [vmem:[%s253_s0 + $0xd] sm:$0x1]   ;;  %v113_v2 = vld [vmem:[%s253_s0 + $0xe] sm:$0x1]  }
   0x2   :  { %8 = vrot.lane.b32.xlu0 %v112_v0, %s167_s10  ;;  %20 = vrot.lane.b32.xlu1 %v114_v1, %s168_s11  ;;  %v115_v3 = vld [vmem:[%s253_s0 + $0xc] sm:$0x1]   ;;  %s169_s16 = smov 112   ;;  %s170_s17 = smov 96   ;;  %v116_v4 = vld [vmem:[%s253_s0 + $0xb] sm:$0x1]  }
   0x3   :  { %v117_v5 = vld [vmem:[%s253_s0 + $0xa] sm:$0x1]   ;;  %v3_v6 = vld [vmem:[%s253_s0] sm:$0x1]  }
   0x6   :  { %14 = vrot.lane.b32.xlu0 %v113_v2, %s169_s16  ;;  %26 = vrot.lane.b32.xlu1 %v115_v3, %s170_s17 }
   0x7   :  { %2 = vsyncpa [#allocation1], 0  ;;  %s171_s24 = smov 88   ;;  %s172_s25 = smov 80   ;;  %5 = vst.msk [vmem:[#allocation2] sm:$0x1] %vm4_vm0, %v3_v6  }
   0x8   :  { %v118_v7 = vld [vmem:[%s253_s0 + $0x9] sm:$0x1]   ;;  %v119_v8 = vld [vmem:[%s253_s0 + $0x8] sm:$0x1]   ;;  %s173_s30 = smov 72   ;;  %s174_s2 = smov 64  }
   0x9   :  { %v120_v9 = vld [vmem:[%s253_s0 + $0x7] sm:$0x1]   ;;  %v121_v10 = vld [vmem:[%s253_s0 + $0x6] sm:$0x1]   ;;  %s175_s7 = smov 56   ;;  %s176_s8 = smov 48  }
   0xa   :  { %32 = vrot.lane.b32.xlu0 %v116_v4, %s171_s24  ;;  %38 = vrot.lane.b32.xlu1 %v117_v5, %s172_s25  ;;  %v122_v11 = vld [vmem:[%s253_s0 + $0x5] sm:$0x1]   ;;  %v123_v12 = vld [vmem:[%s253_s0 + $0x4] sm:$0x1]   ;;  %s177_s13 = smov 40   ;;  %s178_s14 = smov 32  }
   0xb   :  { %v124_v13 = vld [vmem:[%s253_s0 + $0x3] sm:$0x1]   ;;  %v125_v14 = vld [vmem:[%s253_s0 + $0x2] sm:$0x1]   ;;  %s179_s19 = smov 24   ;;  %s180_s20 = smov 16  }
   0xc   :  { %v126_v15 = vld [vmem:[%s253_s0 + $0x1] sm:$0x1]   ;;  %s181_s0 = smov 8   ;;  %vm10_vm1 = vcmask 1048512   ;;  %vm16_vm2 = vcmask 982912   ;;  %vm22_vm3 = vcmask 917312  }
   0xd   :  { %vm28_vm4 = vcmask 851712   ;;  %vm34_vm5 = vcmask 786112   ;;  %vm40_vm6 = vcmask 720512   ;;  %vm46_vm7 = vcmask 654912   ;;  %s182_s23 = smov [#allocation0]  }
   0xe   :  { %44 = vrot.lane.b32.xlu0 %v118_v7, %s173_s30  ;;  %50 = vrot.lane.b32.xlu1 %v119_v8, %s174_s2  ;;  %vm52_vm8 = vcmask 589312   ;;  %vm58_vm9 = vcmask 523712   ;;  %vm64_vm10 = vcmask 458112   ;;  %vm70_vm11 = vcmask 392512   ;;  %s106_s24 = sshll.u32 %s182_s23, 4  ;;  %s107_s24 = int_to_ptr.vmem [resolvable:$true] %s106_s24 }
   0xf   :  { %vm76_vm12 = vcmask 326912   ;;  %vm82_vm13 = vcmask 261312   ;;  %vm88_vm14 = vcmask 195712   ;;  %vm94_vm15 = vcmask 130112   ;;  %s143_s25 = scalar_lea.vmem %s107_s24, 16  ;;  %s147_s26 = scalar_lea.vmem %s107_s24, 32 }
  0x10   :  { %p144_p0 = scmp.ne.s32.totalorder %s107_s24, %s143_s25  ;;  %p148_p1 = scmp.lt.s32.totalorder %s107_s24, %s107_s24 }
  0x11   :  { %p149_p2 = scmp.lt.s32.totalorder %s147_s26, %s143_s25 }
  0x12   :  { %56 = vrot.lane.b32.xlu0 %v120_v9, %s175_s7  ;;  %62 = vrot.lane.b32.xlu1 %v121_v10, %s176_s8 }
  0x13   :  { %p150_p3 = por %p149_p2, %p148_p1 }
  0x15   :  { %p151_p4 = pnand %p150_p3, %p144_p0 }
  0x16   :  { %68 = vrot.lane.b32.xlu0 %v122_v11, %s177_s13  ;;  %74 = vrot.lane.b32.xlu1 %v123_v12, %s178_s14 }
  0x1a   :  { %80 = vrot.lane.b32.xlu0 %v124_v13, %s179_s19  ;;  %86 = vrot.lane.b32.xlu1 %v125_v14, %s180_s20 }
  0x1e   :  { %92 = vrot.lane.b32.xlu0 %v126_v15, %s181_s0 }
  0x74   :  { %v9_v16 = vpop.permute.xlu0 %8   ;;  %v21_v17 = vpop.permute.xlu1 %20  }
  0x75   :  { %11 = vst.msk [vmem:[#allocation2] sm:$0x1] %vm10_vm1, %v9_v16  }
  0x78   :  { %v15_v18 = vpop.permute.xlu0 %14   ;;  %v27_v19 = vpop.permute.xlu1 %26  }
  0x79   :  { %17 = vst.msk [vmem:[#allocation2] sm:$0x1] %vm16_vm2, %v15_v18  }
  0x7a   :  { %23 = vst.msk [vmem:[#allocation2] sm:$0x1] %vm22_vm3, %v21_v17  }
  0x7b   :  { %29 = vst.msk [vmem:[#allocation2] sm:$0x1] %vm28_vm4, %v27_v19  }
  0x7c   :  { %v33_v20 = vpop.permute.xlu0 %32   ;;  %v39_v21 = vpop.permute.xlu1 %38  }
  0x7d   :  { %35 = vst.msk [vmem:[#allocation2] sm:$0x1] %vm34_vm5, %v33_v20  }
  0x7e   :  { %41 = vst.msk [vmem:[#allocation2] sm:$0x1] %vm40_vm6, %v39_v21  }
  0x80   :  { %v45_v22 = vpop.permute.xlu0 %44   ;;  %v51_v23 = vpop.permute.xlu1 %50  }
  0x81   :  { %47 = vst.msk [vmem:[#allocation2] sm:$0x1] %vm46_vm7, %v45_v22  }
  0x82   :  { %53 = vst.msk [vmem:[#allocation2] sm:$0x1] %vm52_vm8, %v51_v23  }
  0x84   :  { %v57_v24 = vpop.permute.xlu0 %56   ;;  %v63_v25 = vpop.permute.xlu1 %62  }
  0x85   :  { %59 = vst.msk [vmem:[#allocation2] sm:$0x1] %vm58_vm9, %v57_v24  }
  0x86   :  { %65 = vst.msk [vmem:[#allocation2] sm:$0x1] %vm64_vm10, %v63_v25  }
  0x88   :  { %v69_v26 = vpop.permute.xlu0 %68   ;;  %v75_v27 = vpop.permute.xlu1 %74  }
  0x89   :  { %71 = vst.msk [vmem:[#allocation2] sm:$0x1] %vm70_vm11, %v69_v26  }
  0x8a   :  { %77 = vst.msk [vmem:[#allocation2] sm:$0x1] %vm76_vm12, %v75_v27  }
  0x8c   :  { %v81_v28 = vpop.permute.xlu0 %80   ;;  %v87_v29 = vpop.permute.xlu1 %86  }
  0x8d   :  { %83 = vst.msk [vmem:[#allocation2] sm:$0x1] %vm82_vm13, %v81_v28  }
  0x8e   :  { %89 = vst.msk [vmem:[#allocation2] sm:$0x1] %vm88_vm14, %v87_v29  }
  0x90   :  { %v93_v30 = vpop.permute.xlu0 %92  }
  0x91   :  { %95 = vst.msk [vmem:[#allocation2] sm:$0x1] %vm94_vm15, %v93_v30  }
  0x98   :  { %v99_v31 = vld [vmem:[#allocation2] sm:$0x1] }
  0x99   :  { %101 = vst [vmem:[#allocation0] sm:$0x1] %v99_v31 }
  0x9a   :  { %154 = shalt.err (!%p151_p4)
}
  0x9b   :  { %s155_s29 = scalar_lea.hbm %s254_s1, 16 }
  0x9c   :  { %p156_p5 = scmp.ne.s32.totalorder %s254_s1, %s155_s29  ;;  %p159_p6 = scmp.lt.u32.totalorder %s155_s29, %s254_s1 }
  0x9e   :  { %p161_p7 = pnand %p159_p6, %p156_p5 }
  0xa0   :  { %164 = shalt.err (!%p161_p7)
}
  0xa1   :  { %109 = dma.vmem_to_hbm [thread:$0]  %s107_s24, 16, %s254_s1, [#allocation1]  }
  0xa2   :  { %165 = dma.done.wait [#allocation1], 16  }
  0xa3   :  { %166 = vsyncadd [#allocation1], 4294967280 }
  0xa4   :  { %111 = vsyncpa [#allocation1], 1 }

// kernel: fwd.20
= control target key start
LH: loop header
LB: loop body
LE: loop exit
PB: predicated region body
PF: predicated region fallthrough
CT: control target
= control target key end

     0   :  { %8 = vsyncpa [#allocation3], 0  ;;  %s258_s0 = inlined_call_operand.hbm [shape: bf16[8,128], index: 0, kind: input, shape index: {}]   ;;  %s259_s1 = inlined_call_operand.hbm [shape: f32[1,128], index: 1, kind: input, shape index: {}]   ;;  %s260_s2 = inlined_call_operand.hbm [shape: f32[1,128], index: 2, kind: input, shape index: {}]   ;;  %s261_s3 = inlined_call_operand.hbm [shape: bf16[8,128], index: 3, kind: output, shape index: {}]  }
   0x1   :  { %9 = vsyncpa [#allocation6], 0 }
   0x2   :  { %10 = vsyncpa [#allocation4], 0  ;;  %s186_s12 = smov [#allocation5]   ;;  %s187_s14 = smov [#allocation2]  }
   0x3   :  { %s27_s13 = sshll.u32 %s186_s12, 4  ;;  %s17_s15 = sshll.u32 %s187_s14, 4  ;;  %s28_s13 = int_to_ptr.vmem [resolvable:$true] %s27_s13  ;;  %s18_s15 = int_to_ptr.vmem [resolvable:$true] %s17_s15 }
   0x4   :  { %s92_s18 = scalar_lea.hbm %s259_s1, 16 }
   0x5   :  { %p93_p0 = scmp.ne.s32.totalorder %s259_s1, %s92_s18  ;;  %p96_p1 = scmp.lt.u32.totalorder %s92_s18, %s259_s1 }
   0x7   :  { %p98_p2 = pnand %p96_p1, %p93_p0 }
   0x9   :  { %101 = shalt.err (!%p98_p2)
}
   0xa   :  { %s102_s23 = scalar_lea.vmem %s28_s13, 16  ;;  %s106_s24 = scalar_lea.vmem %s28_s13, 32 }
   0xb   :  { %p103_p3 = scmp.ne.s32.totalorder %s28_s13, %s102_s23  ;;  %p107_p4 = scmp.lt.s32.totalorder %s28_s13, %s28_s13 }
   0xc   :  { %p108_p5 = scmp.lt.s32.totalorder %s106_s24, %s102_s23 }
   0xe   :  { %p109_p6 = por %p108_p5, %p107_p4 }
  0x10   :  { %p110_p7 = pnand %p109_p6, %p103_p3 }
  0x12   :  { %113 = shalt.err (!%p110_p7)
}
  0x13   :  { %30 = dma.hbm_to_vmem [thread:$0]  %s259_s1, 16, %s28_s13, [#allocation6]  }
  0x14   :  { %s114_s29 = scalar_lea.hbm %s258_s0, 64 }
  0x15   :  { %p115_p8 = scmp.ne.s32.totalorder %s258_s0, %s114_s29  ;;  %p118_p9 = scmp.lt.u32.totalorder %s114_s29, %s258_s0 }
  0x17   :  { %p120_p10 = pnand %p118_p9, %p115_p8 }
  0x19   :  { %123 = shalt.err (!%p120_p10)
}
  0x1a   :  { %s124_s7 = scalar_lea.vmem %s18_s15, 64  ;;  %p129_p12 = scmp.lt.s32.totalorder %s18_s15, %s18_s15 }
  0x1b   :  { %p125_p11 = scmp.ne.s32.totalorder %s18_s15, %s124_s7  ;;  %p130_p13 = scmp.lt.s32.totalorder %s124_s7, %s124_s7 }
  0x1d   :  { %p131_p0 = por %p130_p13, %p129_p12 }
  0x1f   :  { %p132_p1 = pnand %p131_p0, %p125_p11 }
  0x21   :  { %135 = shalt.err (!%p132_p1)
}
  0x22   :  { %20 = dma.hbm_to_vmem [thread:$0]  %s258_s0, 64, %s18_s15, [#allocation3]  }
  0x23   :  { %s188_s9 = smov [#allocation7]   ;;  %s136_s13 = scalar_lea.hbm %s260_s2, 16 }
  0x24   :  { %s37_s10 = sshll.u32 %s188_s9, 4  ;;  %p137_p2 = scmp.ne.s32.totalorder %s260_s2, %s136_s13  ;;  %s38_s10 = int_to_ptr.vmem [resolvable:$true] %s37_s10 }
  0x25   :  { %p140_p3 = scmp.lt.u32.totalorder %s136_s13, %s260_s2 }
  0x27   :  { %p142_p4 = pnand %p140_p3, %p137_p2 }
  0x29   :  { %145 = shalt.err (!%p142_p4)
}
  0x2a   :  { %s146_s19 = scalar_lea.vmem %s38_s10, 16  ;;  %s150_s0 = scalar_lea.vmem %s38_s10, 32 }
  0x2b   :  { %p147_p5 = scmp.ne.s32.totalorder %s38_s10, %s146_s19  ;;  %p151_p6 = scmp.lt.s32.totalorder %s38_s10, %s38_s10 }
  0x2c   :  { %p152_p7 = scmp.lt.s32.totalorder %s150_s0, %s146_s19 }
  0x2e   :  { %p153_p8 = por %p152_p7, %p151_p6 }
  0x30   :  { %p154_p9 = pnand %p153_p8, %p147_p5 }
  0x32   :  { %157 = shalt.err (!%p154_p9)
}
  0x33   :  { %40 = dma.hbm_to_vmem [thread:$0]  %s260_s2, 16, %s38_s10, [#allocation6]  }
  0x34   :  { %180 = dma.done.wait [#allocation3], 64  }
  0x35   :  { %181 = vsyncadd [#allocation3], 4294967232 }
  0x36   :  { %182 = dma.done.wait [#allocation6], 32  }
  0x37   :  { %183 = vsyncadd [#allocation6], 4294967264  ;;  %v50_v0 = vld [vmem:[#allocation2] sm:$0xf]  ;;  %v86_v1 = vld [vmem:[#allocation5] ss:$0 sm:$0xff] }
  0x38   :  { %v51_v2 = vunpack.c.l.bf16 %v50_v0  ;;  %v87_v3 = vld [vmem:[#allocation7] ss:$0 sm:$0xff]  ;;  %s189_s21 = smov [#allocation8]  }
  0x39   :  { %s76_s22 = sshll.u32 %s189_s21, 4  ;;  %s77_s22 = int_to_ptr.vmem [resolvable:$true] %s76_s22 }
  0x3a   :  { %v59_v4 = vmul.f32 %v86_v1, %v51_v2  ;;  %s158_s23 = scalar_lea.vmem %s77_s22, 64  ;;  %p163_p11 = scmp.lt.s32.totalorder %s77_s22, %s77_s22 }
  0x3b   :  { %p159_p10 = scmp.ne.s32.totalorder %s77_s22, %s158_s23  ;;  %p164_p12 = scmp.lt.s32.totalorder %s158_s23, %s158_s23 }
  0x3c   :  { %v67_v5 = vadd.f32 %v87_v3, %v59_v4 }
  0x3d   :  { %p165_p13 = por %p164_p12, %p163_p11 }
  0x3e   :  { %v68_v6 = vpack.c.bf16 %v67_v5, %v67_v5 }
  0x3f   :  { %p166_p0 = pnand %p165_p13, %p159_p10 }
  0x40   :  { %69 = vst [vmem:[#allocation8] sm:$0xf] %v68_v6 }
  0x41   :  { %169 = shalt.err (!%p166_p0)
}
  0x42   :  { %s170_s25 = scalar_lea.hbm %s261_s3, 64 }
  0x43   :  { %p171_p1 = scmp.ne.s32.totalorder %s261_s3, %s170_s25  ;;  %p174_p2 = scmp.lt.u32.totalorder %s170_s25, %s261_s3 }
  0x45   :  { %p176_p3 = pnand %p174_p2, %p171_p1 }
  0x47   :  { %179 = shalt.err (!%p176_p3)
}
  0x48   :  { %79 = dma.vmem_to_hbm [thread:$0]  %s77_s22, 64, %s261_s3, [#allocation4]  }
  0x49   :  { %184 = dma.done.wait [#allocation4], 64  }
  0x4a   :  { %185 = vsyncadd [#allocation4], 4294967232 }
  0x4b   :  { %83 = vsyncpa [#allocation3], 1 }
  0x4c   :  { %84 = vsyncpa [#allocation6], 1 }
  0x4d   :  { %85 = vsyncpa [#allocation4], 1 }

// kernel: tile.111
= control target key start
LH: loop header
LB: loop body
LE: loop exit
PB: predicated region body
PF: predicated region fallthrough
CT: control target
= control target key end

     0   :  { %s22_s0 = inlined_call_operand.vmem [shape: f32[16], index: 0, kind: input, shape index: {}]   ;;  %s23_s1 = inlined_call_operand.vmem [shape: f32[8,16], index: 1, kind: output, shape index: {}]  }
   0x1   :  { %v4_v0 = vld [vmem:[%s22_s0] ss:$0 sm:$0xff] }
   0x2   :  { %5 = vst [vmem:[%s23_s1] sm:$0xff] %v4_v0 }

// kernel: tile.112
= control target key start
LH: loop header
LB: loop body
LE: loop exit
PB: predicated region body
PF: predicated region fallthrough
CT: control target
= control target key end

     0   :  { %s103_s10 = smov 112   ;;  %s104_s11 = smov 80   ;;  %vm4_vm0 = vcmask 130048   ;;  %s157_s0 = inlined_call_operand.vmem [shape: f32[8,16], index: 0, kind: input, shape index: {}]   ;;  %s158_s1 = inlined_call_operand.hbm [shape: f32[1,128], index: 1, kind: output, shape index: {}]  }
   0x1   :  { %v64_v0 = vld [vmem:[%s157_s0 + $0x7] sm:$0x1]   ;;  %v66_v1 = vld [vmem:[%s157_s0 + $0x5] sm:$0x1]   ;;  %v65_v2 = vld [vmem:[%s157_s0 + $0x6] sm:$0x1]  }
   0x2   :  { %8 = vrot.lane.b32.xlu0 %v64_v0, %s103_s10  ;;  %20 = vrot.lane.b32.xlu1 %v66_v1, %s104_s11  ;;  %v67_v3 = vld [vmem:[%s157_s0 + $0x4] sm:$0x1]   ;;  %v3_v4 = vld [vmem:[%s157_s0] sm:$0x1]  }
   0x3   :  { %2 = vsyncpa [#allocation1], 0  ;;  %s105_s18 = smov 96   ;;  %s106_s19 = smov 64   ;;  %5 = vst.msk [vmem:[#allocation2] sm:$0x1] %vm4_vm0, %v3_v4  }
   0x4   :  { %v68_v5 = vld [vmem:[%s157_s0 + $0x3] sm:$0x1]   ;;  %v69_v6 = vld [vmem:[%s157_s0 + $0x2] sm:$0x1]   ;;  %s107_s24 = smov 48   ;;  %s108_s25 = smov 32  }
   0x5   :  { %v70_v7 = vld [vmem:[%s157_s0 + $0x1] sm:$0x1]   ;;  %s109_s0 = smov 16   ;;  %vm10_vm1 = vcmask 1048448   ;;  %vm16_vm2 = vcmask 917248   ;;  %vm22_vm3 = vcmask 786048  }
   0x6   :  { %14 = vrot.lane.b32.xlu0 %v65_v2, %s105_s18  ;;  %26 = vrot.lane.b32.xlu1 %v67_v3, %s106_s19  ;;  %vm28_vm4 = vcmask 654848   ;;  %vm34_vm5 = vcmask 523648   ;;  %vm40_vm6 = vcmask 392448   ;;  %vm46_vm7 = vcmask 261248   ;;  %s110_s28 = smov [#allocation0]  }
   0x7   :  { %s58_s29 = sshll.u32 %s110_s28, 4  ;;  %s59_s29 = int_to_ptr.vmem [resolvable:$true] %s58_s29 }
   0x8   :  { %s79_s30 = scalar_lea.vmem %s59_s29, 16  ;;  %s83_s2 = scalar_lea.vmem %s59_s29, 32 }
   0x9   :  { %p80_p0 = scmp.ne.s32.totalorder %s59_s29, %s79_s30  ;;  %p84_p1 = scmp.lt.s32.totalorder %s59_s29, %s59_s29 }
   0xa   :  { %32 = vrot.lane.b32.xlu0 %v68_v5, %s107_s24  ;;  %38 = vrot.lane.b32.xlu1 %v69_v6, %s108_s25  ;;  %p85_p2 = scmp.lt.s32.totalorder %s83_s2, %s79_s30 }
   0xc   :  { %p86_p3 = por %p85_p2, %p84_p1 }
   0xe   :  { %44 = vrot.lane.b32.xlu0 %v70_v7, %s109_s0  ;;  %p87_p4 = pnand %p86_p3, %p80_p0 }
  0x74   :  { %v9_v8 = vpop.permute.xlu0 %8   ;;  %v21_v9 = vpop.permute.xlu1 %20  }
  0x75   :  { %11 = vst.msk [vmem:[#allocation2] sm:$0x1] %vm10_vm1, %v9_v8  }
  0x78   :  { %v15_v10 = vpop.permute.xlu0 %14   ;;  %v27_v11 = vpop.permute.xlu1 %26  }
  0x79   :  { %17 = vst.msk [vmem:[#allocation2] sm:$0x1] %vm16_vm2, %v15_v10  }
  0x7a   :  { %23 = vst.msk [vmem:[#allocation2] sm:$0x1] %vm22_vm3, %v21_v9  }
  0x7b   :  { %29 = vst.msk [vmem:[#allocation2] sm:$0x1] %vm28_vm4, %v27_v11  }
  0x7c   :  { %v33_v12 = vpop.permute.xlu0 %32   ;;  %v39_v13 = vpop.permute.xlu1 %38  }
  0x7d   :  { %35 = vst.msk [vmem:[#allocation2] sm:$0x1] %vm34_vm5, %v33_v12  }
  0x7e   :  { %41 = vst.msk [vmem:[#allocation2] sm:$0x1] %vm40_vm6, %v39_v13  }
  0x80   :  { %v45_v14 = vpop.permute.xlu0 %44  }
  0x81   :  { %47 = vst.msk [vmem:[#allocation2] sm:$0x1] %vm46_vm7, %v45_v14  }
  0x88   :  { %v51_v15 = vld [vmem:[#allocation2] sm:$0x1] }
  0x89   :  { %53 = vst [vmem:[#allocation0] sm:$0x1] %v51_v15 }
  0x8a   :  { %90 = shalt.err (!%p87_p4)
}
  0x8b   :  { %s91_s5 = scalar_lea.hbm %s158_s1, 16 }
  0x8c   :  { %p92_p5 = scmp.ne.s32.totalorder %s158_s1, %s91_s5  ;;  %p95_p6 = scmp.lt.u32.totalorder %s91_s5, %s158_s1 }
  0x8e   :  { %p97_p7 = pnand %p95_p6, %p92_p5 }
  0x90   :  { %100 = shalt.err (!%p97_p7)
}
  0x91   :  { %61 = dma.vmem_to_hbm [thread:$0]  %s59_s29, 16, %s158_s1, [#allocation1]  }
  0x92   :  { %101 = dma.done.wait [#allocation1], 16  }
  0x93   :  { %102 = vsyncadd [#allocation1], 4294967280 }
  0x94   :  { %63 = vsyncpa [#allocation1], 1 }

// kernel: fwd.21
= control target key start
LH: loop header
LB: loop body
LE: loop exit
PB: predicated region body
PF: predicated region fallthrough
CT: control target
= control target key end

     0   :  { %11 = vsyncpa [#allocation4], 0  ;;  %s1529_s0 = inlined_call_operand.hbm [shape: bf16[32,128], index: 0, kind: input, shape index: {}]   ;;  %s1530_s1 = inlined_call_operand.hbm [shape: bf16[128,16], index: 1, kind: input, shape index: {}]   ;;  %s1531_s2 = inlined_call_operand.hbm [shape: f32[1,16], index: 2, kind: input, shape index: {}]   ;;  %s1532_s3 = inlined_call_operand.hbm [shape: bf16[32,16], index: 3, kind: output, shape index: {0}]   ;;  %s1533_s4 = inlined_call_operand.hbm [shape: f32[2,1,16], index: 4, kind: output, shape index: {1}]   ;;  %s1534_s5 = inlined_call_operand.hbm [shape: f32[2,1,16], index: 5, kind: output, shape index: {2}]  }
   0x1   :  { %13 = vsyncpa [#allocation4 + $0x1], 0 }
   0x2   :  { %14 = vsyncpa [#allocation7], 0 }
   0x3   :  { %15 = vsyncpa [#allocation5], 0 }
   0x4   :  { %17 = vsyncpa [#allocation5 + $0x1], 0 }
   0x5   :  { %18 = vsyncpa [#allocation11], 0 }
   0x6   :  { %20 = vsyncpa [#allocation11 + $0x1], 0  ;;  %s1185_s18 = smov 0   ;;  %s1187_s19 = smov 0  }
   0x7   :  { %s1189_s20 = smov 0   ;;  %s1191_s21 = smov 0  }
   0x8   :  { %s1193_s22 = smov 0   ;;  %s1195_s23 = smov 0  }
   0x9 LB: > { %s1216_s24 = sadd.s32 4294967295, %s1141_s23   ;;  %s1536_s25 = sadd.s32 4294967294, %s1141_s23   ;;  %s1141_s23 = sphi %s1195_s23, %s26_s23   ;;  %s1137_s22 = sphi %s1193_s22, %s1559_s22   ;;  %s1133_s21 = sphi %s1191_s21, %s1558_s21   ;;  %s1129_s20 = sphi %s1189_s20, %s1557_s20   ;;  %s1125_s19 = sphi %s1187_s19, %s1556_s19   ;;  %s1121_s18 = sphi %s1185_s18, %s1555_s18  }
   0xa   : > { %p67_p0 = scmp.ne.s32.totalorder %s1125_s19, %s1121_s18  ;;  %p1535_p1 = scmp.eq.s32.totalorder %s1216_s24, 0 }
   0xb   : > { %p153_p3 = scmp.eq.s32.totalorder %s1536_s25, 1  ;;  %p735_p5 = scmp.ge.s32.totalorder %s1141_s23, 1 }
   0xc   : > { %p1227_p4 = por %p1535_p1, %p67_p0  ;;  %p216_p7 = scmp.lt.s32.totalorder %s1141_s23, 3 }
   0xd   : > { %p1232_p6 = por %p153_p3, %p67_p0  ;;  %s1143_s29 = smov [#allocation6]  }
   0xe   : > { %s1540_s26 = scalar_select %p1227_p4, 1, 0 }
   0xf   : > { %s1541_s27 = scalar_select %p1232_p6, 1, 0 }
  0x10   : > { %p1237_p8 = pnand %p735_p5, %p216_p7  ;;  %s232_s30 = sshll.u32 %s1143_s29, 4  ;;  %s1241_s30 = int_to_ptr.vmem [resolvable:$true] %s232_s30 }
  0x11   : > { %s1144_s7 = smov [#allocation8]   ;;  %s909_s11 = scalar_lea.hbm %s1530_s1, 1024 }
  0x12   : > { %p818_p9 = pneg %p1237_p8  ;;  %s248_s8 = sshll.u32 %s1144_s7, 4  ;;  %s1252_s8 = int_to_ptr.vmem [resolvable:$true] %s248_s8 }
  0x13   : > { %p910_p12 = scmp.ne.s32.totalorder %s1530_s1, %s909_s11  ;;  %p916_p5 = scmp.lt.u32.totalorder %s909_s11, %s1530_s1 }
  0x14   : > { %p1248_p11 = pnand %p818_p9, %p1535_p1 }
  0x16   : > { %p911_p13 = pneg %p1248_p11 }
  0x18   : > { %p912_p0 = pnand %p911_p13, %p910_p12 }
  0x1a   : > { %p913_p3 = pneg %p912_p0 }
  0x1c   : > { %p918_p7 = pnand %p916_p5, %p913_p3 }
  0x1e   : > { %921 = shalt.err (!%p918_p7)
}
  0x1f   : > { %s922_s16 = scalar_lea.vmem %s1241_s30, 1024  ;;  %p930_p2 = scmp.lt.s32.totalorder %s1241_s30, %s1241_s30 }
  0x20   : > { %p923_p9 = scmp.ne.s32.totalorder %s1241_s30, %s922_s16  ;;  %p931_p12 = scmp.lt.s32.totalorder %s922_s16, %s922_s16 }
  0x22   : > { %p925_p10 = pnand %p923_p9, %p911_p13  ;;  %p932_p0 = por %p931_p12, %p930_p2 }
  0x24   : > { %p926_p1 = pneg %p925_p10 }
  0x26   : > { %p933_p6 = pnand %p932_p0, %p926_p1 }
  0x28   : > { %936 = shalt.err (!%p933_p6)
}
  0x29   : > { %s1537_s17 = smov 64   ;;  %s1146_s29 = smov 4  }
  0x2a   : > { %821 = dma.hbm_to_vmem [thread:$0]  (!%p1248_p11), %s1530_s1, 1024, %s1241_s30, [#allocation7], %s1537_s17, %s1537_s17, %s1146_s29  }
  0x2b   : > { %s937_s12 = scalar_lea.hbm %s1531_s2, 16 }
  0x2c   : > { %p938_p1 = scmp.ne.s32.totalorder %s1531_s2, %s937_s12  ;;  %p944_p10 = scmp.lt.u32.totalorder %s937_s12, %s1531_s2 }
  0x2e   : > { %p940_p2 = pnand %p938_p1, %p911_p13 }
  0x30   : > { %p941_p6 = pneg %p940_p2 }
  0x32   : > { %p946_p3 = pnand %p944_p10, %p941_p6 }
  0x34   : > { %949 = shalt.err (!%p946_p3)
}
  0x35   : > { %s950_s30 = scalar_lea.vmem %s1252_s8, 16  ;;  %s957_s7 = scalar_lea.vmem %s1252_s8, 32 }
  0x36   : > { %p951_p5 = scmp.ne.s32.totalorder %s1252_s8, %s950_s30  ;;  %p958_p12 = scmp.lt.s32.totalorder %s1252_s8, %s1252_s8 }
  0x37   : > { %p959_p0 = scmp.lt.s32.totalorder %s957_s7, %s950_s30 }
  0x38   : > { %p953_p7 = pnand %p951_p5, %p911_p13 }
  0x39   : > { %p960_p1 = por %p959_p0, %p958_p12 }
  0x3a   : > { %p954_p9 = pneg %p953_p7 }
  0x3c   : > { %p961_p2 = pnand %p960_p1, %p954_p9 }
  0x3e   : > { %964 = shalt.err (!%p961_p2)
}
  0x3f   : > { %824 = dma.hbm_to_vmem [thread:$0]  (!%p1248_p11), %s1531_s2, 16, %s1252_s8, [#allocation7]  }
  0x40   : > { %s45_s11 = sadd.s32 1, %s1137_s22  ;;  %s54_s12 = sadd.s32 1, %s1129_s20 }
  0x41   : > { %p47_p13 = scmp.ge.s32.totalorder %s45_s11, 2  ;;  %p61_p6 = scmp.ne.s32.totalorder %s1129_s20, %s1125_s19 }
  0x42   : > { %p62_p10 = scmp.eq.s32.totalorder %s1141_s23, 0  ;;  %p841_p3 = scmp.lt.s32.totalorder %s1141_s23, 2 }
  0x43   : > { %s1561_s11 = smov (%p47_p13, %s45_s11), 0  ;;  %p1544_p7 = scmp.eq.s32.totalorder %s1216_s24, 1 }
  0x44   : > { %p63_p5 = por %p62_p10, %p61_p6  ;;  %s49_s13 = ssub.s32 %s1137_s22, %s1561_s11 }
  0x45   : > { %p1320_p9 = por %p1544_p7, %p61_p6  ;;  %s259_s14 = sand.u32 1, %s1129_s20  }
  0x46   : > { %p52_p12 = scmp.eq.s32.totalorder %s49_s13, 0  ;;  %s739_s8 = sshll.u32 %s259_s14, 3 }
  0x47   : > { %s1545_s6 = scalar_select %p1320_p9, 1, 0 }
  0x48   : > { %s765_s15 = sshll.u32 %s1137_s22, 7  ;;  %s263_s10 = scalar_lea.vmem [#allocation3], %s739_s8 }
  0x49   : > { %s1329_s16 = scalar_select %p52_p12, %s1129_s20, %s54_s12  }
  0x4a   : > { %s1334_s9 = scalar_lea.hbm %s1529_s0, %s765_s15  ;;  %s271_s25 = sshll.u32 %s263_s10, 4  ;;  %s1342_s25 = int_to_ptr.vmem [resolvable:$true] %s271_s25 }
  0x4b   : > { %p1338_p11 = pnand %p841_p3, %p63_p5  ;;  %s1344_s12 = scalar_lea.sflag [#allocation4], %s259_s14 }
  0x4c   : > { %s965_s13 = scalar_lea.hbm %s1334_s9, 128  ;;  %s970_s30 = scalar_lea.hbm %s1529_s0, 256 }
  0x4d   : > { %p966_p0 = scmp.ne.s32.totalorder %s1334_s9, %s965_s13  ;;  %p967_p1 = pneg %p1338_p11 }
  0x4e   : > { %p971_p6 = scmp.lt.u32.totalorder %s1334_s9, %s1529_s0  ;;  %p972_p10 = scmp.lt.u32.totalorder %s970_s30, %s965_s13 }
  0x4f   : > { %p968_p2 = pnand %p967_p1, %p966_p0  ;;  %p974_p5 = scmp.lt.u32.totalorder %s965_s13, %s1334_s9 }
  0x50   : > { %p973_p3 = por %p972_p10, %p971_p6 }
  0x51   : > { %p969_p13 = pneg %p968_p2 }
  0x52   : > { %p975_p7 = por %p974_p5, %p973_p3 }
  0x54   : > { %p976_p12 = pnand %p975_p7, %p969_p13 }
  0x56   : > { %979 = shalt.err (!%p976_p12)
}
  0x57   : > { %s980_s14 = scalar_lea.vmem %s1342_s25, 128  ;;  %s1147_s8 = smov [#allocation3]  }
  0x58   : > { %p981_p0 = scmp.ne.s32.totalorder %s1342_s25, %s980_s14  ;;  %s985_s15 = sshll.u32 %s1147_s8, 4  ;;  %s986_s15 = int_to_ptr.vmem [resolvable:$false] %s985_s15 }
  0x59   : > { %s987_s7 = scalar_lea.vmem %s986_s15, 256  ;;  %p988_p4 = scmp.lt.s32.totalorder %s1342_s25, %s986_s15 }
  0x5a   : > { %p983_p2 = pnand %p981_p0, %p967_p1  ;;  %p989_p6 = scmp.lt.s32.totalorder %s987_s7, %s980_s14 }
  0x5c   : > { %p984_p9 = pneg %p983_p2  ;;  %p990_p10 = por %p989_p6, %p988_p4 }
  0x5e   : > { %p991_p3 = pnand %p990_p10, %p984_p9 }
  0x60   : > { %994 = shalt.err (!%p991_p3)
}
  0x61   : > { %s1547_s13 = smov 64   ;;  %283 = sbr.rel (%p1237_p8) target bundleno = 434 (0x1b2), region = 32 }
  0x62   : > { %828 = dma.hbm_to_vmem [thread:$0]  (!%p1338_p11), %s1334_s9, 128, %s1342_s25, %s1344_s12, %s1547_s13, %s1547_s13, %s1146_s29  }
  0x63   : > { %s1378_s30 = sand.u32 (!%p1237_p8), 1, %s1125_s19   ;;  %p1548_p4 = scmp.ne.s32.totalorder (!%p1237_p8), %s1540_s26, 0 }
  0x64   : > { %s743_s10 = sshll.u32 (!%p1237_p8), %s1378_s30, 3  ;;  %s286_s14 = scalar_lea.sflag (!%p1237_p8), [#allocation4], %s1378_s30 }
  0x65   : > { %s289_s17 = scalar_lea.vmem (!%p1237_p8), [#allocation3], %s743_s10 }
  0x68   : > { %1104 = dma.done.wait (%p1548_p4), %s286_s14, 128  }
  0x69   : > { %1106 = vsyncadd (%p1548_p4), %s286_s14, 4294967168  ;;  %p1549_p9 = scmp.eq.s32.totalorder %s1216_s24, 0 }
  0x6b   : > { %1108 = dma.done.wait (%p1549_p9), [#allocation7], 1040   ;;  %p1550_p8 = pmov %p1549_p9 }
  0x6c   : > { %vm340_vm0 = vcmask 130048   ;;  %v1148_v0 = vmov 0.0   ;;  %vm1149_vm1 = vmmov 0   ;;  %v901_v1 = vld [vmem:[#allocation6] sm:$0xff]   ;;  %v902_v2 = vld [vmem:[#allocation6 + $0x8] sm:$0xff]   ;;  %v903_v3 = vld [vmem:[#allocation6 + $0x10] sm:$0xff]  }
  0x6d   : > { %1110 = vsyncadd (%p1550_p8), [#allocation7], 4294966256  ;;  %782 = vmatprep.subr.bf16.mxu0 %v1148_v0  ;;  %798 = vmatprep.mubr.msk.bf16.mxu0 %vm1149_vm1, %v1148_v0  ;;  %341 = vst.msk [vmem:[#allocation2] sm:$0xff] %vm340_vm0, %v1148_v0  ;;  %v904_v4 = vld [vmem:[#allocation6 + $0x18] sm:$0xff]   ;;  %v905_v5 = vld [vmem:[#allocation6 + $0x20] sm:$0xff]   ;;  %s768_s25 = sshll.u32 %s1133_s21, 7 }
  0x6e   : > { %342 = vst.msk [vmem:[#allocation2 + $0x8] sm:$0xff] %vm340_vm0, %v1148_v0  ;;  %783 = vmatpush3.bf16.msra.mxu0 %v901_v1  ;;  %v770_v6 = vld [vmem:[%s289_s17] sm:$0xff]   ;;  %v906_v7 = vld [vmem:[#allocation6 + $0x28] sm:$0xff]   ;;  %v755_v25 = vld [vmem:[#allocation8] ss:$0 sm:$0xff]  ;;  %s319_s26 = scalar_lea.vmem [#allocation9], %s743_s10  ;;  %s1402_s12 = scalar_lea.hbm %s1532_s3, %s768_s25 }
  0x6f   : > { %784 = vmatprep.subr.bf16.mxu0 %v1148_v0  ;;  %v771_v8 = vunpack.c.l.bf16 %v770_v6  ;;  %v772_v9 = vunpack.c.h.bf16 %v770_v6  ;;  %v907_v10 = vld [vmem:[#allocation6 + $0x30] sm:$0xff]   ;;  %v908_v13 = vld [vmem:[#allocation6 + $0x38] sm:$0xff]   ;;  %s537_s28 = sshll.u32 %s319_s26, 4  ;;  %vm511_vm4 = vcmask 125952   ;;  %s515_s8 = scalar_lea.sflag [#allocation5], %s1378_s30  ;;  %s1404_s28 = int_to_ptr.vmem [resolvable:$true] %s537_s28 }
  0x70   : > { %s995_s15 = scalar_lea.vmem %s1404_s28, 128  ;;  %p1551_p1 = scmp.ne.s32.totalorder %s1545_s6, 0 }
  0x71   : > { %v349_v11 = vmul.f32 0.2, %v771_v8  ;;  %v350_v12 = vmul.f32 0.2, %v772_v9  ;;  %vm347_vm2 = vcmp.ge.f32.partialorder %v771_v8, 0.0  ;;  %vm348_vm3 = vcmp.ge.f32.partialorder %v772_v9, 0.0  ;;  %p996_p11 = scmp.ne.s32.totalorder %s1404_s28, %s995_s15 }
  0x72   : > { %785 = vmatpush3.bf16.msra.mxu0 %v902_v2  ;;  %s1150_s7 = smov [#allocation9]  }
  0x73   : > { %786 = vmatprep.subr.bf16.mxu0 %v1148_v0  ;;  %v351_v14 = vsel %vm347_vm2, %v771_v8, %v349_v11  ;;  %v352_v15 = vsel %vm348_vm3, %v772_v9, %v350_v12  ;;  %p997_p13 = pnand %p996_p11, %p1551_p1  ;;  %s999_s13 = sshll.u32 %s1150_s7, 4  ;;  %s1000_s13 = int_to_ptr.vmem [resolvable:$false] %s999_s13 }
  0x74   : > { %v355_v16 = vpack.c.bf16 %v352_v15, %v351_v14  ;;  %v353_v17 = vld [vmem:[#allocation2] sm:$0xff]  ;;  %s1001_s10 = scalar_lea.vmem %s1000_s13, 256  ;;  %p1002_p7 = scmp.lt.s32.totalorder %s1404_s28, %s1000_s13 }
  0x75   : > { %v354_v19 = vld [vmem:[#allocation2 + $0x8] sm:$0xff]  ;;  %p998_p5 = pneg %p997_p13  ;;  %p1003_p12 = scmp.lt.s32.totalorder %s1001_s10, %s995_s15 }
  0x76   : > { %787 = vmatpush3.bf16.msra.mxu0 %v903_v3 }
  0x77   : > { %788 = vmatprep.subr.bf16.mxu0 %v1148_v0  ;;  %p1004_p0 = por %p1003_p12, %p1002_p7 }
  0x79   : > { %p1005_p2 = pnand %p1004_p0, %p998_p5 }
  0x7a   : > { %789 = vmatpush3.bf16.msra.mxu0 %v904_v4 }
  0x7b   : > { %790 = vmatprep.subr.bf16.mxu0 %v1148_v0 }
  0x7e   : > { %791 = vmatpush3.bf16.msra.mxu0 %v905_v5 }
  0x7f   : > { %792 = vmatprep.subr.bf16.mxu0 %v1148_v0 }
  0x82   : > { %793 = vmatpush3.bf16.msra.mxu0 %v906_v7 }
  0x83   : > { %794 = vmatprep.subr.bf16.mxu0 %v1148_v0 }
  0x86   : > { %795 = vmatpush3.bf16.msra.mxu0 %v907_v10 }
  0x87   : > { %796 = vmatprep.subr.bf16.mxu0 %v1148_v0 }
  0x8a   : > { %797 = vmatpush3.bf16.msra.mxu0 %v908_v13 }
  0x8d   : > { %799 = vmatmul.mubr.bf16.vlgmr.msra.gmra.mrb[0].mxu0 %v355_v16 }
 0x160   : > { %v454_v18 = vpop.f32.mrb[0].mxu0 }
 0x161   : > { %v461_v20 = vadd.f32 %v454_v18, %v353_v17  ;;  %v800_v21 = vpop.f32.mrb[1].mxu0 }
 0x162   : > { %v457_v22 = vpop.f32.mrb[2].mxu0 }
 0x163   : > { %464 = vst.msk [vmem:[#allocation2] sm:$0xff] %vm340_vm0, %v461_v20  ;;  %v462_v23 = vadd.f32 %v457_v22, %v354_v19  ;;  %v801_v24 = vpop.f32.mrb[3].mxu0 }
 0x165   : > { %465 = vst.msk [vmem:[#allocation2 + $0x8] sm:$0xff] %vm340_vm0, %v462_v23 }
 0x16a   : > { %v469_v26 = vld [vmem:[#allocation2] sm:$0xff] }
 0x16b   : > { %v478_v27 = vadd.f32 %v755_v25, %v469_v26 }
 0x16c   : > { %v470_v28 = vld [vmem:[#allocation2 + $0x8] sm:$0xff] }
 0x16d   : > { %v479_v29 = vadd.f32 %v755_v25, %v470_v28  ;;  %v766_v30 = vpack.c.bf16 %v478_v27, %v478_v27  ;;  %v491_v31 = vmul.f32 %v478_v27, %v478_v27  ;;  %v480_v32 = vsel %vm340_vm0, %v478_v27, 0.0 }
 0x16f   : > { %v481_v33 = vsel %vm340_vm0, %v479_v29, 0.0  ;;  %v767_v34 = vpack.c.bf16 %v479_v29, %v479_v29  ;;  %512 = vst.msk [vmem:[%s319_s26] sm:$0xf] %vm511_vm4, %v766_v30  ;;  %v492_v35 = vmul.f32 %v479_v29, %v479_v29  ;;  %v493_v37 = vsel %vm340_vm0, %v491_v31, 0.0 }
 0x170   : > { %v482_v36 = vadd.f32 %v481_v33, %v480_v32 }
 0x171   : > { %513 = vst.msk [vmem:[%s319_s26 + $0x4] sm:$0xf] %vm511_vm4, %v767_v34  ;;  %v494_v38 = vsel %vm340_vm0, %v492_v35, 0.0 }
 0x172   : > { %v483_v39 = vrot.slane %v482_v36, 4 }
 0x173   : > { %1008 = shalt.err (!%p1005_p2)
}
 0x174   : > { %s1009_s14 = scalar_lea.hbm %s1402_s12, 128  ;;  %s1013_s26 = scalar_lea.hbm %s1532_s3, 256 }
 0x175   : > { %p1010_p6 = scmp.ne.s32.totalorder %s1402_s12, %s1009_s14  ;;  %p1014_p4 = scmp.lt.u32.totalorder %s1402_s12, %s1532_s3 }
 0x176   : > { %p1015_p9 = scmp.lt.u32.totalorder %s1013_s26, %s1009_s14  ;;  %p1017_p11 = scmp.lt.u32.totalorder %s1009_s14, %s1402_s12 }
 0x177   : > { %p1011_p10 = pnand %p1010_p6, %p1551_p1 }
 0x178   : > { %p1016_p8 = por %p1015_p9, %p1014_p4 }
 0x179   : > { %p1012_p3 = pneg %p1011_p10 }
 0x17a   : > { %p1018_p13 = por %p1017_p11, %p1016_p8 }
 0x17c   : > { %p1019_p5 = pnand %p1018_p13, %p1012_p3 }
 0x17e   : > { %1022 = shalt.err (!%p1019_p5)
}
 0x17f   : > { %s1151_s15 = smov 64   ;;  %s1152_s7 = smov 4   ;;  %v495_v40 = vadd.f32 %v494_v38, %v493_v37  ;;  %v484_v41 = vadd.f32 %v483_v39, %v482_v36  ;;  %vm489_vm5 = vcmask 122880  }
 0x180   : > { %812 = dma.vmem_to_hbm [thread:$0]  (%p1551_p1), %s1404_s28, 128, %s1402_s12, %s515_s8, %s1151_s15, %s1151_s15, %s1152_s7  }
 0x181   : > { %v496_v42 = vrot.slane %v495_v40, 4  ;;  %v485_v43 = vrot.slane %v484_v41, 2  ;;  %s519_s13 = sand.u32 1, %s1216_s24   ;;  %s761_s10 = sshll.u32 %s1133_s21, 4 }
 0x182   : > { %s325_s14 = scalar_lea.vmem [#allocation10], %s1378_s30  ;;  %s331_s25 = scalar_lea.vmem [#allocation12], %s1378_s30 }
 0x183   : > { %v497_v44 = vadd.f32 %v496_v42, %v495_v40  ;;  %v486_v45 = vadd.f32 %v485_v43, %v484_v41  ;;  %s554_s17 = sshll.u32 %s325_s14, 4  ;;  %s568_s26 = sshll.u32 %s331_s25, 4  ;;  %s1445_s17 = int_to_ptr.vmem [resolvable:$true] %s554_s17  ;;  %s1453_s26 = int_to_ptr.vmem [resolvable:$true] %s568_s26 }
 0x184   : > { %s1443_s8 = scalar_lea.hbm %s1533_s4, %s761_s10  ;;  %s1451_s29 = scalar_lea.hbm %s1534_s5, %s761_s10 }
 0x185   : > { %v498_v46 = vrot.slane %v497_v44, 2  ;;  %v487_v47 = vrot.slane %v486_v45, 1  ;;  %s1455_s9 = scalar_lea.sflag [#allocation11], %s519_s13  ;;  %s1023_s15 = scalar_lea.vmem %s1445_s17, 16 }
 0x186   : > { %p1024_p7 = scmp.ne.s32.totalorder %s1445_s17, %s1023_s15  ;;  %s1153_s7 = smov [#allocation10]  }
 0x187   : > { %v499_v48 = vadd.f32 %v498_v46, %v497_v44  ;;  %v488_v49 = vadd.f32 %v487_v47, %v486_v45  ;;  %s1027_s28 = sshll.u32 %s1153_s7, 4  ;;  %s1028_s28 = int_to_ptr.vmem [resolvable:$false] %s1027_s28 }
 0x188   : > { %p1025_p12 = pnand %p1024_p7, %p1551_p1  ;;  %s1029_s12 = scalar_lea.vmem %s1028_s28, 32 }
 0x189   : > { %v500_v50 = vrot.slane %v499_v48, 1  ;;  %490 = vst.msk [vmem:[%s325_s14] sm:$0x1] %vm489_vm5, %v488_v49  ;;  %p1030_p2 = scmp.lt.s32.totalorder %s1445_s17, %s1028_s28  ;;  %p1031_p6 = scmp.lt.s32.totalorder %s1029_s12, %s1023_s15 }
 0x18a   : > { %p1026_p0 = pneg %p1025_p12 }
 0x18b   : > { %v501_v51 = vadd.f32 %v500_v50, %v499_v48  ;;  %p1032_p10 = por %p1031_p6, %p1030_p2 }
 0x18d   : > { %p1033_p3 = pnand %p1032_p10, %p1026_p0 }
 0x18f   : > { %1036 = shalt.err (!%p1033_p3)
}
 0x190   : > { %s1037_s13 = scalar_lea.hbm %s1443_s8, 16  ;;  %s1041_s21 = scalar_lea.hbm %s1533_s4, 32 }
 0x191   : > { %p1038_p4 = scmp.ne.s32.totalorder %s1443_s8, %s1037_s13  ;;  %p1042_p11 = scmp.lt.u32.totalorder %s1443_s8, %s1533_s4 }
 0x192   : > { %p1043_p13 = scmp.lt.u32.totalorder %s1041_s21, %s1037_s13  ;;  %p1045_p7 = scmp.lt.u32.totalorder %s1037_s13, %s1443_s8 }
 0x193   : > { %p1039_p9 = pnand %p1038_p4, %p1551_p1 }
 0x194   : > { %p1044_p5 = por %p1043_p13, %p1042_p11 }
 0x195   : > { %p1040_p8 = pneg %p1039_p9 }
 0x196   : > { %p1046_p12 = por %p1045_p7, %p1044_p5 }
 0x198   : > { %p1047_p0 = pnand %p1046_p12, %p1040_p8 }
 0x19a   : > { %1050 = shalt.err (!%p1047_p0)
}
 0x19b   : > { %813 = dma.vmem_to_hbm [thread:$0]  (%p1551_p1), %s1445_s17, 16, %s1443_s8, %s1455_s9   ;;  %502 = vst.msk [vmem:[%s331_s25] sm:$0x1] %vm489_vm5, %v501_v51 }
 0x19c   : > { %s1051_s15 = scalar_lea.vmem %s1453_s26, 16  ;;  %s1154_s28 = smov [#allocation12]  }
 0x19d   : > { %p1052_p2 = scmp.ne.s32.totalorder %s1453_s26, %s1051_s15  ;;  %s1055_s12 = sshll.u32 %s1154_s28, 4  ;;  %s1056_s12 = int_to_ptr.vmem [resolvable:$false] %s1055_s12 }
 0x19e   : > { %s1057_s13 = scalar_lea.vmem %s1056_s12, 32  ;;  %p1058_p3 = scmp.lt.s32.totalorder %s1453_s26, %s1056_s12 }
 0x19f   : > { %p1053_p6 = pnand %p1052_p2, %p1551_p1  ;;  %p1059_p4 = scmp.lt.s32.totalorder %s1057_s13, %s1051_s15 }
 0x1a1   : > { %p1054_p10 = pneg %p1053_p6  ;;  %p1060_p9 = por %p1059_p4, %p1058_p3 }
 0x1a3   : > { %p1061_p8 = pnand %p1060_p9, %p1054_p10 }
 0x1a5   : > { %1064 = shalt.err (!%p1061_p8)
}
 0x1a6   : > { %s1065_s30 = scalar_lea.hbm %s1451_s29, 16  ;;  %s1069_s8 = scalar_lea.hbm %s1534_s5, 32 }
 0x1a7   : > { %p1066_p11 = scmp.ne.s32.totalorder %s1451_s29, %s1065_s30  ;;  %p1070_p7 = scmp.lt.u32.totalorder %s1451_s29, %s1534_s5 }
 0x1a8   : > { %p1071_p12 = scmp.lt.u32.totalorder %s1069_s8, %s1065_s30  ;;  %p1073_p2 = scmp.lt.u32.totalorder %s1065_s30, %s1451_s29 }
 0x1a9   : > { %p1067_p13 = pnand %p1066_p11, %p1551_p1 }
 0x1aa   : > { %p1072_p0 = por %p1071_p12, %p1070_p7 }
 0x1ab   : > { %p1068_p5 = pneg %p1067_p13 }
 0x1ac   : > { %p1074_p6 = por %p1073_p2, %p1072_p0 }
 0x1ae   : > { %p1075_p10 = pnand %p1074_p6, %p1068_p5 }
 0x1b0   : > { %1078 = shalt.err (!%p1075_p10)
}
 0x1b1   : > { %814 = dma.vmem_to_hbm [thread:$0]  (%p1551_p1), %s1453_s26, 16, %s1451_s29, %s1455_s9  }
 0x1b2 PF: > { %s580_s21 = sand.u32 1, %s1121_s18   ;;  %p1552_p3 = scmp.ne.s32.totalorder %s1541_s27, 0 }
 0x1b3   : > { %p1553_p4 = scmp.ge.s32.totalorder %s1141_s23, 2  ;;  %s581_s24 = scalar_lea.sflag [#allocation5], %s580_s21 }
 0x1b5   : > { %p830_p9 = pnand %p1553_p4, %p1552_p3 }
 0x1b7   : > { %1112 = dma.done.wait (!%p830_p9), %s581_s24, 128  }
 0x1b8   : > { %1114 = vsyncadd (!%p830_p9), %s581_s24, 4294967168  ;;  %s1554_s7 = sadd.s32 4294967294, %s1141_s23  }
 0x1b9   : > { %s589_s15 = sand.u32 1, %s1554_s7  }
 0x1ba   : > { %s590_s28 = scalar_lea.sflag [#allocation11], %s589_s15 }
 0x1bb   : > { %1116 = dma.done.wait (!%p830_p9), %s590_s28, 32  }
 0x1bc   : > { %1118 = vsyncadd (!%p830_p9), %s590_s28, 4294967264  ;;  %s26_s23 = sadd.s32 1, %s1141_s23   ;;  %s1555_s18 = smov %s1125_s19 }
 0x1bd   : > { %p23_p1 = scmp.ge.s32.totalorder %s26_s23, 4   ;;  %s1556_s19 = smov %s1129_s20 }
 0x1be   : > { %s1557_s20 = smov %s1329_s16  ;;  %s1558_s21 = smov %s1137_s22 }
 0x1bf   : > { %s1559_s22 = smov %s1561_s11  ;;  %25 = sbr.rel (!%p23_p1) target bundleno = 9 (0x9), region = 127 }
 0x1c6   :  { %602 = vsyncpa [#allocation4], 1 }
 0x1c7   :  { %604 = vsyncpa [#allocation4 + $0x1], 1 }
 0x1c8   :  { %605 = vsyncpa [#allocation7], 1 }
 0x1c9   :  { %606 = vsyncpa [#allocation5], 1 }
 0x1ca   :  { %608 = vsyncpa [#allocation5 + $0x1], 1 }
 0x1cb   :  { %609 = vsyncpa [#allocation11], 1 }
 0x1cc   :  { %611 = vsyncpa [#allocation11 + $0x1], 1 }

// kernel: fwd.22
= control target key start
LH: loop header
LB: loop body
LE: loop exit
PB: predicated region body
PF: predicated region fallthrough
CT: control target
= control target key end

     0   :  { %8 = vsyncpa [#allocation3], 0  ;;  %s258_s0 = inlined_call_operand.hbm [shape: bf16[4,128], index: 0, kind: input, shape index: {}]   ;;  %s259_s1 = inlined_call_operand.hbm [shape: f32[1,128], index: 1, kind: input, shape index: {}]   ;;  %s260_s2 = inlined_call_operand.hbm [shape: f32[1,128], index: 2, kind: input, shape index: {}]   ;;  %s261_s3 = inlined_call_operand.hbm [shape: bf16[4,128], index: 3, kind: output, shape index: {}]  }
   0x1   :  { %9 = vsyncpa [#allocation6], 0 }
   0x2   :  { %10 = vsyncpa [#allocation4], 0  ;;  %s186_s12 = smov [#allocation5]   ;;  %s187_s14 = smov [#allocation2]  }
   0x3   :  { %s27_s13 = sshll.u32 %s186_s12, 4  ;;  %s17_s15 = sshll.u32 %s187_s14, 4  ;;  %s28_s13 = int_to_ptr.vmem [resolvable:$true] %s27_s13  ;;  %s18_s15 = int_to_ptr.vmem [resolvable:$true] %s17_s15 }
   0x4   :  { %s92_s18 = scalar_lea.hbm %s259_s1, 16 }
   0x5   :  { %p93_p0 = scmp.ne.s32.totalorder %s259_s1, %s92_s18  ;;  %p96_p1 = scmp.lt.u32.totalorder %s92_s18, %s259_s1 }
   0x7   :  { %p98_p2 = pnand %p96_p1, %p93_p0 }
   0x9   :  { %101 = shalt.err (!%p98_p2)
}
   0xa   :  { %s102_s23 = scalar_lea.vmem %s28_s13, 16  ;;  %s106_s24 = scalar_lea.vmem %s28_s13, 32 }
   0xb   :  { %p103_p3 = scmp.ne.s32.totalorder %s28_s13, %s102_s23  ;;  %p107_p4 = scmp.lt.s32.totalorder %s28_s13, %s28_s13 }
   0xc   :  { %p108_p5 = scmp.lt.s32.totalorder %s106_s24, %s102_s23 }
   0xe   :  { %p109_p6 = por %p108_p5, %p107_p4 }
  0x10   :  { %p110_p7 = pnand %p109_p6, %p103_p3 }
  0x12   :  { %113 = shalt.err (!%p110_p7)
}
  0x13   :  { %30 = dma.hbm_to_vmem [thread:$0]  %s259_s1, 16, %s28_s13, [#allocation6]  }
  0x14   :  { %s114_s29 = scalar_lea.hbm %s258_s0, 32 }
  0x15   :  { %p115_p8 = scmp.ne.s32.totalorder %s258_s0, %s114_s29  ;;  %p118_p9 = scmp.lt.u32.totalorder %s114_s29, %s258_s0 }
  0x17   :  { %p120_p10 = pnand %p118_p9, %p115_p8 }
  0x19   :  { %123 = shalt.err (!%p120_p10)
}
  0x1a   :  { %s124_s7 = scalar_lea.vmem %s18_s15, 32  ;;  %p129_p12 = scmp.lt.s32.totalorder %s18_s15, %s18_s15 }
  0x1b   :  { %p125_p11 = scmp.ne.s32.totalorder %s18_s15, %s124_s7  ;;  %p130_p13 = scmp.lt.s32.totalorder %s124_s7, %s124_s7 }
  0x1d   :  { %p131_p0 = por %p130_p13, %p129_p12 }
  0x1f   :  { %p132_p1 = pnand %p131_p0, %p125_p11 }
  0x21   :  { %135 = shalt.err (!%p132_p1)
}
  0x22   :  { %20 = dma.hbm_to_vmem [thread:$0]  %s258_s0, 32, %s18_s15, [#allocation3]  }
  0x23   :  { %s188_s9 = smov [#allocation7]   ;;  %s136_s13 = scalar_lea.hbm %s260_s2, 16 }
  0x24   :  { %s37_s10 = sshll.u32 %s188_s9, 4  ;;  %p137_p2 = scmp.ne.s32.totalorder %s260_s2, %s136_s13  ;;  %s38_s10 = int_to_ptr.vmem [resolvable:$true] %s37_s10 }
  0x25   :  { %p140_p3 = scmp.lt.u32.totalorder %s136_s13, %s260_s2 }
  0x27   :  { %p142_p4 = pnand %p140_p3, %p137_p2 }
  0x29   :  { %145 = shalt.err (!%p142_p4)
}
  0x2a   :  { %s146_s19 = scalar_lea.vmem %s38_s10, 16  ;;  %s150_s0 = scalar_lea.vmem %s38_s10, 32 }
  0x2b   :  { %p147_p5 = scmp.ne.s32.totalorder %s38_s10, %s146_s19  ;;  %p151_p6 = scmp.lt.s32.totalorder %s38_s10, %s38_s10 }
  0x2c   :  { %p152_p7 = scmp.lt.s32.totalorder %s150_s0, %s146_s19 }
  0x2e   :  { %p153_p8 = por %p152_p7, %p151_p6 }
  0x30   :  { %p154_p9 = pnand %p153_p8, %p147_p5 }
  0x32   :  { %157 = shalt.err (!%p154_p9)
}
  0x33   :  { %40 = dma.hbm_to_vmem [thread:$0]  %s260_s2, 16, %s38_s10, [#allocation6]  }
  0x34   :  { %180 = dma.done.wait [#allocation3], 32  }
  0x35   :  { %181 = vsyncadd [#allocation3], 4294967264 }
  0x36   :  { %182 = dma.done.wait [#allocation6], 32  }
  0x37   :  { %183 = vsyncadd [#allocation6], 4294967264  ;;  %v50_v0 = vld [vmem:[#allocation2] sm:$0x3]  ;;  %v86_v1 = vld [vmem:[#allocation5] ss:$0 sm:$0xff] }
  0x38   :  { %v51_v2 = vunpack.c.l.bf16 %v50_v0  ;;  %v87_v3 = vld [vmem:[#allocation7] ss:$0 sm:$0xff]  ;;  %s189_s21 = smov [#allocation8]  }
  0x39   :  { %s76_s22 = sshll.u32 %s189_s21, 4  ;;  %s77_s22 = int_to_ptr.vmem [resolvable:$true] %s76_s22 }
  0x3a   :  { %v59_v4 = vmul.f32 %v86_v1, %v51_v2  ;;  %s158_s23 = scalar_lea.vmem %s77_s22, 32  ;;  %p163_p11 = scmp.lt.s32.totalorder %s77_s22, %s77_s22 }
  0x3b   :  { %p159_p10 = scmp.ne.s32.totalorder %s77_s22, %s158_s23  ;;  %p164_p12 = scmp.lt.s32.totalorder %s158_s23, %s158_s23 }
  0x3c   :  { %v67_v5 = vadd.f32 %v87_v3, %v59_v4 }
  0x3d   :  { %p165_p13 = por %p164_p12, %p163_p11 }
  0x3e   :  { %v68_v6 = vpack.c.bf16 %v67_v5, %v67_v5 }
  0x3f   :  { %p166_p0 = pnand %p165_p13, %p159_p10 }
  0x40   :  { %69 = vst [vmem:[#allocation8] sm:$0x3] %v68_v6 }
  0x41   :  { %169 = shalt.err (!%p166_p0)
}
  0x42   :  { %s170_s25 = scalar_lea.hbm %s261_s3, 32 }
  0x43   :  { %p171_p1 = scmp.ne.s32.totalorder %s261_s3, %s170_s25  ;;  %p174_p2 = scmp.lt.u32.totalorder %s170_s25, %s261_s3 }
  0x45   :  { %p176_p3 = pnand %p174_p2, %p171_p1 }
  0x47   :  { %179 = shalt.err (!%p176_p3)
}
  0x48   :  { %79 = dma.vmem_to_hbm [thread:$0]  %s77_s22, 32, %s261_s3, [#allocation4]  }
  0x49   :  { %184 = dma.done.wait [#allocation4], 32  }
  0x4a   :  { %185 = vsyncadd [#allocation4], 4294967264 }
  0x4b   :  { %83 = vsyncpa [#allocation3], 1 }
  0x4c   :  { %84 = vsyncpa [#allocation6], 1 }
  0x4d   :  { %85 = vsyncpa [#allocation4], 1 }

// kernel: tile.121
= control target key start
LH: loop header
LB: loop body
LE: loop exit
PB: predicated region body
PF: predicated region fallthrough
CT: control target
= control target key end

     0   :  { %s22_s0 = inlined_call_operand.vmem [shape: f32[32], index: 0, kind: input, shape index: {}]   ;;  %s23_s1 = inlined_call_operand.vmem [shape: f32[4,32], index: 1, kind: output, shape index: {}]  }
   0x1   :  { %v4_v0 = vld [vmem:[%s22_s0] ss:$0 sm:$0xff] }
   0x2   :  { %5 = vst [vmem:[%s23_s1] sm:$0xf] %v4_v0 }

// kernel: tile.122
= control target key start
LH: loop header
LB: loop body
LE: loop exit
PB: predicated region body
PF: predicated region fallthrough
CT: control target
= control target key end

     0   :  { %s101_s0 = inlined_call_operand.vmem [shape: f32[4,32], index: 0, kind: input, shape index: {}]   ;;  %s102_s1 = inlined_call_operand.hbm [shape: f32[1,128], index: 1, kind: output, shape index: {}]  }
   0x1   :  { %v5_v0 = vld [vmem:[%s101_s0] sm:$0xf] }
   0x2   :  { %6 = vst [vmem:[#allocation3] sm:$0xf] %v5_v0 }
   0x3   :  { %2 = vsyncpa [#allocation1], 0  ;;  %vm8_vm0 = vcmask 261120   ;;  %s72_s0 = smov 96   ;;  %s73_s8 = smov 32   ;;  %vm14_vm1 = vcmask 1048320  }
   0x4   :  { %s74_s9 = smov 64   ;;  %vm20_vm2 = vcmask 785920   ;;  %vm26_vm3 = vcmask 523520   ;;  %s75_s10 = smov [#allocation0]  }
   0x5   :  { %s38_s11 = sshll.u32 %s75_s10, 4  ;;  %s39_s11 = int_to_ptr.vmem [resolvable:$true] %s38_s11 }
   0x6   :  { %s48_s12 = scalar_lea.vmem %s39_s11, 16  ;;  %s52_s13 = scalar_lea.vmem %s39_s11, 32 }
   0x7   :  { %p49_p0 = scmp.ne.s32.totalorder %s39_s11, %s48_s12  ;;  %p53_p1 = scmp.lt.s32.totalorder %s39_s11, %s39_s11 }
   0x8   :  { %p54_p2 = scmp.lt.s32.totalorder %s52_s13, %s48_s12 }
   0x9   :  { %v11_v1 = vld [vmem:[#allocation3 + $0x3] sm:$0x1]   ;;  %v23_v2 = vld [vmem:[#allocation3 + $0x1] sm:$0x1]   ;;  %v7_v3 = vld [vmem:[#allocation3] sm:$0x1]  }
   0xa   :  { %12 = vrot.lane.b32.xlu0 %v11_v1, %s72_s0  ;;  %24 = vrot.lane.b32.xlu1 %v23_v2, %s73_s8  ;;  %v17_v4 = vld [vmem:[#allocation3 + $0x2] sm:$0x1]   ;;  %9 = vst.msk [vmem:[#allocation2] sm:$0x1] %vm8_vm0, %v7_v3   ;;  %p55_p3 = por %p54_p2, %p53_p1 }
   0xc   :  { %p56_p4 = pnand %p55_p3, %p49_p0 }
   0xe   :  { %18 = vrot.lane.b32.xlu0 %v17_v4, %s74_s9 }
  0x7c   :  { %v13_v5 = vpop.permute.xlu0 %12   ;;  %v25_v6 = vpop.permute.xlu1 %24  }
  0x7d   :  { %15 = vst.msk [vmem:[#allocation2] sm:$0x1] %vm14_vm1, %v13_v5  }
  0x80   :  { %v19_v7 = vpop.permute.xlu0 %18  }
  0x81   :  { %21 = vst.msk [vmem:[#allocation2] sm:$0x1] %vm20_vm2, %v19_v7  }
  0x82   :  { %27 = vst.msk [vmem:[#allocation2] sm:$0x1] %vm26_vm3, %v25_v6  }
  0x89   :  { %v31_v8 = vld [vmem:[#allocation2] sm:$0x1] }
  0x8a   :  { %33 = vst [vmem:[#allocation0] sm:$0x1] %v31_v8 }
  0x8b   :  { %59 = shalt.err (!%p56_p4)
}
  0x8c   :  { %s60_s16 = scalar_lea.hbm %s102_s1, 16 }
  0x8d   :  { %p61_p5 = scmp.ne.s32.totalorder %s102_s1, %s60_s16  ;;  %p64_p6 = scmp.lt.u32.totalorder %s60_s16, %s102_s1 }
  0x8f   :  { %p66_p7 = pnand %p64_p6, %p61_p5 }
  0x91   :  { %69 = shalt.err (!%p66_p7)
}
  0x92   :  { %41 = dma.vmem_to_hbm [thread:$0]  %s39_s11, 16, %s102_s1, [#allocation1]  }
  0x93   :  { %70 = dma.done.wait [#allocation1], 16  }
  0x94   :  { %71 = vsyncadd [#allocation1], 4294967280 }
  0x95   :  { %43 = vsyncpa [#allocation1], 1 }

// kernel: fwd.24
= control target key start
LH: loop header
LB: loop body
LE: loop exit
PB: predicated region body
PF: predicated region fallthrough
CT: control target
= control target key end

     0   :  { %8 = vsyncpa [#allocation3], 0  ;;  %s258_s0 = inlined_call_operand.hbm [shape: bf16[2,128], index: 0, kind: input, shape index: {}]   ;;  %s259_s1 = inlined_call_operand.hbm [shape: f32[1,128], index: 1, kind: input, shape index: {}]   ;;  %s260_s2 = inlined_call_operand.hbm [shape: f32[1,128], index: 2, kind: input, shape index: {}]   ;;  %s261_s3 = inlined_call_operand.hbm [shape: bf16[2,128], index: 3, kind: output, shape index: {}]  }
   0x1   :  { %9 = vsyncpa [#allocation6], 0 }
   0x2   :  { %10 = vsyncpa [#allocation4], 0  ;;  %s186_s12 = smov [#allocation5]   ;;  %s187_s14 = smov [#allocation2]  }
   0x3   :  { %s27_s13 = sshll.u32 %s186_s12, 4  ;;  %s17_s15 = sshll.u32 %s187_s14, 4  ;;  %s28_s13 = int_to_ptr.vmem [resolvable:$true] %s27_s13  ;;  %s18_s15 = int_to_ptr.vmem [resolvable:$true] %s17_s15 }
   0x4   :  { %s92_s18 = scalar_lea.hbm %s259_s1, 16 }
   0x5   :  { %p93_p0 = scmp.ne.s32.totalorder %s259_s1, %s92_s18  ;;  %p96_p1 = scmp.lt.u32.totalorder %s92_s18, %s259_s1 }
   0x7   :  { %p98_p2 = pnand %p96_p1, %p93_p0 }
   0x9   :  { %101 = shalt.err (!%p98_p2)
}
   0xa   :  { %s102_s23 = scalar_lea.vmem %s28_s13, 16  ;;  %s106_s24 = scalar_lea.vmem %s28_s13, 32 }
   0xb   :  { %p103_p3 = scmp.ne.s32.totalorder %s28_s13, %s102_s23  ;;  %p107_p4 = scmp.lt.s32.totalorder %s28_s13, %s28_s13 }
   0xc   :  { %p108_p5 = scmp.lt.s32.totalorder %s106_s24, %s102_s23 }
   0xe   :  { %p109_p6 = por %p108_p5, %p107_p4 }
  0x10   :  { %p110_p7 = pnand %p109_p6, %p103_p3 }
  0x12   :  { %113 = shalt.err (!%p110_p7)
}
  0x13   :  { %30 = dma.hbm_to_vmem [thread:$0]  %s259_s1, 16, %s28_s13, [#allocation6]  }
  0x14   :  { %s114_s29 = scalar_lea.hbm %s258_s0, 16 }
  0x15   :  { %p115_p8 = scmp.ne.s32.totalorder %s258_s0, %s114_s29  ;;  %p118_p9 = scmp.lt.u32.totalorder %s114_s29, %s258_s0 }
  0x17   :  { %p120_p10 = pnand %p118_p9, %p115_p8 }
  0x19   :  { %123 = shalt.err (!%p120_p10)
}
  0x1a   :  { %s124_s7 = scalar_lea.vmem %s18_s15, 16  ;;  %s128_s8 = scalar_lea.vmem %s18_s15, 32 }
  0x1b   :  { %p125_p11 = scmp.ne.s32.totalorder %s18_s15, %s124_s7  ;;  %p129_p12 = scmp.lt.s32.totalorder %s18_s15, %s18_s15 }
  0x1c   :  { %p130_p13 = scmp.lt.s32.totalorder %s128_s8, %s124_s7 }
  0x1e   :  { %p131_p0 = por %p130_p13, %p129_p12 }
  0x20   :  { %p132_p1 = pnand %p131_p0, %p125_p11 }
  0x22   :  { %135 = shalt.err (!%p132_p1)
}
  0x23   :  { %20 = dma.hbm_to_vmem [thread:$0]  %s258_s0, 16, %s18_s15, [#allocation3]  }
  0x24   :  { %s188_s10 = smov [#allocation7]   ;;  %s136_s14 = scalar_lea.hbm %s260_s2, 16 }
  0x25   :  { %s37_s11 = sshll.u32 %s188_s10, 4  ;;  %p137_p2 = scmp.ne.s32.totalorder %s260_s2, %s136_s14  ;;  %s38_s11 = int_to_ptr.vmem [resolvable:$true] %s37_s11 }
  0x26   :  { %p140_p3 = scmp.lt.u32.totalorder %s136_s14, %s260_s2 }
  0x28   :  { %p142_p4 = pnand %p140_p3, %p137_p2 }
  0x2a   :  { %145 = shalt.err (!%p142_p4)
}
  0x2b   :  { %s146_s20 = scalar_lea.vmem %s38_s11, 16  ;;  %s150_s0 = scalar_lea.vmem %s38_s11, 32 }
  0x2c   :  { %p147_p5 = scmp.ne.s32.totalorder %s38_s11, %s146_s20  ;;  %p151_p6 = scmp.lt.s32.totalorder %s38_s11, %s38_s11 }
  0x2d   :  { %p152_p7 = scmp.lt.s32.totalorder %s150_s0, %s146_s20 }
  0x2f   :  { %p153_p8 = por %p152_p7, %p151_p6 }
  0x31   :  { %p154_p9 = pnand %p153_p8, %p147_p5 }
  0x33   :  { %157 = shalt.err (!%p154_p9)
}
  0x34   :  { %40 = dma.hbm_to_vmem [thread:$0]  %s260_s2, 16, %s38_s11, [#allocation6]  }
  0x35   :  { %180 = dma.done.wait [#allocation3], 16  }
  0x36   :  { %181 = vsyncadd [#allocation3], 4294967280 }
  0x37   :  { %182 = dma.done.wait [#allocation6], 32  }
  0x38   :  { %183 = vsyncadd [#allocation6], 4294967264  ;;  %v50_v0 = vld [vmem:[#allocation2] sm:$0x1]  ;;  %v86_v1 = vld [vmem:[#allocation5] ss:$0 sm:$0xff] }
  0x39   :  { %v51_v2 = vunpack.c.l.bf16 %v50_v0  ;;  %v87_v3 = vld [vmem:[#allocation7] ss:$0 sm:$0xff]  ;;  %s189_s22 = smov [#allocation8]  }
  0x3a   :  { %s76_s23 = sshll.u32 %s189_s22, 4  ;;  %s77_s23 = int_to_ptr.vmem [resolvable:$true] %s76_s23 }
  0x3b   :  { %v59_v4 = vmul.f32 %v86_v1, %v51_v2  ;;  %s158_s24 = scalar_lea.vmem %s77_s23, 16  ;;  %s162_s25 = scalar_lea.vmem %s77_s23, 32 }
  0x3c   :  { %p159_p10 = scmp.ne.s32.totalorder %s77_s23, %s158_s24  ;;  %p163_p11 = scmp.lt.s32.totalorder %s77_s23, %s77_s23 }
  0x3d   :  { %v67_v5 = vadd.f32 %v87_v3, %v59_v4  ;;  %p164_p12 = scmp.lt.s32.totalorder %s162_s25, %s158_s24 }
  0x3f   :  { %v68_v6 = vpack.c.bf16 %v67_v5, %v67_v5  ;;  %p165_p13 = por %p164_p12, %p163_p11 }
  0x41   :  { %69 = vst [vmem:[#allocation8] sm:$0x1] %v68_v6  ;;  %p166_p0 = pnand %p165_p13, %p159_p10 }
  0x43   :  { %169 = shalt.err (!%p166_p0)
}
  0x44   :  { %s170_s27 = scalar_lea.hbm %s261_s3, 16 }
  0x45   :  { %p171_p1 = scmp.ne.s32.totalorder %s261_s3, %s170_s27  ;;  %p174_p2 = scmp.lt.u32.totalorder %s170_s27, %s261_s3 }
  0x47   :  { %p176_p3 = pnand %p174_p2, %p171_p1 }
  0x49   :  { %179 = shalt.err (!%p176_p3)
}
  0x4a   :  { %79 = dma.vmem_to_hbm [thread:$0]  %s77_s23, 16, %s261_s3, [#allocation4]  }
  0x4b   :  { %184 = dma.done.wait [#allocation4], 16  }
  0x4c   :  { %185 = vsyncadd [#allocation4], 4294967280 }
  0x4d   :  { %83 = vsyncpa [#allocation3], 1 }
  0x4e   :  { %84 = vsyncpa [#allocation6], 1 }
  0x4f   :  { %85 = vsyncpa [#allocation4], 1 }

// kernel: fwd.23
= control target key start
LH: loop header
LB: loop body
LE: loop exit
PB: predicated region body
PF: predicated region fallthrough
CT: control target
= control target key end

     0   :  { %11 = vsyncpa [#allocation4], 0  ;;  %s651_s0 = inlined_call_operand.hbm [shape: bf16[8,256], index: 0, kind: input, shape index: {}]   ;;  %s652_s1 = inlined_call_operand.hbm [shape: bf16[256,32], index: 1, kind: input, shape index: {}]   ;;  %s653_s2 = inlined_call_operand.hbm [shape: f32[1,32], index: 2, kind: input, shape index: {}]   ;;  %s654_s3 = inlined_call_operand.hbm [shape: bf16[8,32], index: 3, kind: output, shape index: {0}]   ;;  %s655_s4 = inlined_call_operand.hbm [shape: f32[1,1,32], index: 4, kind: output, shape index: {1}]   ;;  %s656_s5 = inlined_call_operand.hbm [shape: f32[1,1,32], index: 5, kind: output, shape index: {2}]  }
   0x1   :  { %12 = vsyncpa [#allocation7], 0 }
   0x2   :  { %13 = vsyncpa [#allocation5], 0 }
   0x3   :  { %14 = vsyncpa [#allocation11], 0  ;;  %s526_s18 = smov [#allocation6]   ;;  %s386_s22 = scalar_lea.hbm %s652_s1, 2048 }
   0x4   :  { %s30_s19 = sshll.u32 %s526_s18, 4  ;;  %p387_p0 = scmp.ne.s32.totalorder %s652_s1, %s386_s22  ;;  %s31_s19 = int_to_ptr.vmem [resolvable:$true] %s30_s19 }
   0x5   :  { %p390_p1 = scmp.lt.u32.totalorder %s386_s22, %s652_s1 }
   0x7   :  { %p392_p2 = pnand %p390_p1, %p387_p0 }
   0x9   :  { %395 = shalt.err (!%p392_p2)
}
   0xa   :  { %s396_s27 = scalar_lea.vmem %s31_s19, 2048  ;;  %p401_p4 = scmp.lt.s32.totalorder %s31_s19, %s31_s19 }
   0xb   :  { %p397_p3 = scmp.ne.s32.totalorder %s31_s19, %s396_s27  ;;  %p402_p5 = scmp.lt.s32.totalorder %s396_s27, %s396_s27 }
   0xd   :  { %p403_p6 = por %p402_p5, %p401_p4 }
   0xf   :  { %p404_p7 = pnand %p403_p6, %p397_p3 }
  0x11   :  { %407 = shalt.err (!%p404_p7)
}
  0x12   :  { %s527_s28 = smov 64   ;;  %s528_s29 = smov 4  }
  0x13   :  { %36 = dma.hbm_to_vmem [thread:$0]  %s652_s1, 2048, %s31_s19, [#allocation7], %s527_s28, %s527_s28, %s528_s29  }
  0x14   :  { %s529_s7 = smov [#allocation3]   ;;  %s530_s9 = smov [#allocation8]  }
  0x15   :  { %s21_s8 = sshll.u32 %s529_s7, 4  ;;  %s43_s10 = sshll.u32 %s530_s9, 4  ;;  %s22_s8 = int_to_ptr.vmem [resolvable:$true] %s21_s8  ;;  %s44_s10 = int_to_ptr.vmem [resolvable:$true] %s43_s10 }
  0x16   :  { %s408_s13 = scalar_lea.hbm %s651_s0, 128 }
  0x17   :  { %p409_p8 = scmp.ne.s32.totalorder %s651_s0, %s408_s13  ;;  %p412_p9 = scmp.lt.u32.totalorder %s408_s13, %s651_s0 }
  0x19   :  { %p414_p10 = pnand %p412_p9, %p409_p8 }
  0x1b   :  { %417 = shalt.err (!%p414_p10)
}
  0x1c   :  { %s418_s1 = scalar_lea.vmem %s22_s8, 128  ;;  %p423_p12 = scmp.lt.s32.totalorder %s22_s8, %s22_s8 }
  0x1d   :  { %p419_p11 = scmp.ne.s32.totalorder %s22_s8, %s418_s1  ;;  %p424_p13 = scmp.lt.s32.totalorder %s418_s1, %s418_s1 }
  0x1f   :  { %p425_p0 = por %p424_p13, %p423_p12 }
  0x21   :  { %p426_p1 = pnand %p425_p0, %p419_p11 }
  0x23   :  { %429 = shalt.err (!%p426_p1)
}
  0x24   :  { %24 = dma.hbm_to_vmem [thread:$0]  %s651_s0, 128, %s22_s8, [#allocation4]  }
  0x25   :  { %s430_s22 = scalar_lea.hbm %s653_s2, 16 }
  0x26   :  { %p431_p2 = scmp.ne.s32.totalorder %s653_s2, %s430_s22  ;;  %p434_p3 = scmp.lt.u32.totalorder %s430_s22, %s653_s2 }
  0x28   :  { %p436_p4 = pnand %p434_p3, %p431_p2 }
  0x2a   :  { %439 = shalt.err (!%p436_p4)
}
  0x2b   :  { %s440_s27 = scalar_lea.vmem %s44_s10, 16  ;;  %s444_s28 = scalar_lea.vmem %s44_s10, 32 }
  0x2c   :  { %p441_p5 = scmp.ne.s32.totalorder %s44_s10, %s440_s27  ;;  %p445_p6 = scmp.lt.s32.totalorder %s44_s10, %s44_s10 }
  0x2d   :  { %p446_p7 = scmp.lt.s32.totalorder %s444_s28, %s440_s27 }
  0x2f   :  { %p447_p8 = por %p446_p7, %p445_p6 }
  0x31   :  { %p448_p9 = pnand %p447_p8, %p441_p5 }
  0x33   :  { %451 = shalt.err (!%p448_p9)
}
  0x34   :  { %46 = dma.hbm_to_vmem [thread:$0]  %s653_s2, 16, %s44_s10, [#allocation7]  }
  0x35   :  { %518 = dma.done.wait [#allocation4], 128  }
  0x36   :  { %519 = vsyncadd [#allocation4], 4294967168 }
  0x37   :  { %520 = dma.done.wait [#allocation7], 2064  }
  0x38   :  { %521 = vsyncadd [#allocation7], 4294965232  ;;  %v370_v0 = vld [vmem:[#allocation6 + $0x40] sm:$0xff]   ;;  %v372_v2 = vld [vmem:[#allocation6 + $0x48] sm:$0xff]   ;;  %vm61_vm2 = vcmask 261120   ;;  %v531_v25 = vmov 0.0  }
  0x39   :  { %v371_v1 = vld [vmem:[#allocation6] sm:$0xff]   ;;  %339 = vmatprep.subr.bf16.mxu0 %v370_v0  ;;  %v373_v3 = vld [vmem:[#allocation6 + $0x8] sm:$0xff]   ;;  %v374_v4 = vld [vmem:[#allocation6 + $0x50] sm:$0xff]   ;;  %62 = vst.msk [vmem:[#allocation2] sm:$0xff] %vm61_vm2, %v531_v25  ;;  %s532_s2 = smov [#allocation9]   ;;  %vm277_vm3 = vcmask 257024  }
  0x3a   :  { %340 = vmatpush3.bf16.msra.mxu0 %v371_v1  ;;  %v375_v5 = vld [vmem:[#allocation6 + $0x10] sm:$0xff]   ;;  %v376_v6 = vld [vmem:[#allocation6 + $0x58] sm:$0xff]   ;;  %v378_v8 = vld [vmem:[#allocation6 + $0x60] sm:$0xff]   ;;  %s285_s30 = sshll.u32 %s532_s2, 4  ;;  %s286_s30 = int_to_ptr.vmem [resolvable:$true] %s285_s30 }
  0x3b   :  { %341 = vmatprep.subr.bf16.mxu0 %v372_v2  ;;  %v377_v7 = vld [vmem:[#allocation6 + $0x18] sm:$0xff]   ;;  %v379_v9 = vld [vmem:[#allocation6 + $0x20] sm:$0xff]   ;;  %v380_v10 = vld [vmem:[#allocation6 + $0x68] sm:$0xff]   ;;  %s452_s6 = scalar_lea.vmem %s286_s30, 64  ;;  %p457_p11 = scmp.lt.s32.totalorder %s286_s30, %s286_s30 }
  0x3c   :  { %v63_v11 = vld [vmem:[#allocation3] sm:$0xff]  ;;  %v381_v13 = vld [vmem:[#allocation6 + $0x28] sm:$0xff]   ;;  %v382_v16 = vld [vmem:[#allocation6 + $0x70] sm:$0xff]   ;;  %p453_p10 = scmp.ne.s32.totalorder %s286_s30, %s452_s6  ;;  %p458_p12 = scmp.lt.s32.totalorder %s452_s6, %s452_s6 }
  0x3d   :  { %v65_v12 = vunpack.c.h.bf16 %v63_v11  ;;  %v64_v14 = vunpack.c.l.bf16 %v63_v11  ;;  %v383_v19 = vld [vmem:[#allocation6 + $0x30] sm:$0xff]   ;;  %v384_v21 = vld [vmem:[#allocation6 + $0x78] sm:$0xff]   ;;  %v338_v33 = vld [vmem:[#allocation8] ss:$0 sm:$0xff] }
  0x3e   :  { %342 = vmatpush3.bf16.msra.mxu0 %v373_v3  ;;  %v385_v22 = vld [vmem:[#allocation6 + $0x38] sm:$0xff]   ;;  %p459_p13 = por %p458_p12, %p457_p11 }
  0x3f   :  { %343 = vmatprep.subr.bf16.mxu0 %v374_v4  ;;  %vm67_vm0 = vcmp.ge.f32.partialorder %v65_v12, 0.0  ;;  %v69_v15 = vmul.f32 0.2, %v65_v12  ;;  %v68_v20 = vmul.f32 0.2, %v64_v14  ;;  %vm66_vm1 = vcmp.ge.f32.partialorder %v64_v14, 0.0 }
  0x40   :  { %v72_v27 = vld [vmem:[#allocation2] sm:$0xff]  ;;  %p460_p0 = pnand %p459_p13, %p453_p10 }
  0x41   :  { %v71_v17 = vsel %vm67_vm0, %v65_v12, %v69_v15  ;;  %v70_v23 = vsel %vm66_vm1, %v64_v14, %v68_v20 }
  0x42   :  { %344 = vmatpush3.bf16.msra.mxu0 %v375_v5  ;;  %v74_v18 = vpack.c.bf16 %v71_v17, %v71_v17  ;;  %v73_v24 = vpack.c.bf16 %v70_v23, %v70_v23 }
  0x43   :  { %345 = vmatprep.subr.bf16.mxu0 %v376_v6 }
  0x44   :  { %235 = vmatprep.mubr.bf16.mxu0 %v74_v18 }
  0x46   :  { %346 = vmatpush3.bf16.msra.mxu0 %v377_v7 }
  0x47   :  { %347 = vmatprep.subr.bf16.mxu0 %v378_v8 }
  0x4a   :  { %348 = vmatpush3.bf16.msra.mxu0 %v379_v9 }
  0x4b   :  { %349 = vmatprep.subr.bf16.mxu0 %v380_v10 }
  0x4e   :  { %350 = vmatpush3.bf16.msra.mxu0 %v381_v13 }
  0x4f   :  { %351 = vmatprep.subr.bf16.mxu0 %v382_v16 }
  0x52   :  { %352 = vmatpush3.bf16.msra.mxu0 %v383_v19 }
  0x53   :  { %353 = vmatprep.subr.bf16.mxu0 %v384_v21 }
  0x56   :  { %354 = vmatpush3.bf16.msra.mxu0 %v385_v22 }
  0x59   :  { %236 = vmatmul.mubr.bf16.vlgmr.msra.gmra.mrb[0].mxu0 %v73_v24 }
 0x12c   :  { %v355_v26 = vpop.f32.mrb[0].mxu0 }
 0x12d   :  { %v356_v28 = vpop.f32.mrb[1].mxu0 }
 0x12e   :  { %v357_v29 = vadd.f32 %v356_v28, %v355_v26  ;;  %v358_v30 = vpop.f32.mrb[2].mxu0 }
 0x12f   :  { %v359_v31 = vpop.f32.mrb[3].mxu0 }
 0x130   :  { %v243_v32 = vadd.f32 %v357_v29, %v72_v27 }
 0x132   :  { %245 = vst.msk [vmem:[#allocation2] sm:$0xff] %vm61_vm2, %v243_v32 }
 0x139   :  { %v249_v34 = vld [vmem:[#allocation2] sm:$0xff] }
 0x13a   :  { %v257_v35 = vadd.f32 %v338_v33, %v249_v34 }
 0x13c   :  { %v258_v36 = vsel %vm61_vm2, %v257_v35, 0.0  ;;  %v276_v37 = vpack.c.bf16 %v257_v35, %v257_v35  ;;  %v267_v38 = vmul.f32 %v257_v35, %v257_v35 }
 0x13d   :  { %v259_v39 = vrot.slane %v258_v36, 4 }
 0x13e   :  { %278 = vst.msk [vmem:[#allocation9] sm:$0xf] %vm277_vm3, %v276_v37  ;;  %v268_v40 = vsel %vm61_vm2, %v267_v38, 0.0 }
 0x13f   :  { %v260_v41 = vadd.f32 %v259_v39, %v258_v36 }
 0x140   :  { %463 = shalt.err (!%p460_p0)
}
 0x141   :  { %s464_s9 = scalar_lea.hbm %s654_s3, 64 }
 0x142   :  { %p465_p1 = scmp.ne.s32.totalorder %s654_s3, %s464_s9  ;;  %p468_p2 = scmp.lt.u32.totalorder %s464_s9, %s654_s3 }
 0x144   :  { %p470_p3 = pnand %p468_p2, %p465_p1 }
 0x146   :  { %473 = shalt.err (!%p470_p3)
}
 0x147   :  { %288 = dma.vmem_to_hbm [thread:$0]  %s286_s30, 64, %s654_s3, [#allocation5]   ;;  %v269_v42 = vrot.slane %v268_v40, 4  ;;  %v261_v43 = vrot.slane %v260_v41, 2  ;;  %vm265_vm4 = vcmask 253952  }
 0x148   :  { %s533_s16 = smov [#allocation10]   ;;  %s534_s1 = smov [#allocation12]  }
 0x149   :  { %v270_v44 = vadd.f32 %v269_v42, %v268_v40  ;;  %v262_v45 = vadd.f32 %v261_v43, %v260_v41  ;;  %s295_s17 = sshll.u32 %s533_s16, 4  ;;  %s305_s18 = sshll.u32 %s534_s1, 4  ;;  %s296_s17 = int_to_ptr.vmem [resolvable:$true] %s295_s17  ;;  %s618_s18 = int_to_ptr.vmem [resolvable:$true] %s305_s18 }
 0x14a   :  { %s474_s3 = scalar_lea.vmem %s296_s17, 16  ;;  %s478_s19 = scalar_lea.vmem %s296_s17, 32 }
 0x14b   :  { %v271_v46 = vrot.slane %v270_v44, 2  ;;  %v263_v47 = vrot.slane %v262_v45, 1  ;;  %p475_p4 = scmp.ne.s32.totalorder %s296_s17, %s474_s3  ;;  %p479_p5 = scmp.lt.s32.totalorder %s296_s17, %s296_s17 }
 0x14c   :  { %p480_p6 = scmp.lt.s32.totalorder %s478_s19, %s474_s3 }
 0x14d   :  { %v272_v48 = vadd.f32 %v271_v46, %v270_v44  ;;  %v264_v49 = vadd.f32 %v263_v47, %v262_v45 }
 0x14e   :  { %p481_p7 = por %p480_p6, %p479_p5 }
 0x14f   :  { %v273_v50 = vrot.slane %v272_v48, 1  ;;  %266 = vst.msk [vmem:[#allocation10] sm:$0x1] %vm265_vm4, %v264_v49 }
 0x150   :  { %p482_p8 = pnand %p481_p7, %p475_p4 }
 0x151   :  { %v274_v51 = vadd.f32 %v273_v50, %v272_v48 }
 0x152   :  { %485 = shalt.err (!%p482_p8)
}
 0x153   :  { %s486_s22 = scalar_lea.hbm %s655_s4, 16 }
 0x154   :  { %p487_p9 = scmp.ne.s32.totalorder %s655_s4, %s486_s22  ;;  %p490_p10 = scmp.lt.u32.totalorder %s486_s22, %s655_s4 }
 0x156   :  { %p492_p11 = pnand %p490_p10, %p487_p9 }
 0x158   :  { %495 = shalt.err (!%p492_p11)
}
 0x159   :  { %298 = dma.vmem_to_hbm [thread:$0]  %s296_s17, 16, %s655_s4, [#allocation11]   ;;  %275 = vst.msk [vmem:[#allocation12] sm:$0x1] %vm265_vm4, %v274_v51 }
 0x15a   :  { %s496_s0 = scalar_lea.vmem %s618_s18, 16  ;;  %s500_s29 = scalar_lea.vmem %s618_s18, 32 }
 0x15b   :  { %p497_p12 = scmp.ne.s32.totalorder %s618_s18, %s496_s0  ;;  %p501_p13 = scmp.lt.s32.totalorder %s618_s18, %s618_s18 }
 0x15c   :  { %p502_p0 = scmp.lt.s32.totalorder %s500_s29, %s496_s0 }
 0x15e   :  { %p503_p1 = por %p502_p0, %p501_p13 }
 0x160   :  { %p504_p2 = pnand %p503_p1, %p497_p12 }
 0x162   :  { %507 = shalt.err (!%p504_p2)
}
 0x163   :  { %s508_s6 = scalar_lea.hbm %s656_s5, 16 }
 0x164   :  { %p509_p3 = scmp.ne.s32.totalorder %s656_s5, %s508_s6  ;;  %p512_p4 = scmp.lt.u32.totalorder %s508_s6, %s656_s5 }
 0x166   :  { %p514_p5 = pnand %p512_p4, %p509_p3 }
 0x168   :  { %517 = shalt.err (!%p514_p5)
}
 0x169   :  { %308 = dma.vmem_to_hbm [thread:$0]  %s618_s18, 16, %s656_s5, [#allocation11]  }
 0x16a   :  { %522 = dma.done.wait [#allocation5], 64  }
 0x16b   :  { %523 = vsyncadd [#allocation5], 4294967232 }
 0x16c   :  { %524 = dma.done.wait [#allocation11], 32  }
 0x16d   :  { %525 = vsyncadd [#allocation11], 4294967264 }
 0x16e   :  { %318 = vsyncpa [#allocation4], 1 }
 0x16f   :  { %319 = vsyncpa [#allocation7], 1 }
 0x170   :  { %320 = vsyncpa [#allocation5], 1 }
 0x171   :  { %321 = vsyncpa [#allocation11], 1 }

// kernel: fwd.34
= control target key start
LH: loop header
LB: loop body
LE: loop exit
PB: predicated region body
PF: predicated region fallthrough
CT: control target
= control target key end

     0   :  { %13 = vsyncpa [#allocation4], 0  ;;  %s564_s0 = inlined_call_operand.vmem [shape: bf16[2,1,1,9,32], index: 0, kind: input, shape index: {}, may-alias: {0,4}]   ;;  %s565_s1 = inlined_call_operand.vmem [shape: bf16[2,512], index: 1, kind: input, shape index: {}]   ;;  %s566_s2 = inlined_call_operand.hbm [shape: bf16[512,32], index: 2, kind: input, shape index: {}]   ;;  %s567_s3 = inlined_call_operand.hbm [shape: f32[1,32], index: 3, kind: input, shape index: {}]   ;;  %s568_s4 = inlined_call_operand.vmem [shape: bf16[2,1,1,9,32], index: 4, kind: output, shape index: {0}, may-alias: {0,4}]   ;;  %s569_s5 = inlined_call_operand.hbm [shape: f32[1,1,32], index: 5, kind: output, shape index: {1}]   ;;  %s570_s6 = inlined_call_operand.hbm [shape: f32[1,1,32], index: 6, kind: output, shape index: {2}]  }
   0x1   :  { %14 = vsyncpa [#allocation7], 0 }
   0x2   :  { %15 = vsyncpa [#allocation5], 0 }
   0x3   :  { %16 = vsyncpa [#allocation11], 0  ;;  %s452_s0 = smov [#allocation3]   ;;  %s356_s24 = scalar_lea.hbm %s566_s2, 4096 }
   0x4   :  { %s24_s21 = sshll.u32 %s452_s0, 4  ;;  %p357_p0 = scmp.ne.s32.totalorder %s566_s2, %s356_s24  ;;  %s25_s21 = int_to_ptr.vmem [resolvable:$true] %s24_s21 }
   0x5   :  { %p360_p1 = scmp.lt.u32.totalorder %s356_s24, %s566_s2 }
   0x7   :  { %p362_p2 = pnand %p360_p1, %p357_p0 }
   0x9   :  { %365 = shalt.err (!%p362_p2)
}
   0xa   :  { %s366_s29 = scalar_lea.vmem %s25_s21, 4096  ;;  %p371_p4 = scmp.lt.s32.totalorder %s25_s21, %s25_s21 }
   0xb   :  { %p367_p3 = scmp.ne.s32.totalorder %s25_s21, %s366_s29  ;;  %p372_p5 = scmp.lt.s32.totalorder %s366_s29, %s366_s29 }
   0xd   :  { %p373_p6 = por %p372_p5, %p371_p4 }
   0xf   :  { %p374_p7 = pnand %p373_p6, %p367_p3 }
  0x11   :  { %377 = shalt.err (!%p374_p7)
}
  0x12   :  { %s453_s30 = smov 128   ;;  %s454_s7 = smov 8  }
  0x13   :  { %30 = dma.hbm_to_vmem [thread:$0]  %s566_s2, 4096, %s25_s21, [#allocation4], %s453_s30, %s453_s30, %s454_s7  }
  0x14   :  { %s455_s10 = smov [#allocation6]   ;;  %s378_s14 = scalar_lea.hbm %s567_s3, 16 }
  0x15   :  { %s37_s11 = sshll.u32 %s455_s10, 4  ;;  %p379_p8 = scmp.ne.s32.totalorder %s567_s3, %s378_s14  ;;  %s38_s11 = int_to_ptr.vmem [resolvable:$true] %s37_s11 }
  0x16   :  { %p382_p9 = scmp.lt.u32.totalorder %s378_s14, %s567_s3 }
  0x18   :  { %p384_p10 = pnand %p382_p9, %p379_p8 }
  0x1a   :  { %387 = shalt.err (!%p384_p10)
}
  0x1b   :  { %s388_s19 = scalar_lea.vmem %s38_s11, 16  ;;  %s392_s2 = scalar_lea.vmem %s38_s11, 32 }
  0x1c   :  { %p389_p11 = scmp.ne.s32.totalorder %s38_s11, %s388_s19  ;;  %p393_p12 = scmp.lt.s32.totalorder %s38_s11, %s38_s11 }
  0x1d   :  { %p394_p13 = scmp.lt.s32.totalorder %s392_s2, %s388_s19 }
  0x1f   :  { %p395_p0 = por %p394_p13, %p393_p12 }
  0x21   :  { %p396_p1 = pnand %p395_p0, %p389_p11 }
  0x23   :  { %399 = shalt.err (!%p396_p1)
}
  0x24   :  { %40 = dma.hbm_to_vmem [thread:$0]  %s567_s3, 16, %s38_s11, [#allocation7]  }
  0x25   :  { %444 = dma.done.wait [#allocation4], 4096  }
  0x26   :  { %445 = vsyncadd [#allocation4], 4294963200 }
  0x27   :  { %446 = dma.done.wait [#allocation7], 16  }
  0x28   :  { %447 = vsyncadd [#allocation7], 4294967280  ;;  %v94_v0 = vld [vmem:[#allocation3 + $0x40] sm:$0xff]  ;;  %v95_v4 = vld [vmem:[#allocation3 + $0x48] sm:$0xff]  ;;  %v456_v10 = vmov 1983009808   ;;  %v65_v12 = vlaneseq }
  0x29   :  { %v110_v1 = vld [vmem:[#allocation3 + $0xc0] sm:$0xff]  ;;  %304 = vmatprep.subr.bf16.mxu0 %v94_v0  ;;  %v111_v5 = vld [vmem:[#allocation3 + $0xc8] sm:$0xff]  ;;  %v96_v8 = vld [vmem:[#allocation3 + $0x50] sm:$0xff]  ;;  %v63_v11 = vunpack.c.l.s4 %v456_v10  ;;  %vm52_vm1 = vcmask 254976   ;;  %v457_v51 = vmov 0.0   ;;  %vm220_vm2 = vcmask 253952  }
  0x2a   :  { %v86_v2 = vld [vmem:[#allocation3] sm:$0xff]  ;;  %326 = vmatprep.subr.bf16.mxu1 %v110_v1  ;;  %v87_v6 = vld [vmem:[#allocation3 + $0x8] sm:$0xff]  ;;  %v112_v9 = vld [vmem:[#allocation3 + $0xd0] sm:$0xff]  ;;  %v66_v18 = vshrl.u32 %v65_v12, 7  ;;  %53 = vst.msk [vmem:[#allocation2] sm:$0x3] %vm52_vm1, %v457_v51 }
  0x2b   :  { %v102_v3 = vld [vmem:[#allocation3 + $0x80] sm:$0xff]  ;;  %305 = vmatpush3.bf16.msra.mxu0 %v86_v2  ;;  %v103_v7 = vld [vmem:[#allocation3 + $0x88] sm:$0xff]  ;;  %v88_v13 = vld [vmem:[#allocation3 + $0x10] sm:$0xff]  ;;  %v64_v17 = vunpack.c.0.s8 %v63_v11  ;;  %s459_s25 = smov [#allocation10]  }
  0x2c   :  { %327 = vmatpush3.bf16.msra.mxu1 %v102_v3  ;;  %306 = vmatprep.subr.bf16.mxu0 %v95_v4  ;;  %v104_v14 = vld [vmem:[#allocation3 + $0x90] sm:$0xff]  ;;  %v97_v15 = vld [vmem:[#allocation3 + $0x58] sm:$0xff]  ;;  %v98_v23 = vld [vmem:[#allocation3 + $0x60] sm:$0xff]  ;;  %s282_s26 = sshll.u32 %s459_s25, 4  ;;  %s531_s26 = int_to_ptr.vmem [resolvable:$true] %s282_s26 }
  0x2d   :  { %328 = vmatprep.subr.bf16.mxu1 %v111_v5  ;;  %v113_v16 = vld [vmem:[#allocation3 + $0xd8] sm:$0xff]  ;;  %v114_v24 = vld [vmem:[#allocation3 + $0xe0] sm:$0xff]  ;;  %v67_v25 = vsub.s32 %v64_v17, %v66_v18  ;;  %v99_v30 = vld [vmem:[#allocation3 + $0x68] sm:$0xff] }
  0x2e   :  { %v54_v19 = vld [vmem:[%s565_s1] sm:$0xf]  ;;  %v115_v31 = vld [vmem:[#allocation3 + $0xe8] sm:$0xff]  ;;  %v100_v38 = vld [vmem:[#allocation3 + $0x70] sm:$0xff]  ;;  %s458_s1 = smov [#allocation9]  }
  0x2f   :  { %307 = vmatpush3.bf16.msra.mxu0 %v87_v6  ;;  %v89_v20 = vld [vmem:[#allocation3 + $0x18] sm:$0xff]  ;;  %v55_v22 = vunpack.c.l.bf16 %v54_v19  ;;  %v90_v27 = vld [vmem:[#allocation3 + $0x20] sm:$0xff]  ;;  %v91_v36 = vld [vmem:[#allocation3 + $0x28] sm:$0xff]  ;;  %s272_s22 = sshll.u32 %s458_s1, 4  ;;  %s273_s22 = int_to_ptr.vmem [resolvable:$true] %s272_s22 }
  0x30   :  { %329 = vmatpush3.bf16.msra.mxu1 %v103_v7  ;;  %308 = vmatprep.subr.bf16.mxu0 %v96_v8  ;;  %v105_v21 = vld [vmem:[#allocation3 + $0x98] sm:$0xff]  ;;  %v106_v28 = vld [vmem:[#allocation3 + $0xa0] sm:$0xff]  ;;  %v107_v37 = vld [vmem:[#allocation3 + $0xa8] sm:$0xff]  ;;  %s400_s27 = scalar_lea.vmem %s273_s22, 16  ;;  %s404_s28 = scalar_lea.vmem %s273_s22, 32 }
  0x31   :  { %330 = vmatprep.subr.bf16.mxu1 %v112_v9  ;;  %vm56_vm0 = vcmp.ge.f32.partialorder %v55_v22, 0.0  ;;  %v57_v26 = vmul.f32 0.2, %v55_v22  ;;  %v116_v39 = vld [vmem:[#allocation3 + $0xf0] sm:$0xff]  ;;  %v101_v45 = vld [vmem:[#allocation3 + $0x78] sm:$0xff]  ;;  %p401_p2 = scmp.ne.s32.totalorder %s273_s22, %s400_s27  ;;  %p405_p3 = scmp.lt.s32.totalorder %s273_s22, %s273_s22 }
  0x32   :  { %v92_v43 = vld [vmem:[#allocation3 + $0x30] sm:$0xff]  ;;  %v117_v46 = vld [vmem:[#allocation3 + $0xf8] sm:$0xff]  ;;  %v302_v1 = vld [vmem:[#allocation6] ss:$0 sm:$0xff]  ;;  %p406_p4 = scmp.lt.s32.totalorder %s404_s28, %s400_s27 }
  0x33   :  { %309 = vmatpush3.bf16.msra.mxu0 %v88_v13  ;;  %v58_v29 = vsel %vm56_vm0, %v55_v22, %v57_v26  ;;  %v108_v44 = vld [vmem:[#allocation3 + $0xb0] sm:$0xff]  ;;  %v93_v47 = vld [vmem:[#allocation3 + $0x38] sm:$0xff] }
  0x34   :  { %331 = vmatpush3.bf16.msra.mxu1 %v104_v14  ;;  %310 = vmatprep.subr.bf16.mxu0 %v97_v15  ;;  %v68_v32 = vrot.slane %v58_v29, %v67_v25  ;;  %v61_v33 = vcombine.high %v58_v29, %v58_v29  ;;  %v109_v48 = vld [vmem:[#allocation3 + $0xb8] sm:$0xff]  ;;  %p407_p5 = por %p406_p4, %p405_p3 }
  0x35   :  { %332 = vmatprep.subr.bf16.mxu1 %v113_v16  ;;  %v59_v60 = vld [vmem:[#allocation2] sm:$0x3] }
  0x36   :  { %v76_v34 = vcombine.high %v68_v32, %v68_v32  ;;  %v75_v35 = vrot.slane %v61_v33, %v67_v25  ;;  %v82_v49 = vpack.c.bf16 %v68_v32, %v68_v32  ;;  %p408_p6 = pnand %p407_p5, %p401_p2 }
  0x37   :  { %311 = vmatpush3.bf16.msra.mxu0 %v89_v20 }
  0x38   :  { %333 = vmatpush3.bf16.msra.mxu1 %v105_v21  ;;  %312 = vmatprep.subr.bf16.mxu0 %v98_v23  ;;  %v83_v40 = vpack.c.bf16 %v76_v34, %v76_v34  ;;  %v77_v41 = vcombine.high %v75_v35, %v75_v35  ;;  %v84_v50 = vpack.c.bf16 %v75_v35, %v75_v35 }
  0x39   :  { %334 = vmatprep.subr.bf16.mxu1 %v114_v24 }
  0x3a   :  { %v85_v42 = vpack.c.bf16 %v77_v41, %v77_v41  ;;  %150 = vmatprep.mubr.bf16.mxu0 %v83_v40 }
  0x3b   :  { %313 = vmatpush3.bf16.msra.mxu0 %v90_v27 }
  0x3c   :  { %335 = vmatpush3.bf16.msra.mxu1 %v106_v28  ;;  %314 = vmatprep.subr.bf16.mxu0 %v99_v30 }
  0x3d   :  { %336 = vmatprep.subr.bf16.mxu1 %v115_v31  ;;  %190 = vmatprep.mubr.bf16.mxu1 %v85_v42 }
  0x3f   :  { %315 = vmatpush3.bf16.msra.mxu0 %v91_v36 }
  0x40   :  { %337 = vmatpush3.bf16.msra.mxu1 %v107_v37  ;;  %316 = vmatprep.subr.bf16.mxu0 %v100_v38 }
  0x41   :  { %338 = vmatprep.subr.bf16.mxu1 %v116_v39 }
  0x43   :  { %317 = vmatpush3.bf16.msra.mxu0 %v92_v43 }
  0x44   :  { %339 = vmatpush3.bf16.msra.mxu1 %v108_v44  ;;  %318 = vmatprep.subr.bf16.mxu0 %v101_v45 }
  0x45   :  { %340 = vmatprep.subr.bf16.mxu1 %v117_v46 }
  0x47   :  { %319 = vmatpush3.bf16.msra.mxu0 %v93_v47 }
  0x48   :  { %341 = vmatpush3.bf16.msra.mxu1 %v109_v48 }
  0x4a   :  { %151 = vmatmul.mubr.bf16.vlgmr.msra.gmra.mrb[0].mxu0 %v82_v49 }
  0x4b   :  { %191 = vmatmul.mubr.bf16.vlgmr.msra.gmra.mrb[0].mxu1 %v84_v50 }
 0x11d   :  { %v320_v52 = vpop.f32.mrb[0].mxu0 }
 0x11e   :  { %v342_v53 = vpop.f32.mrb[0].mxu1  ;;  %v321_v54 = vpop.f32.mrb[1].mxu0 }
 0x11f   :  { %v343_v55 = vpop.f32.mrb[1].mxu1  ;;  %v322_v56 = vadd.f32 %v321_v54, %v320_v52  ;;  %v323_v58 = vpop.f32.mrb[2].mxu0 }
 0x120   :  { %v344_v57 = vadd.f32 %v343_v55, %v342_v53  ;;  %v345_v59 = vpop.f32.mrb[2].mxu1  ;;  %v324_v61 = vpop.f32.mrb[3].mxu0 }
 0x121   :  { %v346_v62 = vpop.f32.mrb[3].mxu1 }
 0x122   :  { %v193_v63 = vadd.f32 %v344_v57, %v322_v56 }
 0x124   :  { %v198_v0 = vadd.f32 %v193_v63, %v59_v60 }
 0x126   :  { %200 = vst.msk [vmem:[#allocation2] sm:$0x3] %vm52_vm1, %v198_v0 }
 0x12d   :  { %v204_v2 = vld [vmem:[#allocation2] sm:$0x3] }
 0x12e   :  { %v212_v3 = vadd.f32 %v302_v1, %v204_v2 }
 0x130   :  { %v213_v4 = vsel %vm52_vm1, %v212_v3, 0.0  ;;  %v231_v5 = vpack.c.bf16 %v212_v3, %v212_v3  ;;  %v222_v6 = vmul.f32 %v212_v3, %v212_v3 }
 0x131   :  { %v214_v7 = vrot.slane %v213_v4, 4 }
 0x132   :  { %232 = vst.msk [vmem:[#allocation8] sm:$0x1] %vm220_vm2, %v231_v5  ;;  %v223_v8 = vsel %vm52_vm1, %v222_v6, 0.0 }
 0x133   :  { %v215_v9 = vadd.f32 %v214_v7, %v213_v4  ;;  %v224_v10 = vrot.slane %v223_v8, 4 }
 0x135   :  { %v216_v11 = vrot.slane %v215_v9, 2  ;;  %v225_v12 = vadd.f32 %v224_v10, %v223_v8 }
 0x137   :  { %v217_v13 = vadd.f32 %v216_v11, %v215_v9  ;;  %v226_v14 = vrot.slane %v225_v12, 2 }
 0x139   :  { %v218_v15 = vrot.slane %v217_v13, 1  ;;  %v250_v16 = vld [vmem:[#allocation8] sm:$0x1]  ;;  %v227_v17 = vadd.f32 %v226_v14, %v225_v12 }
 0x13a   :  { %303 = vst [vmem:[%s568_s4 + $0x4] sm:$0x1] %v250_v16 }
 0x13b   :  { %v219_v18 = vadd.f32 %v218_v15, %v217_v13  ;;  %v228_v19 = vrot.slane %v227_v17, 1 }
 0x13d   :  { %221 = vst.msk [vmem:[#allocation9] sm:$0x1] %vm220_vm2, %v219_v18  ;;  %v229_v20 = vadd.f32 %v228_v19, %v227_v17 }
 0x13e   :  { %411 = shalt.err (!%p408_p6)
}
 0x13f   :  { %s412_s30 = scalar_lea.hbm %s569_s5, 16 }
 0x140   :  { %p413_p7 = scmp.ne.s32.totalorder %s569_s5, %s412_s30  ;;  %p416_p8 = scmp.lt.u32.totalorder %s412_s30, %s569_s5 }
 0x142   :  { %p418_p9 = pnand %p416_p8, %p413_p7 }
 0x144   :  { %421 = shalt.err (!%p418_p9)
}
 0x145   :  { %275 = dma.vmem_to_hbm [thread:$0]  %s273_s22, 16, %s569_s5, [#allocation5]   ;;  %230 = vst.msk [vmem:[#allocation10] sm:$0x1] %vm220_vm2, %v229_v20 }
 0x146   :  { %s422_s13 = scalar_lea.vmem %s531_s26, 16  ;;  %s426_s14 = scalar_lea.vmem %s531_s26, 32 }
 0x147   :  { %p423_p10 = scmp.ne.s32.totalorder %s531_s26, %s422_s13  ;;  %p427_p11 = scmp.lt.s32.totalorder %s531_s26, %s531_s26 }
 0x148   :  { %p428_p12 = scmp.lt.s32.totalorder %s426_s14, %s422_s13 }
 0x14a   :  { %p429_p13 = por %p428_p12, %p427_p11 }
 0x14c   :  { %p430_p0 = pnand %p429_p13, %p423_p10 }
 0x14e   :  { %433 = shalt.err (!%p430_p0)
}
 0x14f   :  { %s434_s17 = scalar_lea.hbm %s570_s6, 16 }
 0x150   :  { %p435_p1 = scmp.ne.s32.totalorder %s570_s6, %s434_s17  ;;  %p438_p2 = scmp.lt.u32.totalorder %s434_s17, %s570_s6 }
 0x152   :  { %p440_p3 = pnand %p438_p2, %p435_p1 }
 0x154   :  { %443 = shalt.err (!%p440_p3)
}
 0x155   :  { %285 = dma.vmem_to_hbm [thread:$0]  %s531_s26, 16, %s570_s6, [#allocation11]  }
 0x156   :  { %448 = dma.done.wait [#allocation5], 16  }
 0x157   :  { %449 = vsyncadd [#allocation5], 4294967280 }
 0x158   :  { %450 = dma.done.wait [#allocation11], 16  }
 0x159   :  { %451 = vsyncadd [#allocation11], 4294967280 }
 0x15a   :  { %294 = vsyncpa [#allocation4], 1 }
 0x15b   :  { %295 = vsyncpa [#allocation7], 1 }
 0x15c   :  { %296 = vsyncpa [#allocation5], 1 }
 0x15d   :  { %297 = vsyncpa [#allocation11], 1 }

// kernel: fwd.25
= control target key start
LH: loop header
LB: loop body
LE: loop exit
PB: predicated region body
PF: predicated region fallthrough
CT: control target
= control target key end

     0   :  { %11 = vsyncpa [#allocation4], 0  ;;  %s737_s0 = inlined_call_operand.hbm [shape: bf16[2,288], index: 0, kind: input, shape index: {}]   ;;  %s738_s1 = inlined_call_operand.hbm [shape: bf16[288,128], index: 1, kind: input, shape index: {}]   ;;  %s739_s2 = inlined_call_operand.hbm [shape: f32[1,128], index: 2, kind: input, shape index: {}]   ;;  %s740_s3 = inlined_call_operand.hbm [shape: bf16[2,128], index: 3, kind: output, shape index: {0}]   ;;  %s741_s4 = inlined_call_operand.hbm [shape: f32[1,1,128], index: 4, kind: output, shape index: {1}]   ;;  %s742_s5 = inlined_call_operand.hbm [shape: f32[1,1,128], index: 5, kind: output, shape index: {2}]  }
   0x1   :  { %12 = vsyncpa [#allocation7], 0 }
   0x2   :  { %13 = vsyncpa [#allocation5], 0 }
   0x3   :  { %14 = vsyncpa [#allocation11], 0  ;;  %s616_s18 = smov [#allocation6]   ;;  %s476_s22 = scalar_lea.hbm %s738_s1, 2304 }
   0x4   :  { %s30_s19 = sshll.u32 %s616_s18, 4  ;;  %p477_p0 = scmp.ne.s32.totalorder %s738_s1, %s476_s22  ;;  %s31_s19 = int_to_ptr.vmem [resolvable:$true] %s30_s19 }
   0x5   :  { %p480_p1 = scmp.lt.u32.totalorder %s476_s22, %s738_s1 }
   0x7   :  { %p482_p2 = pnand %p480_p1, %p477_p0 }
   0x9   :  { %485 = shalt.err (!%p482_p2)
}
   0xa   :  { %s486_s27 = scalar_lea.vmem %s31_s19, 2304  ;;  %p491_p4 = scmp.lt.s32.totalorder %s31_s19, %s31_s19 }
   0xb   :  { %p487_p3 = scmp.ne.s32.totalorder %s31_s19, %s486_s27  ;;  %p492_p5 = scmp.lt.s32.totalorder %s486_s27, %s486_s27 }
   0xd   :  { %p493_p6 = por %p492_p5, %p491_p4 }
   0xf   :  { %p494_p7 = pnand %p493_p6, %p487_p3 }
  0x11   :  { %497 = shalt.err (!%p494_p7)
}
  0x12   :  { %s617_s28 = smov 64   ;;  %s618_s29 = smov 4  }
  0x13   :  { %36 = dma.hbm_to_vmem [thread:$0]  %s738_s1, 2304, %s31_s19, [#allocation7], %s617_s28, %s617_s28, %s618_s29  }
  0x14   :  { %s619_s7 = smov [#allocation3]   ;;  %s620_s9 = smov [#allocation8]  }
  0x15   :  { %s21_s8 = sshll.u32 %s619_s7, 4  ;;  %s43_s10 = sshll.u32 %s620_s9, 4  ;;  %s22_s8 = int_to_ptr.vmem [resolvable:$true] %s21_s8  ;;  %s44_s10 = int_to_ptr.vmem [resolvable:$true] %s43_s10 }
  0x16   :  { %s498_s13 = scalar_lea.hbm %s737_s0, 48 }
  0x17   :  { %p499_p8 = scmp.ne.s32.totalorder %s737_s0, %s498_s13  ;;  %p502_p9 = scmp.lt.u32.totalorder %s498_s13, %s737_s0 }
  0x19   :  { %p504_p10 = pnand %p502_p9, %p499_p8 }
  0x1b   :  { %507 = shalt.err (!%p504_p10)
}
  0x1c   :  { %s508_s1 = scalar_lea.vmem %s22_s8, 48  ;;  %s512_s18 = scalar_lea.vmem %s22_s8, 64 }
  0x1d   :  { %p509_p11 = scmp.ne.s32.totalorder %s22_s8, %s508_s1  ;;  %p513_p12 = scmp.lt.s32.totalorder %s22_s8, %s22_s8 }
  0x1e   :  { %p514_p13 = scmp.lt.s32.totalorder %s512_s18, %s508_s1 }
  0x20   :  { %p515_p0 = por %p514_p13, %p513_p12 }
  0x22   :  { %p516_p1 = pnand %p515_p0, %p509_p11 }
  0x24   :  { %519 = shalt.err (!%p516_p1)
}
  0x25   :  { %24 = dma.hbm_to_vmem [thread:$0]  %s737_s0, 48, %s22_s8, [#allocation4]  }
  0x26   :  { %s520_s23 = scalar_lea.hbm %s739_s2, 16 }
  0x27   :  { %p521_p2 = scmp.ne.s32.totalorder %s739_s2, %s520_s23  ;;  %p524_p3 = scmp.lt.u32.totalorder %s520_s23, %s739_s2 }
  0x29   :  { %p526_p4 = pnand %p524_p3, %p521_p2 }
  0x2b   :  { %529 = shalt.err (!%p526_p4)
}
  0x2c   :  { %s530_s28 = scalar_lea.vmem %s44_s10, 16  ;;  %s534_s29 = scalar_lea.vmem %s44_s10, 32 }
  0x2d   :  { %p531_p5 = scmp.ne.s32.totalorder %s44_s10, %s530_s28  ;;  %p535_p6 = scmp.lt.s32.totalorder %s44_s10, %s44_s10 }
  0x2e   :  { %p536_p7 = scmp.lt.s32.totalorder %s534_s29, %s530_s28 }
  0x30   :  { %p537_p8 = por %p536_p7, %p535_p6 }
  0x32   :  { %p538_p9 = pnand %p537_p8, %p531_p5 }
  0x34   :  { %541 = shalt.err (!%p538_p9)
}
  0x35   :  { %46 = dma.hbm_to_vmem [thread:$0]  %s739_s2, 16, %s44_s10, [#allocation7]  }
  0x36   :  { %608 = dma.done.wait [#allocation4], 48  }
  0x37   :  { %609 = vsyncadd [#allocation4], 4294967248 }
  0x38   :  { %610 = dma.done.wait [#allocation7], 2320  }
  0x39   :  { %611 = vsyncadd [#allocation7], 4294964976  ;;  %v621_v0 = vmov 0.0   ;;  %vm622_vm0 = vmmov 0   ;;  %v458_v1 = vld [vmem:[#allocation6 + $0x40] sm:$0xff]   ;;  %v460_v3 = vld [vmem:[#allocation6 + $0x48] sm:$0xff]   ;;  %v71_v11 = vlaneseq }
  0x3a   :  { %61 = vst [vmem:[#allocation2] sm:$0x3] %v621_v0  ;;  %439 = vmatprep.subr.bf16.mxu1 %v621_v0  ;;  %443 = vmatprep.mubr.msk.bf16.mxu1 %vm622_vm0, %v621_v0  ;;  %v459_v2 = vld [vmem:[#allocation6] sm:$0xff]   ;;  %v461_v4 = vld [vmem:[#allocation6 + $0x8] sm:$0xff]   ;;  %v462_v5 = vld [vmem:[#allocation6 + $0x50] sm:$0xff]   ;;  %vm233_vm1 = vcmask 261120  }
  0x3b   :  { %414 = vmatprep.subr.bf16.mxu0 %v458_v1  ;;  %v463_v6 = vld [vmem:[#allocation6 + $0x10] sm:$0xff]   ;;  %v464_v7 = vld [vmem:[#allocation6 + $0x58] sm:$0xff]   ;;  %v623_v9 = vmov 1983009808   ;;  %v466_v12 = vld [vmem:[#allocation6 + $0x60] sm:$0xff]   ;;  %v72_v16 = vshrl.u32 %v71_v11, 7 }
  0x3c   :  { %415 = vmatpush3.bf16.msra.mxu0 %v459_v2  ;;  %v465_v8 = vld [vmem:[#allocation6 + $0x18] sm:$0xff]   ;;  %v69_v10 = vunpack.c.l.s4 %v623_v9  ;;  %v472_v13 = vld [vmem:[#allocation6 + $0x80] sm:$0xff]   ;;  %v468_v17 = vld [vmem:[#allocation6 + $0x68] sm:$0xff]   ;;  %vm331_vm2 = vcmask 1041408   ;;  %s624_s2 = smov [#allocation9]  }
  0x3d   :  { %416 = vmatprep.subr.bf16.mxu0 %v460_v3  ;;  %v467_v14 = vld [vmem:[#allocation6 + $0x20] sm:$0xff]   ;;  %440 = vmatpush3.bf16.msra.mxu1 %v472_v13  ;;  %v475_v18 = vld [vmem:[#allocation6 + $0x88] sm:$0xff]   ;;  %v62_v19 = vld [vmem:[#allocation3] sm:$0x7]  ;;  %s357_s6 = sshll.u32 %s624_s2, 4  ;;  %s358_s6 = int_to_ptr.vmem [resolvable:$true] %s357_s6 }
  0x3e   :  { %v70_v15 = vunpack.c.0.s8 %v69_v10  ;;  %441 = vmatprep.subr.bf16.mxu1 %v621_v0  ;;  %v469_v20 = vld [vmem:[#allocation6 + $0x28] sm:$0xff]   ;;  %v63_v21 = vunpack.c.l.bf16 %v62_v19  ;;  %v470_v23 = vld [vmem:[#allocation6 + $0x70] sm:$0xff]   ;;  %v473_v28 = vld [vmem:[#allocation6 + $0x78] sm:$0xff]   ;;  %s542_s7 = scalar_lea.vmem %s358_s6, 16  ;;  %s546_s8 = scalar_lea.vmem %s358_s6, 32 }
  0x3f   :  { %v471_v25 = vld [vmem:[#allocation6 + $0x30] sm:$0xff]   ;;  %v474_v31 = vld [vmem:[#allocation6 + $0x38] sm:$0xff]   ;;  %p543_p10 = scmp.ne.s32.totalorder %s358_s6, %s542_s7  ;;  %p547_p11 = scmp.lt.s32.totalorder %s358_s6, %s358_s6 }
  0x40   :  { %417 = vmatpush3.bf16.msra.mxu0 %v461_v4  ;;  %v73_v22 = vsub.s32 %v70_v15, %v72_v16  ;;  %v64_v24 = vmax.f32 %v63_v21, 0.0  ;;  %v413_v47 = vld [vmem:[#allocation8] ss:$0 sm:$0xff]  ;;  %p548_p12 = scmp.lt.s32.totalorder %s546_s8, %s542_s7 }
  0x41   :  { %418 = vmatprep.subr.bf16.mxu0 %v462_v5  ;;  %442 = vmatpush3.bf16.msra.mxu1 %v475_v18  ;;  %v65_v43 = vld [vmem:[#allocation2] sm:$0x3] }
  0x42   :  { %v67_v26 = vcombine.high %v64_v24, %v64_v24  ;;  %v74_v27 = vrot.slane %v64_v24, %v73_v22  ;;  %p549_p13 = por %p548_p12, %p547_p11 }
  0x44   :  { %419 = vmatpush3.bf16.msra.mxu0 %v463_v6  ;;  %v81_v29 = vrot.slane %v67_v26, %v73_v22  ;;  %v82_v30 = vcombine.high %v74_v27, %v74_v27  ;;  %v86_v34 = vpack.c.bf16 %v74_v27, %v74_v27  ;;  %p550_p0 = pnand %p549_p13, %p543_p10 }
  0x45   :  { %420 = vmatprep.subr.bf16.mxu0 %v464_v7 }
  0x46   :  { %v87_v32 = vpack.c.bf16 %v82_v30, %v82_v30  ;;  %v88_v33 = vpack.c.bf16 %v81_v29, %v81_v29 }
  0x48   :  { %421 = vmatpush3.bf16.msra.mxu0 %v465_v8  ;;  %269 = vmatprep.mubr.bf16.mxu0 %v87_v32 }
  0x49   :  { %422 = vmatprep.subr.bf16.mxu0 %v466_v12  ;;  %444 = vmatmul.mubr.msk.bf16.vlgmr.msra.gmra.mrb[0].mxu1 %vm233_vm1, %v88_v33 }
  0x4c   :  { %423 = vmatpush3.bf16.msra.mxu0 %v467_v14 }
  0x4d   :  { %424 = vmatprep.subr.bf16.mxu0 %v468_v17 }
  0x50   :  { %425 = vmatpush3.bf16.msra.mxu0 %v469_v20 }
  0x51   :  { %426 = vmatprep.subr.bf16.mxu0 %v470_v23 }
  0x54   :  { %427 = vmatpush3.bf16.msra.mxu0 %v471_v25 }
  0x55   :  { %428 = vmatprep.subr.bf16.mxu0 %v473_v28 }
  0x58   :  { %429 = vmatpush3.bf16.msra.mxu0 %v474_v31 }
  0x5b   :  { %270 = vmatmul.mubr.bf16.vlgmr.msra.gmra.mrb[0].mxu0 %v86_v34 }
 0x11c   :  { %v311_v35 = vpop.f32.mrb[0].mxu1 }
 0x11d   :  { %v445_v36 = vpop.f32.mrb[1].mxu1 }
 0x11e   :  { %v314_v37 = vpop.f32.mrb[2].mxu1 }
 0x11f   :  { %v446_v38 = vpop.f32.mrb[3].mxu1 }
 0x12e   :  { %v430_v39 = vpop.f32.mrb[0].mxu0 }
 0x12f   :  { %v431_v40 = vpop.f32.mrb[1].mxu0 }
 0x130   :  { %v432_v41 = vadd.f32 %v431_v40, %v430_v39  ;;  %v433_v42 = vpop.f32.mrb[2].mxu0 }
 0x131   :  { %v434_v44 = vpop.f32.mrb[3].mxu0 }
 0x132   :  { %v312_v45 = vadd.f32 %v432_v41, %v311_v35 }
 0x134   :  { %v317_v46 = vadd.f32 %v312_v45, %v65_v43 }
 0x136   :  { %318 = vst [vmem:[#allocation2] sm:$0x3] %v317_v46 }
 0x13d   :  { %v322_v48 = vld [vmem:[#allocation2] sm:$0x3] }
 0x13e   :  { %v330_v49 = vadd.f32 %v413_v47, %v322_v48 }
 0x140   :  { %v332_v50 = vsel %vm331_vm2, %v330_v49, 0.0  ;;  %v349_v51 = vpack.c.bf16 %v330_v49, %v330_v49  ;;  %v340_v52 = vmul.f32 %v330_v49, %v330_v49 }
 0x141   :  { %v333_v53 = vrot.slane %v332_v50, 4 }
 0x142   :  { %350 = vst [vmem:[#allocation9] sm:$0x1] %v349_v51  ;;  %v341_v54 = vsel %vm331_vm2, %v340_v52, 0.0 }
 0x143   :  { %v334_v55 = vadd.f32 %v333_v53, %v332_v50 }
 0x144   :  { %553 = shalt.err (!%p550_p0)
}
 0x145   :  { %s554_s11 = scalar_lea.hbm %s740_s3, 16 }
 0x146   :  { %p555_p1 = scmp.ne.s32.totalorder %s740_s3, %s554_s11  ;;  %p558_p2 = scmp.lt.u32.totalorder %s554_s11, %s740_s3 }
 0x148   :  { %p560_p3 = pnand %p558_p2, %p555_p1 }
 0x14a   :  { %563 = shalt.err (!%p560_p3)
}
 0x14b   :  { %360 = dma.vmem_to_hbm [thread:$0]  %s358_s6, 16, %s740_s3, [#allocation5]   ;;  %v342_v56 = vrot.slane %v341_v54, 4  ;;  %v335_v57 = vrot.slane %v334_v55, 2 }
 0x14c   :  { %s625_s1 = smov [#allocation10]   ;;  %s626_s19 = smov [#allocation12]  }
 0x14d   :  { %v343_v58 = vadd.f32 %v342_v56, %v341_v54  ;;  %v336_v59 = vadd.f32 %v335_v57, %v334_v55  ;;  %s367_s18 = sshll.u32 %s625_s1, 4  ;;  %s377_s20 = sshll.u32 %s626_s19, 4  ;;  %s368_s18 = int_to_ptr.vmem [resolvable:$true] %s367_s18  ;;  %s705_s20 = int_to_ptr.vmem [resolvable:$true] %s377_s20 }
 0x14e   :  { %s564_s21 = scalar_lea.vmem %s368_s18, 16  ;;  %s568_s3 = scalar_lea.vmem %s368_s18, 32 }
 0x14f   :  { %v344_v60 = vrot.slane %v343_v58, 2  ;;  %v337_v61 = vrot.slane %v336_v59, 1  ;;  %p565_p4 = scmp.ne.s32.totalorder %s368_s18, %s564_s21  ;;  %p569_p5 = scmp.lt.s32.totalorder %s368_s18, %s368_s18 }
 0x150   :  { %p570_p6 = scmp.lt.s32.totalorder %s568_s3, %s564_s21 }
 0x151   :  { %v345_v62 = vadd.f32 %v344_v60, %v343_v58  ;;  %v338_v63 = vadd.f32 %v337_v61, %v336_v59 }
 0x152   :  { %p571_p7 = por %p570_p6, %p569_p5 }
 0x153   :  { %v346_v0 = vrot.slane %v345_v62, 1  ;;  %339 = vst [vmem:[#allocation10] sm:$0x1] %v338_v63 }
 0x154   :  { %p572_p8 = pnand %p571_p7, %p565_p4 }
 0x155   :  { %v347_v1 = vadd.f32 %v346_v0, %v345_v62 }
 0x156   :  { %575 = shalt.err (!%p572_p8)
}
 0x157   :  { %s576_s24 = scalar_lea.hbm %s741_s4, 16 }
 0x158   :  { %p577_p9 = scmp.ne.s32.totalorder %s741_s4, %s576_s24  ;;  %p580_p10 = scmp.lt.u32.totalorder %s576_s24, %s741_s4 }
 0x15a   :  { %p582_p11 = pnand %p580_p10, %p577_p9 }
 0x15c   :  { %585 = shalt.err (!%p582_p11)
}
 0x15d   :  { %370 = dma.vmem_to_hbm [thread:$0]  %s368_s18, 16, %s741_s4, [#allocation11]   ;;  %348 = vst [vmem:[#allocation12] sm:$0x1] %v347_v1 }
 0x15e   :  { %s586_s30 = scalar_lea.vmem %s705_s20, 16  ;;  %s590_s2 = scalar_lea.vmem %s705_s20, 32 }
 0x15f   :  { %p587_p12 = scmp.ne.s32.totalorder %s705_s20, %s586_s30  ;;  %p591_p13 = scmp.lt.s32.totalorder %s705_s20, %s705_s20 }
 0x160   :  { %p592_p0 = scmp.lt.s32.totalorder %s590_s2, %s586_s30 }
 0x162   :  { %p593_p1 = por %p592_p0, %p591_p13 }
 0x164   :  { %p594_p2 = pnand %p593_p1, %p587_p12 }
 0x166   :  { %597 = shalt.err (!%p594_p2)
}
 0x167   :  { %s598_s8 = scalar_lea.hbm %s742_s5, 16 }
 0x168   :  { %p599_p3 = scmp.ne.s32.totalorder %s742_s5, %s598_s8  ;;  %p602_p4 = scmp.lt.u32.totalorder %s598_s8, %s742_s5 }
 0x16a   :  { %p604_p5 = pnand %p602_p4, %p599_p3 }
 0x16c   :  { %607 = shalt.err (!%p604_p5)
}
 0x16d   :  { %380 = dma.vmem_to_hbm [thread:$0]  %s705_s20, 16, %s742_s5, [#allocation11]  }
 0x16e   :  { %612 = dma.done.wait [#allocation5], 16  }
 0x16f   :  { %613 = vsyncadd [#allocation5], 4294967280 }
 0x170   :  { %614 = dma.done.wait [#allocation11], 32  }
 0x171   :  { %615 = vsyncadd [#allocation11], 4294967264 }
 0x172   :  { %390 = vsyncpa [#allocation4], 1 }
 0x173   :  { %391 = vsyncpa [#allocation7], 1 }
 0x174   :  { %392 = vsyncpa [#allocation5], 1 }
 0x175   :  { %393 = vsyncpa [#allocation11], 1 }

// kernel: tile.141
= control target key start
LH: loop header
LB: loop body
LE: loop exit
PB: predicated region body
PF: predicated region fallthrough
CT: control target
= control target key end

     0   :  { %s22_s0 = inlined_call_operand.vmem [shape: f32[16], index: 0, kind: input, shape index: {}]   ;;  %s23_s1 = inlined_call_operand.vmem [shape: f32[4,16], index: 1, kind: output, shape index: {}]  }
   0x1   :  { %v4_v0 = vld [vmem:[%s22_s0] ss:$0 sm:$0xff] }
   0x2   :  { %5 = vst [vmem:[%s23_s1] sm:$0xf] %v4_v0 }

// kernel: tile.148
= control target key start
LH: loop header
LB: loop body
LE: loop exit
PB: predicated region body
PF: predicated region fallthrough
CT: control target
= control target key end

     0   :  { %vm7_vm0 = vcmask 130048   ;;  %s37_s8 = smov 16   ;;  %s38_s9 = smov 32   ;;  %vm13_vm1 = vcmask 523648   ;;  %vm19_vm2 = vcmask 392448   ;;  %vm25_vm3 = vcmask 261248   ;;  %s55_s0 = inlined_call_operand.vmem [shape: f32[4,16], index: 0, kind: input, shape index: {}]   ;;  %s56_s1 = inlined_call_operand.vmem [shape: f32[64], index: 1, kind: output, shape index: {}]  }
   0x1   :  { %v4_v0 = vld [vmem:[%s55_s0] sm:$0xf]  ;;  %s36_s0 = smov 48  }
   0x2   :  { %5 = vst [vmem:[#allocation1] sm:$0xf] %v4_v0 }
   0x9   :  { %v10_v1 = vld [vmem:[#allocation1 + $0x3] sm:$0x1]   ;;  %v22_v2 = vld [vmem:[#allocation1 + $0x1] sm:$0x1]   ;;  %v6_v3 = vld [vmem:[#allocation1] sm:$0x1]  }
   0xa   :  { %11 = vrot.lane.b32.xlu0 %v10_v1, %s36_s0  ;;  %23 = vrot.lane.b32.xlu1 %v22_v2, %s37_s8  ;;  %v16_v4 = vld [vmem:[#allocation1 + $0x2] sm:$0x1]   ;;  %8 = vst.msk [vmem:[#allocation0] sm:$0x1] %vm7_vm0, %v6_v3  }
   0xe   :  { %17 = vrot.lane.b32.xlu0 %v16_v4, %s38_s9 }
  0x7c   :  { %v12_v5 = vpop.permute.xlu0 %11   ;;  %v24_v6 = vpop.permute.xlu1 %23  }
  0x7d   :  { %14 = vst.msk [vmem:[#allocation0] sm:$0x1] %vm13_vm1, %v12_v5  }
  0x80   :  { %v18_v7 = vpop.permute.xlu0 %17  }
  0x81   :  { %20 = vst.msk [vmem:[#allocation0] sm:$0x1] %vm19_vm2, %v18_v7  }
  0x82   :  { %26 = vst.msk [vmem:[#allocation0] sm:$0x1] %vm25_vm3, %v24_v6  }
  0x89   :  { %v30_v8 = vld [vmem:[#allocation0] sm:$0x1] }
  0x8a   :  { %32 = vst [vmem:[%s56_s1] sm:$0x1] %v30_v8 }

// kernel: tile.150
= control target key start
LH: loop header
LB: loop body
LE: loop exit
PB: predicated region body
PF: predicated region fallthrough
CT: control target
= control target key end

     0   :  { %s85_s0 = inlined_call_operand.vmem [shape: f32[2,64], index: 0, kind: input, shape index: {}]   ;;  %s86_s1 = inlined_call_operand.hbm [shape: f32[1,128], index: 1, kind: output, shape index: {}]  }
   0x1   :  { %v5_v0 = vld [vmem:[%s85_s0] sm:$0x3] }
   0x2   :  { %6 = vst [vmem:[#allocation3] sm:$0x3] %v5_v0 }
   0x3   :  { %2 = vsyncpa [#allocation1], 0  ;;  %vm8_vm0 = vcmask 523264   ;;  %s58_s0 = smov 64   ;;  %vm14_vm1 = vcmask 1048064   ;;  %s59_s8 = smov [#allocation0]  }
   0x4   :  { %s26_s9 = sshll.u32 %s59_s8, 4  ;;  %s27_s9 = int_to_ptr.vmem [resolvable:$true] %s26_s9 }
   0x5   :  { %s34_s10 = scalar_lea.vmem %s27_s9, 16  ;;  %s38_s11 = scalar_lea.vmem %s27_s9, 32 }
   0x6   :  { %p35_p0 = scmp.ne.s32.totalorder %s27_s9, %s34_s10  ;;  %p39_p1 = scmp.lt.s32.totalorder %s27_s9, %s27_s9 }
   0x7   :  { %p40_p2 = scmp.lt.s32.totalorder %s38_s11, %s34_s10 }
   0x9   :  { %v11_v1 = vld [vmem:[#allocation3 + $0x1] sm:$0x1]   ;;  %v7_v2 = vld [vmem:[#allocation3] sm:$0x1]   ;;  %p41_p3 = por %p40_p2, %p39_p1 }
   0xa   :  { %12 = vrot.lane.b32.xlu0 %v11_v1, %s58_s0  ;;  %9 = vst.msk [vmem:[#allocation2] sm:$0x1] %vm8_vm0, %v7_v2  }
   0xb   :  { %p42_p4 = pnand %p41_p3, %p35_p0 }
  0x7c   :  { %v13_v3 = vpop.permute.xlu0 %12  }
  0x7d   :  { %15 = vst.msk [vmem:[#allocation2] sm:$0x1] %vm14_vm1, %v13_v3  }
  0x84   :  { %v19_v4 = vld [vmem:[#allocation2] sm:$0x1] }
  0x85   :  { %21 = vst [vmem:[#allocation0] sm:$0x1] %v19_v4 }
  0x86   :  { %45 = shalt.err (!%p42_p4)
}
  0x87   :  { %s46_s14 = scalar_lea.hbm %s86_s1, 16 }
  0x88   :  { %p47_p5 = scmp.ne.s32.totalorder %s86_s1, %s46_s14  ;;  %p50_p6 = scmp.lt.u32.totalorder %s46_s14, %s86_s1 }
  0x8a   :  { %p52_p7 = pnand %p50_p6, %p47_p5 }
  0x8c   :  { %55 = shalt.err (!%p52_p7)
}
  0x8d   :  { %29 = dma.vmem_to_hbm [thread:$0]  %s27_s9, 16, %s86_s1, [#allocation1]  }
  0x8e   :  { %56 = dma.done.wait [#allocation1], 16  }
  0x8f   :  { %57 = vsyncadd [#allocation1], 4294967280 }
  0x90   :  { %31 = vsyncpa [#allocation1], 1 }

// kernel: tile.149
= control target key start
LH: loop header
LB: loop body
LE: loop exit
PB: predicated region body
PF: predicated region fallthrough
CT: control target
= control target key end

     0   :  { %s22_s0 = inlined_call_operand.vmem [shape: f32[64], index: 0, kind: input, shape index: {}]   ;;  %s23_s1 = inlined_call_operand.vmem [shape: f32[2,64], index: 1, kind: output, shape index: {}]  }
   0x1   :  { %v4_v0 = vld [vmem:[%s22_s0] ss:$0 sm:$0xff] }
   0x2   :  { %5 = vst [vmem:[%s23_s1] sm:$0x3] %v4_v0 }

// kernel: fwd.27
= control target key start
LH: loop header
LB: loop body
LE: loop exit
PB: predicated region body
PF: predicated region fallthrough
CT: control target
= control target key end

     0   :  { %11 = vsyncpa [#allocation4], 0  ;;  %s990_s0 = inlined_call_operand.hbm [shape: bf16[8,576], index: 0, kind: input, shape index: {}]   ;;  %s991_s1 = inlined_call_operand.hbm [shape: bf16[576,64], index: 1, kind: input, shape index: {}]   ;;  %s992_s2 = inlined_call_operand.hbm [shape: f32[1,64], index: 2, kind: input, shape index: {}]   ;;  %s993_s3 = inlined_call_operand.hbm [shape: bf16[8,64], index: 3, kind: output, shape index: {0}]   ;;  %s994_s4 = inlined_call_operand.hbm [shape: f32[1,1,64], index: 4, kind: output, shape index: {1}]   ;;  %s995_s5 = inlined_call_operand.hbm [shape: f32[1,1,64], index: 5, kind: output, shape index: {2}]  }
   0x1   :  { %12 = vsyncpa [#allocation7], 0 }
   0x2   :  { %13 = vsyncpa [#allocation5], 0 }
   0x3   :  { %14 = vsyncpa [#allocation11], 0  ;;  %s857_s18 = smov [#allocation6]   ;;  %s717_s22 = scalar_lea.hbm %s991_s1, 4608 }
   0x4   :  { %s30_s19 = sshll.u32 %s857_s18, 4  ;;  %p718_p0 = scmp.ne.s32.totalorder %s991_s1, %s717_s22  ;;  %s31_s19 = int_to_ptr.vmem [resolvable:$true] %s30_s19 }
   0x5   :  { %p721_p1 = scmp.lt.u32.totalorder %s717_s22, %s991_s1 }
   0x7   :  { %p723_p2 = pnand %p721_p1, %p718_p0 }
   0x9   :  { %726 = shalt.err (!%p723_p2)
}
   0xa   :  { %s727_s27 = scalar_lea.vmem %s31_s19, 4608  ;;  %p732_p4 = scmp.lt.s32.totalorder %s31_s19, %s31_s19 }
   0xb   :  { %p728_p3 = scmp.ne.s32.totalorder %s31_s19, %s727_s27  ;;  %p733_p5 = scmp.lt.s32.totalorder %s727_s27, %s727_s27 }
   0xd   :  { %p734_p6 = por %p733_p5, %p732_p4 }
   0xf   :  { %p735_p7 = pnand %p734_p6, %p728_p3 }
  0x11   :  { %738 = shalt.err (!%p735_p7)
}
  0x12   :  { %s858_s28 = smov 64   ;;  %s859_s29 = smov 4  }
  0x13   :  { %36 = dma.hbm_to_vmem [thread:$0]  %s991_s1, 4608, %s31_s19, [#allocation7], %s858_s28, %s858_s28, %s859_s29  }
  0x14   :  { %s860_s7 = smov [#allocation3]   ;;  %s861_s9 = smov [#allocation8]  }
  0x15   :  { %s21_s8 = sshll.u32 %s860_s7, 4  ;;  %s43_s10 = sshll.u32 %s861_s9, 4  ;;  %s22_s8 = int_to_ptr.vmem [resolvable:$true] %s21_s8  ;;  %s44_s10 = int_to_ptr.vmem [resolvable:$true] %s43_s10 }
  0x16   :  { %s739_s13 = scalar_lea.hbm %s990_s0, 320 }
  0x17   :  { %p740_p8 = scmp.ne.s32.totalorder %s990_s0, %s739_s13  ;;  %p743_p9 = scmp.lt.u32.totalorder %s739_s13, %s990_s0 }
  0x19   :  { %p745_p10 = pnand %p743_p9, %p740_p8 }
  0x1b   :  { %748 = shalt.err (!%p745_p10)
}
  0x1c   :  { %s749_s1 = scalar_lea.vmem %s22_s8, 320  ;;  %p754_p12 = scmp.lt.s32.totalorder %s22_s8, %s22_s8 }
  0x1d   :  { %p750_p11 = scmp.ne.s32.totalorder %s22_s8, %s749_s1  ;;  %p755_p13 = scmp.lt.s32.totalorder %s749_s1, %s749_s1 }
  0x1f   :  { %p756_p0 = por %p755_p13, %p754_p12 }
  0x21   :  { %p757_p1 = pnand %p756_p0, %p750_p11 }
  0x23   :  { %760 = shalt.err (!%p757_p1)
}
  0x24   :  { %24 = dma.hbm_to_vmem [thread:$0]  %s990_s0, 320, %s22_s8, [#allocation4]  }
  0x25   :  { %s761_s22 = scalar_lea.hbm %s992_s2, 16 }
  0x26   :  { %p762_p2 = scmp.ne.s32.totalorder %s992_s2, %s761_s22  ;;  %p765_p3 = scmp.lt.u32.totalorder %s761_s22, %s992_s2 }
  0x28   :  { %p767_p4 = pnand %p765_p3, %p762_p2 }
  0x2a   :  { %770 = shalt.err (!%p767_p4)
}
  0x2b   :  { %s771_s27 = scalar_lea.vmem %s44_s10, 16  ;;  %s775_s28 = scalar_lea.vmem %s44_s10, 32 }
  0x2c   :  { %p772_p5 = scmp.ne.s32.totalorder %s44_s10, %s771_s27  ;;  %p776_p6 = scmp.lt.s32.totalorder %s44_s10, %s44_s10 }
  0x2d   :  { %p777_p7 = scmp.lt.s32.totalorder %s775_s28, %s771_s27 }
  0x2f   :  { %p778_p8 = por %p777_p7, %p776_p6 }
  0x31   :  { %p779_p9 = pnand %p778_p8, %p772_p5 }
  0x33   :  { %782 = shalt.err (!%p779_p9)
}
  0x34   :  { %46 = dma.hbm_to_vmem [thread:$0]  %s992_s2, 16, %s44_s10, [#allocation7]  }
  0x35   :  { %849 = dma.done.wait [#allocation4], 320  }
  0x36   :  { %850 = vsyncadd [#allocation4], 4294966976 }
  0x37   :  { %851 = dma.done.wait [#allocation7], 4624  }
  0x38   :  { %852 = vsyncadd [#allocation7], 4294962672  ;;  %vm61_vm0 = vcmask 523264   ;;  %v862_v0 = vmov 0.0   ;;  %v681_v1 = vld [vmem:[#allocation6 + $0x40] sm:$0xff]   ;;  %v685_v5 = vld [vmem:[#allocation6 + $0x48] sm:$0xff]  }
  0x39   :  { %62 = vst.msk [vmem:[#allocation2] sm:$0xff] %vm61_vm0, %v862_v0  ;;  %v682_v2 = vld [vmem:[#allocation6 + $0xc0] sm:$0xff]   ;;  %610 = vmatprep.subr.bf16.mxu0 %v681_v1  ;;  %v686_v6 = vld [vmem:[#allocation6 + $0xc8] sm:$0xff]   ;;  %v689_v9 = vld [vmem:[#allocation6 + $0x50] sm:$0xff]   ;;  %vm863_vm1 = vmmov 0   ;;  %s864_s2 = smov [#allocation9]  }
  0x3a   :  { %v683_v3 = vld [vmem:[#allocation6] sm:$0xff]   ;;  %632 = vmatprep.subr.bf16.mxu1 %v682_v2  ;;  %v687_v7 = vld [vmem:[#allocation6 + $0x8] sm:$0xff]   ;;  %v690_v10 = vld [vmem:[#allocation6 + $0xd0] sm:$0xff]   ;;  %s535_s30 = sshll.u32 %s864_s2, 4  ;;  %vm527_vm2 = vcmask 519168   ;;  %s536_s30 = int_to_ptr.vmem [resolvable:$true] %s535_s30 }
  0x3b   :  { %v684_v4 = vld [vmem:[#allocation6 + $0x80] sm:$0xff]   ;;  %611 = vmatpush3.bf16.msra.mxu0 %v683_v3  ;;  %v688_v8 = vld [vmem:[#allocation6 + $0x88] sm:$0xff]   ;;  %v691_v11 = vld [vmem:[#allocation6 + $0x10] sm:$0xff]   ;;  %s783_s6 = scalar_lea.vmem %s536_s30, 64  ;;  %p788_p11 = scmp.lt.s32.totalorder %s536_s30, %s536_s30 }
  0x3c   :  { %633 = vmatpush3.bf16.msra.mxu1 %v684_v4  ;;  %612 = vmatprep.subr.bf16.mxu0 %v685_v5  ;;  %v692_v12 = vld [vmem:[#allocation6 + $0x90] sm:$0xff]   ;;  %v693_v13 = vld [vmem:[#allocation6 + $0x58] sm:$0xff]   ;;  %v697_v17 = vld [vmem:[#allocation6 + $0x60] sm:$0xff]   ;;  %p784_p10 = scmp.ne.s32.totalorder %s536_s30, %s783_s6  ;;  %p789_p12 = scmp.lt.s32.totalorder %s783_s6, %s783_s6 }
  0x3d   :  { %634 = vmatprep.subr.bf16.mxu1 %v686_v6  ;;  %v694_v14 = vld [vmem:[#allocation6 + $0xd8] sm:$0xff]   ;;  %v698_v18 = vld [vmem:[#allocation6 + $0xe0] sm:$0xff]   ;;  %v701_v21 = vld [vmem:[#allocation6 + $0x68] sm:$0xff]  }
  0x3e   :  { %v695_v15 = vld [vmem:[#allocation6 + $0x18] sm:$0xff]   ;;  %v699_v19 = vld [vmem:[#allocation6 + $0x20] sm:$0xff]   ;;  %v702_v22 = vld [vmem:[#allocation6 + $0xe8] sm:$0xff]   ;;  %p790_p13 = por %p789_p12, %p788_p11 }
  0x3f   :  { %613 = vmatpush3.bf16.msra.mxu0 %v687_v7  ;;  %v696_v16 = vld [vmem:[#allocation6 + $0x98] sm:$0xff]   ;;  %v700_v20 = vld [vmem:[#allocation6 + $0xa0] sm:$0xff]   ;;  %v703_v23 = vld [vmem:[#allocation6 + $0x28] sm:$0xff]  }
  0x40   :  { %635 = vmatpush3.bf16.msra.mxu1 %v688_v8  ;;  %614 = vmatprep.subr.bf16.mxu0 %v689_v9  ;;  %v704_v24 = vld [vmem:[#allocation6 + $0xa8] sm:$0xff]   ;;  %v705_v25 = vld [vmem:[#allocation6 + $0x70] sm:$0xff]   ;;  %v709_v29 = vld [vmem:[#allocation6 + $0x78] sm:$0xff]   ;;  %p791_p0 = pnand %p790_p13, %p784_p10 }
  0x41   :  { %636 = vmatprep.subr.bf16.mxu1 %v690_v10  ;;  %v706_v26 = vld [vmem:[#allocation6 + $0xf0] sm:$0xff]   ;;  %v710_v30 = vld [vmem:[#allocation6 + $0xf8] sm:$0xff]   ;;  %v713_v47 = vld [vmem:[#allocation6 + $0x100] sm:$0xff]  }
  0x42   :  { %v707_v27 = vld [vmem:[#allocation6 + $0x30] sm:$0xff]   ;;  %v711_v31 = vld [vmem:[#allocation6 + $0x38] sm:$0xff]   ;;  %v714_v48 = vld [vmem:[#allocation6 + $0x108] sm:$0xff]  }
  0x43   :  { %615 = vmatpush3.bf16.msra.mxu0 %v691_v11  ;;  %v708_v28 = vld [vmem:[#allocation6 + $0xb0] sm:$0xff]   ;;  %v712_v32 = vld [vmem:[#allocation6 + $0xb8] sm:$0xff]   ;;  %v76_v3 = vld [vmem:[#allocation2] sm:$0xff] }
  0x44   :  { %637 = vmatpush3.bf16.msra.mxu1 %v692_v12  ;;  %616 = vmatprep.subr.bf16.mxu0 %v693_v13  ;;  %v63_v33 = vld [vmem:[#allocation3] sm:$0xff]  ;;  %v64_v34 = vld [vmem:[#allocation3 + $0x8] sm:$0xff]  ;;  %v65_v49 = vld [vmem:[#allocation3 + $0x10] sm:$0xf] }
  0x45   :  { %638 = vmatprep.subr.bf16.mxu1 %v694_v14  ;;  %v66_v35 = vunpack.c.l.bf16 %v63_v33  ;;  %v67_v36 = vunpack.c.h.bf16 %v63_v33  ;;  %v68_v37 = vunpack.c.l.bf16 %v64_v34  ;;  %v69_v38 = vunpack.c.h.bf16 %v64_v34  ;;  %v715_v51 = vld [vmem:[#allocation6 + $0x110] sm:$0xff]   ;;  %v716_v53 = vld [vmem:[#allocation6 + $0x118] sm:$0xff]   ;;  %v609_v9 = vld [vmem:[#allocation8] ss:$0 sm:$0xff] }
  0x46   :  { %v70_v50 = vunpack.c.l.bf16 %v65_v49 }
  0x47   :  { %617 = vmatpush3.bf16.msra.mxu0 %v695_v15  ;;  %v71_v39 = vmax.f32 %v66_v35, 0.0  ;;  %v72_v40 = vmax.f32 %v67_v36, 0.0  ;;  %v73_v41 = vmax.f32 %v68_v37, 0.0  ;;  %v74_v42 = vmax.f32 %v69_v38, 0.0 }
  0x48   :  { %639 = vmatpush3.bf16.msra.mxu1 %v696_v16  ;;  %618 = vmatprep.subr.bf16.mxu0 %v697_v17  ;;  %v75_v52 = vmax.f32 %v70_v50, 0.0 }
  0x49   :  { %640 = vmatprep.subr.bf16.mxu1 %v698_v18  ;;  %v78_v43 = vpack.c.bf16 %v72_v40, %v72_v40  ;;  %v80_v44 = vpack.c.bf16 %v74_v42, %v74_v42  ;;  %v77_v45 = vpack.c.bf16 %v71_v39, %v71_v39  ;;  %v79_v46 = vpack.c.bf16 %v73_v41, %v73_v41 }
  0x4a   :  { %v81_v54 = vpack.c.bf16 %v75_v52, %v75_v52 }
  0x4b   :  { %619 = vmatpush3.bf16.msra.mxu0 %v699_v19  ;;  %406 = vmatprep.mubr.bf16.mxu0 %v78_v43 }
  0x4c   :  { %641 = vmatpush3.bf16.msra.mxu1 %v700_v20  ;;  %620 = vmatprep.subr.bf16.mxu0 %v701_v21 }
  0x4d   :  { %642 = vmatprep.subr.bf16.mxu1 %v702_v22  ;;  %446 = vmatprep.mubr.bf16.mxu1 %v80_v44 }
  0x4f   :  { %621 = vmatpush3.bf16.msra.mxu0 %v703_v23 }
  0x50   :  { %643 = vmatpush3.bf16.msra.mxu1 %v704_v24  ;;  %622 = vmatprep.subr.bf16.mxu0 %v705_v25 }
  0x51   :  { %644 = vmatprep.subr.bf16.mxu1 %v706_v26 }
  0x53   :  { %623 = vmatpush3.bf16.msra.mxu0 %v707_v27 }
  0x54   :  { %645 = vmatpush3.bf16.msra.mxu1 %v708_v28  ;;  %624 = vmatprep.subr.bf16.mxu0 %v709_v29 }
  0x55   :  { %646 = vmatprep.subr.bf16.mxu1 %v710_v30 }
  0x57   :  { %625 = vmatpush3.bf16.msra.mxu0 %v711_v31 }
  0x58   :  { %647 = vmatpush3.bf16.msra.mxu1 %v712_v32  ;;  %659 = vmatprep.subr.bf16.mxu0 %v862_v0 }
  0x5a   :  { %407 = vmatmul.mubr.bf16.vlgmr.msra.gmra.mrb[0].mxu0 %v77_v45 }
  0x5b   :  { %447 = vmatmul.mubr.bf16.vlgmr.msra.gmra.mrb[0].mxu1 %v79_v46  ;;  %660 = vmatpush3.bf16.msra.mxu0 %v713_v47 }
  0x5c   :  { %667 = vmatprep.mubr.msk.bf16.mxu0 %vm863_vm1, %v862_v0  ;;  %661 = vmatprep.subr.bf16.mxu0 %v862_v0 }
  0x5f   :  { %662 = vmatpush3.bf16.msra.mxu0 %v714_v48 }
  0x60   :  { %663 = vmatprep.subr.bf16.mxu0 %v862_v0 }
  0x63   :  { %664 = vmatpush3.bf16.msra.mxu0 %v715_v51 }
  0x64   :  { %665 = vmatprep.subr.bf16.mxu0 %v862_v0 }
  0x67   :  { %666 = vmatpush3.bf16.msra.mxu0 %v716_v53 }
  0x6a   :  { %668 = vmatmul.mubr.msk.bf16.vlgmr.msra.gmra.mrb[4].mxu0 %vm61_vm0, %v81_v54 }
 0x12d   :  { %v626_v55 = vpop.f32.mrb[0].mxu0 }
 0x12e   :  { %v648_v56 = vpop.f32.mrb[0].mxu1  ;;  %v627_v57 = vpop.f32.mrb[1].mxu0 }
 0x12f   :  { %v649_v58 = vpop.f32.mrb[1].mxu1  ;;  %v628_v59 = vadd.f32 %v627_v57, %v626_v55  ;;  %v629_v61 = vpop.f32.mrb[2].mxu0 }
 0x130   :  { %v650_v60 = vadd.f32 %v649_v58, %v648_v56  ;;  %v651_v62 = vpop.f32.mrb[2].mxu1  ;;  %v630_v63 = vpop.f32.mrb[3].mxu0 }
 0x131   :  { %v652_v1 = vpop.f32.mrb[3].mxu1 }
 0x132   :  { %v449_v2 = vadd.f32 %v650_v60, %v628_v59 }
 0x13d   :  { %v488_v4 = vpop.f32.mrb[4].mxu0 }
 0x13e   :  { %v489_v5 = vadd.f32 %v488_v4, %v449_v2  ;;  %v669_v6 = vpop.f32.mrb[5].mxu0 }
 0x13f   :  { %v491_v0 = vpop.f32.mrb[6].mxu0 }
 0x140   :  { %v494_v7 = vadd.f32 %v489_v5, %v76_v3  ;;  %v670_v8 = vpop.f32.mrb[7].mxu0 }
 0x142   :  { %495 = vst.msk [vmem:[#allocation2] sm:$0xff] %vm61_vm0, %v494_v7 }
 0x149   :  { %v499_v10 = vld [vmem:[#allocation2] sm:$0xff] }
 0x14a   :  { %v507_v11 = vadd.f32 %v609_v9, %v499_v10 }
 0x14c   :  { %v508_v12 = vsel %vm61_vm0, %v507_v11, 0.0  ;;  %v526_v13 = vpack.c.bf16 %v507_v11, %v507_v11  ;;  %v517_v14 = vmul.f32 %v507_v11, %v507_v11 }
 0x14d   :  { %v509_v15 = vrot.slane %v508_v12, 4 }
 0x14e   :  { %528 = vst.msk [vmem:[#allocation9] sm:$0xf] %vm527_vm2, %v526_v13  ;;  %v518_v16 = vsel %vm61_vm0, %v517_v14, 0.0 }
 0x14f   :  { %v510_v17 = vadd.f32 %v509_v15, %v508_v12 }
 0x150   :  { %794 = shalt.err (!%p791_p0)
}
 0x151   :  { %s795_s9 = scalar_lea.hbm %s993_s3, 64 }
 0x152   :  { %p796_p1 = scmp.ne.s32.totalorder %s993_s3, %s795_s9  ;;  %p799_p2 = scmp.lt.u32.totalorder %s795_s9, %s993_s3 }
 0x154   :  { %p801_p3 = pnand %p799_p2, %p796_p1 }
 0x156   :  { %804 = shalt.err (!%p801_p3)
}
 0x157   :  { %538 = dma.vmem_to_hbm [thread:$0]  %s536_s30, 64, %s993_s3, [#allocation5]   ;;  %v519_v18 = vrot.slane %v518_v16, 4  ;;  %v511_v19 = vrot.slane %v510_v17, 2  ;;  %vm515_vm3 = vcmask 516096  }
 0x158   :  { %s865_s16 = smov [#allocation10]   ;;  %s866_s1 = smov [#allocation12]  }
 0x159   :  { %v520_v20 = vadd.f32 %v519_v18, %v518_v16  ;;  %v512_v21 = vadd.f32 %v511_v19, %v510_v17  ;;  %s545_s17 = sshll.u32 %s865_s16, 4  ;;  %s555_s18 = sshll.u32 %s866_s1, 4  ;;  %s546_s17 = int_to_ptr.vmem [resolvable:$true] %s545_s17  ;;  %s957_s18 = int_to_ptr.vmem [resolvable:$true] %s555_s18 }
 0x15a   :  { %s805_s3 = scalar_lea.vmem %s546_s17, 16  ;;  %s809_s19 = scalar_lea.vmem %s546_s17, 32 }
 0x15b   :  { %v521_v22 = vrot.slane %v520_v20, 2  ;;  %v513_v23 = vrot.slane %v512_v21, 1  ;;  %p806_p4 = scmp.ne.s32.totalorder %s546_s17, %s805_s3  ;;  %p810_p5 = scmp.lt.s32.totalorder %s546_s17, %s546_s17 }
 0x15c   :  { %p811_p6 = scmp.lt.s32.totalorder %s809_s19, %s805_s3 }
 0x15d   :  { %v522_v24 = vadd.f32 %v521_v22, %v520_v20  ;;  %v514_v25 = vadd.f32 %v513_v23, %v512_v21 }
 0x15e   :  { %p812_p7 = por %p811_p6, %p810_p5 }
 0x15f   :  { %v523_v26 = vrot.slane %v522_v24, 1  ;;  %516 = vst.msk [vmem:[#allocation10] sm:$0x1] %vm515_vm3, %v514_v25 }
 0x160   :  { %p813_p8 = pnand %p812_p7, %p806_p4 }
 0x161   :  { %v524_v27 = vadd.f32 %v523_v26, %v522_v24 }
 0x162   :  { %816 = shalt.err (!%p813_p8)
}
 0x163   :  { %s817_s22 = scalar_lea.hbm %s994_s4, 16 }
 0x164   :  { %p818_p9 = scmp.ne.s32.totalorder %s994_s4, %s817_s22  ;;  %p821_p10 = scmp.lt.u32.totalorder %s817_s22, %s994_s4 }
 0x166   :  { %p823_p11 = pnand %p821_p10, %p818_p9 }
 0x168   :  { %826 = shalt.err (!%p823_p11)
}
 0x169   :  { %548 = dma.vmem_to_hbm [thread:$0]  %s546_s17, 16, %s994_s4, [#allocation11]   ;;  %525 = vst.msk [vmem:[#allocation12] sm:$0x1] %vm515_vm3, %v524_v27 }
 0x16a   :  { %s827_s0 = scalar_lea.vmem %s957_s18, 16  ;;  %s831_s29 = scalar_lea.vmem %s957_s18, 32 }
 0x16b   :  { %p828_p12 = scmp.ne.s32.totalorder %s957_s18, %s827_s0  ;;  %p832_p13 = scmp.lt.s32.totalorder %s957_s18, %s957_s18 }
 0x16c   :  { %p833_p0 = scmp.lt.s32.totalorder %s831_s29, %s827_s0 }
 0x16e   :  { %p834_p1 = por %p833_p0, %p832_p13 }
 0x170   :  { %p835_p2 = pnand %p834_p1, %p828_p12 }
 0x172   :  { %838 = shalt.err (!%p835_p2)
}
 0x173   :  { %s839_s6 = scalar_lea.hbm %s995_s5, 16 }
 0x174   :  { %p840_p3 = scmp.ne.s32.totalorder %s995_s5, %s839_s6  ;;  %p843_p4 = scmp.lt.u32.totalorder %s839_s6, %s995_s5 }
 0x176   :  { %p845_p5 = pnand %p843_p4, %p840_p3 }
 0x178   :  { %848 = shalt.err (!%p845_p5)
}
 0x179   :  { %558 = dma.vmem_to_hbm [thread:$0]  %s957_s18, 16, %s995_s5, [#allocation11]  }
 0x17a   :  { %853 = dma.done.wait [#allocation5], 64  }
 0x17b   :  { %854 = vsyncadd [#allocation5], 4294967232 }
 0x17c   :  { %855 = dma.done.wait [#allocation11], 32  }
 0x17d   :  { %856 = vsyncadd [#allocation11], 4294967264 }
 0x17e   :  { %568 = vsyncpa [#allocation4], 1 }
 0x17f   :  { %569 = vsyncpa [#allocation7], 1 }
 0x180   :  { %570 = vsyncpa [#allocation5], 1 }
 0x181   :  { %571 = vsyncpa [#allocation11], 1 }

// kernel: tile.159
= control target key start
LH: loop header
LB: loop body
LE: loop exit
PB: predicated region body
PF: predicated region fallthrough
CT: control target
= control target key end

     0   :  { %s22_s0 = inlined_call_operand.vmem [shape: f32[8], index: 0, kind: input, shape index: {}]   ;;  %s23_s1 = inlined_call_operand.vmem [shape: f32[4,8], index: 1, kind: output, shape index: {}]  }
   0x1   :  { %v4_v0 = vld [vmem:[%s22_s0] ss:$0 sm:$0xff] }
   0x2   :  { %5 = vst [vmem:[%s23_s1] sm:$0xf] %v4_v0 }

// kernel: tile.166
= control target key start
LH: loop header
LB: loop body
LE: loop exit
PB: predicated region body
PF: predicated region fallthrough
CT: control target
= control target key end

     0   :  { %vm7_vm0 = vcmask 64512   ;;  %s37_s8 = smov 8   ;;  %s38_s9 = smov 16   ;;  %vm13_vm1 = vcmask 261312   ;;  %vm19_vm2 = vcmask 195712   ;;  %vm25_vm3 = vcmask 130112   ;;  %s55_s0 = inlined_call_operand.vmem [shape: f32[4,8], index: 0, kind: input, shape index: {}]   ;;  %s56_s1 = inlined_call_operand.vmem [shape: f32[32], index: 1, kind: output, shape index: {}]  }
   0x1   :  { %v4_v0 = vld [vmem:[%s55_s0] sm:$0xf]  ;;  %s36_s0 = smov 24  }
   0x2   :  { %5 = vst [vmem:[#allocation1] sm:$0xf] %v4_v0 }
   0x9   :  { %v10_v1 = vld [vmem:[#allocation1 + $0x3] sm:$0x1]   ;;  %v22_v2 = vld [vmem:[#allocation1 + $0x1] sm:$0x1]   ;;  %v6_v3 = vld [vmem:[#allocation1] sm:$0x1]  }
   0xa   :  { %11 = vrot.lane.b32.xlu0 %v10_v1, %s36_s0  ;;  %23 = vrot.lane.b32.xlu1 %v22_v2, %s37_s8  ;;  %v16_v4 = vld [vmem:[#allocation1 + $0x2] sm:$0x1]   ;;  %8 = vst.msk [vmem:[#allocation0] sm:$0x1] %vm7_vm0, %v6_v3  }
   0xe   :  { %17 = vrot.lane.b32.xlu0 %v16_v4, %s38_s9 }
  0x7c   :  { %v12_v5 = vpop.permute.xlu0 %11   ;;  %v24_v6 = vpop.permute.xlu1 %23  }
  0x7d   :  { %14 = vst.msk [vmem:[#allocation0] sm:$0x1] %vm13_vm1, %v12_v5  }
  0x80   :  { %v18_v7 = vpop.permute.xlu0 %17  }
  0x81   :  { %20 = vst.msk [vmem:[#allocation0] sm:$0x1] %vm19_vm2, %v18_v7  }
  0x82   :  { %26 = vst.msk [vmem:[#allocation0] sm:$0x1] %vm25_vm3, %v24_v6  }
  0x89   :  { %v30_v8 = vld [vmem:[#allocation0] sm:$0x1] }
  0x8a   :  { %32 = vst [vmem:[%s56_s1] sm:$0x1] %v30_v8 }

// kernel: fwd.29
= control target key start
LH: loop header
LB: loop body
LE: loop exit
PB: predicated region body
PF: predicated region fallthrough
CT: control target
= control target key end

     0   :  { %11 = vsyncpa [#allocation4], 0  ;;  %s1686_s0 = inlined_call_operand.hbm [shape: bf16[32,288], index: 0, kind: input, shape index: {}]   ;;  %s1687_s1 = inlined_call_operand.hbm [shape: bf16[288,32], index: 1, kind: input, shape index: {}]   ;;  %s1688_s2 = inlined_call_operand.hbm [shape: f32[1,32], index: 2, kind: input, shape index: {}]   ;;  %s1689_s3 = inlined_call_operand.hbm [shape: bf16[32,32], index: 3, kind: output, shape index: {0}]   ;;  %s1690_s4 = inlined_call_operand.hbm [shape: f32[2,1,32], index: 4, kind: output, shape index: {1}]   ;;  %s1691_s5 = inlined_call_operand.hbm [shape: f32[2,1,32], index: 5, kind: output, shape index: {2}]  }
   0x1   :  { %13 = vsyncpa [#allocation4 + $0x1], 0 }
   0x2   :  { %14 = vsyncpa [#allocation7], 0 }
   0x3   :  { %15 = vsyncpa [#allocation5], 0 }
   0x4   :  { %17 = vsyncpa [#allocation5 + $0x1], 0 }
   0x5   :  { %18 = vsyncpa [#allocation11], 0 }
   0x6   :  { %20 = vsyncpa [#allocation11 + $0x1], 0  ;;  %s1347_s18 = smov 0   ;;  %s1349_s19 = smov 0  }
   0x7   :  { %s1351_s20 = smov 0   ;;  %s1353_s21 = smov 0  }
   0x8   :  { %s1355_s22 = smov 0   ;;  %s1357_s23 = smov 0  }
   0x9 LB: > { %s1378_s24 = sadd.s32 4294967295, %s1301_s23   ;;  %s1693_s25 = sadd.s32 4294967294, %s1301_s23   ;;  %s1301_s23 = sphi %s1357_s23, %s26_s23   ;;  %s1297_s22 = sphi %s1355_s22, %s1714_s22   ;;  %s1293_s21 = sphi %s1353_s21, %s1713_s21   ;;  %s1289_s20 = sphi %s1351_s20, %s1712_s20   ;;  %s1285_s19 = sphi %s1349_s19, %s1711_s19   ;;  %s1281_s18 = sphi %s1347_s18, %s1710_s18  }
   0xa   : > { %p67_p0 = scmp.ne.s32.totalorder %s1285_s19, %s1281_s18  ;;  %p1692_p1 = scmp.eq.s32.totalorder %s1378_s24, 0 }
   0xb   : > { %p153_p3 = scmp.eq.s32.totalorder %s1693_s25, 1  ;;  %p871_p5 = scmp.ge.s32.totalorder %s1301_s23, 1 }
   0xc   : > { %p1389_p4 = por %p1692_p1, %p67_p0  ;;  %p216_p7 = scmp.lt.s32.totalorder %s1301_s23, 3 }
   0xd   : > { %p1394_p6 = por %p153_p3, %p67_p0  ;;  %s1303_s29 = smov [#allocation6]  }
   0xe   : > { %s1696_s26 = scalar_select %p1389_p4, 1, 0 }
   0xf   : > { %s1697_s27 = scalar_select %p1394_p6, 1, 0 }
  0x10   : > { %p1399_p8 = pnand %p871_p5, %p216_p7  ;;  %s232_s30 = sshll.u32 %s1303_s29, 4  ;;  %s1403_s30 = int_to_ptr.vmem [resolvable:$true] %s232_s30 }
  0x11   : > { %s1304_s7 = smov [#allocation8]   ;;  %s1069_s11 = scalar_lea.hbm %s1687_s1, 2304 }
  0x12   : > { %p966_p9 = pneg %p1399_p8  ;;  %s248_s8 = sshll.u32 %s1304_s7, 4  ;;  %s1414_s8 = int_to_ptr.vmem [resolvable:$true] %s248_s8 }
  0x13   : > { %p1070_p12 = scmp.ne.s32.totalorder %s1687_s1, %s1069_s11  ;;  %p1076_p5 = scmp.lt.u32.totalorder %s1069_s11, %s1687_s1 }
  0x14   : > { %p1410_p11 = pnand %p966_p9, %p1692_p1 }
  0x16   : > { %p1071_p13 = pneg %p1410_p11 }
  0x18   : > { %p1072_p0 = pnand %p1071_p13, %p1070_p12 }
  0x1a   : > { %p1073_p3 = pneg %p1072_p0 }
  0x1c   : > { %p1078_p7 = pnand %p1076_p5, %p1073_p3 }
  0x1e   : > { %1081 = shalt.err (!%p1078_p7)
}
  0x1f   : > { %s1082_s16 = scalar_lea.vmem %s1403_s30, 2304  ;;  %p1090_p2 = scmp.lt.s32.totalorder %s1403_s30, %s1403_s30 }
  0x20   : > { %p1083_p9 = scmp.ne.s32.totalorder %s1403_s30, %s1082_s16  ;;  %p1091_p12 = scmp.lt.s32.totalorder %s1082_s16, %s1082_s16 }
  0x22   : > { %p1085_p10 = pnand %p1083_p9, %p1071_p13  ;;  %p1092_p0 = por %p1091_p12, %p1090_p2 }
  0x24   : > { %p1086_p1 = pneg %p1085_p10 }
  0x26   : > { %p1093_p6 = pnand %p1092_p0, %p1086_p1 }
  0x28   : > { %1096 = shalt.err (!%p1093_p6)
}
  0x29   : > { %s1305_s17 = smov 64   ;;  %s1306_s29 = smov 4  }
  0x2a   : > { %969 = dma.hbm_to_vmem [thread:$0]  (!%p1410_p11), %s1687_s1, 2304, %s1403_s30, [#allocation7], %s1305_s17, %s1305_s17, %s1306_s29  }
  0x2b   : > { %s1097_s12 = scalar_lea.hbm %s1688_s2, 16 }
  0x2c   : > { %p1098_p2 = scmp.ne.s32.totalorder %s1688_s2, %s1097_s12  ;;  %p1104_p10 = scmp.lt.u32.totalorder %s1097_s12, %s1688_s2 }
  0x2e   : > { %p1100_p1 = pnand %p1098_p2, %p1071_p13 }
  0x30   : > { %p1101_p6 = pneg %p1100_p1 }
  0x32   : > { %p1106_p3 = pnand %p1104_p10, %p1101_p6 }
  0x34   : > { %1109 = shalt.err (!%p1106_p3)
}
  0x35   : > { %s1110_s30 = scalar_lea.vmem %s1414_s8, 16  ;;  %s1117_s17 = scalar_lea.vmem %s1414_s8, 32 }
  0x36   : > { %p1111_p5 = scmp.ne.s32.totalorder %s1414_s8, %s1110_s30  ;;  %p1118_p12 = scmp.lt.s32.totalorder %s1414_s8, %s1414_s8 }
  0x37   : > { %p1119_p0 = scmp.lt.s32.totalorder %s1117_s17, %s1110_s30 }
  0x38   : > { %p1113_p7 = pnand %p1111_p5, %p1071_p13 }
  0x39   : > { %p1120_p2 = por %p1119_p0, %p1118_p12 }
  0x3a   : > { %p1114_p9 = pneg %p1113_p7 }
  0x3c   : > { %p1121_p1 = pnand %p1120_p2, %p1114_p9 }
  0x3e   : > { %1124 = shalt.err (!%p1121_p1)
}
  0x3f   : > { %972 = dma.hbm_to_vmem [thread:$0]  (!%p1410_p11), %s1688_s2, 16, %s1414_s8, [#allocation7]  }
  0x40   : > { %s45_s9 = sadd.s32 1, %s1297_s22  ;;  %s54_s10 = sadd.s32 1, %s1289_s20 }
  0x41   : > { %p47_p13 = scmp.ge.s32.totalorder %s45_s9, 2  ;;  %p61_p6 = scmp.ne.s32.totalorder %s1289_s20, %s1285_s19 }
  0x42   : > { %p62_p10 = scmp.eq.s32.totalorder %s1301_s23, 0  ;;  %p989_p3 = scmp.lt.s32.totalorder %s1301_s23, 2 }
  0x43   : > { %s1716_s9 = smov (%p47_p13, %s45_s9), 0  ;;  %p1700_p7 = scmp.eq.s32.totalorder %s1378_s24, 1 }
  0x44   : > { %p63_p5 = por %p62_p10, %p61_p6  ;;  %s49_s11 = ssub.s32 %s1297_s22, %s1716_s9 }
  0x45   : > { %p1479_p9 = por %p1700_p7, %p61_p6  ;;  %s259_s12 = sand.u32 1, %s1289_s20  }
  0x46   : > { %p52_p12 = scmp.eq.s32.totalorder %s49_s11, 0  ;;  %s947_s8 = smul.u32 24, %s259_s12 }
  0x47   : > { %s1701_s6 = scalar_select %p1479_p9, 1, 0 }
  0x48   : > { %p1486_p11 = pnand %p989_p3, %p63_p5  ;;  %s948_s15 = smul.u32 384, %s1297_s22 }
  0x49   : > { %s1491_s14 = scalar_select %p52_p12, %s1289_s20, %s54_s10  }
  0x4a   : > { %s263_s16 = scalar_lea.vmem [#allocation3], %s947_s8  ;;  %s1497_s7 = scalar_lea.hbm %s1686_s0, %s948_s15 }
  0x4b   : > { %s273_s30 = sshll.u32 %s263_s16, 4  ;;  %s1501_s11 = scalar_lea.sflag [#allocation4], %s259_s12  ;;  %s1499_s30 = int_to_ptr.vmem [resolvable:$true] %s273_s30 }
  0x4c   : > { %s1125_s25 = scalar_lea.hbm %s1497_s7, 384  ;;  %p1127_p2 = pneg %p1486_p11 }
  0x4d   : > { %p1126_p0 = scmp.ne.s32.totalorder %s1497_s7, %s1125_s25  ;;  %s1130_s15 = scalar_lea.hbm %s1686_s0, 768 }
  0x4e   : > { %p1131_p6 = scmp.lt.u32.totalorder %s1497_s7, %s1686_s0  ;;  %p1132_p10 = scmp.lt.u32.totalorder %s1130_s15, %s1125_s25 }
  0x4f   : > { %p1128_p1 = pnand %p1127_p2, %p1126_p0  ;;  %p1134_p5 = scmp.lt.u32.totalorder %s1125_s25, %s1497_s7 }
  0x50   : > { %p1133_p3 = por %p1132_p10, %p1131_p6 }
  0x51   : > { %p1129_p13 = pneg %p1128_p1 }
  0x52   : > { %p1135_p7 = por %p1134_p5, %p1133_p3 }
  0x54   : > { %p1136_p12 = pnand %p1135_p7, %p1129_p13 }
  0x56   : > { %1139 = shalt.err (!%p1136_p12)
}
  0x57   : > { %s1140_s12 = scalar_lea.vmem %s1499_s30, 384  ;;  %s1307_s29 = smov [#allocation3]  }
  0x58   : > { %p1141_p0 = scmp.ne.s32.totalorder %s1499_s30, %s1140_s12  ;;  %s1145_s10 = sshll.u32 %s1307_s29, 4  ;;  %s1146_s10 = int_to_ptr.vmem [resolvable:$false] %s1145_s10 }
  0x59   : > { %s1147_s8 = scalar_lea.vmem %s1146_s10, 768  ;;  %p1148_p4 = scmp.lt.s32.totalorder %s1499_s30, %s1146_s10 }
  0x5a   : > { %p1143_p1 = pnand %p1141_p0, %p1127_p2  ;;  %p1149_p6 = scmp.lt.s32.totalorder %s1147_s8, %s1140_s12 }
  0x5c   : > { %p1144_p9 = pneg %p1143_p1  ;;  %p1150_p10 = por %p1149_p6, %p1148_p4 }
  0x5e   : > { %p1151_p3 = pnand %p1150_p10, %p1144_p9 }
  0x60   : > { %1154 = shalt.err (!%p1151_p3)
}
  0x61   : > { %s1308_s25 = smov 192   ;;  %s1309_s15 = smov 12  }
  0x62   : > { %976 = dma.hbm_to_vmem [thread:$0]  (!%p1486_p11), %s1497_s7, 384, %s1499_s30, %s1501_s11, %s1308_s25, %s1308_s25, %s1309_s15  }
  0x63   : > { %285 = sbr.rel (%p1399_p8) target bundleno = 442 (0x1ba), region = 32  ;;  %s1532_s16 = sand.u32 (!%p1399_p8), 1, %s1285_s19  }
  0x64   : > { %s949_s17 = smul.u32 (!%p1399_p8), 24, %s1532_s16  ;;  %s288_s12 = scalar_lea.sflag (!%p1399_p8), [#allocation4], %s1532_s16 }
  0x65   : > { %p1703_p4 = scmp.ne.s32.totalorder (!%p1399_p8), %s1696_s26, 0 }
  0x66   : > { %s1536_s29 = scalar_lea.vmem (!%p1399_p8), [#allocation3], %s949_s17 }
  0x6a   : > { %1264 = dma.done.wait (%p1703_p4), %s288_s12, 384  }
  0x6b   : > { %1266 = vsyncadd (%p1703_p4), %s288_s12, 4294966912  ;;  %p1704_p9 = scmp.eq.s32.totalorder %s1378_s24, 0 }
  0x6d   : > { %1268 = dma.done.wait (%p1704_p9), [#allocation7], 2320   ;;  %p1705_p8 = pmov %p1704_p9 }
  0x6e   : > { %vm343_vm0 = vcmask 261120   ;;  %v1310_v0 = vmov 0.0   ;;  %vm1311_vm1 = vmmov 0   ;;  %v1051_v1 = vld [vmem:[#allocation6 + $0x40] sm:$0xff]   ;;  %v1053_v3 = vld [vmem:[#allocation6 + $0x48] sm:$0xff]   ;;  %v1055_v5 = vld [vmem:[#allocation6 + $0x50] sm:$0xff]  }
  0x6f   : > { %1270 = vsyncadd (%p1705_p8), [#allocation7], 4294964976  ;;  %344 = vst.msk [vmem:[#allocation2] sm:$0xff] %vm343_vm0, %v1310_v0  ;;  %939 = vmatprep.subr.bf16.mxu1 %v1310_v0  ;;  %943 = vmatprep.mubr.msk.bf16.mxu1 %vm1311_vm1, %v1310_v0  ;;  %v1052_v2 = vld [vmem:[#allocation6] sm:$0xff]   ;;  %v1054_v4 = vld [vmem:[#allocation6 + $0x8] sm:$0xff]   ;;  %s881_s26 = sshll.u32 %s1532_s16, 3 }
  0x70   : > { %345 = vst.msk [vmem:[#allocation2 + $0x8] sm:$0xff] %vm343_vm0, %v1310_v0  ;;  %914 = vmatprep.subr.bf16.mxu0 %v1051_v1  ;;  %v1056_v6 = vld [vmem:[#allocation6 + $0x10] sm:$0xff]   ;;  %v1057_v7 = vld [vmem:[#allocation6 + $0x58] sm:$0xff]   ;;  %v1059_v9 = vld [vmem:[#allocation6 + $0x60] sm:$0xff]   ;;  %s913_s28 = sshll.u32 %s1293_s21, 7  ;;  %s321_s13 = scalar_lea.vmem [#allocation9], %s881_s26 }
  0x71   : > { %915 = vmatpush3.bf16.msra.mxu0 %v1052_v2  ;;  %v1058_v8 = vld [vmem:[#allocation6 + $0x18] sm:$0xff]   ;;  %v1065_v10 = vld [vmem:[#allocation6 + $0x80] sm:$0xff]   ;;  %v1061_v12 = vld [vmem:[#allocation6 + $0x68] sm:$0xff]   ;;  %s672_s30 = sshll.u32 %s321_s13, 4  ;;  %vm646_vm2 = vcmask 257024   ;;  %s1559_s10 = scalar_lea.hbm %s1689_s3, %s913_s28  ;;  %s1561_s30 = int_to_ptr.vmem [resolvable:$true] %s672_s30 }
  0x72   : > { %916 = vmatprep.subr.bf16.mxu0 %v1053_v3  ;;  %v1060_v11 = vld [vmem:[#allocation6 + $0x20] sm:$0xff]   ;;  %940 = vmatpush3.bf16.msra.mxu1 %v1065_v10  ;;  %v1068_v13 = vld [vmem:[#allocation6 + $0x88] sm:$0xff]   ;;  %v1063_v20 = vld [vmem:[#allocation6 + $0x70] sm:$0xff]   ;;  %s650_s8 = scalar_lea.sflag [#allocation5], %s1532_s16  ;;  %s1155_s25 = scalar_lea.vmem %s1561_s30, 128 }
  0x73   : > { %941 = vmatprep.subr.bf16.mxu1 %v1310_v0  ;;  %v346_v14 = vld [vmem:[%s1536_s29] sm:$0xff]  ;;  %v348_v15 = vld [vmem:[%s1536_s29 + $0xc] sm:$0xff]  ;;  %v347_v16 = vld [vmem:[%s1536_s29 + $0x8] ss:$12 sps:$4 sm:$0xff]   ;;  %p1156_p11 = scmp.ne.s32.totalorder %s1561_s30, %s1155_s25  ;;  %p1706_p2 = scmp.ne.s32.totalorder %s1701_s6, 0 }
  0x74   : > { %v1062_v17 = vld [vmem:[#allocation6 + $0x28] sm:$0xff]   ;;  %v351_v18 = vunpack.c.h.bf16 %v346_v14  ;;  %v354_v19 = vunpack.c.h.bf16 %v348_v15  ;;  %v352_v21 = vunpack.c.l.bf16 %v347_v16  ;;  %v355_v22 = vunpack.c.h.bf16 %v347_v16  ;;  %v1064_v29 = vld [vmem:[#allocation6 + $0x30] sm:$0xff]   ;;  %v1066_v31 = vld [vmem:[#allocation6 + $0x78] sm:$0xff]   ;;  %s1312_s15 = smov [#allocation9]  }
  0x75   : > { %917 = vmatpush3.bf16.msra.mxu0 %v1054_v4  ;;  %v350_v25 = vunpack.c.l.bf16 %v346_v14  ;;  %v353_v26 = vunpack.c.l.bf16 %v348_v15  ;;  %v1067_v35 = vld [vmem:[#allocation6 + $0x38] sm:$0xff]   ;;  %v901_v53 = vld [vmem:[#allocation8] ss:$0 sm:$0xff]  ;;  %p1157_p13 = pnand %p1156_p11, %p1706_p2  ;;  %s1159_s17 = sshll.u32 %s1312_s15, 4  ;;  %s1160_s17 = int_to_ptr.vmem [resolvable:$false] %s1159_s17 }
  0x76   : > { %918 = vmatprep.subr.bf16.mxu0 %v1055_v5  ;;  %942 = vmatpush3.bf16.msra.mxu1 %v1068_v13  ;;  %v357_v23 = vmax.f32 %v351_v18, 0.0  ;;  %v360_v24 = vmax.f32 %v354_v19, 0.0  ;;  %v358_v27 = vmax.f32 %v352_v21, 0.0  ;;  %v361_v28 = vmax.f32 %v355_v22, 0.0  ;;  %v362_v45 = vld [vmem:[#allocation2] sm:$0xff]  ;;  %s1161_s12 = scalar_lea.vmem %s1160_s17, 256  ;;  %p1162_p7 = scmp.lt.s32.totalorder %s1561_s30, %s1160_s17 }
  0x77   : > { %v356_v33 = vmax.f32 %v350_v25, 0.0  ;;  %v359_v34 = vmax.f32 %v353_v26, 0.0  ;;  %v363_v49 = vld [vmem:[#allocation2 + $0x8] sm:$0xff]  ;;  %p1158_p5 = pneg %p1157_p13  ;;  %p1163_p12 = scmp.lt.s32.totalorder %s1161_s12, %s1155_s25 }
  0x78   : > { %v365_v30 = vpack.c.bf16 %v360_v24, %v357_v23  ;;  %v366_v32 = vpack.c.bf16 %v361_v28, %v358_v27 }
  0x79   : > { %919 = vmatpush3.bf16.msra.mxu0 %v1056_v6  ;;  %v364_v36 = vpack.c.bf16 %v359_v34, %v356_v33  ;;  %p1164_p0 = por %p1163_p12, %p1162_p7 }
  0x7a   : > { %920 = vmatprep.subr.bf16.mxu0 %v1057_v7  ;;  %547 = vmatprep.mubr.bf16.mxu0 %v365_v30 }
  0x7b   : > { %944 = vmatmul.mubr.msk.bf16.vlgmr.msra.gmra.mrb[0].mxu1 %vm343_vm0, %v366_v32  ;;  %p1165_p1 = pnand %p1164_p0, %p1158_p5 }
  0x7d   : > { %921 = vmatpush3.bf16.msra.mxu0 %v1058_v8 }
  0x7e   : > { %922 = vmatprep.subr.bf16.mxu0 %v1059_v9 }
  0x81   : > { %923 = vmatpush3.bf16.msra.mxu0 %v1060_v11 }
  0x82   : > { %924 = vmatprep.subr.bf16.mxu0 %v1061_v12 }
  0x85   : > { %925 = vmatpush3.bf16.msra.mxu0 %v1062_v17 }
  0x86   : > { %926 = vmatprep.subr.bf16.mxu0 %v1063_v20 }
  0x89   : > { %927 = vmatpush3.bf16.msra.mxu0 %v1064_v29 }
  0x8a   : > { %928 = vmatprep.subr.bf16.mxu0 %v1066_v31 }
  0x8d   : > { %929 = vmatpush3.bf16.msra.mxu0 %v1067_v35 }
  0x90   : > { %548 = vmatmul.mubr.bf16.vlgmr.msra.gmra.mrb[0].mxu0 %v364_v36 }
 0x14e   : > { %v590_v37 = vpop.f32.mrb[0].mxu1 }
 0x14f   : > { %v945_v38 = vpop.f32.mrb[1].mxu1 }
 0x150   : > { %v593_v39 = vpop.f32.mrb[2].mxu1 }
 0x151   : > { %v946_v40 = vpop.f32.mrb[3].mxu1 }
 0x163   : > { %v930_v41 = vpop.f32.mrb[0].mxu0 }
 0x164   : > { %v931_v42 = vpop.f32.mrb[1].mxu0 }
 0x165   : > { %v932_v43 = vadd.f32 %v931_v42, %v930_v41  ;;  %v933_v44 = vpop.f32.mrb[2].mxu0 }
 0x166   : > { %v934_v46 = vpop.f32.mrb[3].mxu0 }
 0x167   : > { %v591_v47 = vadd.f32 %v932_v43, %v590_v37  ;;  %v935_v48 = vadd.f32 %v934_v46, %v933_v44 }
 0x169   : > { %v597_v50 = vadd.f32 %v591_v47, %v362_v45  ;;  %v594_v51 = vadd.f32 %v935_v48, %v593_v39 }
 0x16b   : > { %599 = vst.msk [vmem:[#allocation2] sm:$0xff] %vm343_vm0, %v597_v50  ;;  %v598_v52 = vadd.f32 %v594_v51, %v363_v49 }
 0x16d   : > { %600 = vst.msk [vmem:[#allocation2 + $0x8] sm:$0xff] %vm343_vm0, %v598_v52 }
 0x172   : > { %v604_v54 = vld [vmem:[#allocation2] sm:$0xff] }
 0x173   : > { %v613_v55 = vadd.f32 %v901_v53, %v604_v54 }
 0x174   : > { %v605_v56 = vld [vmem:[#allocation2 + $0x8] sm:$0xff] }
 0x175   : > { %v614_v57 = vadd.f32 %v901_v53, %v605_v56  ;;  %v911_v58 = vpack.c.bf16 %v613_v55, %v613_v55  ;;  %v626_v59 = vmul.f32 %v613_v55, %v613_v55  ;;  %v615_v60 = vsel %vm343_vm0, %v613_v55, 0.0 }
 0x177   : > { %v616_v61 = vsel %vm343_vm0, %v614_v57, 0.0  ;;  %v912_v62 = vpack.c.bf16 %v614_v57, %v614_v57  ;;  %647 = vst.msk [vmem:[%s321_s13] sm:$0xf] %vm646_vm2, %v911_v58  ;;  %v627_v63 = vmul.f32 %v614_v57, %v614_v57  ;;  %v628_v1 = vsel %vm343_vm0, %v626_v59, 0.0 }
 0x178   : > { %v617_v0 = vadd.f32 %v616_v61, %v615_v60 }
 0x179   : > { %648 = vst.msk [vmem:[%s321_s13 + $0x4] sm:$0xf] %vm646_vm2, %v912_v62  ;;  %v629_v2 = vsel %vm343_vm0, %v627_v63, 0.0 }
 0x17a   : > { %v618_v3 = vrot.slane %v617_v0, 4 }
 0x17b   : > { %1168 = shalt.err (!%p1165_p1)
}
 0x17c   : > { %s1169_s29 = scalar_lea.hbm %s1559_s10, 128  ;;  %s1173_s13 = scalar_lea.hbm %s1689_s3, 256 }
 0x17d   : > { %p1170_p6 = scmp.ne.s32.totalorder %s1559_s10, %s1169_s29  ;;  %p1174_p4 = scmp.lt.u32.totalorder %s1559_s10, %s1689_s3 }
 0x17e   : > { %p1175_p9 = scmp.lt.u32.totalorder %s1173_s13, %s1169_s29  ;;  %p1177_p11 = scmp.lt.u32.totalorder %s1169_s29, %s1559_s10 }
 0x17f   : > { %p1171_p10 = pnand %p1170_p6, %p1706_p2 }
 0x180   : > { %p1176_p8 = por %p1175_p9, %p1174_p4 }
 0x181   : > { %p1172_p3 = pneg %p1171_p10 }
 0x182   : > { %p1178_p13 = por %p1177_p11, %p1176_p8 }
 0x184   : > { %p1179_p5 = pnand %p1178_p13, %p1172_p3 }
 0x186   : > { %1182 = shalt.err (!%p1179_p5)
}
 0x187   : > { %s1313_s25 = smov 64   ;;  %s1314_s15 = smov 4   ;;  %v630_v4 = vadd.f32 %v629_v2, %v628_v1  ;;  %v619_v5 = vadd.f32 %v618_v3, %v617_v0  ;;  %vm624_vm3 = vcmask 253952  }
 0x188   : > { %960 = dma.vmem_to_hbm [thread:$0]  (%p1706_p2), %s1561_s30, 128, %s1559_s10, %s650_s8, %s1313_s25, %s1313_s25, %s1314_s15  }
 0x189   : > { %v631_v6 = vrot.slane %v630_v4, 4  ;;  %v620_v7 = vrot.slane %v619_v5, 2  ;;  %s654_s17 = sand.u32 1, %s1378_s24   ;;  %s907_s12 = sshll.u32 %s1293_s21, 4 }
 0x18a   : > { %s327_s29 = scalar_lea.vmem [#allocation10], %s1532_s16  ;;  %s333_s28 = scalar_lea.vmem [#allocation12], %s1532_s16 }
 0x18b   : > { %v632_v8 = vadd.f32 %v631_v6, %v630_v4  ;;  %v621_v9 = vadd.f32 %v620_v7, %v619_v5  ;;  %s689_s26 = sshll.u32 %s327_s29, 4  ;;  %s703_s13 = sshll.u32 %s333_s28, 4  ;;  %s1602_s26 = int_to_ptr.vmem [resolvable:$true] %s689_s26  ;;  %s1610_s13 = int_to_ptr.vmem [resolvable:$true] %s703_s13 }
 0x18c   : > { %s1600_s8 = scalar_lea.hbm %s1690_s4, %s907_s12  ;;  %s1608_s7 = scalar_lea.hbm %s1691_s5, %s907_s12 }
 0x18d   : > { %v633_v10 = vrot.slane %v632_v8, 2  ;;  %v622_v11 = vrot.slane %v621_v9, 1  ;;  %s1612_s11 = scalar_lea.sflag [#allocation11], %s654_s17  ;;  %s1183_s25 = scalar_lea.vmem %s1602_s26, 16 }
 0x18e   : > { %p1184_p7 = scmp.ne.s32.totalorder %s1602_s26, %s1183_s25  ;;  %s1315_s15 = smov [#allocation10]  }
 0x18f   : > { %v634_v12 = vadd.f32 %v633_v10, %v632_v8  ;;  %v623_v13 = vadd.f32 %v622_v11, %v621_v9  ;;  %s1187_s30 = sshll.u32 %s1315_s15, 4  ;;  %s1188_s30 = int_to_ptr.vmem [resolvable:$false] %s1187_s30 }
 0x190   : > { %p1185_p12 = pnand %p1184_p7, %p1706_p2  ;;  %s1189_s10 = scalar_lea.vmem %s1188_s30, 32 }
 0x191   : > { %v635_v14 = vrot.slane %v634_v12, 1  ;;  %625 = vst.msk [vmem:[%s327_s29] sm:$0x1] %vm624_vm3, %v623_v13  ;;  %p1190_p1 = scmp.lt.s32.totalorder %s1602_s26, %s1188_s30  ;;  %p1191_p6 = scmp.lt.s32.totalorder %s1189_s10, %s1183_s25 }
 0x192   : > { %p1186_p0 = pneg %p1185_p12 }
 0x193   : > { %v636_v15 = vadd.f32 %v635_v14, %v634_v12  ;;  %p1192_p10 = por %p1191_p6, %p1190_p1 }
 0x195   : > { %p1193_p3 = pnand %p1192_p10, %p1186_p0 }
 0x197   : > { %1196 = shalt.err (!%p1193_p3)
}
 0x198   : > { %s1197_s17 = scalar_lea.hbm %s1600_s8, 16  ;;  %s1201_s21 = scalar_lea.hbm %s1690_s4, 32 }
 0x199   : > { %p1198_p4 = scmp.ne.s32.totalorder %s1600_s8, %s1197_s17  ;;  %p1202_p11 = scmp.lt.u32.totalorder %s1600_s8, %s1690_s4 }
 0x19a   : > { %p1203_p13 = scmp.lt.u32.totalorder %s1201_s21, %s1197_s17  ;;  %p1205_p7 = scmp.lt.u32.totalorder %s1197_s17, %s1600_s8 }
 0x19b   : > { %p1199_p9 = pnand %p1198_p4, %p1706_p2 }
 0x19c   : > { %p1204_p5 = por %p1203_p13, %p1202_p11 }
 0x19d   : > { %p1200_p8 = pneg %p1199_p9 }
 0x19e   : > { %p1206_p12 = por %p1205_p7, %p1204_p5 }
 0x1a0   : > { %p1207_p0 = pnand %p1206_p12, %p1200_p8 }
 0x1a2   : > { %1210 = shalt.err (!%p1207_p0)
}
 0x1a3   : > { %961 = dma.vmem_to_hbm [thread:$0]  (%p1706_p2), %s1602_s26, 16, %s1600_s8, %s1612_s11   ;;  %637 = vst.msk [vmem:[%s333_s28] sm:$0x1] %vm624_vm3, %v636_v15 }
 0x1a4   : > { %s1211_s25 = scalar_lea.vmem %s1610_s13, 16  ;;  %s1316_s30 = smov [#allocation12]  }
 0x1a5   : > { %p1212_p1 = scmp.ne.s32.totalorder %s1610_s13, %s1211_s25  ;;  %s1215_s10 = sshll.u32 %s1316_s30, 4  ;;  %s1216_s10 = int_to_ptr.vmem [resolvable:$false] %s1215_s10 }
 0x1a6   : > { %s1217_s17 = scalar_lea.vmem %s1216_s10, 32  ;;  %p1218_p3 = scmp.lt.s32.totalorder %s1610_s13, %s1216_s10 }
 0x1a7   : > { %p1213_p6 = pnand %p1212_p1, %p1706_p2  ;;  %p1219_p4 = scmp.lt.s32.totalorder %s1217_s17, %s1211_s25 }
 0x1a9   : > { %p1214_p10 = pneg %p1213_p6  ;;  %p1220_p9 = por %p1219_p4, %p1218_p3 }
 0x1ab   : > { %p1221_p8 = pnand %p1220_p9, %p1214_p10 }
 0x1ad   : > { %1224 = shalt.err (!%p1221_p8)
}
 0x1ae   : > { %s1225_s16 = scalar_lea.hbm %s1608_s7, 16  ;;  %s1229_s8 = scalar_lea.hbm %s1691_s5, 32 }
 0x1af   : > { %p1226_p11 = scmp.ne.s32.totalorder %s1608_s7, %s1225_s16  ;;  %p1230_p7 = scmp.lt.u32.totalorder %s1608_s7, %s1691_s5 }
 0x1b0   : > { %p1231_p12 = scmp.lt.u32.totalorder %s1229_s8, %s1225_s16  ;;  %p1233_p1 = scmp.lt.u32.totalorder %s1225_s16, %s1608_s7 }
 0x1b1   : > { %p1227_p13 = pnand %p1226_p11, %p1706_p2 }
 0x1b2   : > { %p1232_p0 = por %p1231_p12, %p1230_p7 }
 0x1b3   : > { %p1228_p5 = pneg %p1227_p13 }
 0x1b4   : > { %p1234_p6 = por %p1233_p1, %p1232_p0 }
 0x1b6   : > { %p1235_p10 = pnand %p1234_p6, %p1228_p5 }
 0x1b8   : > { %1238 = shalt.err (!%p1235_p10)
}
 0x1b9   : > { %962 = dma.vmem_to_hbm [thread:$0]  (%p1706_p2), %s1610_s13, 16, %s1608_s7, %s1612_s11  }
 0x1ba PF: > { %s715_s21 = sand.u32 1, %s1281_s18   ;;  %p1707_p3 = scmp.ne.s32.totalorder %s1697_s27, 0 }
 0x1bb   : > { %p1708_p4 = scmp.ge.s32.totalorder %s1301_s23, 2  ;;  %s716_s24 = scalar_lea.sflag [#allocation5], %s715_s21 }
 0x1bd   : > { %p978_p9 = pnand %p1708_p4, %p1707_p3 }
 0x1bf   : > { %1272 = dma.done.wait (!%p978_p9), %s716_s24, 128  }
 0x1c0   : > { %1274 = vsyncadd (!%p978_p9), %s716_s24, 4294967168  ;;  %s1709_s15 = sadd.s32 4294967294, %s1301_s23  }
 0x1c1   : > { %s724_s25 = sand.u32 1, %s1709_s15  }
 0x1c2   : > { %s725_s30 = scalar_lea.sflag [#allocation11], %s724_s25 }
 0x1c3   : > { %1276 = dma.done.wait (!%p978_p9), %s725_s30, 32  }
 0x1c4   : > { %1278 = vsyncadd (!%p978_p9), %s725_s30, 4294967264  ;;  %s26_s23 = sadd.s32 1, %s1301_s23   ;;  %s1710_s18 = smov %s1285_s19 }
 0x1c5   : > { %p23_p2 = scmp.ge.s32.totalorder %s26_s23, 4   ;;  %s1711_s19 = smov %s1289_s20 }
 0x1c6   : > { %s1712_s20 = smov %s1491_s14  ;;  %s1713_s21 = smov %s1297_s22 }
 0x1c7   : > { %s1714_s22 = smov %s1716_s9  ;;  %25 = sbr.rel (!%p23_p2) target bundleno = 9 (0x9), region = 127 }
 0x1ce   :  { %737 = vsyncpa [#allocation4], 1 }
 0x1cf   :  { %739 = vsyncpa [#allocation4 + $0x1], 1 }
 0x1d0   :  { %740 = vsyncpa [#allocation7], 1 }
 0x1d1   :  { %741 = vsyncpa [#allocation5], 1 }
 0x1d2   :  { %743 = vsyncpa [#allocation5 + $0x1], 1 }
 0x1d3   :  { %744 = vsyncpa [#allocation11], 1 }
 0x1d4   :  { %746 = vsyncpa [#allocation11 + $0x1], 1 }

// kernel: tile.177
= control target key start
LH: loop header
LB: loop body
LE: loop exit
PB: predicated region body
PF: predicated region fallthrough
CT: control target
= control target key end

     0   :  { %s22_s0 = inlined_call_operand.vmem [shape: f32[4], index: 0, kind: input, shape index: {}]   ;;  %s23_s1 = inlined_call_operand.vmem [shape: f32[4,4], index: 1, kind: output, shape index: {}]  }
   0x1   :  { %v4_v0 = vld [vmem:[%s22_s0] ss:$0 sm:$0xff] }
   0x2   :  { %5 = vst [vmem:[%s23_s1] sm:$0xf] %v4_v0 }

// kernel: tile.184
= control target key start
LH: loop header
LB: loop body
LE: loop exit
PB: predicated region body
PF: predicated region fallthrough
CT: control target
= control target key end

     0   :  { %vm7_vm0 = vcmask 31744   ;;  %s37_s8 = smov 4   ;;  %s38_s9 = smov 8   ;;  %vm13_vm1 = vcmask 130144   ;;  %vm19_vm2 = vcmask 97344   ;;  %vm25_vm3 = vcmask 64544   ;;  %s55_s0 = inlined_call_operand.vmem [shape: f32[4,4], index: 0, kind: input, shape index: {}]   ;;  %s56_s1 = inlined_call_operand.vmem [shape: f32[16], index: 1, kind: output, shape index: {}]  }
   0x1   :  { %v4_v0 = vld [vmem:[%s55_s0] sm:$0xf]  ;;  %s36_s0 = smov 12  }
   0x2   :  { %5 = vst [vmem:[#allocation1] sm:$0xf] %v4_v0 }
   0x9   :  { %v10_v1 = vld [vmem:[#allocation1 + $0x3] sm:$0x1]   ;;  %v22_v2 = vld [vmem:[#allocation1 + $0x1] sm:$0x1]   ;;  %v6_v3 = vld [vmem:[#allocation1] sm:$0x1]  }
   0xa   :  { %11 = vrot.lane.b32.xlu0 %v10_v1, %s36_s0  ;;  %23 = vrot.lane.b32.xlu1 %v22_v2, %s37_s8  ;;  %v16_v4 = vld [vmem:[#allocation1 + $0x2] sm:$0x1]   ;;  %8 = vst.msk [vmem:[#allocation0] sm:$0x1] %vm7_vm0, %v6_v3  }
   0xe   :  { %17 = vrot.lane.b32.xlu0 %v16_v4, %s38_s9 }
  0x7c   :  { %v12_v5 = vpop.permute.xlu0 %11   ;;  %v24_v6 = vpop.permute.xlu1 %23  }
  0x7d   :  { %14 = vst.msk [vmem:[#allocation0] sm:$0x1] %vm13_vm1, %v12_v5  }
  0x80   :  { %v18_v7 = vpop.permute.xlu0 %17  }
  0x81   :  { %20 = vst.msk [vmem:[#allocation0] sm:$0x1] %vm19_vm2, %v18_v7  }
  0x82   :  { %26 = vst.msk [vmem:[#allocation0] sm:$0x1] %vm25_vm3, %v24_v6  }
  0x89   :  { %v30_v8 = vld [vmem:[#allocation0] sm:$0x1] }
  0x8a   :  { %32 = vst [vmem:[%s56_s1] sm:$0x1] %v30_v8 }

// kernel: fwd.31
= control target key start
LH: loop header
LB: loop body
LE: loop exit
PB: predicated region body
PF: predicated region fallthrough
CT: control target
= control target key end

     0   :  { %11 = vsyncpa [#allocation4], 0  ;;  %s1807_s0 = inlined_call_operand.hbm [shape: bf16[128,144], index: 0, kind: input, shape index: {}]   ;;  %s1808_s1 = inlined_call_operand.hbm [shape: bf16[144,16], index: 1, kind: input, shape index: {}]   ;;  %s1809_s2 = inlined_call_operand.hbm [shape: f32[1,16], index: 2, kind: input, shape index: {}]   ;;  %s1810_s3 = inlined_call_operand.hbm [shape: bf16[128,16], index: 3, kind: output, shape index: {0}]   ;;  %s1811_s4 = inlined_call_operand.hbm [shape: f32[2,1,16], index: 4, kind: output, shape index: {1}]   ;;  %s1812_s5 = inlined_call_operand.hbm [shape: f32[2,1,16], index: 5, kind: output, shape index: {2}]  }
   0x1   :  { %13 = vsyncpa [#allocation4 + $0x1], 0 }
   0x2   :  { %14 = vsyncpa [#allocation7], 0 }
   0x3   :  { %15 = vsyncpa [#allocation5], 0 }
   0x4   :  { %17 = vsyncpa [#allocation5 + $0x1], 0 }
   0x5   :  { %18 = vsyncpa [#allocation11], 0 }
   0x6   :  { %20 = vsyncpa [#allocation11 + $0x1], 0  ;;  %s1375_s18 = smov 0   ;;  %s1377_s19 = smov 0  }
   0x7   :  { %s1379_s20 = smov 0   ;;  %s1381_s21 = smov 0  }
   0x8   :  { %s1383_s22 = smov 0   ;;  %s1385_s23 = smov 0  }
   0x9 LB: > { %s1406_s24 = sadd.s32 4294967295, %s1329_s23   ;;  %s1816_s25 = sadd.s32 4294967294, %s1329_s23   ;;  %s1329_s23 = sphi %s1385_s23, %s26_s23   ;;  %s1325_s22 = sphi %s1383_s22, %s1835_s22   ;;  %s1321_s21 = sphi %s1381_s21, %s1834_s21   ;;  %s1317_s20 = sphi %s1379_s20, %s1833_s20   ;;  %s1313_s19 = sphi %s1377_s19, %s1832_s19   ;;  %s1309_s18 = sphi %s1375_s18, %s1831_s18  }
   0xa   : > { %p67_p0 = scmp.ne.s32.totalorder %s1313_s19, %s1309_s18  ;;  %p1813_p1 = scmp.eq.s32.totalorder %s1406_s24, 0 }
   0xb   : > { %p153_p3 = scmp.eq.s32.totalorder %s1816_s25, 1  ;;  %p916_p5 = scmp.ge.s32.totalorder %s1329_s23, 1 }
   0xc   : > { %p1417_p4 = por %p1813_p1, %p67_p0  ;;  %p216_p7 = scmp.lt.s32.totalorder %s1329_s23, 3 }
   0xd   : > { %p1422_p6 = por %p153_p3, %p67_p0  ;;  %s1331_s29 = smov [#allocation6]  }
   0xe   : > { %s1817_s26 = scalar_select %p1417_p4, 1, 0 }
   0xf   : > { %s1818_s27 = scalar_select %p1422_p6, 1, 0 }
  0x10   : > { %p1427_p8 = pnand %p916_p5, %p216_p7  ;;  %s232_s30 = sshll.u32 %s1331_s29, 4  ;;  %s1431_s30 = int_to_ptr.vmem [resolvable:$true] %s232_s30 }
  0x11   : > { %s1332_s7 = smov [#allocation8]   ;;  %s1097_s11 = scalar_lea.hbm %s1808_s1, 1152 }
  0x12   : > { %p1003_p9 = pneg %p1427_p8  ;;  %s248_s8 = sshll.u32 %s1332_s7, 4  ;;  %s1442_s8 = int_to_ptr.vmem [resolvable:$true] %s248_s8 }
  0x13   : > { %p1098_p12 = scmp.ne.s32.totalorder %s1808_s1, %s1097_s11  ;;  %p1104_p5 = scmp.lt.u32.totalorder %s1097_s11, %s1808_s1 }
  0x14   : > { %p1438_p11 = pnand %p1003_p9, %p1813_p1 }
  0x16   : > { %p1099_p13 = pneg %p1438_p11 }
  0x18   : > { %p1100_p0 = pnand %p1099_p13, %p1098_p12 }
  0x1a   : > { %p1101_p3 = pneg %p1100_p0 }
  0x1c   : > { %p1106_p7 = pnand %p1104_p5, %p1101_p3 }
  0x1e   : > { %1109 = shalt.err (!%p1106_p7)
}
  0x1f   : > { %s1110_s16 = scalar_lea.vmem %s1431_s30, 1152  ;;  %p1118_p2 = scmp.lt.s32.totalorder %s1431_s30, %s1431_s30 }
  0x20   : > { %p1111_p9 = scmp.ne.s32.totalorder %s1431_s30, %s1110_s16  ;;  %p1119_p12 = scmp.lt.s32.totalorder %s1110_s16, %s1110_s16 }
  0x22   : > { %p1113_p10 = pnand %p1111_p9, %p1099_p13  ;;  %p1120_p0 = por %p1119_p12, %p1118_p2 }
  0x24   : > { %p1114_p1 = pneg %p1113_p10 }
  0x26   : > { %p1121_p6 = pnand %p1120_p0, %p1114_p1 }
  0x28   : > { %1124 = shalt.err (!%p1121_p6)
}
  0x29   : > { %s1333_s17 = smov 64   ;;  %s1334_s29 = smov 4  }
  0x2a   : > { %1006 = dma.hbm_to_vmem [thread:$0]  (!%p1438_p11), %s1808_s1, 1152, %s1431_s30, [#allocation7], %s1333_s17, %s1333_s17, %s1334_s29  }
  0x2b   : > { %s1125_s12 = scalar_lea.hbm %s1809_s2, 16 }
  0x2c   : > { %p1126_p2 = scmp.ne.s32.totalorder %s1809_s2, %s1125_s12  ;;  %p1132_p10 = scmp.lt.u32.totalorder %s1125_s12, %s1809_s2 }
  0x2e   : > { %p1128_p1 = pnand %p1126_p2, %p1099_p13 }
  0x30   : > { %p1129_p6 = pneg %p1128_p1 }
  0x32   : > { %p1134_p3 = pnand %p1132_p10, %p1129_p6 }
  0x34   : > { %1137 = shalt.err (!%p1134_p3)
}
  0x35   : > { %s1138_s30 = scalar_lea.vmem %s1442_s8, 16  ;;  %s1145_s17 = scalar_lea.vmem %s1442_s8, 32 }
  0x36   : > { %p1139_p5 = scmp.ne.s32.totalorder %s1442_s8, %s1138_s30  ;;  %p1146_p12 = scmp.lt.s32.totalorder %s1442_s8, %s1442_s8 }
  0x37   : > { %p1147_p0 = scmp.lt.s32.totalorder %s1145_s17, %s1138_s30 }
  0x38   : > { %p1141_p7 = pnand %p1139_p5, %p1099_p13 }
  0x39   : > { %p1148_p2 = por %p1147_p0, %p1146_p12 }
  0x3a   : > { %p1142_p9 = pneg %p1141_p7 }
  0x3c   : > { %p1149_p1 = pnand %p1148_p2, %p1142_p9 }
  0x3e   : > { %1152 = shalt.err (!%p1149_p1)
}
  0x3f   : > { %1009 = dma.hbm_to_vmem [thread:$0]  (!%p1438_p11), %s1809_s2, 16, %s1442_s8, [#allocation7]  }
  0x40   : > { %s45_s9 = sadd.s32 1, %s1325_s22  ;;  %s54_s10 = sadd.s32 1, %s1317_s20 }
  0x41   : > { %p47_p13 = scmp.ge.s32.totalorder %s45_s9, 2  ;;  %p61_p6 = scmp.ne.s32.totalorder %s1317_s20, %s1313_s19 }
  0x42   : > { %p62_p10 = scmp.eq.s32.totalorder %s1329_s23, 0  ;;  %p1026_p3 = scmp.lt.s32.totalorder %s1329_s23, 2 }
  0x43   : > { %s1837_s9 = smov (%p47_p13, %s45_s9), 0  ;;  %p1821_p7 = scmp.eq.s32.totalorder %s1406_s24, 1 }
  0x44   : > { %p63_p5 = por %p62_p10, %p61_p6  ;;  %s49_s11 = ssub.s32 %s1325_s22, %s1837_s9 }
  0x45   : > { %p1507_p9 = por %p1821_p7, %p61_p6  ;;  %s259_s12 = sand.u32 1, %s1317_s20  }
  0x46   : > { %p52_p12 = scmp.eq.s32.totalorder %s49_s11, 0  ;;  %s920_s8 = sshll.u32 %s259_s12, 6 }
  0x47   : > { %s1822_s6 = scalar_select %p1507_p9, 1, 0 }
  0x48   : > { %s959_s13 = sshll.u32 %s1325_s22, 10  ;;  %s263_s17 = scalar_lea.vmem [#allocation3], %s920_s8 }
  0x49   : > { %s1516_s14 = scalar_select %p52_p12, %s1317_s20, %s54_s10  }
  0x4a   : > { %s1521_s30 = scalar_lea.hbm %s1807_s0, %s959_s13  ;;  %s273_s29 = sshll.u32 %s263_s17, 4  ;;  %s1529_s29 = int_to_ptr.vmem [resolvable:$true] %s273_s29 }
  0x4b   : > { %p1525_p11 = pnand %p1026_p3, %p63_p5  ;;  %s1531_s10 = scalar_lea.sflag [#allocation4], %s259_s12 }
  0x4c   : > { %s1153_s11 = scalar_lea.hbm %s1521_s30, 1024  ;;  %s1158_s15 = scalar_lea.hbm %s1807_s0, 2048 }
  0x4d   : > { %p1154_p0 = scmp.ne.s32.totalorder %s1521_s30, %s1153_s11  ;;  %p1155_p2 = pneg %p1525_p11 }
  0x4e   : > { %p1159_p6 = scmp.lt.u32.totalorder %s1521_s30, %s1807_s0  ;;  %p1160_p10 = scmp.lt.u32.totalorder %s1158_s15, %s1153_s11 }
  0x4f   : > { %p1156_p1 = pnand %p1155_p2, %p1154_p0  ;;  %p1162_p5 = scmp.lt.u32.totalorder %s1153_s11, %s1521_s30 }
  0x50   : > { %p1161_p3 = por %p1160_p10, %p1159_p6 }
  0x51   : > { %p1157_p13 = pneg %p1156_p1 }
  0x52   : > { %p1163_p7 = por %p1162_p5, %p1161_p3 }
  0x54   : > { %p1164_p12 = pnand %p1163_p7, %p1157_p13 }
  0x56   : > { %1167 = shalt.err (!%p1164_p12)
}
  0x57   : > { %s1168_s12 = scalar_lea.vmem %s1529_s29, 1024  ;;  %s1335_s8 = smov [#allocation3]  }
  0x58   : > { %p1169_p0 = scmp.ne.s32.totalorder %s1529_s29, %s1168_s12  ;;  %s1173_s13 = sshll.u32 %s1335_s8, 4  ;;  %s1174_s13 = int_to_ptr.vmem [resolvable:$false] %s1173_s13 }
  0x59   : > { %s1175_s16 = scalar_lea.vmem %s1174_s13, 2048  ;;  %p1176_p4 = scmp.lt.s32.totalorder %s1529_s29, %s1174_s13 }
  0x5a   : > { %p1171_p1 = pnand %p1169_p0, %p1155_p2  ;;  %p1177_p6 = scmp.lt.s32.totalorder %s1175_s16, %s1168_s12 }
  0x5c   : > { %p1172_p9 = pneg %p1171_p1  ;;  %p1178_p10 = por %p1177_p6, %p1176_p4 }
  0x5e   : > { %p1179_p3 = pnand %p1178_p10, %p1172_p9 }
  0x60   : > { %1182 = shalt.err (!%p1179_p3)
}
  0x61   : > { %s1336_s11 = smov 128   ;;  %s1337_s15 = smov 8  }
  0x62   : > { %1013 = dma.hbm_to_vmem [thread:$0]  (!%p1525_p11), %s1521_s30, 1024, %s1529_s29, %s1531_s10, %s1336_s11, %s1336_s11, %s1337_s15  }
  0x63   : > { %285 = sbr.rel (%p1427_p8) target bundleno = 454 (0x1c6), region = 32  ;;  %s1562_s17 = sand.u32 (!%p1427_p8), 1, %s1313_s19  }
  0x64   : > { %s925_s12 = sshll.u32 (!%p1427_p8), %s1562_s17, 6  ;;  %s288_s8 = scalar_lea.sflag (!%p1427_p8), [#allocation4], %s1562_s17 }
  0x65   : > { %s1566_s13 = scalar_lea.vmem (!%p1427_p8), [#allocation3], %s925_s12  ;;  %p1824_p4 = scmp.ne.s32.totalorder (!%p1427_p8), %s1817_s26, 0 }
  0x6a   : > { %1292 = dma.done.wait (%p1824_p4), %s288_s8, 1024  }
  0x6b   : > { %1294 = vsyncadd (%p1824_p4), %s288_s8, 4294966272  ;;  %p1825_p9 = scmp.eq.s32.totalorder %s1406_s24, 0 }
  0x6d   : > { %1296 = dma.done.wait (%p1825_p9), [#allocation7], 1168   ;;  %p1826_p8 = pmov %p1825_p9 }
  0x6e   : > { %vm343_vm0 = vcmask 130048   ;;  %v1338_v0 = vmov 0   ;;  %v1339_v1 = vmov 0.0   ;;  %v1088_v2 = vld [vmem:[#allocation6] sm:$0xff]   ;;  %v1089_v3 = vld [vmem:[#allocation6 + $0x8] sm:$0xff]   ;;  %v1090_v4 = vld [vmem:[#allocation6 + $0x10] sm:$0xff]  }
  0x6f   : > { %1298 = vsyncadd (%p1826_p8), [#allocation7], 4294966128  ;;  %493 = vmatprep.subr.bf16.mxu0 %v1338_v0  ;;  %969 = vmatprep.subr.bf16.mxu1 %v1338_v0  ;;  %344 = vst.msk [vmem:[#allocation2] sm:$0xff] %vm343_vm0, %v1339_v1  ;;  %v352_v5 = vld [vmem:[%s1566_s13] sm:$0xff]  ;;  %v353_v6 = vld [vmem:[%s1566_s13 + $0x8] sm:$0xff]  ;;  %s928_s26 = sshll.u32 %s1562_s17, 5 }
  0x70   : > { %345 = vst.msk [vmem:[#allocation2 + $0x8] sm:$0xff] %vm343_vm0, %v1339_v1  ;;  %346 = vst.msk [vmem:[#allocation2 + $0x10] sm:$0xff] %vm343_vm0, %v1339_v1  ;;  %494 = vmatpush1.bf16.msra.mxu0 %v1088_v2  ;;  %978 = vmatpush1.bf16.msra.mxu1 %v1088_v2  ;;  %v356_v7 = vld [vmem:[%s1566_s13 + $0x20] sm:$0xff]  ;;  %v1091_v8 = vld [vmem:[#allocation6 + $0x18] sm:$0xff]   ;;  %v361_v9 = vunpack.c.h.bf16 %v352_v5  ;;  %v363_v10 = vunpack.c.h.bf16 %v353_v6  ;;  %v360_v27 = vunpack.c.l.bf16 %v352_v5  ;;  %v362_v28 = vunpack.c.l.bf16 %v353_v6  ;;  %s1627_s28 = scalar_lea.vmem [#allocation9], %s928_s26  ;;  %s968_s30 = sshll.u32 %s1321_s21, 9 }
  0x71   : > { %347 = vst.msk [vmem:[#allocation2 + $0x18] sm:$0xff] %vm343_vm0, %v1339_v1  ;;  %348 = vst.msk [vmem:[#allocation2 + $0x20] sm:$0xff] %vm343_vm0, %v1339_v1  ;;  %495 = vmatprep.subr.bf16.mxu0 %v1338_v0  ;;  %970 = vmatprep.subr.bf16.mxu1 %v1338_v0  ;;  %v357_v11 = vld [vmem:[%s1566_s13 + $0x28] sm:$0xff]  ;;  %v369_v12 = vunpack.c.h.bf16 %v356_v7  ;;  %v1092_v18 = vld [vmem:[#allocation6 + $0x20] sm:$0xff]   ;;  %v368_v29 = vunpack.c.l.bf16 %v356_v7  ;;  %vm685_vm1 = vcmask 125952   ;;  %s717_s29 = sshll.u32 %s1627_s28, 4  ;;  %s1652_s16 = scalar_lea.hbm %s1810_s3, %s968_s30  ;;  %s1654_s29 = int_to_ptr.vmem [resolvable:$true] %s717_s29 }
  0x72   : > { %349 = vst.msk [vmem:[#allocation2 + $0x28] sm:$0xff] %vm343_vm0, %v1339_v1  ;;  %350 = vst.msk [vmem:[#allocation2 + $0x30] sm:$0xff] %vm343_vm0, %v1339_v1  ;;  %v371_v13 = vunpack.c.h.bf16 %v357_v11  ;;  %v377_v14 = vmax.f32 %v361_v9, 0.0  ;;  %v379_v15 = vmax.f32 %v363_v10, 0.0  ;;  %v1093_v21 = vld [vmem:[#allocation6 + $0x28] sm:$0xff]   ;;  %v1094_v22 = vld [vmem:[#allocation6 + $0x30] sm:$0xff]   ;;  %v370_v30 = vunpack.c.l.bf16 %v357_v11 }
  0x73   : > { %351 = vst.msk [vmem:[#allocation2 + $0x38] sm:$0xff] %vm343_vm0, %v1339_v1  ;;  %v385_v16 = vmax.f32 %v369_v12, 0.0  ;;  %v354_v23 = vld [vmem:[%s1566_s13 + $0x10] sm:$0xff]  ;;  %v355_v24 = vld [vmem:[%s1566_s13 + $0x18] sm:$0xff]  ;;  %v376_v36 = vmax.f32 %v360_v27, 0.0  ;;  %v378_v37 = vmax.f32 %v362_v28, 0.0 }
  0x74   : > { %496 = vmatpush1.bf16.msra.mxu0 %v1089_v3  ;;  %979 = vmatpush1.bf16.msra.mxu1 %v1089_v3  ;;  %v387_v17 = vmax.f32 %v371_v13, 0.0  ;;  %v401_v19 = vpack.c.bf16 %v379_v15, %v377_v14  ;;  %v358_v25 = vld [vmem:[%s1566_s13 + $0x30] sm:$0xff]  ;;  %v359_v26 = vld [vmem:[%s1566_s13 + $0x38] sm:$0xff]  ;;  %v365_v32 = vunpack.c.h.bf16 %v354_v23  ;;  %v367_v33 = vunpack.c.h.bf16 %v355_v24  ;;  %v1096_v40 = vld [vmem:[#allocation6 + $0x40] sm:$0xff]   ;;  %s695_s11 = scalar_lea.sflag [#allocation5], %s1562_s17  ;;  %s1183_s15 = scalar_lea.vmem %s1654_s29, 512 }
  0x75   : > { %497 = vmatprep.subr.bf16.mxu0 %v1338_v0  ;;  %971 = vmatprep.subr.bf16.mxu1 %v1338_v0  ;;  %v1095_v31 = vld [vmem:[#allocation6 + $0x38] sm:$0xff]   ;;  %v373_v34 = vunpack.c.h.bf16 %v358_v25  ;;  %v375_v35 = vunpack.c.h.bf16 %v359_v26  ;;  %v384_v38 = vmax.f32 %v368_v29, 0.0  ;;  %v386_v39 = vmax.f32 %v370_v30, 0.0  ;;  %p1184_p11 = scmp.ne.s32.totalorder %s1654_s29, %s1183_s15  ;;  %p1827_p2 = scmp.ne.s32.totalorder %s1822_s6, 0 }
  0x76   : > { %v405_v20 = vpack.c.bf16 %v387_v17, %v385_v16  ;;  %938 = vmatprep.mubr.msk.bf16.mxu0 %vm343_vm0, %v401_v19  ;;  %v381_v41 = vmax.f32 %v365_v32, 0.0  ;;  %v383_v42 = vmax.f32 %v367_v33, 0.0  ;;  %v400_v45 = vpack.c.bf16 %v378_v37, %v376_v36  ;;  %v392_v59 = vld [vmem:[#allocation2] sm:$0xff]  ;;  %v942_v17 = vld [vmem:[#allocation8] ss:$0 sm:$0xff]  ;;  %s1340_s12 = smov [#allocation9]  }
  0x77   : > { %v389_v43 = vmax.f32 %v373_v34, 0.0  ;;  %v391_v44 = vmax.f32 %v375_v35, 0.0  ;;  %v404_v46 = vpack.c.bf16 %v386_v39, %v384_v38  ;;  %v364_v47 = vunpack.c.l.bf16 %v354_v23  ;;  %v393_v62 = vld [vmem:[#allocation2 + $0x8] sm:$0xff]  ;;  %v394_v11 = vld [vmem:[#allocation2 + $0x10] sm:$0xff]  ;;  %p1185_p13 = pnand %p1184_p11, %p1827_p2  ;;  %s1187_s8 = sshll.u32 %s1340_s12, 4  ;;  %s1188_s8 = int_to_ptr.vmem [resolvable:$false] %s1187_s8 }
  0x78   : > { %498 = vmatpush1.bf16.msra.mxu0 %v1090_v4  ;;  %980 = vmatpush1.bf16.msra.mxu1 %v1090_v4  ;;  %v366_v48 = vunpack.c.l.bf16 %v355_v24  ;;  %v372_v49 = vunpack.c.l.bf16 %v358_v25  ;;  %v374_v50 = vunpack.c.l.bf16 %v359_v26  ;;  %v403_v51 = vpack.c.bf16 %v383_v42, %v381_v41  ;;  %v396_v60 = vld [vmem:[#allocation2 + $0x20] sm:$0xff]  ;;  %v395_v14 = vld [vmem:[#allocation2 + $0x18] sm:$0xff]  ;;  %s1189_s13 = scalar_lea.vmem %s1188_s8, 1024  ;;  %p1190_p7 = scmp.lt.s32.totalorder %s1654_s29, %s1188_s8 }
  0x79   : > { %499 = vmatprep.subr.bf16.mxu0 %v1338_v0  ;;  %972 = vmatprep.subr.bf16.mxu1 %v1338_v0  ;;  %v407_v52 = vpack.c.bf16 %v391_v44, %v389_v43  ;;  %v380_v53 = vmax.f32 %v364_v47, 0.0  ;;  %v398_v12 = vld [vmem:[#allocation2 + $0x30] sm:$0xff]  ;;  %p1186_p5 = pneg %p1185_p13  ;;  %p1191_p12 = scmp.lt.s32.totalorder %s1189_s13, %s1183_s15 }
  0x7a   : > { %940 = vmatprep.mubr.msk.bf16.mxu1 %vm343_vm0, %v405_v20  ;;  %v382_v54 = vmax.f32 %v366_v48, 0.0  ;;  %v388_v55 = vmax.f32 %v372_v49, 0.0  ;;  %v390_v56 = vmax.f32 %v374_v50, 0.0  ;;  %v399_v16 = vld [vmem:[#allocation2 + $0x38] sm:$0xff] }
  0x7b   : > { %p1192_p0 = por %p1191_p12, %p1190_p7 }
  0x7c   : > { %500 = vmatpush1.bf16.msra.mxu0 %v1091_v8  ;;  %981 = vmatpush1.bf16.msra.mxu1 %v1091_v8  ;;  %v402_v57 = vpack.c.bf16 %v382_v54, %v380_v53  ;;  %v406_v58 = vpack.c.bf16 %v390_v56, %v388_v55 }
  0x7d   : > { %501 = vmatprep.subr.bf16.mxu0 %v1338_v0  ;;  %973 = vmatprep.subr.bf16.mxu1 %v1338_v0  ;;  %p1193_p1 = pnand %p1192_p0, %p1186_p5 }
  0x80   : > { %502 = vmatpush1.bf16.msra.mxu0 %v1092_v18  ;;  %982 = vmatpush1.bf16.msra.mxu1 %v1092_v18 }
  0x81   : > { %503 = vmatprep.subr.bf16.mxu0 %v1338_v0  ;;  %974 = vmatprep.subr.bf16.mxu1 %v1338_v0 }
  0x84   : > { %504 = vmatpush1.bf16.msra.mxu0 %v1093_v21  ;;  %983 = vmatpush1.bf16.msra.mxu1 %v1093_v21 }
  0x85   : > { %505 = vmatprep.subr.bf16.mxu0 %v1338_v0  ;;  %975 = vmatprep.subr.bf16.mxu1 %v1338_v0 }
  0x88   : > { %506 = vmatpush1.bf16.msra.mxu0 %v1094_v22  ;;  %984 = vmatpush1.bf16.msra.mxu1 %v1094_v22 }
  0x89   : > { %507 = vmatprep.subr.bf16.mxu0 %v1338_v0  ;;  %976 = vmatprep.subr.bf16.mxu1 %v1338_v0 }
  0x8c   : > { %508 = vmatpush1.bf16.msra.mxu0 %v1095_v31  ;;  %985 = vmatpush1.bf16.msra.mxu1 %v1095_v31 }
  0x8d   : > { %509 = vmatprep.subr.bf16.mxu0 %v1338_v0  ;;  %977 = vmatprep.subr.bf16.mxu1 %v1338_v0  ;;  %v397_v0 = vld [vmem:[#allocation2 + $0x28] sm:$0xff] }
  0x90   : > { %510 = vmatpush1.bf16.msra.mxu0 %v1096_v40  ;;  %986 = vmatpush1.bf16.msra.mxu1 %v1096_v40 }
  0x93   : > { %526 = vmatmul.mubr.bf16.vlgmr.msra.gmra.mrb[0].mxu0 %v400_v45  ;;  %542 = vmatmul.mubr.bf16.vlgmr.msra.gmra.mrb[0].mxu1 %v404_v46 }
  0x94   : > { %939 = vmatprep.mubr.msk.bf16.mxu0 %vm343_vm0, %v403_v51  ;;  %941 = vmatprep.mubr.msk.bf16.mxu1 %vm343_vm0, %v407_v52 }
  0x9b   : > { %534 = vmatmul.mubr.bf16.gmra.mrb[4].mxu0 %v402_v57  ;;  %550 = vmatmul.mubr.bf16.gmra.mrb[4].mxu1 %v406_v58 }
 0x166   : > { %v527_v61 = vpop.f32.mrb[0].mxu0  ;;  %v543_v63 = vpop.f32.mrb[0].mxu1 }
 0x167   : > { %v558_v1 = vadd.f32 %v527_v61, %v392_v59  ;;  %v529_v2 = vpop.f32.mrb[1].mxu0  ;;  %v562_v3 = vadd.f32 %v543_v63, %v396_v60  ;;  %v545_v4 = vpop.f32.mrb[1].mxu1 }
 0x168   : > { %v530_v5 = vpop.f32.mrb[2].mxu0  ;;  %v546_v6 = vpop.f32.mrb[2].mxu1 }
 0x169   : > { %566 = vst.msk [vmem:[#allocation2] sm:$0xff] %vm343_vm0, %v558_v1  ;;  %v559_v7 = vadd.f32 %v530_v5, %v393_v62  ;;  %v532_v8 = vpop.f32.mrb[3].mxu0  ;;  %570 = vst.msk [vmem:[#allocation2 + $0x20] sm:$0xff] %vm343_vm0, %v562_v3  ;;  %v563_v9 = vadd.f32 %v546_v6, %v397_v0  ;;  %v548_v10 = vpop.f32.mrb[3].mxu1 }
 0x16b   : > { %567 = vst.msk [vmem:[#allocation2 + $0x8] sm:$0xff] %vm343_vm0, %v559_v7  ;;  %571 = vst.msk [vmem:[#allocation2 + $0x28] sm:$0xff] %vm343_vm0, %v563_v9 }
 0x16e   : > { %v535_v13 = vpop.f32.mrb[4].mxu0  ;;  %v551_v15 = vpop.f32.mrb[4].mxu1 }
 0x16f   : > { %v560_v18 = vadd.f32 %v535_v13, %v394_v11  ;;  %v537_v19 = vpop.f32.mrb[5].mxu0  ;;  %v564_v20 = vadd.f32 %v551_v15, %v398_v12  ;;  %v553_v21 = vpop.f32.mrb[5].mxu1 }
 0x170   : > { %v538_v22 = vpop.f32.mrb[6].mxu0  ;;  %v554_v23 = vpop.f32.mrb[6].mxu1  ;;  %v577_v24 = vld [vmem:[#allocation2] sm:$0xff] }
 0x171   : > { %v581_v25 = vld [vmem:[#allocation2 + $0x20] sm:$0xff]  ;;  %568 = vst.msk [vmem:[#allocation2 + $0x10] sm:$0xff] %vm343_vm0, %v560_v18  ;;  %v561_v26 = vadd.f32 %v538_v22, %v395_v14  ;;  %v540_v27 = vpop.f32.mrb[7].mxu0  ;;  %572 = vst.msk [vmem:[#allocation2 + $0x30] sm:$0xff] %vm343_vm0, %v564_v20  ;;  %v565_v28 = vadd.f32 %v554_v23, %v399_v16  ;;  %v556_v29 = vpop.f32.mrb[7].mxu1  ;;  %v592_v30 = vadd.f32 %v942_v17, %v577_v24 }
 0x172   : > { %v596_v31 = vadd.f32 %v942_v17, %v581_v25  ;;  %v578_v32 = vld [vmem:[#allocation2 + $0x8] sm:$0xff] }
 0x173   : > { %v582_v33 = vld [vmem:[#allocation2 + $0x28] sm:$0xff]  ;;  %569 = vst.msk [vmem:[#allocation2 + $0x18] sm:$0xff] %vm343_vm0, %v561_v26  ;;  %573 = vst.msk [vmem:[#allocation2 + $0x38] sm:$0xff] %vm343_vm0, %v565_v28  ;;  %v593_v34 = vadd.f32 %v942_v17, %v578_v32  ;;  %v960_v36 = vpack.c.bf16 %v592_v30, %v592_v30  ;;  %v600_v46 = vsel %vm343_vm0, %v592_v30, 0.0  ;;  %v623_v47 = vmul.f32 %v592_v30, %v592_v30 }
 0x174   : > { %v1623_v35 = vadd.f32 %v942_v17, %v582_v33  ;;  %v964_v37 = vpack.c.bf16 %v596_v31, %v596_v31  ;;  %v607_v2 = vsel %vm343_vm0, %v596_v31, 0.0  ;;  %v627_v3 = vmul.f32 %v596_v31, %v596_v31 }
 0x175   : > { %v961_v38 = vpack.c.bf16 %v593_v34, %v593_v34  ;;  %686 = vst.msk [vmem:[%s1627_s28] sm:$0xf] %vm685_vm1, %v960_v36  ;;  %v601_v40 = vsel %vm343_vm0, %v593_v34, 0.0  ;;  %v624_v41 = vmul.f32 %v593_v34, %v593_v34  ;;  %v631_v62 = vsel %vm343_vm0, %v623_v47, 0.0 }
 0x176   : > { %v965_v39 = vpack.c.bf16 %v1623_v35, %v1623_v35  ;;  %690 = vst.msk [vmem:[%s1627_s28 + $0x10] sm:$0xf] %vm685_vm1, %v964_v37  ;;  %v602_v50 = vadd.f32 %v601_v40, %v600_v46 }
 0x177   : > { %687 = vst.msk [vmem:[%s1627_s28 + $0x4] sm:$0xf] %vm685_vm1, %v961_v38  ;;  %v632_v54 = vsel %vm343_vm0, %v624_v41, 0.0 }
 0x178   : > { %691 = vst.msk [vmem:[%s1627_s28 + $0x14] sm:$0xf] %vm685_vm1, %v965_v39  ;;  %v579_v42 = vld [vmem:[#allocation2 + $0x10] sm:$0xff]  ;;  %v633_v1 = vadd.f32 %v632_v54, %v631_v62 }
 0x179   : > { %v583_v43 = vld [vmem:[#allocation2 + $0x30] sm:$0xff]  ;;  %v594_v44 = vadd.f32 %v942_v17, %v579_v42 }
 0x17a   : > { %v1638_v45 = vadd.f32 %v942_v17, %v583_v43  ;;  %v580_v48 = vld [vmem:[#allocation2 + $0x18] sm:$0xff] }
 0x17b   : > { %v584_v49 = vld [vmem:[#allocation2 + $0x38] sm:$0xff]  ;;  %v595_v51 = vadd.f32 %v942_v17, %v580_v48  ;;  %v603_v53 = vsel %vm343_vm0, %v594_v44, 0.0  ;;  %v962_v56 = vpack.c.bf16 %v594_v44, %v594_v44  ;;  %v625_v58 = vmul.f32 %v594_v44, %v594_v44 }
 0x17c   : > { %v1643_v52 = vadd.f32 %v942_v17, %v584_v49  ;;  %v604_v55 = vadd.f32 %v603_v53, %v602_v50  ;;  %v966_v57 = vpack.c.bf16 %v1638_v45, %v1638_v45 }
 0x17d   : > { %v605_v59 = vsel %vm343_vm0, %v595_v51, 0.0  ;;  %v963_v60 = vpack.c.bf16 %v595_v51, %v595_v51  ;;  %688 = vst.msk [vmem:[%s1627_s28 + $0x8] sm:$0xf] %vm685_vm1, %v962_v56  ;;  %v626_v0 = vmul.f32 %v595_v51, %v595_v51  ;;  %v634_v4 = vsel %vm343_vm0, %v625_v58, 0.0 }
 0x17e   : > { %v967_v61 = vpack.c.bf16 %v1643_v52, %v1643_v52  ;;  %v606_v63 = vadd.f32 %v605_v59, %v604_v55  ;;  %692 = vst.msk [vmem:[%s1627_s28 + $0x18] sm:$0xf] %vm685_vm1, %v966_v57 }
 0x17f   : > { %689 = vst.msk [vmem:[%s1627_s28 + $0xc] sm:$0xf] %vm685_vm1, %v963_v60 }
 0x180   : > { %693 = vst.msk [vmem:[%s1627_s28 + $0x1c] sm:$0xf] %vm685_vm1, %v967_v61  ;;  %v608_v5 = vadd.f32 %v607_v2, %v606_v63 }
 0x181   : > { %1196 = shalt.err (!%p1193_p1)
}
 0x182   : > { %s1197_s26 = scalar_lea.hbm %s1652_s16, 512  ;;  %s1201_s7 = scalar_lea.hbm %s1810_s3, 1024 }
 0x183   : > { %p1198_p6 = scmp.ne.s32.totalorder %s1652_s16, %s1197_s26  ;;  %p1202_p4 = scmp.lt.u32.totalorder %s1652_s16, %s1810_s3 }
 0x184   : > { %p1203_p9 = scmp.lt.u32.totalorder %s1201_s7, %s1197_s26  ;;  %p1205_p11 = scmp.lt.u32.totalorder %s1197_s26, %s1652_s16 }
 0x185   : > { %p1199_p10 = pnand %p1198_p6, %p1827_p2 }
 0x186   : > { %p1204_p8 = por %p1203_p9, %p1202_p4 }
 0x187   : > { %p1200_p3 = pneg %p1199_p10 }
 0x188   : > { %p1206_p13 = por %p1205_p11, %p1204_p8 }
 0x18a   : > { %p1207_p5 = pnand %p1206_p13, %p1200_p3 }
 0x18c   : > { %1210 = shalt.err (!%p1207_p5)
}
 0x18d   : > { %s1341_s15 = smov 64   ;;  %s1342_s8 = smov 4   ;;  %v635_v6 = vadd.f32 %v634_v4, %v633_v1  ;;  %v636_v7 = vsel %vm343_vm0, %v626_v0, 0.0  ;;  %v609_v8 = vsel %vm343_vm0, %v1623_v35, 0.0  ;;  %v611_v9 = vsel %vm343_vm0, %v1638_v45, 0.0 }
 0x18e   : > { %997 = dma.vmem_to_hbm [thread:$0]  (%p1827_p2), %s1654_s29, 512, %s1652_s16, %s695_s11, %s1341_s15, %s1341_s15, %s1342_s8   ;;  %v628_v10 = vmul.f32 %v1623_v35, %v1623_v35  ;;  %v629_v11 = vmul.f32 %v1638_v45, %v1638_v45  ;;  %v610_v12 = vadd.f32 %v609_v8, %v608_v5  ;;  %v638_v14 = vsel %vm343_vm0, %v627_v3, 0.0 }
 0x18f   : > { %v637_v13 = vadd.f32 %v636_v7, %v635_v6  ;;  %v613_v17 = vsel %vm343_vm0, %v1643_v52, 0.0  ;;  %v630_v18 = vmul.f32 %v1643_v52, %v1643_v52  ;;  %s699_s29 = sand.u32 1, %s1406_s24   ;;  %s954_s16 = sshll.u32 %s1321_s21, 4  ;;  %vm621_vm2 = vcmask 122880  }
 0x190   : > { %v612_v15 = vadd.f32 %v611_v9, %v610_v12  ;;  %v640_v19 = vsel %vm343_vm0, %v628_v10, 0.0  ;;  %v642_v20 = vsel %vm343_vm0, %v629_v11, 0.0  ;;  %s327_s11 = scalar_lea.vmem [#allocation10], %s1562_s17  ;;  %s1719_s30 = scalar_lea.hbm %s1811_s4, %s954_s16 }
 0x191   : > { %v639_v16 = vadd.f32 %v638_v14, %v637_v13  ;;  %v644_v25 = vsel %vm343_vm0, %v630_v18, 0.0  ;;  %s734_s13 = sshll.u32 %s327_s11, 4  ;;  %s333_s24 = scalar_lea.vmem [#allocation12], %s1562_s17  ;;  %s1721_s13 = int_to_ptr.vmem [resolvable:$true] %s734_s13 }
 0x192   : > { %v614_v21 = vadd.f32 %v613_v17, %v612_v15  ;;  %s1726_s7 = sshll.u32 %s333_s24, 4  ;;  %s1729_s10 = scalar_lea.sflag [#allocation11], %s699_s29  ;;  %s749_s7 = int_to_ptr.vmem [resolvable:$true] %s1726_s7 }
 0x193   : > { %v641_v22 = vadd.f32 %v640_v19, %v639_v16  ;;  %s1211_s12 = scalar_lea.vmem %s1721_s13, 16  ;;  %s1343_s15 = smov [#allocation10]  }
 0x194   : > { %v615_v23 = vrot.slane %v614_v21, 4  ;;  %p1212_p7 = scmp.ne.s32.totalorder %s1721_s13, %s1211_s12  ;;  %s1215_s8 = sshll.u32 %s1343_s15, 4  ;;  %s1216_s8 = int_to_ptr.vmem [resolvable:$false] %s1215_s8 }
 0x195   : > { %v643_v24 = vadd.f32 %v642_v20, %v641_v22  ;;  %s1217_s26 = scalar_lea.vmem %s1216_s8, 32  ;;  %p1218_p1 = scmp.lt.s32.totalorder %s1721_s13, %s1216_s8 }
 0x196   : > { %v616_v26 = vadd.f32 %v615_v23, %v614_v21  ;;  %p1213_p12 = pnand %p1212_p7, %p1827_p2  ;;  %p1219_p6 = scmp.lt.s32.totalorder %s1217_s26, %s1211_s12 }
 0x197   : > { %v645_v27 = vadd.f32 %v644_v25, %v643_v24 }
 0x198   : > { %v617_v28 = vrot.slane %v616_v26, 2  ;;  %p1214_p0 = pneg %p1213_p12  ;;  %p1220_p10 = por %p1219_p6, %p1218_p1 }
 0x199   : > { %v646_v29 = vrot.slane %v645_v27, 4 }
 0x19a   : > { %v618_v30 = vadd.f32 %v617_v28, %v616_v26  ;;  %p1221_p3 = pnand %p1220_p10, %p1214_p0 }
 0x19b   : > { %v647_v31 = vadd.f32 %v646_v29, %v645_v27 }
 0x19c   : > { %v619_v32 = vrot.slane %v618_v30, 1 }
 0x19d   : > { %v648_v33 = vrot.slane %v647_v31, 2 }
 0x19e   : > { %v620_v34 = vadd.f32 %v619_v32, %v618_v30 }
 0x19f   : > { %v649_v35 = vadd.f32 %v648_v33, %v647_v31 }
 0x1a0   : > { %622 = vst.msk [vmem:[%s327_s11] sm:$0x1] %vm621_vm2, %v620_v34 }
 0x1a1   : > { %v650_v36 = vrot.slane %v649_v35, 1 }
 0x1a2   : > { %1224 = shalt.err (!%p1221_p3)
}
 0x1a3   : > { %s1225_s29 = scalar_lea.hbm %s1719_s30, 16  ;;  %s1229_s15 = scalar_lea.hbm %s1811_s4, 32 }
 0x1a4   : > { %p1226_p4 = scmp.ne.s32.totalorder %s1719_s30, %s1225_s29  ;;  %p1230_p11 = scmp.lt.u32.totalorder %s1719_s30, %s1811_s4 }
 0x1a5   : > { %p1231_p13 = scmp.lt.u32.totalorder %s1229_s15, %s1225_s29  ;;  %p1233_p7 = scmp.lt.u32.totalorder %s1225_s29, %s1719_s30 }
 0x1a6   : > { %p1227_p9 = pnand %p1226_p4, %p1827_p2 }
 0x1a7   : > { %p1232_p5 = por %p1231_p13, %p1230_p11 }
 0x1a8   : > { %p1228_p8 = pneg %p1227_p9 }
 0x1a9   : > { %p1234_p12 = por %p1233_p7, %p1232_p5 }
 0x1ab   : > { %p1235_p0 = pnand %p1234_p12, %p1228_p8 }
 0x1ad   : > { %1238 = shalt.err (!%p1235_p0)
}
 0x1ae   : > { %998 = dma.vmem_to_hbm [thread:$0]  (%p1827_p2), %s1721_s13, 16, %s1719_s30, %s1729_s10   ;;  %v651_v37 = vadd.f32 %v650_v36, %v649_v35 }
 0x1af   : > { %s1758_s26 = scalar_lea.hbm %s1812_s5, %s954_s16  ;;  %s1239_s29 = scalar_lea.vmem %s749_s7, 16 }
 0x1b0   : > { %652 = vst.msk [vmem:[%s333_s24] sm:$0x1] %vm621_vm2, %v651_v37  ;;  %p1240_p1 = scmp.ne.s32.totalorder %s749_s7, %s1239_s29  ;;  %s1344_s11 = smov [#allocation12]  }
 0x1b1   : > { %s1243_s28 = sshll.u32 %s1344_s11, 4  ;;  %s1244_s28 = int_to_ptr.vmem [resolvable:$false] %s1243_s28 }
 0x1b2   : > { %p1241_p6 = pnand %p1240_p1, %p1827_p2  ;;  %s1245_s13 = scalar_lea.vmem %s1244_s28, 32 }
 0x1b3   : > { %p1246_p3 = scmp.lt.s32.totalorder %s749_s7, %s1244_s28  ;;  %p1247_p4 = scmp.lt.s32.totalorder %s1245_s13, %s1239_s29 }
 0x1b4   : > { %p1242_p10 = pneg %p1241_p6 }
 0x1b5   : > { %p1248_p9 = por %p1247_p4, %p1246_p3 }
 0x1b7   : > { %p1249_p8 = pnand %p1248_p9, %p1242_p10 }
 0x1b9   : > { %1252 = shalt.err (!%p1249_p8)
}
 0x1ba   : > { %s1253_s21 = scalar_lea.hbm %s1758_s26, 16  ;;  %s1257_s30 = scalar_lea.hbm %s1812_s5, 32 }
 0x1bb   : > { %p1254_p11 = scmp.ne.s32.totalorder %s1758_s26, %s1253_s21  ;;  %p1258_p7 = scmp.lt.u32.totalorder %s1758_s26, %s1812_s5 }
 0x1bc   : > { %p1259_p12 = scmp.lt.u32.totalorder %s1257_s30, %s1253_s21  ;;  %p1261_p1 = scmp.lt.u32.totalorder %s1253_s21, %s1758_s26 }
 0x1bd   : > { %p1255_p13 = pnand %p1254_p11, %p1827_p2 }
 0x1be   : > { %p1260_p0 = por %p1259_p12, %p1258_p7 }
 0x1bf   : > { %p1256_p5 = pneg %p1255_p13 }
 0x1c0   : > { %p1262_p6 = por %p1261_p1, %p1260_p0 }
 0x1c2   : > { %p1263_p10 = pnand %p1262_p6, %p1256_p5 }
 0x1c4   : > { %1266 = shalt.err (!%p1263_p10)
}
 0x1c5   : > { %999 = dma.vmem_to_hbm [thread:$0]  (%p1827_p2), %s749_s7, 16, %s1758_s26, %s1729_s10  }
 0x1c6 PF: > { %s760_s8 = sand.u32 1, %s1309_s18   ;;  %p1828_p3 = scmp.ne.s32.totalorder %s1818_s27, 0 }
 0x1c7   : > { %p1829_p4 = scmp.ge.s32.totalorder %s1329_s23, 2  ;;  %s761_s12 = scalar_lea.sflag [#allocation5], %s760_s8 }
 0x1c9   : > { %p1015_p9 = pnand %p1829_p4, %p1828_p3 }
 0x1cb   : > { %1300 = dma.done.wait (!%p1015_p9), %s761_s12, 512  }
 0x1cc   : > { %1302 = vsyncadd (!%p1015_p9), %s761_s12, 4294966784  ;;  %s1830_s25 = sadd.s32 4294967294, %s1329_s23  }
 0x1cd   : > { %s769_s29 = sand.u32 1, %s1830_s25  }
 0x1ce   : > { %s770_s11 = scalar_lea.sflag [#allocation11], %s769_s29 }
 0x1cf   : > { %1304 = dma.done.wait (!%p1015_p9), %s770_s11, 32  }
 0x1d0   : > { %1306 = vsyncadd (!%p1015_p9), %s770_s11, 4294967264  ;;  %s26_s23 = sadd.s32 1, %s1329_s23   ;;  %s1831_s18 = smov %s1313_s19 }
 0x1d1   : > { %p23_p2 = scmp.ge.s32.totalorder %s26_s23, 4   ;;  %s1832_s19 = smov %s1317_s20 }
 0x1d2   : > { %s1833_s20 = smov %s1516_s14  ;;  %s1834_s21 = smov %s1325_s22 }
 0x1d3   : > { %s1835_s22 = smov %s1837_s9  ;;  %25 = sbr.rel (!%p23_p2) target bundleno = 9 (0x9), region = 127 }
 0x1da   :  { %782 = vsyncpa [#allocation4], 1 }
 0x1db   :  { %784 = vsyncpa [#allocation4 + $0x1], 1 }
 0x1dc   :  { %785 = vsyncpa [#allocation7], 1 }
 0x1dd   :  { %786 = vsyncpa [#allocation5], 1 }
 0x1de   :  { %788 = vsyncpa [#allocation5 + $0x1], 1 }
 0x1df   :  { %789 = vsyncpa [#allocation11], 1 }
 0x1e0   :  { %791 = vsyncpa [#allocation11 + $0x1], 1 }

// kernel: fwd.32
= control target key start
LH: loop header
LB: loop body
LE: loop exit
PB: predicated region body
PF: predicated region fallthrough
CT: control target
= control target key end

     0   :  { %8 = vsyncpa [#allocation3], 0  ;;  %s304_s0 = inlined_call_operand.hbm [shape: bf16[16,128], index: 0, kind: input, shape index: {}]   ;;  %s305_s1 = inlined_call_operand.hbm [shape: f32[1,128], index: 1, kind: input, shape index: {}]   ;;  %s306_s2 = inlined_call_operand.hbm [shape: f32[1,128], index: 2, kind: input, shape index: {}]   ;;  %s307_s3 = inlined_call_operand.hbm [shape: bf16[16,128], index: 3, kind: output, shape index: {}]  }
   0x1   :  { %9 = vsyncpa [#allocation6], 0 }
   0x2   :  { %10 = vsyncpa [#allocation4], 0  ;;  %s217_s12 = smov [#allocation5]   ;;  %s218_s14 = smov [#allocation2]  }
   0x3   :  { %s29_s13 = sshll.u32 %s217_s12, 4  ;;  %s16_s15 = sshll.u32 %s218_s14, 4  ;;  %s30_s13 = int_to_ptr.vmem [resolvable:$true] %s29_s13  ;;  %s243_s15 = int_to_ptr.vmem [resolvable:$true] %s16_s15 }
   0x4   :  { %s123_s18 = scalar_lea.hbm %s305_s1, 16 }
   0x5   :  { %p124_p0 = scmp.ne.s32.totalorder %s305_s1, %s123_s18  ;;  %p127_p1 = scmp.lt.u32.totalorder %s123_s18, %s305_s1 }
   0x7   :  { %p129_p2 = pnand %p127_p1, %p124_p0 }
   0x9   :  { %132 = shalt.err (!%p129_p2)
}
   0xa   :  { %s133_s23 = scalar_lea.vmem %s30_s13, 16  ;;  %s137_s24 = scalar_lea.vmem %s30_s13, 32 }
   0xb   :  { %p134_p3 = scmp.ne.s32.totalorder %s30_s13, %s133_s23  ;;  %p138_p4 = scmp.lt.s32.totalorder %s30_s13, %s30_s13 }
   0xc   :  { %p139_p5 = scmp.lt.s32.totalorder %s137_s24, %s133_s23 }
   0xe   :  { %p140_p6 = por %p139_p5, %p138_p4 }
  0x10   :  { %p141_p7 = pnand %p140_p6, %p134_p3 }
  0x12   :  { %144 = shalt.err (!%p141_p7)
}
  0x13   :  { %32 = dma.hbm_to_vmem [thread:$0]  %s305_s1, 16, %s30_s13, [#allocation6]  }
  0x14   :  { %s145_s29 = scalar_lea.hbm %s304_s0, 128 }
  0x15   :  { %p146_p8 = scmp.ne.s32.totalorder %s304_s0, %s145_s29  ;;  %p149_p9 = scmp.lt.u32.totalorder %s145_s29, %s304_s0 }
  0x17   :  { %p151_p10 = pnand %p149_p9, %p146_p8 }
  0x19   :  { %154 = shalt.err (!%p151_p10)
}
  0x1a   :  { %s155_s7 = scalar_lea.vmem %s243_s15, 128  ;;  %p160_p12 = scmp.lt.s32.totalorder %s243_s15, %s243_s15 }
  0x1b   :  { %p156_p11 = scmp.ne.s32.totalorder %s243_s15, %s155_s7  ;;  %p161_p13 = scmp.lt.s32.totalorder %s155_s7, %s155_s7 }
  0x1d   :  { %p162_p0 = por %p161_p13, %p160_p12 }
  0x1f   :  { %p163_p1 = pnand %p162_p0, %p156_p11 }
  0x21   :  { %166 = shalt.err (!%p163_p1)
}
  0x22   :  { %s219_s1 = smov 64   ;;  %s220_s8 = smov 4  }
  0x23   :  { %22 = dma.hbm_to_vmem [thread:$0]  %s304_s0, 128, %s243_s15, [#allocation3], %s219_s1, %s219_s1, %s220_s8  }
  0x24   :  { %s221_s11 = smov [#allocation7]   ;;  %s167_s16 = scalar_lea.hbm %s306_s2, 16 }
  0x25   :  { %s39_s12 = sshll.u32 %s221_s11, 4  ;;  %p168_p2 = scmp.ne.s32.totalorder %s306_s2, %s167_s16  ;;  %s40_s12 = int_to_ptr.vmem [resolvable:$true] %s39_s12 }
  0x26   :  { %p171_p3 = scmp.lt.u32.totalorder %s167_s16, %s306_s2 }
  0x28   :  { %p173_p4 = pnand %p171_p3, %p168_p2 }
  0x2a   :  { %176 = shalt.err (!%p173_p4)
}
  0x2b   :  { %s177_s21 = scalar_lea.vmem %s40_s12, 16  ;;  %s181_s0 = scalar_lea.vmem %s40_s12, 32 }
  0x2c   :  { %p178_p5 = scmp.ne.s32.totalorder %s40_s12, %s177_s21  ;;  %p182_p6 = scmp.lt.s32.totalorder %s40_s12, %s40_s12 }
  0x2d   :  { %p183_p7 = scmp.lt.s32.totalorder %s181_s0, %s177_s21 }
  0x2f   :  { %p184_p8 = por %p183_p7, %p182_p6 }
  0x31   :  { %p185_p9 = pnand %p184_p8, %p178_p5 }
  0x33   :  { %188 = shalt.err (!%p185_p9)
}
  0x34   :  { %42 = dma.hbm_to_vmem [thread:$0]  %s306_s2, 16, %s40_s12, [#allocation6]  }
  0x35   :  { %211 = dma.done.wait [#allocation3], 128  }
  0x36   :  { %212 = vsyncadd [#allocation3], 4294967168 }
  0x37   :  { %213 = dma.done.wait [#allocation6], 32  }
  0x38   :  { %214 = vsyncadd [#allocation6], 4294967264  ;;  %v109_v0 = vld [vmem:[#allocation2] sm:$0xff]   ;;  %v102_v1 = vld [vmem:[#allocation5] ss:$0 sm:$0xff]  ;;  %s222_s23 = smov [#allocation8]  }
  0x39   :  { %v110_v2 = vunpack.c.l.bf16 %v109_v0  ;;  %v111_v3 = vunpack.c.h.bf16 %v109_v0  ;;  %v103_v4 = vld [vmem:[#allocation7] ss:$0 sm:$0xff]  ;;  %s89_s24 = sshll.u32 %s222_s23, 4  ;;  %s90_s24 = int_to_ptr.vmem [resolvable:$true] %s89_s24 }
  0x3a   :  { %s189_s25 = scalar_lea.vmem %s90_s24, 128  ;;  %p194_p11 = scmp.lt.s32.totalorder %s90_s24, %s90_s24 }
  0x3b   :  { %v63_v5 = vmul.f32 %v110_v2, %v102_v1  ;;  %v64_v6 = vmul.f32 %v111_v3, %v102_v1  ;;  %p190_p10 = scmp.ne.s32.totalorder %s90_s24, %s189_s25  ;;  %p195_p12 = scmp.lt.s32.totalorder %s189_s25, %s189_s25 }
  0x3d   :  { %v72_v7 = vadd.f32 %v103_v4, %v63_v5  ;;  %v73_v8 = vadd.f32 %v103_v4, %v64_v6  ;;  %p196_p13 = por %p195_p12, %p194_p11 }
  0x3f   :  { %v115_v9 = vpack.c.bf16 %v73_v8, %v72_v7  ;;  %p197_p0 = pnand %p196_p13, %p190_p10 }
  0x41   :  { %116 = vst [vmem:[#allocation8] sm:$0xff] %v115_v9  }
  0x42   :  { %200 = shalt.err (!%p197_p0)
}
  0x43   :  { %s201_s27 = scalar_lea.hbm %s307_s3, 128 }
  0x44   :  { %p202_p1 = scmp.ne.s32.totalorder %s307_s3, %s201_s27  ;;  %p205_p2 = scmp.lt.u32.totalorder %s201_s27, %s307_s3 }
  0x46   :  { %p207_p3 = pnand %p205_p2, %p202_p1 }
  0x48   :  { %210 = shalt.err (!%p207_p3)
}
  0x49   :  { %95 = dma.vmem_to_hbm [thread:$0]  %s90_s24, 128, %s307_s3, [#allocation4], %s219_s1, %s219_s1, %s220_s8  }
  0x4a   :  { %215 = dma.done.wait [#allocation4], 128  }
  0x4b   :  { %216 = vsyncadd [#allocation4], 4294967168 }
  0x4c   :  { %99 = vsyncpa [#allocation3], 1 }
  0x4d   :  { %100 = vsyncpa [#allocation6], 1 }
  0x4e   :  { %101 = vsyncpa [#allocation4], 1 }

// kernel: tile.195
= control target key start
LH: loop header
LB: loop body
LE: loop exit
PB: predicated region body
PF: predicated region fallthrough
CT: control target
= control target key end

     0   :  { %s101_s0 = inlined_call_operand.vmem [shape: f32[4,4], index: 0, kind: input, shape index: {}]   ;;  %s102_s1 = inlined_call_operand.hbm [shape: f32[1,16], index: 1, kind: output, shape index: {}]  }
   0x1   :  { %v5_v0 = vld [vmem:[%s101_s0] sm:$0xf] }
   0x2   :  { %6 = vst [vmem:[#allocation3] sm:$0xf] %v5_v0 }
   0x3   :  { %2 = vsyncpa [#allocation1], 0  ;;  %vm8_vm0 = vcmask 31744   ;;  %s72_s0 = smov 12   ;;  %s73_s8 = smov 4   ;;  %vm14_vm1 = vcmask 130144  }
   0x4   :  { %s74_s9 = smov 8   ;;  %vm20_vm2 = vcmask 97344   ;;  %vm26_vm3 = vcmask 64544   ;;  %s75_s10 = smov [#allocation0]  }
   0x5   :  { %s38_s11 = sshll.u32 %s75_s10, 4  ;;  %s39_s11 = int_to_ptr.vmem [resolvable:$true] %s38_s11 }
   0x6   :  { %s48_s12 = scalar_lea.vmem %s39_s11, 16  ;;  %s52_s13 = scalar_lea.vmem %s39_s11, 32 }
   0x7   :  { %p49_p0 = scmp.ne.s32.totalorder %s39_s11, %s48_s12  ;;  %p53_p1 = scmp.lt.s32.totalorder %s39_s11, %s39_s11 }
   0x8   :  { %p54_p2 = scmp.lt.s32.totalorder %s52_s13, %s48_s12 }
   0x9   :  { %v11_v1 = vld [vmem:[#allocation3 + $0x3] sm:$0x1]   ;;  %v23_v2 = vld [vmem:[#allocation3 + $0x1] sm:$0x1]   ;;  %v7_v3 = vld [vmem:[#allocation3] sm:$0x1]  }
   0xa   :  { %12 = vrot.lane.b32.xlu0 %v11_v1, %s72_s0  ;;  %24 = vrot.lane.b32.xlu1 %v23_v2, %s73_s8  ;;  %v17_v4 = vld [vmem:[#allocation3 + $0x2] sm:$0x1]   ;;  %9 = vst.msk [vmem:[#allocation2] sm:$0x1] %vm8_vm0, %v7_v3   ;;  %p55_p3 = por %p54_p2, %p53_p1 }
   0xc   :  { %p56_p4 = pnand %p55_p3, %p49_p0 }
   0xe   :  { %18 = vrot.lane.b32.xlu0 %v17_v4, %s74_s9 }
  0x7c   :  { %v13_v5 = vpop.permute.xlu0 %12   ;;  %v25_v6 = vpop.permute.xlu1 %24  }
  0x7d   :  { %15 = vst.msk [vmem:[#allocation2] sm:$0x1] %vm14_vm1, %v13_v5  }
  0x80   :  { %v19_v7 = vpop.permute.xlu0 %18  }
  0x81   :  { %21 = vst.msk [vmem:[#allocation2] sm:$0x1] %vm20_vm2, %v19_v7  }
  0x82   :  { %27 = vst.msk [vmem:[#allocation2] sm:$0x1] %vm26_vm3, %v25_v6  }
  0x89   :  { %v31_v8 = vld [vmem:[#allocation2] sm:$0x1] }
  0x8a   :  { %33 = vst [vmem:[#allocation0] sm:$0x1] %v31_v8 }
  0x8b   :  { %59 = shalt.err (!%p56_p4)
}
  0x8c   :  { %s60_s16 = scalar_lea.hbm %s102_s1, 16 }
  0x8d   :  { %p61_p5 = scmp.ne.s32.totalorder %s102_s1, %s60_s16  ;;  %p64_p6 = scmp.lt.u32.totalorder %s60_s16, %s102_s1 }
  0x8f   :  { %p66_p7 = pnand %p64_p6, %p61_p5 }
  0x91   :  { %69 = shalt.err (!%p66_p7)
}
  0x92   :  { %41 = dma.vmem_to_hbm [thread:$0]  %s39_s11, 16, %s102_s1, [#allocation1]  }
  0x93   :  { %70 = dma.done.wait [#allocation1], 16  }
  0x94   :  { %71 = vsyncadd [#allocation1], 4294967280 }
  0x95   :  { %43 = vsyncpa [#allocation1], 1 }

// kernel: fwd.33
= control target key start
LH: loop header
LB: loop body
LE: loop exit
PB: predicated region body
PF: predicated region fallthrough
CT: control target
= control target key end

     0   :  { %11 = vsyncpa [#allocation4], 0  ;;  %s3005_s0 = inlined_call_operand.hbm [shape: bf16[512,72], index: 0, kind: input, shape index: {}]   ;;  %s3006_s1 = inlined_call_operand.hbm [shape: bf16[72,16], index: 1, kind: input, shape index: {}]   ;;  %s3007_s2 = inlined_call_operand.hbm [shape: f32[1,16], index: 2, kind: input, shape index: {}]   ;;  %s3008_s3 = inlined_call_operand.hbm [shape: f32[512,16], index: 3, kind: output, shape index: {0}]   ;;  %s3009_s4 = inlined_call_operand.hbm [shape: f32[2,1,16], index: 4, kind: output, shape index: {1}]   ;;  %s3010_s5 = inlined_call_operand.hbm [shape: f32[2,1,16], index: 5, kind: output, shape index: {2}]  }
   0x1   :  { %13 = vsyncpa [#allocation4 + $0x1], 0 }
   0x2   :  { %14 = vsyncpa [#allocation7], 0 }
   0x3   :  { %15 = vsyncpa [#allocation5], 0 }
   0x4   :  { %17 = vsyncpa [#allocation5 + $0x1], 0 }
   0x5   :  { %18 = vsyncpa [#allocation11], 0 }
   0x6   :  { %20 = vsyncpa [#allocation11 + $0x1], 0  ;;  %s2227_s18 = smov 0   ;;  %s2229_s19 = smov 0  }
   0x7   :  { %s2231_s20 = smov 0   ;;  %s2233_s21 = smov 0  }
   0x8   :  { %s2235_s22 = smov 0   ;;  %s2237_s23 = smov 0  }
   0x9 LB: > { %s2258_s24 = sadd.s32 4294967295, %s2184_s23   ;;  %s3012_s25 = sadd.s32 4294967294, %s2184_s23   ;;  %s2184_s23 = sphi %s2237_s23, %s26_s23   ;;  %s2180_s22 = sphi %s2235_s22, %s3037_s22   ;;  %s2176_s21 = sphi %s2233_s21, %s3036_s21   ;;  %s2172_s20 = sphi %s2231_s20, %s3035_s20   ;;  %s2168_s19 = sphi %s2229_s19, %s3034_s19   ;;  %s2164_s18 = sphi %s2227_s18, %s3033_s18  }
   0xa   : > { %p67_p0 = scmp.ne.s32.totalorder %s2168_s19, %s2164_s18  ;;  %p3011_p1 = scmp.eq.s32.totalorder %s2258_s24, 0 }
   0xb   : > { %p153_p3 = scmp.eq.s32.totalorder %s3012_s25, 1  ;;  %p1524_p5 = scmp.ge.s32.totalorder %s2184_s23, 1 }
   0xc   : > { %p2269_p4 = por %p3011_p1, %p67_p0  ;;  %p216_p7 = scmp.lt.s32.totalorder %s2184_s23, 3 }
   0xd   : > { %p2274_p6 = por %p153_p3, %p67_p0  ;;  %s2186_s29 = smov [#allocation6]  }
   0xe   : > { %s3017_s26 = scalar_select %p2269_p4, 1, 0 }
   0xf   : > { %s3018_s27 = scalar_select %p2274_p6, 1, 0 }
  0x10   : > { %p2279_p8 = pnand %p1524_p5, %p216_p7  ;;  %s232_s30 = sshll.u32 %s2186_s29, 4  ;;  %s2283_s30 = int_to_ptr.vmem [resolvable:$true] %s232_s30 }
  0x11   : > { %s2187_s7 = smov [#allocation8]   ;;  %s1952_s11 = scalar_lea.hbm %s3006_s1, 576 }
  0x12   : > { %p1737_p9 = pneg %p2279_p8  ;;  %s248_s8 = sshll.u32 %s2187_s7, 4  ;;  %s2294_s8 = int_to_ptr.vmem [resolvable:$true] %s248_s8 }
  0x13   : > { %p1953_p12 = scmp.ne.s32.totalorder %s3006_s1, %s1952_s11  ;;  %p1959_p5 = scmp.lt.u32.totalorder %s1952_s11, %s3006_s1 }
  0x14   : > { %p2290_p11 = pnand %p1737_p9, %p3011_p1 }
  0x16   : > { %p1954_p13 = pneg %p2290_p11 }
  0x18   : > { %p1955_p0 = pnand %p1954_p13, %p1953_p12 }
  0x1a   : > { %p1956_p3 = pneg %p1955_p0 }
  0x1c   : > { %p1961_p7 = pnand %p1959_p5, %p1956_p3 }
  0x1e   : > { %1964 = shalt.err (!%p1961_p7)
}
  0x1f   : > { %s1965_s16 = scalar_lea.vmem %s2283_s30, 576  ;;  %p1973_p2 = scmp.lt.s32.totalorder %s2283_s30, %s2283_s30 }
  0x20   : > { %p1966_p9 = scmp.ne.s32.totalorder %s2283_s30, %s1965_s16  ;;  %p1974_p12 = scmp.lt.s32.totalorder %s1965_s16, %s1965_s16 }
  0x22   : > { %p1968_p10 = pnand %p1966_p9, %p1954_p13  ;;  %p1975_p0 = por %p1974_p12, %p1973_p2 }
  0x24   : > { %p1969_p1 = pneg %p1968_p10 }
  0x26   : > { %p1976_p6 = pnand %p1975_p0, %p1969_p1 }
  0x28   : > { %1979 = shalt.err (!%p1976_p6)
}
  0x29   : > { %s3013_s17 = smov 64   ;;  %s2189_s29 = smov 4  }
  0x2a   : > { %1740 = dma.hbm_to_vmem [thread:$0]  (!%p2290_p11), %s3006_s1, 576, %s2283_s30, [#allocation7], %s3013_s17, %s3013_s17, %s2189_s29  }
  0x2b   : > { %s1980_s12 = scalar_lea.hbm %s3007_s2, 16 }
  0x2c   : > { %p1981_p1 = scmp.ne.s32.totalorder %s3007_s2, %s1980_s12  ;;  %p1987_p10 = scmp.lt.u32.totalorder %s1980_s12, %s3007_s2 }
  0x2e   : > { %p1983_p2 = pnand %p1981_p1, %p1954_p13 }
  0x30   : > { %p1984_p6 = pneg %p1983_p2 }
  0x32   : > { %p1989_p3 = pnand %p1987_p10, %p1984_p6 }
  0x34   : > { %1992 = shalt.err (!%p1989_p3)
}
  0x35   : > { %s1993_s30 = scalar_lea.vmem %s2294_s8, 16  ;;  %s2000_s7 = scalar_lea.vmem %s2294_s8, 32 }
  0x36   : > { %p1994_p5 = scmp.ne.s32.totalorder %s2294_s8, %s1993_s30  ;;  %p2001_p12 = scmp.lt.s32.totalorder %s2294_s8, %s2294_s8 }
  0x37   : > { %p2002_p0 = scmp.lt.s32.totalorder %s2000_s7, %s1993_s30 }
  0x38   : > { %p1996_p7 = pnand %p1994_p5, %p1954_p13 }
  0x39   : > { %p2003_p1 = por %p2002_p0, %p2001_p12 }
  0x3a   : > { %p1997_p9 = pneg %p1996_p7 }
  0x3c   : > { %p2004_p2 = pnand %p2003_p1, %p1997_p9 }
  0x3e   : > { %2007 = shalt.err (!%p2004_p2)
}
  0x3f   : > { %1743 = dma.hbm_to_vmem [thread:$0]  (!%p2290_p11), %s3007_s2, 16, %s2294_s8, [#allocation7]  }
  0x40   : > { %s45_s11 = sadd.s32 1, %s2180_s22  ;;  %s54_s12 = sadd.s32 1, %s2172_s20 }
  0x41   : > { %p47_p13 = scmp.ge.s32.totalorder %s45_s11, 2  ;;  %p61_p6 = scmp.ne.s32.totalorder %s2172_s20, %s2168_s19 }
  0x42   : > { %p62_p10 = scmp.eq.s32.totalorder %s2184_s23, 0  ;;  %p1760_p3 = scmp.lt.s32.totalorder %s2184_s23, 2 }
  0x43   : > { %s3039_s11 = smov (%p47_p13, %s45_s11), 0  ;;  %p3021_p7 = scmp.eq.s32.totalorder %s2258_s24, 1 }
  0x44   : > { %p63_p5 = por %p62_p10, %p61_p6  ;;  %s49_s13 = ssub.s32 %s2180_s22, %s3039_s11 }
  0x45   : > { %p2362_p9 = por %p3021_p7, %p61_p6  ;;  %s259_s14 = sand.u32 1, %s2172_s20  }
  0x46   : > { %p52_p12 = scmp.eq.s32.totalorder %s49_s13, 0  ;;  %s1528_s8 = sshll.u32 %s259_s14, 7 }
  0x47   : > { %s3022_s6 = scalar_select %p2362_p9, 1, 0 }
  0x48   : > { %s1565_s15 = sshll.u32 %s2180_s22, 11  ;;  %s263_s10 = scalar_lea.vmem [#allocation3], %s1528_s8 }
  0x49   : > { %s2371_s16 = scalar_select %p52_p12, %s2172_s20, %s54_s12  }
  0x4a   : > { %s2376_s9 = scalar_lea.hbm %s3005_s0, %s1565_s15  ;;  %s271_s25 = sshll.u32 %s263_s10, 4  ;;  %s2384_s25 = int_to_ptr.vmem [resolvable:$true] %s271_s25 }
  0x4b   : > { %p2380_p11 = pnand %p1760_p3, %p63_p5  ;;  %s2386_s12 = scalar_lea.sflag [#allocation4], %s259_s14 }
  0x4c   : > { %s2008_s13 = scalar_lea.hbm %s2376_s9, 2048  ;;  %s2013_s30 = scalar_lea.hbm %s3005_s0, 4096 }
  0x4d   : > { %p2009_p0 = scmp.ne.s32.totalorder %s2376_s9, %s2008_s13  ;;  %p2010_p1 = pneg %p2380_p11 }
  0x4e   : > { %p2014_p6 = scmp.lt.u32.totalorder %s2376_s9, %s3005_s0  ;;  %p2015_p10 = scmp.lt.u32.totalorder %s2013_s30, %s2008_s13 }
  0x4f   : > { %p2011_p2 = pnand %p2010_p1, %p2009_p0  ;;  %p2017_p5 = scmp.lt.u32.totalorder %s2008_s13, %s2376_s9 }
  0x50   : > { %p2016_p3 = por %p2015_p10, %p2014_p6 }
  0x51   : > { %p2012_p13 = pneg %p2011_p2 }
  0x52   : > { %p2018_p7 = por %p2017_p5, %p2016_p3 }
  0x54   : > { %p2019_p12 = pnand %p2018_p7, %p2012_p13 }
  0x56   : > { %2022 = shalt.err (!%p2019_p12)
}
  0x57   : > { %s2023_s14 = scalar_lea.vmem %s2384_s25, 2048  ;;  %s2190_s8 = smov [#allocation3]  }
  0x58   : > { %p2024_p0 = scmp.ne.s32.totalorder %s2384_s25, %s2023_s14  ;;  %s2028_s15 = sshll.u32 %s2190_s8, 4  ;;  %s2029_s15 = int_to_ptr.vmem [resolvable:$false] %s2028_s15 }
  0x59   : > { %s2030_s7 = scalar_lea.vmem %s2029_s15, 4096  ;;  %p2031_p4 = scmp.lt.s32.totalorder %s2384_s25, %s2029_s15 }
  0x5a   : > { %p2026_p2 = pnand %p2024_p0, %p2010_p1  ;;  %p2032_p6 = scmp.lt.s32.totalorder %s2030_s7, %s2023_s14 }
  0x5c   : > { %p2027_p9 = pneg %p2026_p2  ;;  %p2033_p10 = por %p2032_p6, %p2031_p4 }
  0x5e   : > { %p2034_p3 = pnand %p2033_p10, %p2027_p9 }
  0x60   : > { %2037 = shalt.err (!%p2034_p3)
}
  0x61   : > { %s3024_s13 = smov 64   ;;  %283 = sbr.rel (%p2279_p8) target bundleno = 518 (0x206), region = 32 }
  0x62   : > { %1747 = dma.hbm_to_vmem [thread:$0]  (!%p2380_p11), %s2376_s9, 2048, %s2384_s25, %s2386_s12, %s3024_s13, %s3024_s13, %s2189_s29  }
  0x63   : > { %s2420_s30 = sand.u32 (!%p2279_p8), 1, %s2168_s19   ;;  %p3025_p4 = scmp.ne.s32.totalorder (!%p2279_p8), %s3017_s26, 0 }
  0x64   : > { %s1532_s10 = sshll.u32 (!%p2279_p8), %s2420_s30, 7  ;;  %s286_s14 = scalar_lea.sflag (!%p2279_p8), [#allocation4], %s2420_s30 }
  0x65   : > { %s2424_s8 = scalar_lea.vmem (!%p2279_p8), [#allocation3], %s1532_s10 }
  0x68   : > { %2147 = dma.done.wait (%p3025_p4), %s286_s14, 2048  }
  0x69   : > { %2149 = vsyncadd (%p3025_p4), %s286_s14, 4294965248  ;;  %p3026_p9 = scmp.eq.s32.totalorder %s2258_s24, 0 }
  0x6b   : > { %2151 = dma.done.wait (%p3026_p9), [#allocation7], 592   ;;  %p3027_p8 = pmov %p3026_p9 }
  0x6c   : > { %vm340_vm0 = vcmask 130048   ;;  %v2191_v0 = vmov 0.0   ;;  %v1819_v1 = vld [vmem:[#allocation6] sm:$0xff]   ;;  %v1820_v2 = vld [vmem:[#allocation6 + $0x8] sm:$0xff]   ;;  %v1821_v3 = vld [vmem:[#allocation6 + $0x10] sm:$0xff]   ;;  %vm553_vm1 = vcmask 588800  }
  0x6d   : > { %2153 = vsyncadd (%p3027_p8), [#allocation7], 4294966704  ;;  %343 = vst.msk [vmem:[#allocation2 + $0x10] sm:$0xff] %vm340_vm0, %v2191_v0  ;;  %1667 = vmatprep.subr.bf16.mxu0 %v1819_v1  ;;  %1709 = vmatprep.subr.bf16.mxu1 %v1819_v1  ;;  %v1568_v4 = vld [vmem:[%s2424_s8] sm:$0xff]   ;;  %v1631_v7 = vld [vmem:[%s2424_s8 + $0x8] sm:$0xff]   ;;  %vm602_vm2 = vcmask 1043456  }
  0x6e   : > { %341 = vst.msk [vmem:[#allocation2] sm:$0xff] %vm340_vm0, %v2191_v0  ;;  %342 = vst.msk [vmem:[#allocation2 + $0x8] sm:$0xff] %vm340_vm0, %v2191_v0  ;;  %1668 = vmatpush3.bf16.msra.mxu0 %v1819_v1  ;;  %1714 = vmatpush3.bf16.msra.mxu1 %v1819_v1  ;;  %v1569_v5 = vunpack.c.l.bf16 %v1568_v4  ;;  %v1570_v6 = vunpack.c.h.bf16 %v1568_v4  ;;  %v1632_v10 = vld [vmem:[%s2424_s8 + $0x10] sm:$0xff]   ;;  %v1822_v11 = vld [vmem:[#allocation6 + $0x18] sm:$0xff]   ;;  %v1573_v14 = vunpack.c.l.bf16 %v1631_v7  ;;  %v1574_v15 = vunpack.c.h.bf16 %v1631_v7  ;;  %s1535_s25 = sshll.u32 %s2420_s30, 8  ;;  %s1308_s28 = sand.u32 1, %s2258_s24  }
  0x6f   : > { %344 = vst.msk [vmem:[#allocation2 + $0x18] sm:$0xff] %vm340_vm0, %v2191_v0  ;;  %345 = vst.msk [vmem:[#allocation2 + $0x20] sm:$0xff] %vm340_vm0, %v2191_v0  ;;  %1669 = vmatprep.subr.bf16.mxu0 %v1820_v2  ;;  %1710 = vmatprep.subr.bf16.mxu1 %v1820_v2  ;;  %v1638_v12 = vld [vmem:[%s2424_s8 + $0x40] sm:$0xff]   ;;  %v1577_v16 = vunpack.c.l.bf16 %v1632_v10  ;;  %v1578_v17 = vunpack.c.h.bf16 %v1632_v10  ;;  %v1639_v18 = vld [vmem:[%s2424_s8 + $0x48] sm:$0xff]   ;;  %s2600_s26 = scalar_lea.vmem [#allocation9], %s1535_s25  ;;  %s3016_s17 = sshll.u32 %s2176_s21, 4 }
  0x70   : > { %346 = vst.msk [vmem:[#allocation2 + $0x28] sm:$0xff] %vm340_vm0, %v2191_v0  ;;  %347 = vst.msk [vmem:[#allocation2 + $0x30] sm:$0xff] %vm340_vm0, %v2191_v0  ;;  %v437_v8 = vmax.f32 %v1569_v5, 0.0  ;;  %v438_v9 = vmax.f32 %v1570_v6, 0.0  ;;  %v1601_v19 = vunpack.c.l.bf16 %v1638_v12  ;;  %v1823_v20 = vld [vmem:[#allocation6 + $0x20] ss:$0 sps:$4 sm:$0xff]   ;;  %v1602_v21 = vunpack.c.h.bf16 %v1638_v12  ;;  %s2871_s10 = scalar_lea.hbm %s3009_s4, %s3016_s17 }
  0x71   : > { %348 = vst.msk [vmem:[#allocation2 + $0x38] sm:$0xff] %vm340_vm0, %v2191_v0  ;;  %349 = vst.msk [vmem:[#allocation2 + $0x40] sm:$0xff] %vm340_vm0, %v2191_v0  ;;  %v439_v22 = vmax.f32 %v1573_v14, 0.0  ;;  %v1633_v23 = vld [vmem:[%s2424_s8 + $0x18] sm:$0xff]   ;;  %v1605_v25 = vunpack.c.l.bf16 %v1639_v18  ;;  %v1606_v26 = vunpack.c.h.bf16 %v1639_v18  ;;  %v440_v27 = vmax.f32 %v1574_v15, 0.0  ;;  %v1634_v30 = vld [vmem:[%s2424_s8 + $0x20] sm:$0xff]  }
  0x72   : > { %350 = vst.msk [vmem:[#allocation2 + $0x48] sm:$0xff] %vm340_vm0, %v2191_v0  ;;  %351 = vst.msk [vmem:[#allocation2 + $0x50] sm:$0xff] %vm340_vm0, %v2191_v0  ;;  %1670 = vmatpush3.bf16.msra.mxu0 %v1820_v2  ;;  %1715 = vmatpush3.bf16.msra.mxu1 %v1820_v2  ;;  %v501_v13 = vpack.c.bf16 %v438_v9, %v437_v8  ;;  %v453_v24 = vmax.f32 %v1601_v19, 0.0  ;;  %v441_v28 = vmax.f32 %v1577_v16, 0.0  ;;  %v442_v29 = vmax.f32 %v1578_v17, 0.0  ;;  %v1640_v32 = vld [vmem:[%s2424_s8 + $0x50] sm:$0xff]  }
  0x73   : > { %352 = vst.msk [vmem:[#allocation2 + $0x58] sm:$0xff] %vm340_vm0, %v2191_v0  ;;  %353 = vst.msk [vmem:[#allocation2 + $0x60] sm:$0xff] %vm340_vm0, %v2191_v0  ;;  %1671 = vmatprep.subr.bf16.mxu0 %v1821_v3  ;;  %1711 = vmatprep.subr.bf16.mxu1 %v1821_v3  ;;  %v454_v31 = vmax.f32 %v1602_v21, 0.0  ;;  %v455_v33 = vmax.f32 %v1605_v25, 0.0  ;;  %v456_v34 = vmax.f32 %v1606_v26, 0.0  ;;  %v604_v35 = vsel %vm602_vm2, %v1823_v20, 0 }
  0x74   : > { %354 = vst.msk [vmem:[#allocation2 + $0x68] sm:$0xff] %vm340_vm0, %v2191_v0  ;;  %355 = vst.msk [vmem:[#allocation2 + $0x70] sm:$0xff] %vm340_vm0, %v2191_v0  ;;  %1677 = vmatprep.mubr.msk.bf16.mxu0 %vm553_vm1, %v501_v13  ;;  %v1581_v36 = vunpack.c.l.bf16 %v1633_v23  ;;  %v1641_v38 = vld [vmem:[%s2424_s8 + $0x58] sm:$0xff]   ;;  %v1582_v39 = vunpack.c.h.bf16 %v1633_v23  ;;  %v1585_v40 = vunpack.c.l.bf16 %v1634_v30  ;;  %v1609_v41 = vunpack.c.l.bf16 %v1640_v32  ;;  %v1642_v43 = vld [vmem:[%s2424_s8 + $0x60] sm:$0xff]   ;;  %s325_s29 = scalar_lea.vmem [#allocation10], %s2420_s30  ;;  %s1566_s12 = sshll.u32 %s2176_s21, 12 }
  0x75   : > { %356 = vst.msk [vmem:[#allocation2 + $0x78] sm:$0xff] %vm340_vm0, %v2191_v0  ;;  %357 = vst.msk [vmem:[#allocation2 + $0x80] sm:$0xff] %vm340_vm0, %v2191_v0  ;;  %v509_v37 = vpack.c.bf16 %v454_v31, %v453_v24  ;;  %v1610_v42 = vunpack.c.h.bf16 %v1640_v32  ;;  %v502_v44 = vpack.c.bf16 %v440_v27, %v439_v22  ;;  %v503_v45 = vpack.c.bf16 %v442_v29, %v441_v28  ;;  %v1635_v59 = vld [vmem:[%s2424_s8 + $0x28] sm:$0xff]   ;;  %v1636_v60 = vld [vmem:[%s2424_s8 + $0x30] sm:$0xff]   ;;  %s1343_s9 = sshll.u32 %s325_s29, 4  ;;  %s1326_s15 = sshll.u32 %s2600_s26, 4  ;;  %s2878_s9 = int_to_ptr.vmem [resolvable:$true] %s1343_s9  ;;  %s2887_s15 = int_to_ptr.vmem [resolvable:$true] %s1326_s15 }
  0x76   : > { %358 = vst.msk [vmem:[#allocation2 + $0x88] sm:$0xff] %vm340_vm0, %v2191_v0  ;;  %359 = vst.msk [vmem:[#allocation2 + $0x90] sm:$0xff] %vm340_vm0, %v2191_v0  ;;  %1672 = vmatpush3.bf16.msra.mxu0 %v1821_v3  ;;  %1716 = vmatpush3.bf16.msra.mxu1 %v1821_v3  ;;  %v1586_v46 = vunpack.c.h.bf16 %v1634_v30  ;;  %v510_v47 = vpack.c.bf16 %v456_v34, %v455_v33  ;;  %v457_v48 = vmax.f32 %v1609_v41, 0.0  ;;  %v1613_v50 = vunpack.c.l.bf16 %v1641_v38  ;;  %v1643_v1 = vld [vmem:[%s2424_s8 + $0x68] sm:$0xff]   ;;  %v1644_v3 = vld [vmem:[%s2424_s8 + $0x70] sm:$0xff]   ;;  %s2885_s25 = scalar_lea.hbm %s3008_s3, %s1566_s12  ;;  %s2899_s12 = scalar_lea.sflag [#allocation11], %s1308_s28 }
  0x77   : > { %360 = vst.msk [vmem:[#allocation2 + $0x98] sm:$0xff] %vm340_vm0, %v2191_v0  ;;  %361 = vst.msk [vmem:[#allocation2 + $0xa0] sm:$0xff] %vm340_vm0, %v2191_v0  ;;  %1673 = vmatprep.subr.bf16.mxu0 %v1822_v11  ;;  %1712 = vmatprep.subr.bf16.mxu1 %v1822_v11  ;;  %v458_v49 = vmax.f32 %v1610_v42, 0.0  ;;  %v1614_v51 = vunpack.c.h.bf16 %v1641_v38  ;;  %v1617_v52 = vunpack.c.l.bf16 %v1642_v43  ;;  %v1618_v53 = vunpack.c.h.bf16 %v1642_v43  ;;  %v1637_v19 = vld [vmem:[%s2424_s8 + $0x38] sm:$0xff]   ;;  %s2038_s7 = scalar_lea.vmem %s2878_s9, 16  ;;  %p3028_p1 = scmp.ne.s32.totalorder %s3022_s6, 0 }
  0x78   : > { %362 = vst.msk [vmem:[#allocation2 + $0xa8] sm:$0xff] %vm340_vm0, %v2191_v0  ;;  %363 = vst.msk [vmem:[#allocation2 + $0xb0] sm:$0xff] %vm340_vm0, %v2191_v0  ;;  %1693 = vmatprep.mubr.msk.bf16.mxu1 %vm553_vm1, %v509_v37  ;;  %v443_v55 = vmax.f32 %v1581_v36, 0.0  ;;  %v444_v56 = vmax.f32 %v1582_v39, 0.0  ;;  %v445_v57 = vmax.f32 %v1585_v40, 0.0  ;;  %v446_v58 = vmax.f32 %v1586_v46, 0.0  ;;  %p2039_p11 = scmp.ne.s32.totalorder %s2878_s9, %s2038_s7 }
  0x79   : > { %364 = vst.msk [vmem:[#allocation2 + $0xb8] sm:$0xff] %vm340_vm0, %v2191_v0  ;;  %365 = vst.msk [vmem:[#allocation2 + $0xc0] sm:$0xff] %vm340_vm0, %v2191_v0  ;;  %v511_v54 = vpack.c.bf16 %v458_v49, %v457_v48  ;;  %v459_v61 = vmax.f32 %v1613_v50, 0.0  ;;  %v460_v62 = vmax.f32 %v1614_v51, 0.0  ;;  %v461_v63 = vmax.f32 %v1617_v52, 0.0  ;;  %v1645_v24 = vld [vmem:[%s2424_s8 + $0x78] sm:$0xff]  }
  0x7a   : > { %366 = vst.msk [vmem:[#allocation2 + $0xc8] sm:$0xff] %vm340_vm0, %v2191_v0  ;;  %367 = vst.msk [vmem:[#allocation2 + $0xd0] sm:$0xff] %vm340_vm0, %v2191_v0  ;;  %1674 = vmatpush3.bf16.msra.mxu0 %v1822_v11  ;;  %1717 = vmatpush3.bf16.msra.mxu1 %v1822_v11  ;;  %v1589_v2 = vunpack.c.l.bf16 %v1635_v59  ;;  %v504_v4 = vpack.c.bf16 %v444_v56, %v443_v55  ;;  %v505_v5 = vpack.c.bf16 %v446_v58, %v445_v57  ;;  %v471_v39 = vld [vmem:[#allocation2 + $0x10] sm:$0xff]  ;;  %v469_v40 = vld [vmem:[#allocation2] sm:$0xff]  ;;  %vm975_vm3 = vcmask 122880   ;;  %p2040_p13 = pnand %p2039_p11, %p3028_p1  ;;  %s2192_s13 = smov [#allocation10]  }
  0x7b   : > { %368 = vst.msk [vmem:[#allocation2 + $0xd8] sm:$0xff] %vm340_vm0, %v2191_v0  ;;  %369 = vst.msk [vmem:[#allocation2 + $0xe0] sm:$0xff] %vm340_vm0, %v2191_v0  ;;  %1719 = vmatprep.subr.msk.bf16.mxu0 %vm602_vm2, %v1823_v20  ;;  %1720 = vmatprep.subr.msk.bf16.mxu1 %vm602_vm2, %v1823_v20  ;;  %v1590_v6 = vunpack.c.h.bf16 %v1635_v59  ;;  %v1593_v7 = vunpack.c.l.bf16 %v1636_v60  ;;  %v1594_v8 = vunpack.c.h.bf16 %v1636_v60  ;;  %v512_v9 = vpack.c.bf16 %v460_v62, %v459_v61  ;;  %v472_v43 = vld [vmem:[#allocation2 + $0x18] sm:$0xff]  ;;  %s2042_s14 = sshll.u32 %s2192_s13, 4  ;;  %s2043_s14 = int_to_ptr.vmem [resolvable:$false] %s2042_s14 }
  0x7c   : > { %370 = vst.msk [vmem:[#allocation2 + $0xe8] sm:$0xff] %vm340_vm0, %v2191_v0  ;;  %371 = vst.msk [vmem:[#allocation2 + $0xf0] sm:$0xff] %vm340_vm0, %v2191_v0  ;;  %v1621_v10 = vunpack.c.l.bf16 %v1643_v1  ;;  %v1622_v11 = vunpack.c.h.bf16 %v1643_v1  ;;  %v1625_v13 = vunpack.c.l.bf16 %v1644_v3  ;;  %v1626_v14 = vunpack.c.h.bf16 %v1644_v3  ;;  %p2041_p5 = pneg %p2040_p13  ;;  %s2044_s8 = scalar_lea.vmem %s2043_s14, 32 }
  0x7d   : > { %372 = vst.msk [vmem:[#allocation2 + $0xf8] sm:$0xff] %vm340_vm0, %v2191_v0  ;;  %v462_v0 = vmax.f32 %v1618_v53, 0.0  ;;  %v447_v15 = vmax.f32 %v1589_v2, 0.0  ;;  %v448_v16 = vmax.f32 %v1590_v6, 0.0  ;;  %v449_v17 = vmax.f32 %v1593_v7, 0.0  ;;  %v487_v41 = vld [vmem:[#allocation2 + $0x90] sm:$0xff]  ;;  %p2045_p7 = scmp.lt.s32.totalorder %s2878_s9, %s2043_s14  ;;  %p2046_p12 = scmp.lt.s32.totalorder %s2044_s8, %s2038_s7 }
  0x7e   : > { %1676 = vmatpush3.bf16.msra.mxu0 %v604_v35  ;;  %1718 = vmatpush3.bf16.msra.mxu1 %v604_v35  ;;  %v450_v18 = vmax.f32 %v1594_v8, 0.0  ;;  %v463_v20 = vmax.f32 %v1621_v10, 0.0  ;;  %v464_v21 = vmax.f32 %v1622_v11, 0.0  ;;  %v465_v22 = vmax.f32 %v1625_v13, 0.0  ;;  %v488_v49 = vld [vmem:[#allocation2 + $0x98] sm:$0xff]  ;;  %v474_v8 = vld [vmem:[#allocation2 + $0x28] sm:$0xff] }
  0x7f   : > { %v513_v12 = vpack.c.bf16 %v462_v0, %v461_v63  ;;  %v466_v23 = vmax.f32 %v1626_v14, 0.0  ;;  %v506_v25 = vpack.c.bf16 %v448_v16, %v447_v15  ;;  %v1597_v26 = vunpack.c.l.bf16 %v1637_v19  ;;  %v475_v63 = vld [vmem:[#allocation2 + $0x30] sm:$0xff]  ;;  %v473_v0 = vld [vmem:[#allocation2 + $0x20] sm:$0xff]  ;;  %p2047_p0 = por %p2046_p12, %p2045_p7 }
  0x80   : > { %v1598_v27 = vunpack.c.h.bf16 %v1637_v19  ;;  %v507_v28 = vpack.c.bf16 %v450_v18, %v449_v17  ;;  %v514_v29 = vpack.c.bf16 %v464_v21, %v463_v20  ;;  %v1629_v30 = vunpack.c.l.bf16 %v1645_v24  ;;  %v491_v1 = vld [vmem:[#allocation2 + $0xb0] sm:$0xff]  ;;  %v2509_v2 = vld [vmem:[#allocation8] ss:$0 sm:$0xff]  ;;  %v492_v10 = vld [vmem:[#allocation2 + $0xb8] sm:$0xff] }
  0x81   : > { %1678 = vmatmul.mubr.msk.bf16.vlgmr.msra.gmra.mrb[0].mxu0 %vm553_vm1, %v502_v44  ;;  %1694 = vmatmul.mubr.msk.bf16.vlgmr.msra.gmra.mrb[0].mxu1 %vm553_vm1, %v510_v47  ;;  %v1630_v31 = vunpack.c.h.bf16 %v1645_v24  ;;  %v515_v32 = vpack.c.bf16 %v466_v23, %v465_v22  ;;  %v451_v33 = vmax.f32 %v1597_v26, 0.0  ;;  %v485_v44 = vld [vmem:[#allocation2 + $0x80] sm:$0xff]  ;;  %v470_v47 = vld [vmem:[#allocation2 + $0x8] sm:$0xff]  ;;  %p2048_p2 = pnand %p2047_p0, %p2041_p5 }
  0x82   : > { %1681 = vmatprep.mubr.msk.bf16.mxu0 %vm553_vm1, %v503_v45  ;;  %1697 = vmatprep.mubr.msk.bf16.mxu1 %vm553_vm1, %v511_v54  ;;  %v452_v34 = vmax.f32 %v1598_v27, 0.0  ;;  %v467_v35 = vmax.f32 %v1629_v30, 0.0  ;;  %v486_v54 = vld [vmem:[#allocation2 + $0x88] sm:$0xff] }
  0x83   : > { %v468_v36 = vmax.f32 %v1630_v31, 0.0 }
  0x84   : > { %v508_v37 = vpack.c.bf16 %v452_v34, %v451_v33 }
  0x85   : > { %v516_v38 = vpack.c.bf16 %v468_v36, %v467_v35 }
  0x89   : > { %1682 = vmatmul.mubr.msk.bf16.gmra.mrb[4].mxu0 %vm553_vm1, %v504_v4  ;;  %1698 = vmatmul.mubr.msk.bf16.gmra.mrb[4].mxu1 %vm553_vm1, %v512_v9  ;;  %v476_v4 = vld [vmem:[#allocation2 + $0x38] sm:$0xff] }
  0x8a   : > { %1685 = vmatprep.mubr.msk.bf16.mxu0 %vm553_vm1, %v505_v5  ;;  %1701 = vmatprep.mubr.msk.bf16.mxu1 %vm553_vm1, %v513_v12  ;;  %v489_v5 = vld [vmem:[#allocation2 + $0xa0] sm:$0xff] }
  0x91   : > { %1686 = vmatmul.mubr.msk.bf16.gmra.mrb[8].mxu0 %vm553_vm1, %v506_v25  ;;  %1702 = vmatmul.mubr.msk.bf16.gmra.mrb[8].mxu1 %vm553_vm1, %v514_v29 }
  0x92   : > { %1689 = vmatprep.mubr.msk.bf16.mxu0 %vm553_vm1, %v507_v28  ;;  %1705 = vmatprep.mubr.msk.bf16.mxu1 %vm553_vm1, %v515_v32 }
  0x99   : > { %1690 = vmatmul.mubr.msk.bf16.gmra.mrb[12].mxu0 %vm553_vm1, %v508_v37  ;;  %1706 = vmatmul.mubr.msk.bf16.gmra.mrb[12].mxu1 %vm553_vm1, %v516_v38  ;;  %v479_v38 = vld [vmem:[#allocation2 + $0x50] sm:$0xff] }
 0x154   : > { %v1679_v42 = vpop.f32.mrb[0].mxu0  ;;  %v1695_v48 = vpop.f32.mrb[0].mxu1 }
 0x155   : > { %v769_v45 = vadd.f32 %v1679_v42, %v471_v39  ;;  %v640_v46 = vpop.f32.mrb[1].mxu0  ;;  %v785_v52 = vadd.f32 %v1695_v48, %v487_v41  ;;  %v704_v53 = vpop.f32.mrb[1].mxu1 }
 0x156   : > { %v767_v50 = vadd.f32 %v640_v46, %v469_v40  ;;  %v1680_v51 = vpop.f32.mrb[2].mxu0  ;;  %v783_v57 = vadd.f32 %v704_v53, %v485_v44  ;;  %v1696_v58 = vpop.f32.mrb[2].mxu1  ;;  %v477_v44 = vld [vmem:[#allocation2 + $0x40] sm:$0xff] }
 0x157   : > { %802 = vst.msk [vmem:[#allocation2 + $0x10] sm:$0xff] %vm340_vm0, %v769_v45  ;;  %v770_v55 = vadd.f32 %v1680_v51, %v472_v43  ;;  %v643_v56 = vpop.f32.mrb[3].mxu0  ;;  %818 = vst.msk [vmem:[#allocation2 + $0x90] sm:$0xff] %vm340_vm0, %v785_v52  ;;  %v786_v60 = vadd.f32 %v1696_v58, %v488_v49  ;;  %v707_v61 = vpop.f32.mrb[3].mxu1 }
 0x158   : > { %800 = vst.msk [vmem:[#allocation2] sm:$0xff] %vm340_vm0, %v767_v50  ;;  %v768_v59 = vadd.f32 %v643_v56, %v470_v47  ;;  %816 = vst.msk [vmem:[#allocation2 + $0x80] sm:$0xff] %vm340_vm0, %v783_v57  ;;  %v784_v62 = vadd.f32 %v707_v61, %v486_v54 }
 0x159   : > { %803 = vst.msk [vmem:[#allocation2 + $0x18] sm:$0xff] %vm340_vm0, %v770_v55  ;;  %819 = vst.msk [vmem:[#allocation2 + $0x98] sm:$0xff] %vm340_vm0, %v786_v60 }
 0x15a   : > { %801 = vst.msk [vmem:[#allocation2 + $0x8] sm:$0xff] %vm340_vm0, %v768_v59  ;;  %817 = vst.msk [vmem:[#allocation2 + $0x88] sm:$0xff] %vm340_vm0, %v784_v62 }
 0x15c   : > { %v1683_v3 = vpop.f32.mrb[4].mxu0  ;;  %v1699_v9 = vpop.f32.mrb[4].mxu1 }
 0x15d   : > { %v773_v6 = vadd.f32 %v1683_v3, %v475_v63  ;;  %v656_v7 = vpop.f32.mrb[5].mxu0  ;;  %v789_v14 = vadd.f32 %v1699_v9, %v491_v1  ;;  %v720_v15 = vpop.f32.mrb[5].mxu1 }
 0x15e   : > { %v837_v11 = vld [vmem:[#allocation2 + $0x10] sm:$0xff]  ;;  %v771_v12 = vadd.f32 %v656_v7, %v473_v0  ;;  %v1684_v13 = vpop.f32.mrb[6].mxu0  ;;  %v787_v20 = vadd.f32 %v720_v15, %v489_v5  ;;  %v1700_v21 = vpop.f32.mrb[6].mxu1 }
 0x15f   : > { %v876_v16 = vadd.f32 %v2509_v2, %v837_v11  ;;  %v835_v17 = vld [vmem:[#allocation2] sm:$0xff]  ;;  %806 = vst.msk [vmem:[#allocation2 + $0x30] sm:$0xff] %vm340_vm0, %v773_v6  ;;  %v774_v18 = vadd.f32 %v1684_v13, %v476_v4  ;;  %v659_v19 = vpop.f32.mrb[7].mxu0  ;;  %822 = vst.msk [vmem:[#allocation2 + $0xb0] sm:$0xff] %vm340_vm0, %v789_v14  ;;  %v790_v25 = vadd.f32 %v1700_v21, %v492_v10  ;;  %v2516_v26 = vpop.f32.mrb[7].mxu1  ;;  %v478_v13 = vld [vmem:[#allocation2 + $0x48] sm:$0xff] }
 0x160   : > { %v874_v22 = vadd.f32 %v2509_v2, %v835_v17  ;;  %v838_v23 = vld [vmem:[#allocation2 + $0x18] sm:$0xff]  ;;  %804 = vst.msk [vmem:[#allocation2 + $0x20] sm:$0xff] %vm340_vm0, %v771_v12  ;;  %v772_v24 = vadd.f32 %v659_v19, %v474_v8  ;;  %820 = vst.msk [vmem:[#allocation2 + $0xa0] sm:$0xff] %vm340_vm0, %v787_v20 }
 0x161   : > { %v1081_v27 = vsub.f32 0.0, %v876_v16  ;;  %v877_v28 = vadd.f32 %v2509_v2, %v838_v23  ;;  %v836_v29 = vld [vmem:[#allocation2 + $0x8] sm:$0xff]  ;;  %807 = vst.msk [vmem:[#allocation2 + $0x38] sm:$0xff] %vm340_vm0, %v774_v18  ;;  %v909_v30 = vsel %vm340_vm0, %v876_v16, 0.0  ;;  %823 = vst.msk [vmem:[#allocation2 + $0xb8] sm:$0xff] %vm340_vm0, %v790_v25  ;;  %v979_v34 = vmul.f32 %v876_v16, %v876_v16  ;;  %v480_v12 = vld [vmem:[#allocation2 + $0x58] sm:$0xff] }
 0x162   : > { %v977_v31 = vmul.f32 %v874_v22, %v874_v22  ;;  %v1079_v32 = vsub.f32 0.0, %v874_v22  ;;  %v875_v33 = vadd.f32 %v2509_v2, %v836_v29  ;;  %805 = vst.msk [vmem:[#allocation2 + $0x28] sm:$0xff] %vm340_vm0, %v772_v24  ;;  %v906_v36 = vsel %vm340_vm0, %v874_v22, 0.0 }
 0x163   : > { %v1115_v35 = vmul.f32 1.442695, %v1081_v27  ;;  %v911_v37 = vsel %vm340_vm0, %v877_v28, 0.0  ;;  %v980_v40 = vmul.f32 %v877_v28, %v877_v28  ;;  %v1082_v41 = vsub.f32 0.0, %v877_v28 }
 0x164   : > { %v1111_v39 = vmul.f32 1.442695, %v1079_v32  ;;  %v907_v42 = vsel %vm340_vm0, %v875_v33, 0.0  ;;  %v1687_v43 = vpop.f32.mrb[8].mxu0  ;;  %v1009_v45 = vsel %vm340_vm0, %v977_v31, 0.0  ;;  %v978_v47 = vmul.f32 %v875_v33, %v875_v33  ;;  %v2529_v49 = vpop.f32.mrb[8].mxu1 }
 0x165   : > { %1824 = vpow2.f32 %v1115_v35  ;;  %v908_v46 = vadd.f32 %v907_v42, %v906_v36  ;;  %v672_v48 = vpop.f32.mrb[9].mxu0  ;;  %v1117_v50 = vmul.f32 1.442695, %v1082_v41  ;;  %v1080_v51 = vsub.f32 0.0, %v875_v33  ;;  %v2531_v55 = vpop.f32.mrb[9].mxu1 }
 0x166   : > { %1826 = vpow2.f32 %v1111_v39  ;;  %v841_v52 = vld [vmem:[#allocation2 + $0x30] sm:$0xff]  ;;  %v777_v53 = vadd.f32 %v1687_v43, %v479_v38  ;;  %v1688_v54 = vpop.f32.mrb[10].mxu0  ;;  %v1010_v57 = vsel %vm340_vm0, %v978_v47, 0.0  ;;  %v775_v60 = vadd.f32 %v672_v48, %v477_v44  ;;  %v2537_v62 = vpop.f32.mrb[10].mxu1 }
 0x167   : > { %v910_v56 = vadd.f32 %v909_v30, %v908_v46  ;;  %v2535_v58 = vadd.f32 %v2509_v2, %v841_v52  ;;  %v839_v59 = vld [vmem:[#allocation2 + $0x20] sm:$0xff]  ;;  %v675_v61 = vpop.f32.mrb[11].mxu0  ;;  %1828 = vpow2.f32 %v1117_v50  ;;  %v1011_v63 = vadd.f32 %v1010_v57, %v1009_v45  ;;  %v2541_v3 = vpop.f32.mrb[11].mxu1  ;;  %v853_v57 = vld [vmem:[#allocation2 + $0x90] sm:$0xff] }
 0x168   : > { %v1113_v0 = vmul.f32 1.442695, %v1080_v51  ;;  %v878_v1 = vadd.f32 %v2509_v2, %v839_v59  ;;  %810 = vst.msk [vmem:[#allocation2 + $0x50] sm:$0xff] %vm340_vm0, %v777_v53  ;;  %v1012_v4 = vsel %vm340_vm0, %v979_v34, 0.0  ;;  %v842_v7 = vld [vmem:[#allocation2 + $0x38] sm:$0xff]  ;;  %808 = vst.msk [vmem:[#allocation2 + $0x40] sm:$0xff] %vm340_vm0, %v775_v60  ;;  %v778_v24 = vadd.f32 %v1688_v54, %v480_v12 }
 0x169   : > { %v1085_v5 = vsub.f32 0.0, %v2535_v58  ;;  %v912_v6 = vadd.f32 %v911_v37, %v910_v56  ;;  %v840_v8 = vld [vmem:[#allocation2 + $0x28] sm:$0xff]  ;;  %v1013_v9 = vadd.f32 %v1012_v4, %v1011_v63  ;;  %v1014_v14 = vsel %vm340_vm0, %v980_v40, 0.0 }
 0x16a   : > { %1830 = vpow2.f32 %v1113_v0  ;;  %v913_v10 = vsel %vm340_vm0, %v878_v1, 0.0  ;;  %v981_v11 = vmul.f32 %v878_v1, %v878_v1  ;;  %v1083_v17 = vsub.f32 0.0, %v878_v1  ;;  %811 = vst.msk [vmem:[#allocation2 + $0x58] sm:$0xff] %vm340_vm0, %v778_v24 }
 0x16b   : > { %v1123_v15 = vmul.f32 1.442695, %v1085_v5  ;;  %v914_v16 = vadd.f32 %v913_v10, %v912_v6  ;;  %v1015_v18 = vadd.f32 %v1014_v14, %v1013_v9  ;;  %v2550_v20 = vadd.f32 %v2509_v2, %v842_v7 }
 0x16c   : > { %v1016_v19 = vsel %vm340_vm0, %v981_v11, 0.0  ;;  %v879_v21 = vadd.f32 %v2509_v2, %v840_v8  ;;  %v2553_v22 = vpop.f32.mrb[12].mxu0  ;;  %v1119_v23 = vmul.f32 1.442695, %v1083_v17  ;;  %v776_v25 = vadd.f32 %v675_v61, %v478_v13  ;;  %v2557_v28 = vpop.f32.mrb[12].mxu1 }
 0x16d   : > { %1832 = vpow2.f32 %v1123_v15  ;;  %v2555_v27 = vpop.f32.mrb[13].mxu0  ;;  %v1017_v29 = vadd.f32 %v1016_v19, %v1015_v18  ;;  %v1086_v30 = vsub.f32 0.0, %v2550_v20  ;;  %v2562_v32 = vpop.f32.mrb[13].mxu1  ;;  %v983_v42 = vmul.f32 %v2535_v58, %v2535_v58 }
 0x16e   : > { %v2560_v31 = vpop.f32.mrb[14].mxu0  ;;  %1834 = vpow2.f32 %v1119_v23  ;;  %v915_v34 = vsel %vm340_vm0, %v879_v21, 0.0  ;;  %v982_v35 = vmul.f32 %v879_v21, %v879_v21  ;;  %v1084_v36 = vsub.f32 0.0, %v879_v21  ;;  %809 = vst.msk [vmem:[#allocation2 + $0x48] sm:$0xff] %vm340_vm0, %v776_v25  ;;  %v2569_v39 = vpop.f32.mrb[14].mxu1 }
 0x16f   : > { %v1825_v33 = vpop.eup %1824  ;;  %v845_v37 = vld [vmem:[#allocation2 + $0x50] sm:$0xff]  ;;  %v2567_v38 = vpop.f32.mrb[15].mxu0  ;;  %v1125_v43 = vmul.f32 1.442695, %v1086_v30  ;;  %v843_v44 = vld [vmem:[#allocation2 + $0x40] sm:$0xff]  ;;  %v916_v47 = vadd.f32 %v915_v34, %v914_v16  ;;  %v917_v60 = vsel %vm340_vm0, %v2535_v58, 0.0  ;;  %v984_v1 = vmul.f32 %v2550_v20, %v2550_v20 }
 0x170   : > { %v1827_v40 = vpop.eup %1826  ;;  %v1177_v41 = vadd.f32 1.0, %v1825_v33  ;;  %v2573_v45 = vpop.f32.mrb[15].mxu1  ;;  %v1018_v48 = vsel %vm340_vm0, %v982_v35, 0.0  ;;  %v2577_v50 = vadd.f32 %v2509_v2, %v845_v37  ;;  %v1121_v53 = vmul.f32 1.442695, %v1084_v36  ;;  %v851_v30 = vld [vmem:[#allocation2 + $0x80] sm:$0xff] }
 0x171   : > { %v1175_v46 = vadd.f32 1.0, %v1827_v40  ;;  %v1829_v51 = vpop.eup %1828  ;;  %v1019_v52 = vadd.f32 %v1018_v48, %v1017_v29  ;;  %v882_v56 = vadd.f32 %v2509_v2, %v843_v44  ;;  %v1020_v61 = vsel %vm340_vm0, %v983_v42, 0.0  ;;  %v846_v7 = vld [vmem:[#allocation2 + $0x58] sm:$0xff]  ;;  %v483_v36 = vld [vmem:[#allocation2 + $0x70] sm:$0xff] }
 0x172   : > { %1836 = vrcp.f32 %v1177_v41  ;;  %v1178_v54 = vadd.f32 1.0, %v1829_v51  ;;  %v1089_v63 = vsub.f32 0.0, %v2577_v50  ;;  %v918_v4 = vadd.f32 %v917_v60, %v916_v47  ;;  %v854_v47 = vld [vmem:[#allocation2 + $0x98] sm:$0xff] }
 0x173   : > { %1838 = vrcp.f32 %v1175_v46  ;;  %v1021_v5 = vadd.f32 %v1020_v61, %v1019_v52  ;;  %v2587_v9 = vadd.f32 %v2509_v2, %v853_v57  ;;  %v985_v10 = vmul.f32 %v882_v56, %v882_v56 }
 0x174   : > { %v1831_v59 = vpop.eup %1830  ;;  %1840 = vpow2.f32 %v1125_v43  ;;  %v1131_v6 = vmul.f32 1.442695, %v1089_v63  ;;  %v1087_v11 = vsub.f32 0.0, %v882_v56  ;;  %v2591_v12 = vadd.f32 %v2509_v2, %v846_v7 }
 0x175   : > { %1842 = vrcp.f32 %v1178_v54  ;;  %v1176_v0 = vadd.f32 1.0, %v1831_v59  ;;  %v844_v8 = vld [vmem:[#allocation2 + $0x48] sm:$0xff]  ;;  %v919_v14 = vsel %vm340_vm0, %v2550_v20, 0.0  ;;  %v1022_v17 = vsel %vm340_vm0, %v984_v1, 0.0 }
 0x176   : > { %1844 = vpow2.f32 %v1121_v53  ;;  %v883_v15 = vadd.f32 %v2509_v2, %v844_v8  ;;  %v920_v18 = vadd.f32 %v919_v14, %v918_v4  ;;  %v921_v19 = vsel %vm340_vm0, %v882_v56, 0.0  ;;  %v481_v56 = vld [vmem:[#allocation2 + $0x60] sm:$0xff]  ;;  %v852_v1 = vld [vmem:[#allocation2 + $0x88] sm:$0xff]  ;;  %v484_v4 = vld [vmem:[#allocation2 + $0x78] sm:$0xff] }
 0x177   : > { %v1833_v58 = vpop.eup %1832  ;;  %1846 = vrcp.f32 %v1176_v0  ;;  %v1127_v21 = vmul.f32 1.442695, %v1087_v11  ;;  %v1023_v24 = vadd.f32 %v1022_v17, %v1021_v5  ;;  %v1090_v25 = vsub.f32 0.0, %v2591_v12  ;;  %v482_v8 = vld [vmem:[#allocation2 + $0x68] sm:$0xff]  ;;  %v857_v17 = vld [vmem:[#allocation2 + $0xb0] sm:$0xff] }
 0x178   : > { %v1181_v13 = vadd.f32 1.0, %v1833_v58  ;;  %1848 = vpow2.f32 %v1131_v6  ;;  %v1835_v16 = vpop.eup %1834  ;;  %v1024_v29 = vsel %vm340_vm0, %v985_v10, 0.0  ;;  %v986_v34 = vmul.f32 %v883_v15, %v883_v15 }
 0x179   : > { %v1179_v23 = vadd.f32 1.0, %v1835_v16  ;;  %v1133_v33 = vmul.f32 1.442695, %v1090_v25  ;;  %v1088_v35 = vsub.f32 0.0, %v883_v15  ;;  %v922_v40 = vadd.f32 %v921_v19, %v920_v18  ;;  %v495_v25 = vld [vmem:[#allocation2 + $0xd0] sm:$0xff] }
 0x17a   : > { %1850 = vrcp.f32 %v1181_v13  ;;  %v1097_v41 = vsub.f32 0.0, %v2587_v9  ;;  %v1025_v43 = vadd.f32 %v1024_v29, %v1023_v24  ;;  %v2608_v46 = vadd.f32 %v2509_v2, %v851_v30  ;;  %v490_v24 = vld [vmem:[#allocation2 + $0xa8] sm:$0xff] }
 0x17b   : > { %1852 = vpow2.f32 %v1127_v21  ;;  %v1129_v44 = vmul.f32 1.442695, %v1088_v35  ;;  %v923_v52 = vsel %vm340_vm0, %v883_v15, 0.0  ;;  %v781_v54 = vadd.f32 %v2553_v22, %v483_v36 }
 0x17c   : > { %v1837_v20 = vpop.eup %1836  ;;  %1854 = vrcp.f32 %v1179_v23  ;;  %v1147_v53 = vmul.f32 1.442695, %v1097_v41  ;;  %v987_v59 = vmul.f32 %v2577_v50, %v2577_v50  ;;  %v1026_v60 = vsel %vm340_vm0, %v986_v34, 0.0  ;;  %v855_v23 = vld [vmem:[#allocation2 + $0xa0] sm:$0xff] }
 0x17d   : > { %v1839_v37 = vpop.eup %1838  ;;  %1273 = vst.msk [vmem:[%s2600_s26 + $0x10] sm:$0xff] %vm340_vm0, %v1837_v20  ;;  %1856 = vpow2.f32 %v1133_v33  ;;  %v1095_v0 = vsub.f32 0.0, %v2608_v46  ;;  %814 = vst.msk [vmem:[#allocation2 + $0x70] sm:$0xff] %vm340_vm0, %v781_v54  ;;  %v2620_v22 = vadd.f32 %v2509_v2, %v854_v47  ;;  %v924_v6 = vadd.f32 %v923_v52, %v922_v40  ;;  %v858_v33 = vld [vmem:[#allocation2 + $0xb8] sm:$0xff] }
 0x17e   : > { %v1841_v42 = vpop.eup %1840  ;;  %1271 = vst.msk [vmem:[%s2600_s26] sm:$0xff] %vm340_vm0, %v1839_v37  ;;  %1858 = vpow2.f32 %v1129_v44  ;;  %v779_v7 = vadd.f32 %v2555_v27, %v481_v56  ;;  %v1027_v10 = vadd.f32 %v1026_v60, %v1025_v43  ;;  %v2628_v15 = vadd.f32 %v2509_v2, %v852_v1 }
 0x17f   : > { %v1843_v48 = vpop.eup %1842  ;;  %v1182_v51 = vadd.f32 1.0, %v1841_v42  ;;  %v1143_v11 = vmul.f32 1.442695, %v1095_v0  ;;  %v1098_v14 = vsub.f32 0.0, %v2620_v22  ;;  %v782_v16 = vadd.f32 %v2560_v31, %v484_v4 }
 0x180   : > { %v1845_v57 = vpop.eup %1844  ;;  %1274 = vst.msk [vmem:[%s2600_s26 + $0x18] sm:$0xff] %vm340_vm0, %v1843_v48  ;;  %812 = vst.msk [vmem:[#allocation2 + $0x60] sm:$0xff] %vm340_vm0, %v779_v7  ;;  %v925_v27 = vsel %vm340_vm0, %v2577_v50, 0.0  ;;  %v1028_v19 = vsel %vm340_vm0, %v987_v59, 0.0  ;;  %v780_v21 = vadd.f32 %v2567_v38, %v482_v8  ;;  %v988_v31 = vmul.f32 %v2591_v12, %v2591_v12 }
 0x181   : > { %v1847_v61 = vpop.eup %1846  ;;  %1860 = vrcp.f32 %v1182_v51  ;;  %v1180_v63 = vadd.f32 1.0, %v1845_v57  ;;  %v1149_v20 = vmul.f32 1.442695, %v1098_v14  ;;  %815 = vst.msk [vmem:[#allocation2 + $0x78] sm:$0xff] %vm340_vm0, %v782_v16  ;;  %v926_v50 = vadd.f32 %v925_v27, %v924_v6 }
 0x182   : > { %v1849_v5 = vpop.eup %1848  ;;  %1272 = vst.msk [vmem:[%s2600_s26 + $0x8] sm:$0xff] %vm340_vm0, %v1847_v61  ;;  %1862 = vpow2.f32 %v1147_v53  ;;  %v1029_v34 = vadd.f32 %v1028_v19, %v1027_v10  ;;  %v1096_v35 = vsub.f32 0.0, %v2628_v15  ;;  %813 = vst.msk [vmem:[#allocation2 + $0x68] sm:$0xff] %vm340_vm0, %v780_v21  ;;  %v2645_v38 = vadd.f32 %v2509_v2, %v857_v17 }
 0x183   : > { %1864 = vrcp.f32 %v1180_v63  ;;  %v1185_v58 = vadd.f32 1.0, %v1849_v5  ;;  %v2648_v40 = vadd.f32 %v2509_v2, %v855_v23  ;;  %v788_v41 = vadd.f32 %v2516_v26, %v490_v24 }
 0x184   : > { %v1851_v13 = vpop.eup %1850  ;;  %v849_v37 = vld [vmem:[#allocation2 + $0x70] sm:$0xff]  ;;  %v793_v42 = vadd.f32 %v2529_v49, %v495_v25  ;;  %v2656_v47 = vadd.f32 %v2509_v2, %v858_v33  ;;  %v927_v51 = vsel %vm340_vm0, %v2591_v12, 0.0  ;;  %v1030_v52 = vsel %vm340_vm0, %v988_v31, 0.0 }
 0x185   : > { %v1853_v18 = vpop.eup %1852  ;;  %1277 = vst.msk [vmem:[%s2600_s26 + $0x30] sm:$0xff] %vm340_vm0, %v1851_v13  ;;  %1866 = vrcp.f32 %v1185_v58  ;;  %v2653_v44 = vadd.f32 %v2509_v2, %v849_v37  ;;  %v2663_v26 = vsel %vm340_vm0, %v2608_v46, 0.0  ;;  %v1145_v49 = vmul.f32 1.442695, %v1096_v35  ;;  %821 = vst.msk [vmem:[#allocation2 + $0xa8] sm:$0xff] %vm340_vm0, %v788_v41  ;;  %v493_v41 = vld [vmem:[#allocation2 + $0xc0] sm:$0xff] }
 0x186   : > { %v1855_v29 = vpop.eup %1854  ;;  %v1183_v30 = vadd.f32 1.0, %v1853_v18  ;;  %1868 = vpow2.f32 %v1143_v11  ;;  %826 = vst.msk [vmem:[#allocation2 + $0xd0] sm:$0xff] %vm340_vm0, %v793_v42  ;;  %v928_v57 = vadd.f32 %v927_v51, %v926_v50  ;;  %v1031_v59 = vadd.f32 %v1030_v52, %v1029_v34  ;;  %v496_v42 = vld [vmem:[#allocation2 + $0xd8] sm:$0xff] }
 0x187   : > { %1275 = vst.msk [vmem:[%s2600_s26 + $0x20] sm:$0xff] %vm340_vm0, %v1855_v29  ;;  %v1857_v36 = vpop.eup %1856  ;;  %v847_v56 = vld [vmem:[#allocation2 + $0x60] sm:$0xff]  ;;  %v1093_v12 = vsub.f32 0.0, %v2653_v44  ;;  %v1101_v63 = vsub.f32 0.0, %v2645_v38  ;;  %v1099_v5 = vsub.f32 0.0, %v2648_v40  ;;  %v1102_v6 = vsub.f32 0.0, %v2656_v47 }
 0x188   : > { %1870 = vrcp.f32 %v1183_v30  ;;  %v1186_v43 = vadd.f32 1.0, %v1857_v36  ;;  %v1859_v48 = vpop.eup %1858  ;;  %v886_v61 = vadd.f32 %v2509_v2, %v847_v56  ;;  %v850_v4 = vld [vmem:[#allocation2 + $0x78] sm:$0xff]  ;;  %v933_v24 = vsel %vm340_vm0, %v2653_v44, 0.0  ;;  %v494_v56 = vld [vmem:[#allocation2 + $0xc8] sm:$0xff] }
 0x189   : > { %1872 = vpow2.f32 %v1149_v20  ;;  %v1184_v54 = vadd.f32 1.0, %v1859_v48  ;;  %v1139_v7 = vmul.f32 1.442695, %v1093_v12  ;;  %v848_v11 = vld [vmem:[#allocation2 + $0x68] sm:$0xff]  ;;  %v2678_v16 = vadd.f32 %v2509_v2, %v850_v4 }
 0x18a   : > { %1874 = vrcp.f32 %v1186_v43  ;;  %v929_v8 = vsel %vm340_vm0, %v886_v61, 0.0  ;;  %v989_v58 = vmul.f32 %v886_v61, %v886_v61  ;;  %v1091_v10 = vsub.f32 0.0, %v886_v61  ;;  %v499_v61 = vld [vmem:[#allocation2 + $0xf0] sm:$0xff] }
 0x18b   : > { %v1861_v53 = vpop.eup %1860  ;;  %1876 = vpow2.f32 %v1145_v49  ;;  %v930_v14 = vadd.f32 %v929_v8, %v928_v57  ;;  %v887_v17 = vadd.f32 %v2509_v2, %v848_v11  ;;  %v1155_v21 = vmul.f32 1.442695, %v1101_v63  ;;  %v497_v63 = vld [vmem:[#allocation2 + $0xe0] sm:$0xff] }
 0x18c   : > { %v1863_v60 = vpop.eup %1862  ;;  %1278 = vst.msk [vmem:[%s2600_s26 + $0x38] sm:$0xff] %vm340_vm0, %v1861_v53  ;;  %1878 = vrcp.f32 %v1184_v54  ;;  %v1032_v27 = vsel %vm340_vm0, %v989_v58, 0.0  ;;  %v1135_v19 = vmul.f32 1.442695, %v1091_v10  ;;  %v1151_v25 = vmul.f32 1.442695, %v1099_v5 }
 0x18d   : > { %v1865_v0 = vpop.eup %1864  ;;  %v1193_v1 = vadd.f32 1.0, %v1863_v60  ;;  %v1157_v29 = vmul.f32 1.442695, %v1102_v6  ;;  %v1094_v31 = vsub.f32 0.0, %v2678_v16  ;;  %v931_v20 = vsel %vm340_vm0, %v887_v17, 0.0  ;;  %v856_v37 = vld [vmem:[#allocation2 + $0xa8] sm:$0xff] }
 0x18e   : > { %1276 = vst.msk [vmem:[%s2600_s26 + $0x28] sm:$0xff] %vm340_vm0, %v1865_v0  ;;  %v990_v33 = vmul.f32 %v887_v17, %v887_v17  ;;  %v1033_v34 = vadd.f32 %v1032_v27, %v1031_v59  ;;  %v932_v35 = vadd.f32 %v931_v20, %v930_v14  ;;  %v1092_v36 = vsub.f32 0.0, %v887_v17  ;;  %v500_v6 = vld [vmem:[#allocation2 + $0xf8] sm:$0xff] }
 0x18f   : > { %v1867_v13 = vpop.eup %1866  ;;  %1880 = vrcp.f32 %v1193_v1  ;;  %v935_v48 = vsel %vm340_vm0, %v2678_v16, 0.0  ;;  %v1141_v51 = vmul.f32 1.442695, %v1094_v31  ;;  %v2696_v59 = vadd.f32 %v2509_v2, %v856_v37 }
 0x190   : > { %v1869_v18 = vpop.eup %1868  ;;  %1281 = vst.msk [vmem:[%s2600_s26 + $0x50] sm:$0xff] %vm340_vm0, %v1867_v13  ;;  %1882 = vpow2.f32 %v1139_v7  ;;  %v934_v49 = vadd.f32 %v933_v24, %v932_v35  ;;  %v1034_v53 = vsel %vm340_vm0, %v990_v33, 0.0  ;;  %v1137_v54 = vmul.f32 1.442695, %v1092_v36  ;;  %v498_v7 = vld [vmem:[#allocation2 + $0xe8] sm:$0xff] }
 0x191   : > { %v1191_v23 = vadd.f32 1.0, %v1869_v18  ;;  %1884 = vpow2.f32 %v1135_v19  ;;  %v791_v60 = vadd.f32 %v2531_v55, %v493_v41  ;;  %v794_v12 = vadd.f32 %v2537_v62, %v496_v42 }
 0x192   : > { %v1871_v30 = vpop.eup %1870  ;;  %v991_v1 = vmul.f32 %v2653_v44, %v2653_v44  ;;  %v936_v5 = vadd.f32 %v935_v48, %v934_v49  ;;  %v1035_v8 = vadd.f32 %v1034_v53, %v1033_v34  ;;  %v1100_v55 = vsub.f32 0.0, %v2696_v59 }
 0x193   : > { %v1873_v50 = vpop.eup %1872  ;;  %1279 = vst.msk [vmem:[%s2600_s26 + $0x40] sm:$0xff] %vm340_vm0, %v1871_v30  ;;  %1886 = vrcp.f32 %v1191_v23  ;;  %824 = vst.msk [vmem:[#allocation2 + $0xc0] sm:$0xff] %vm340_vm0, %v791_v60  ;;  %v792_v62 = vadd.f32 %v2541_v3, %v494_v56  ;;  %v993_v44 = vmul.f32 %v2608_v46, %v2608_v46  ;;  %v797_v10 = vadd.f32 %v2557_v28, %v499_v61  ;;  %v861_v28 = vld [vmem:[#allocation2 + $0xd0] sm:$0xff] }
 0x194   : > { %v1194_v43 = vadd.f32 1.0, %v1873_v50  ;;  %1888 = vpow2.f32 %v1155_v21  ;;  %v1875_v52 = vpop.eup %1874  ;;  %827 = vst.msk [vmem:[#allocation2 + $0xd8] sm:$0xff] %vm340_vm0, %v794_v12  ;;  %v795_v11 = vadd.f32 %v2562_v32, %v497_v63  ;;  %v1153_v14 = vmul.f32 1.442695, %v1100_v55 }
 0x195   : > { %1890 = vpow2.f32 %v1151_v25  ;;  %v1877_v57 = vpop.eup %1876  ;;  %1282 = vst.msk [vmem:[%s2600_s26 + $0x58] sm:$0xff] %vm340_vm0, %v1875_v52  ;;  %825 = vst.msk [vmem:[#allocation2 + $0xc8] sm:$0xff] %vm340_vm0, %v792_v62  ;;  %v798_v17 = vadd.f32 %v2569_v39, %v500_v6  ;;  %v796_v3 = vadd.f32 %v2573_v45, %v498_v7  ;;  %v1036_v18 = vsel %vm340_vm0, %v991_v1, 0.0 }
 0x196   : > { %1892 = vrcp.f32 %v1194_v43  ;;  %v1879_v0 = vpop.eup %1878  ;;  %v1192_v4 = vadd.f32 1.0, %v1877_v57  ;;  %v992_v46 = vmul.f32 %v2678_v16, %v2678_v16  ;;  %830 = vst.msk [vmem:[#allocation2 + $0xf0] sm:$0xff] %vm340_vm0, %v797_v10  ;;  %828 = vst.msk [vmem:[#allocation2 + $0xe0] sm:$0xff] %vm340_vm0, %v795_v11  ;;  %v938_v32 = vadd.f32 %v2663_v26, %v936_v5 }
 0x197   : > { %1894 = vpow2.f32 %v1141_v51  ;;  %1280 = vst.msk [vmem:[%s2600_s26 + $0x48] sm:$0xff] %vm340_vm0, %v1879_v0  ;;  %v939_v39 = vsel %vm340_vm0, %v2628_v15, 0.0  ;;  %v1037_v21 = vadd.f32 %v1036_v18, %v1035_v8  ;;  %831 = vst.msk [vmem:[#allocation2 + $0xf8] sm:$0xff] %vm340_vm0, %v798_v17  ;;  %v941_v25 = vsel %vm340_vm0, %v2587_v9, 0.0 }
 0x198   : > { %1896 = vpow2.f32 %v1137_v54  ;;  %829 = vst.msk [vmem:[#allocation2 + $0xe8] sm:$0xff] %vm340_vm0, %v796_v3  ;;  %v940_v23 = vadd.f32 %v939_v39, %v938_v32  ;;  %v2730_v26 = vsel %vm340_vm0, %v993_v44, 0.0  ;;  %v1038_v31 = vsel %vm340_vm0, %v992_v46, 0.0 }
 0x199   : > { %v1881_v58 = vpop.eup %1880  ;;  %1898 = vrcp.f32 %v1192_v4  ;;  %v2740_v35 = vmul.f32 %v2628_v15, %v2628_v15  ;;  %v2742_v36 = vadd.f32 %v1038_v31, %v1037_v21  ;;  %v943_v42 = vsel %vm340_vm0, %v2620_v22, 0.0 }
 0x19a   : > { %v1883_v13 = vpop.eup %1882  ;;  %1289 = vst.msk [vmem:[%s2600_s26 + $0x90] sm:$0xff] %vm340_vm0, %v1881_v58  ;;  %1900 = vpow2.f32 %v1157_v29  ;;  %v2735_v29 = vadd.f32 %v2509_v2, %v861_v28  ;;  %v859_v33 = vld [vmem:[#allocation2 + $0xc0] sm:$0xff]  ;;  %v942_v50 = vadd.f32 %v941_v25, %v940_v23  ;;  %v945_v52 = vsel %vm340_vm0, %v2648_v40, 0.0 }
 0x19b   : > { %v1189_v27 = vadd.f32 1.0, %v1883_v13  ;;  %v1885_v19 = vpop.eup %1884  ;;  %1902 = vpow2.f32 %v1153_v14  ;;  %v862_v41 = vld [vmem:[#allocation2 + $0xd8] sm:$0xff]  ;;  %v947_v15 = vsel %vm340_vm0, %v2696_v59, 0.0  ;;  %v2753_v57 = vadd.f32 %v2509_v2, %v859_v33 }
 0x19c   : > { %v1187_v16 = vadd.f32 1.0, %v1885_v19  ;;  %v860_v48 = vld [vmem:[#allocation2 + $0xc8] sm:$0xff]  ;;  %v944_v51 = vadd.f32 %v943_v42, %v942_v50  ;;  %v1105_v60 = vsub.f32 0.0, %v2735_v29  ;;  %v2760_v4 = vadd.f32 %v2509_v2, %v862_v41 }
 0x19d   : > { %v1887_v45 = vpop.eup %1886  ;;  %1904 = vrcp.f32 %v1189_v27  ;;  %v863_v54 = vld [vmem:[#allocation2 + $0xe0] sm:$0xff]  ;;  %v865_v56 = vld [vmem:[#allocation2 + $0xf0] sm:$0xff]  ;;  %v2757_v1 = vadd.f32 %v2509_v2, %v860_v48  ;;  %v949_v11 = vsel %vm340_vm0, %v2645_v38, 0.0  ;;  %v951_v13 = vsel %vm340_vm0, %v2656_v47, 0.0 }
 0x19e   : > { %v1889_v24 = vpop.eup %1888  ;;  %1287 = vst.msk [vmem:[%s2600_s26 + $0x80] sm:$0xff] %vm340_vm0, %v1887_v45  ;;  %1906 = vrcp.f32 %v1187_v16  ;;  %v866_v0 = vld [vmem:[#allocation2 + $0xf8] sm:$0xff]  ;;  %v946_v5 = vadd.f32 %v945_v52, %v944_v51  ;;  %v2765_v7 = vadd.f32 %v2509_v2, %v863_v54  ;;  %v2771_v55 = vadd.f32 %v2509_v2, %v865_v56 }
 0x19f   : > { %v1891_v30 = vpop.eup %1890  ;;  %v1197_v20 = vadd.f32 1.0, %v1889_v24  ;;  %v864_v63 = vld [vmem:[#allocation2 + $0xe8] sm:$0xff]  ;;  %v2774_v58 = vadd.f32 %v2509_v2, %v866_v0  ;;  %v953_v14 = vsel %vm340_vm0, %v2753_v57, 0.0  ;;  %v1163_v17 = vmul.f32 1.442695, %v1105_v60 }
 0x1a0   : > { %v1893_v34 = vpop.eup %1892  ;;  %v1195_v37 = vadd.f32 1.0, %v1891_v30  ;;  %v2768_v8 = vadd.f32 %v2509_v2, %v864_v63  ;;  %v948_v44 = vadd.f32 %v947_v15, %v946_v5  ;;  %v1103_v2 = vsub.f32 0.0, %v2753_v57 }
 0x1a1   : > { %v1895_v43 = vpop.eup %1894  ;;  %1290 = vst.msk [vmem:[%s2600_s26 + $0x98] sm:$0xff] %vm340_vm0, %v1893_v34  ;;  %1908 = vrcp.f32 %v1197_v20  ;;  %v1104_v46 = vsub.f32 0.0, %v2757_v1  ;;  %v1106_v28 = vsub.f32 0.0, %v2760_v4  ;;  %v1107_v32 = vsub.f32 0.0, %v2765_v7 }
 0x1a2   : > { %v1897_v49 = vpop.eup %1896  ;;  %v1190_v53 = vadd.f32 1.0, %v1895_v43  ;;  %1910 = vrcp.f32 %v1195_v37  ;;  %v950_v27 = vadd.f32 %v949_v11, %v948_v44  ;;  %v1108_v19 = vsub.f32 0.0, %v2768_v8 }
 0x1a3   : > { %v1899_v12 = vpop.eup %1898  ;;  %v1188_v61 = vadd.f32 1.0, %v1897_v49  ;;  %v1109_v45 = vsub.f32 0.0, %v2771_v55  ;;  %v1110_v16 = vsub.f32 0.0, %v2774_v58  ;;  %v1159_v23 = vmul.f32 1.442695, %v1103_v2 }
 0x1a4   : > { %v1901_v6 = vpop.eup %1900  ;;  %1288 = vst.msk [vmem:[%s2600_s26 + $0x88] sm:$0xff] %vm340_vm0, %v1899_v12  ;;  %1912 = vrcp.f32 %v1190_v53  ;;  %v952_v21 = vadd.f32 %v951_v13, %v950_v27  ;;  %v1161_v24 = vmul.f32 1.442695, %v1104_v46  ;;  %v1165_v25 = vmul.f32 1.442695, %v1106_v28 }
 0x1a5   : > { %1914 = vrcp.f32 %v1188_v61  ;;  %v1198_v62 = vadd.f32 1.0, %v1901_v6  ;;  %v1903_v10 = vpop.eup %1902  ;;  %v1167_v20 = vmul.f32 1.442695, %v1107_v32  ;;  %v1041_v33 = vadd.f32 %v2730_v26, %v2742_v36 }
 0x1a6   : > { %v1196_v18 = vadd.f32 1.0, %v1903_v10  ;;  %v954_v31 = vadd.f32 %v953_v14, %v952_v21  ;;  %v995_v34 = vmul.f32 %v2587_v9, %v2587_v9  ;;  %v955_v37 = vsel %vm340_vm0, %v2757_v1, 0.0 }
 0x1a7   : > { %v1905_v3 = vpop.eup %1904  ;;  %1916 = vrcp.f32 %v1198_v62  ;;  %v1169_v41 = vmul.f32 1.442695, %v1108_v19  ;;  %v996_v42 = vmul.f32 %v2620_v22, %v2620_v22  ;;  %v1171_v26 = vmul.f32 1.442695, %v1109_v45 }
 0x1a8   : > { %1285 = vst.msk [vmem:[%s2600_s26 + $0x70] sm:$0xff] %vm340_vm0, %v1905_v3  ;;  %v1907_v39 = vpop.eup %1906  ;;  %1918 = vrcp.f32 %v1196_v18  ;;  %v956_v43 = vadd.f32 %v955_v37, %v954_v31  ;;  %v1042_v9 = vsel %vm340_vm0, %v2740_v35, 0.0  ;;  %v957_v48 = vsel %vm340_vm0, %v2735_v29, 0.0 }
 0x1a9   : > { %1283 = vst.msk [vmem:[%s2600_s26 + $0x60] sm:$0xff] %vm340_vm0, %v1907_v39  ;;  %1920 = vpow2.f32 %v1163_v17  ;;  %v1173_v51 = vmul.f32 1.442695, %v1110_v16  ;;  %v1043_v15 = vadd.f32 %v1042_v9, %v1041_v33  ;;  %v1044_v49 = vsel %vm340_vm0, %v995_v34, 0.0 }
 0x1aa   : > { %1922 = vpow2.f32 %v1159_v23  ;;  %v958_v22 = vadd.f32 %v957_v48, %v956_v43  ;;  %v997_v53 = vmul.f32 %v2648_v40, %v2648_v40  ;;  %v959_v35 = vsel %vm340_vm0, %v2760_v4, 0.0 }
 0x1ab   : > { %v1909_v30 = vpop.eup %1908  ;;  %1924 = vpow2.f32 %v1161_v24  ;;  %v1045_v60 = vadd.f32 %v1044_v49, %v1043_v15  ;;  %v1046_v12 = vsel %vm340_vm0, %v996_v42, 0.0  ;;  %v998_v61 = vmul.f32 %v2696_v59, %v2696_v59 }
 0x1ac   : > { %v1911_v50 = vpop.eup %1910  ;;  %1293 = vst.msk [vmem:[%s2600_s26 + $0xb0] sm:$0xff] %vm340_vm0, %v1909_v30  ;;  %1926 = vpow2.f32 %v1165_v25  ;;  %v960_v56 = vadd.f32 %v959_v35, %v958_v22  ;;  %v961_v63 = vsel %vm340_vm0, %v2765_v7, 0.0  ;;  %v963_v62 = vsel %vm340_vm0, %v2768_v8, 0.0 }
 0x1ad   : > { %1291 = vst.msk [vmem:[%s2600_s26 + $0xa0] sm:$0xff] %vm340_vm0, %v1911_v50  ;;  %1928 = vpow2.f32 %v1167_v20  ;;  %v1047_v5 = vadd.f32 %v1046_v12, %v1045_v60  ;;  %v999_v44 = vmul.f32 %v2645_v38, %v2645_v38  ;;  %v1048_v10 = vsel %vm340_vm0, %v997_v53, 0.0 }
 0x1ae   : > { %v1913_v36 = vpop.eup %1912  ;;  %1930 = vpow2.f32 %v1169_v41  ;;  %v962_v0 = vadd.f32 %v961_v63, %v960_v56  ;;  %v965_v17 = vsel %vm340_vm0, %v2771_v55, 0.0  ;;  %v1000_v3 = vmul.f32 %v2656_v47, %v2656_v47 }
 0x1af   : > { %v1915_v52 = vpop.eup %1914  ;;  %1286 = vst.msk [vmem:[%s2600_s26 + $0x78] sm:$0xff] %vm340_vm0, %v1913_v36  ;;  %1932 = vpow2.f32 %v1171_v26  ;;  %v1049_v13 = vadd.f32 %v1048_v10, %v1047_v5  ;;  %v1050_v18 = vsel %vm340_vm0, %v998_v61, 0.0  ;;  %v967_v32 = vsel %vm340_vm0, %v2774_v58, 0.0 }
 0x1b0   : > { %1284 = vst.msk [vmem:[%s2600_s26 + $0x68] sm:$0xff] %vm340_vm0, %v1915_v52  ;;  %1934 = vpow2.f32 %v1173_v51  ;;  %v964_v11 = vadd.f32 %v963_v62, %v962_v0  ;;  %v1001_v39 = vmul.f32 %v2753_v57, %v2753_v57  ;;  %v1052_v21 = vsel %vm340_vm0, %v999_v44, 0.0 }
 0x1b1   : > { %v1917_v54 = vpop.eup %1916  ;;  %v1051_v28 = vadd.f32 %v1050_v18, %v1049_v13  ;;  %v1002_v30 = vmul.f32 %v2757_v1, %v2757_v1  ;;  %v1054_v31 = vsel %vm340_vm0, %v1000_v3, 0.0  ;;  %v1003_v41 = vmul.f32 %v2735_v29, %v2735_v29 }
 0x1b2   : > { %1294 = vst.msk [vmem:[%s2600_s26 + $0xb8] sm:$0xff] %vm340_vm0, %v1917_v54  ;;  %v1919_v40 = vpop.eup %1918  ;;  %v966_v2 = vadd.f32 %v965_v17, %v964_v11  ;;  %v1056_v42 = vsel %vm340_vm0, %v1001_v39, 0.0  ;;  %v1004_v36 = vmul.f32 %v2760_v4, %v2760_v4  ;;  %v1005_v51 = vmul.f32 %v2765_v7, %v2765_v7 }
 0x1b3   : > { %v1921_v6 = vpop.eup %1920  ;;  %1292 = vst.msk [vmem:[%s2600_s26 + $0xa8] sm:$0xff] %vm340_vm0, %v1919_v40  ;;  %v1053_v23 = vadd.f32 %v1052_v21, %v1051_v28  ;;  %v1058_v9 = vsel %vm340_vm0, %v1002_v30, 0.0  ;;  %v1060_v52 = vsel %vm340_vm0, %v1003_v41, 0.0  ;;  %v1006_v4 = vmul.f32 %v2768_v8, %v2768_v8 }
 0x1b4   : > { %v1201_v59 = vadd.f32 1.0, %v1921_v6  ;;  %v1923_v14 = vpop.eup %1922  ;;  %v968_v16 = vadd.f32 %v967_v32, %v966_v2  ;;  %v1062_v53 = vsel %vm340_vm0, %v1004_v36, 0.0  ;;  %v1007_v8 = vmul.f32 %v2771_v55, %v2771_v55 }
 0x1b5   : > { %v1925_v27 = vpop.eup %1924  ;;  %v1199_v46 = vadd.f32 1.0, %v1923_v14  ;;  %v1055_v57 = vadd.f32 %v1054_v31, %v1053_v23  ;;  %v1064_v60 = vsel %vm340_vm0, %v1005_v51, 0.0  ;;  %v1008_v55 = vmul.f32 %v2774_v58, %v2774_v58 }
 0x1b6   : > { %1936 = vrcp.f32 %v1201_v59  ;;  %v1927_v38 = vpop.eup %1926  ;;  %v1200_v19 = vadd.f32 1.0, %v1925_v27  ;;  %v969_v33 = vrot.slane %v968_v16, 4  ;;  %v1066_v0 = vsel %vm340_vm0, %v1006_v4, 0.0 }
 0x1b7   : > { %v1929_v45 = vpop.eup %1928  ;;  %v1202_v47 = vadd.f32 1.0, %v1927_v38  ;;  %1938 = vrcp.f32 %v1199_v46  ;;  %v1057_v1 = vadd.f32 %v1056_v42, %v1055_v57 }
 0x1b8   : > { %v1931_v24 = vpop.eup %1930  ;;  %v1203_v25 = vadd.f32 1.0, %v1929_v45  ;;  %1940 = vrcp.f32 %v1200_v19  ;;  %v970_v43 = vadd.f32 %v969_v33, %v968_v16 }
 0x1b9   : > { %v1933_v20 = vpop.eup %1932  ;;  %v1204_v50 = vadd.f32 1.0, %v1931_v24  ;;  %1942 = vrcp.f32 %v1202_v47  ;;  %v1059_v29 = vadd.f32 %v1058_v9, %v1057_v1 }
 0x1ba   : > { %v1935_v34 = vpop.eup %1934  ;;  %v1205_v37 = vadd.f32 1.0, %v1933_v20  ;;  %1944 = vrcp.f32 %v1203_v25  ;;  %v971_v48 = vrot.slane %v970_v43, 2 }
 0x1bb   : > { %v1206_v26 = vadd.f32 1.0, %v1935_v34  ;;  %1946 = vrcp.f32 %v1204_v50  ;;  %v1061_v49 = vadd.f32 %v1060_v52, %v1059_v29 }
 0x1bc   : > { %1948 = vrcp.f32 %v1205_v37  ;;  %v972_v15 = vadd.f32 %v971_v48, %v970_v43 }
 0x1bd   : > { %1950 = vrcp.f32 %v1206_v26  ;;  %v1063_v54 = vadd.f32 %v1062_v53, %v1061_v49 }
 0x1be   : > { %v973_v35 = vrot.slane %v972_v15, 1 }
 0x1bf   : > { %v1065_v63 = vadd.f32 %v1064_v60, %v1063_v54 }
 0x1c0   : > { %v1937_v22 = vpop.eup %1936  ;;  %v974_v61 = vadd.f32 %v973_v35, %v972_v15 }
 0x1c1   : > { %1297 = vst.msk [vmem:[%s2600_s26 + $0xd0] sm:$0xff] %vm340_vm0, %v1937_v22  ;;  %v1939_v7 = vpop.eup %1938  ;;  %v1067_v6 = vadd.f32 %v1066_v0, %v1065_v63 }
 0x1c2   : > { %v1941_v56 = vpop.eup %1940  ;;  %1295 = vst.msk [vmem:[%s2600_s26 + $0xc0] sm:$0xff] %vm340_vm0, %v1939_v7 }
 0x1c3   : > { %v1943_v12 = vpop.eup %1942  ;;  %1296 = vst.msk [vmem:[%s2600_s26 + $0xc8] sm:$0xff] %vm340_vm0, %v1941_v56 }
 0x1c4   : > { %v1945_v40 = vpop.eup %1944  ;;  %1298 = vst.msk [vmem:[%s2600_s26 + $0xd8] sm:$0xff] %vm340_vm0, %v1943_v12 }
 0x1c5   : > { %v1947_v5 = vpop.eup %1946  ;;  %976 = vst.msk [vmem:[%s325_s29] sm:$0x1] %vm975_vm3, %v974_v61 }
 0x1c6   : > { %1299 = vst.msk [vmem:[%s2600_s26 + $0xe0] sm:$0xff] %vm340_vm0, %v1945_v40  ;;  %v1949_v62 = vpop.eup %1948  ;;  %1300 = vst.msk [vmem:[%s2600_s26 + $0xe8] sm:$0xff] %vm340_vm0, %v1947_v5 }
 0x1c7   : > { %2051 = shalt.err (!%p2048_p2)
}
 0x1c8   : > { %s2052_s24 = scalar_lea.hbm %s2871_s10, 16  ;;  %s2056_s13 = scalar_lea.hbm %s3009_s4, 32 }
 0x1c9   : > { %p2053_p6 = scmp.ne.s32.totalorder %s2871_s10, %s2052_s24  ;;  %p2057_p4 = scmp.lt.u32.totalorder %s2871_s10, %s3009_s4 }
 0x1ca   : > { %p2058_p9 = scmp.lt.u32.totalorder %s2056_s13, %s2052_s24  ;;  %p2060_p11 = scmp.lt.u32.totalorder %s2052_s24, %s2871_s10 }
 0x1cb   : > { %p2054_p10 = pnand %p2053_p6, %p3028_p1 }
 0x1cc   : > { %p2059_p8 = por %p2058_p9, %p2057_p4 }
 0x1cd   : > { %p2055_p3 = pneg %p2054_p10 }
 0x1ce   : > { %p2061_p13 = por %p2060_p11, %p2059_p8 }
 0x1d0   : > { %p2062_p5 = pnand %p2061_p13, %p2055_p3 }
 0x1d2   : > { %2065 = shalt.err (!%p2062_p5)
}
 0x1d3   : > { %1732 = dma.vmem_to_hbm [thread:$0]  (%p3028_p1), %s2878_s9, 16, %s2871_s10, %s2899_s12   ;;  %v1068_v58 = vsel %vm340_vm0, %v1007_v8, 0.0  ;;  %v1951_v44 = vpop.eup %1950  ;;  %1301 = vst.msk [vmem:[%s2600_s26 + $0xf0] sm:$0xff] %vm340_vm0, %v1949_v62  ;;  %v1070_v11 = vsel %vm340_vm0, %v1008_v55, 0.0 }
 0x1d4   : > { %v1069_v10 = vadd.f32 %v1068_v58, %v1067_v6  ;;  %1302 = vst.msk [vmem:[%s2600_s26 + $0xf8] sm:$0xff] %vm340_vm0, %v1951_v44  ;;  %s1304_s17 = scalar_lea.sflag [#allocation5], %s2420_s30  ;;  %s2066_s7 = scalar_lea.vmem %s2887_s15, 4096 }
 0x1d5   : > { %p2067_p7 = scmp.ne.s32.totalorder %s2887_s15, %s2066_s7  ;;  %s2193_s8 = smov [#allocation9]  }
 0x1d6   : > { %s2070_s24 = sshll.u32 %s2193_s8, 4  ;;  %s2071_s24 = int_to_ptr.vmem [resolvable:$false] %s2070_s24 }
 0x1d7   : > { %p2068_p12 = pnand %p2067_p7, %p3028_p1  ;;  %s2072_s9 = scalar_lea.vmem %s2071_s24, 8192 }
 0x1d8   : > { %p2073_p2 = scmp.lt.s32.totalorder %s2887_s15, %s2071_s24  ;;  %p2074_p6 = scmp.lt.s32.totalorder %s2072_s9, %s2066_s7 }
 0x1d9   : > { %p2069_p0 = pneg %p2068_p12 }
 0x1da   : > { %p2075_p10 = por %p2074_p6, %p2073_p2 }
 0x1dc   : > { %p2076_p3 = pnand %p2075_p10, %p2069_p0 }
 0x1de   : > { %2079 = shalt.err (!%p2076_p3)
}
 0x1df   : > { %s2080_s26 = scalar_lea.hbm %s2885_s25, 4096  ;;  %s2084_s29 = scalar_lea.hbm %s3008_s3, 8192 }
 0x1e0   : > { %p2081_p4 = scmp.ne.s32.totalorder %s2885_s25, %s2080_s26  ;;  %p2085_p11 = scmp.lt.u32.totalorder %s2885_s25, %s3008_s3 }
 0x1e1   : > { %p2086_p13 = scmp.lt.u32.totalorder %s2084_s29, %s2080_s26  ;;  %p2088_p7 = scmp.lt.u32.totalorder %s2080_s26, %s2885_s25 }
 0x1e2   : > { %p2082_p9 = pnand %p2081_p4, %p3028_p1 }
 0x1e3   : > { %p2087_p5 = por %p2086_p13, %p2085_p11 }
 0x1e4   : > { %p2083_p8 = pneg %p2082_p9 }
 0x1e5   : > { %p2089_p12 = por %p2088_p7, %p2087_p5 }
 0x1e7   : > { %p2090_p0 = pnand %p2089_p12, %p2083_p8 }
 0x1e9   : > { %2093 = shalt.err (!%p2090_p0)
}
 0x1ea   : > { %s2194_s7 = smov 128   ;;  %s2195_s8 = smov 8   ;;  %v1071_v59 = vadd.f32 %v1070_v11, %v1069_v10 }
 0x1eb   : > { %1731 = dma.vmem_to_hbm [thread:$0]  (%p3028_p1), %s2887_s15, 4096, %s2885_s25, %s1304_s17, %s2194_s7, %s2194_s7, %s2195_s8  }
 0x1ec   : > { %v1072_v13 = vrot.slane %v1071_v59, 4  ;;  %s331_s24 = scalar_lea.vmem [#allocation12], %s2420_s30  ;;  %s3029_s26 = sshll.u32 %s2176_s21, 4 }
 0x1ed   : > { %s1357_s9 = sshll.u32 %s331_s24, 4  ;;  %s2959_s29 = scalar_lea.hbm %s3010_s5, %s3029_s26  ;;  %s1358_s9 = int_to_ptr.vmem [resolvable:$true] %s1357_s9 }
 0x1ee   : > { %v1073_v14 = vadd.f32 %v1072_v13, %v1071_v59  ;;  %s2094_s13 = scalar_lea.vmem %s1358_s9, 16  ;;  %s2196_s15 = smov [#allocation12]  }
 0x1ef   : > { %p2095_p2 = scmp.ne.s32.totalorder %s1358_s9, %s2094_s13  ;;  %s2098_s25 = sshll.u32 %s2196_s15, 4  ;;  %s2099_s25 = int_to_ptr.vmem [resolvable:$false] %s2098_s25 }
 0x1f0   : > { %v1074_v17 = vrot.slane %v1073_v14, 2  ;;  %s2100_s30 = scalar_lea.vmem %s2099_s25, 32  ;;  %p2101_p3 = scmp.lt.s32.totalorder %s1358_s9, %s2099_s25 }
 0x1f1   : > { %p2096_p6 = pnand %p2095_p2, %p3028_p1  ;;  %p2102_p4 = scmp.lt.s32.totalorder %s2100_s30, %s2094_s13 }
 0x1f2   : > { %v1075_v3 = vadd.f32 %v1074_v17, %v1073_v14 }
 0x1f3   : > { %p2097_p10 = pneg %p2096_p6  ;;  %p2103_p9 = por %p2102_p4, %p2101_p3 }
 0x1f4   : > { %v1076_v18 = vrot.slane %v1075_v3, 1 }
 0x1f5   : > { %p2104_p8 = pnand %p2103_p9, %p2097_p10 }
 0x1f6   : > { %v1077_v27 = vadd.f32 %v1076_v18, %v1075_v3 }
 0x1f8   : > { %1078 = vst.msk [vmem:[%s331_s24] sm:$0x1] %vm975_vm3, %v1077_v27 }
 0x1f9   : > { %2107 = shalt.err (!%p2104_p8)
}
 0x1fa   : > { %s2108_s21 = scalar_lea.hbm %s2959_s29, 16  ;;  %s2112_s7 = scalar_lea.hbm %s3010_s5, 32 }
 0x1fb   : > { %p2109_p11 = scmp.ne.s32.totalorder %s2959_s29, %s2108_s21  ;;  %p2113_p7 = scmp.lt.u32.totalorder %s2959_s29, %s3010_s5 }
 0x1fc   : > { %p2114_p12 = scmp.lt.u32.totalorder %s2112_s7, %s2108_s21  ;;  %p2116_p2 = scmp.lt.u32.totalorder %s2108_s21, %s2959_s29 }
 0x1fd   : > { %p2110_p13 = pnand %p2109_p11, %p3028_p1 }
 0x1fe   : > { %p2115_p0 = por %p2114_p12, %p2113_p7 }
 0x1ff   : > { %p2111_p5 = pneg %p2110_p13 }
 0x200   : > { %p2117_p6 = por %p2116_p2, %p2115_p0 }
 0x202   : > { %p2118_p10 = pnand %p2117_p6, %p2111_p5 }
 0x204   : > { %2121 = shalt.err (!%p2118_p10)
}
 0x205   : > { %1733 = dma.vmem_to_hbm [thread:$0]  (%p3028_p1), %s1358_s9, 16, %s2959_s29, %s2899_s12  }
 0x206 PF: > { %s1369_s26 = sand.u32 1, %s2164_s18   ;;  %p3030_p3 = scmp.ne.s32.totalorder %s3018_s27, 0 }
 0x207   : > { %p3031_p4 = scmp.ge.s32.totalorder %s2184_s23, 2  ;;  %s1370_s10 = scalar_lea.sflag [#allocation5], %s1369_s26 }
 0x209   : > { %p1749_p9 = pnand %p3031_p4, %p3030_p3 }
 0x20b   : > { %2155 = dma.done.wait (!%p1749_p9), %s1370_s10, 4096  }
 0x20c   : > { %2157 = vsyncadd (!%p1749_p9), %s1370_s10, 4294963200  ;;  %s3032_s28 = sadd.s32 4294967294, %s2184_s23  }
 0x20d   : > { %s1378_s13 = sand.u32 1, %s3032_s28  }
 0x20e   : > { %s1379_s15 = scalar_lea.sflag [#allocation11], %s1378_s13 }
 0x20f   : > { %2159 = dma.done.wait (!%p1749_p9), %s1379_s15, 32  }
 0x210   : > { %2161 = vsyncadd (!%p1749_p9), %s1379_s15, 4294967264  ;;  %s26_s23 = sadd.s32 1, %s2184_s23   ;;  %s3033_s18 = smov %s2168_s19 }
 0x211   : > { %p23_p1 = scmp.ge.s32.totalorder %s26_s23, 4   ;;  %s3034_s19 = smov %s2172_s20 }
 0x212   : > { %s3035_s20 = smov %s2371_s16  ;;  %s3036_s21 = smov %s2180_s22 }
 0x213   : > { %s3037_s22 = smov %s3039_s11  ;;  %25 = sbr.rel (!%p23_p1) target bundleno = 9 (0x9), region = 127 }
 0x21a   :  { %1391 = vsyncpa [#allocation4], 1 }
 0x21b   :  { %1393 = vsyncpa [#allocation4 + $0x1], 1 }
 0x21c   :  { %1394 = vsyncpa [#allocation7], 1 }
 0x21d   :  { %1395 = vsyncpa [#allocation5], 1 }
 0x21e   :  { %1397 = vsyncpa [#allocation5 + $0x1], 1 }
 0x21f   :  { %1398 = vsyncpa [#allocation11], 1 }
 0x220   :  { %1400 = vsyncpa [#allocation11 + $0x1], 1 }

</bundles_post_ra>
